<compile_context>
chip_gen: v6e
topology: v6e:2x2x1
jax: 0.10.0
libtpu: 0.0.40
codegen_flags: <defaults>
</compile_context>

<pallas_src>
import functools
import math

import jax
import jax.numpy as jnp
from jax.experimental import pallas as pl
from jax.experimental.pallas import tpu as pltpu

LN_EPS = 1e-5


# --------------------------------------------------------------------------
# Fused Pallas kernel (whole forward, one batch element per grid step)
# --------------------------------------------------------------------------
def _layer_norm(y, g, b):
    mu = jnp.mean(y, axis=-1, keepdims=True)
    var = jnp.mean(jnp.square(y - mu), axis=-1, keepdims=True)
    return (y - mu) * jax.lax.rsqrt(var + LN_EPS) * g + b


def fused_vit_kernel(x_ref, comb_ref,
                     wqkv_ref, bqkv_ref, wo_ref, bo_ref,
                     ln1g_ref, ln1b_ref, ln2g_ref, ln2b_ref,
                     w1_ref, b1_ref, w2_ref, b2_ref,
                     o1_ref, o2_ref, *, nhead, n_channels, seq_len):
    C, S = n_channels, seq_len
    D = x_ref.shape[-1]
    dh = D // nhead
    bf16 = jnp.bfloat16

    def encoder_layer(x2d, layer, n_seq, apply_sigmoid):
        """One post-norm transformer encoder layer on (n_seq*S, D) f32 rows."""
        M = n_seq * S

        # Fused QKV projection (bf16 MXU inputs, f32 accumulation).
        xb = x2d.astype(bf16)
        qkv = jnp.dot(xb, wqkv_ref[layer],
                      preferred_element_type=jnp.float32) + bqkv_ref[layer]
        # Reshape to per-sequence 3-D views once and cast to bf16 once
        # (instead of per-head reshapes/casts); head slices are lane slices.
        q = qkv[:, :D].reshape(n_seq, S, D).astype(bf16)
        k = qkv[:, D:2 * D].reshape(n_seq, S, D).astype(bf16)
        v = qkv[:, 2 * D:].reshape(n_seq, S, D).astype(bf16)
        wo = wo_ref[layer]                                    # (D, D) bf16

        attn = jnp.zeros((M, D), jnp.float32)
        for h in range(nhead):                                # static unroll
            lo = h * dh
            qh = q[:, :, lo:lo + dh]                          # (n_seq, S, dh)
            kh = k[:, :, lo:lo + dh]
            vh = v[:, :, lo:lo + dh]
            # NOTE: 1/sqrt(dh) is folded into the Q weights at init time.
            s = jnp.einsum('bqd,bkd->bqk', qh, kh,
                           preferred_element_type=jnp.float32)      # (n_seq, S, S)
            s = s - jnp.max(s, axis=-1, keepdims=True)
            p = jnp.exp(s)
            p = p * pl.reciprocal(jnp.sum(p, axis=-1, keepdims=True), approx=True)
            oh = jnp.einsum('bqk,bkd->bqd', p.astype(bf16), vh,
                            preferred_element_type=jnp.float32)     # (n_seq, S, dh)
            # Accumulate through the matching rows of Wo: avoids a lane-concat.
            attn = attn + jnp.dot(oh.reshape(M, dh).astype(bf16),
                                  wo[lo:lo + dh, :],
                                  preferred_element_type=jnp.float32)
        attn = attn + bo_ref[layer]

        # residual + LayerNorm 1 (post-norm, nn.TransformerEncoderLayer default)
        y = _layer_norm(x2d + attn, ln1g_ref[layer], ln1b_ref[layer])

        # feed-forward (ReLU) + residual + LayerNorm 2
        h1 = jnp.dot(y.astype(bf16), w1_ref[layer],
                     preferred_element_type=jnp.float32) + b1_ref[layer]
        h1 = jnp.maximum(h1, 0.0)
        ff = jnp.dot(h1.astype(bf16), w2_ref[layer],
                     preferred_element_type=jnp.float32) + b2_ref[layer]
        z = _layer_norm(y + ff, ln2g_ref[layer], ln2b_ref[layer])

        if apply_sigmoid:                                     # fused head activation
            z = jax.nn.sigmoid(z)
        return z

    # --- RGBCombinator: shared raw ViT encoder applied per channel ------------
    x = x_ref[0]                                              # (C, S, D) f32
    enc = encoder_layer(x.reshape(C * S, D), 0, C, False)     # batched over C*S rows
    enc = enc.reshape(C, S, D)

    comb = enc[0] * comb_ref[0]                               # scalar channel weights (SMEM)
    for c in range(1, C):
        comb = comb + enc[c] * comb_ref[c]
    x0 = jnp.maximum(comb, 0.0)                               # combinator activation (ReLU)

    # --- hidden transformer + two heads (independent DAGs -> LLO interleaves) --
    x1 = encoder_layer(x0, 1, 1, False)
    o1_ref[0] = encoder_layer(x1, 2, 1, True)
    o2_ref[0] = encoder_layer(x1, 3, 1, True)


# --------------------------------------------------------------------------
# pallas_call wrapper
# --------------------------------------------------------------------------
def vit_object_detection_network2(x, params, *, nhead):
    """x: (B, 3, H, W) NCHW float32 -> (sigmoid(head1), sigmoid(head2)), each (B, H, W)."""
    B, C, S, D = x.shape
    L = params["wqkv"].shape[0]
    F = params["w1"].shape[-1]
    assert D % nhead == 0

    def wspec(shape):
        nd = len(shape)
        return pl.BlockSpec(shape, lambda b: (0,) * nd)       # grid-invariant: fetched once

    kernel = functools.partial(fused_vit_kernel, nhead=nhead,
                               n_channels=C, seq_len=S)

    grid_spec = pltpu.PrefetchScalarGridSpec(
        num_scalar_prefetch=0,
        grid=(B,),                                            # batch split -> both v7x TCs busy
        in_specs=[
            pl.BlockSpec((1, C, S, D), lambda b: (b, 0, 0, 0)),
            pl.BlockSpec(memory_space=pltpu.MemorySpace.SMEM),           # comb_w scalars
            wspec((L, D, 3 * D)), wspec((L, 1, 3 * D)),                  # wqkv, bqkv
            wspec((L, D, D)), wspec((L, 1, D)),                          # wo, bo
            wspec((L, 1, D)), wspec((L, 1, D)),                          # ln1 gamma, beta
            wspec((L, 1, D)), wspec((L, 1, D)),                          # ln2 gamma, beta
            wspec((L, D, F)), wspec((L, 1, F)),                          # w1, b1
            wspec((L, F, D)), wspec((L, 1, D)),                          # w2, b2
        ],
        out_specs=(pl.BlockSpec((1, S, D), lambda b: (b, 0, 0)),
                   pl.BlockSpec((1, S, D), lambda b: (b, 0, 0))),
    )

    return pl.pallas_call(
        kernel,
        out_shape=(jax.ShapeDtypeStruct((B, S, D), jnp.float32),
                   jax.ShapeDtypeStruct((B, S, D), jnp.float32)),
        grid_spec=grid_spec,
        compiler_params=pltpu.CompilerParams(dimension_semantics=("parallel",)),
    )(x, params["comb_w"],
      params["wqkv"], params["bqkv"], params["wo"], params["bo"],
      params["ln1_g"], params["ln1_b"], params["ln2_g"], params["ln2_b"],
      params["w1"], params["b1"], params["w2"], params["b2"])


# --------------------------------------------------------------------------
# Parameters (deterministic synthetic init): layer 0 = rgb encoder,
# 1 = hidden_transformer0, 2 = head1, 3 = head2.  Matmul weights in bf16.
# --------------------------------------------------------------------------
def init_params(key, d_model, d_ff, nhead, n_channels=3, n_layers=4):
    D, F, L = d_model, d_ff, n_layers
    ks = jax.random.split(key, 7)
    s_in = 1.0 / math.sqrt(D)
    s_ff = 1.0 / math.sqrt(F)
    q_scale = 1.0 / math.sqrt(D // nhead)

    def n(k, shape, sc):
        return jax.random.normal(k, shape, jnp.float32) * sc

    wq = n(ks[0], (L, D, D), s_in) * q_scale        # attention scale folded into Q
    wk = n(ks[1], (L, D, D), s_in)
    wv = n(ks[2], (L, D, D), s_in)
    wqkv = jnp.concatenate([wq, wk, wv], axis=-1)   # (L, D, 3D)

    return dict(
        wqkv=wqkv.astype(jnp.bfloat16),
        bqkv=jnp.zeros((L, 1, 3 * D), jnp.float32),  # zero bias (q-scale no-op on zeros)
        wo=n(ks[3], (L, D, D), s_in).astype(jnp.bfloat16),
        bo=jnp.zeros((L, 1, D), jnp.float32),
        ln1_g=jnp.ones((L, 1, D), jnp.float32), ln1_b=jnp.zeros((L, 1, D), jnp.float32),
        ln2_g=jnp.ones((L, 1, D), jnp.float32), ln2_b=jnp.zeros((L, 1, D), jnp.float32),
        w1=n(ks[4], (L, D, F), s_in).astype(jnp.bfloat16),
        b1=jnp.zeros((L, 1, F), jnp.float32),
        w2=n(ks[5], (L, F, D), s_ff).astype(jnp.bfloat16),
        b2=jnp.zeros((L, 1, D), jnp.float32),
        comb_w=jax.random.normal(ks[6], (n_channels,), jnp.float32) * 0.5 + 0.5,
    )


if __name__ == "__main__":
    # NCHW image with 3 channels, H = seq_len = 16 tokens (rows),
    # W = d_model = 128 (lane-aligned).
    B, C, H, W = 2, 3, 16, 128
    NHEAD, D_FF = 4, 256

    key = jax.random.PRNGKey(0)
    k_x, k_p = jax.random.split(key)
    x = jax.random.uniform(k_x, (B, C, H, W), jnp.float32)
    params = init_params(k_p, W, D_FF, NHEAD, n_channels=C)

    fwd = jax.jit(functools.partial(vit_object_detection_network2, nhead=NHEAD))
    out1, out2 = fwd(x, params)
    jax.block_until_ready((out1, out2))

    assert out1.shape == (B, H, W) and out2.shape == (B, H, W)
    assert bool(jnp.all(jnp.isfinite(out1))) and bool(jnp.all(jnp.isfinite(out2)))
    assert bool(jnp.all((out1 >= 0.0) & (out1 <= 1.0)))
    assert bool(jnp.all((out2 >= 0.0) & (out2 <= 1.0)))
    print("KERNEL_OK")
</pallas_src>

<mosaic_0001>
module attributes {stable_mosaic.version = 11 : i64} {
  func.func @fused_vit_kernel(%arg0: i32, %arg1: memref<1x3x16x128xf32, #tpu.memory_space<vmem>>, %arg2: memref<3xf32, #tpu.memory_space<smem>>, %arg3: memref<4x128x384xbf16, #tpu.memory_space<vmem>>, %arg4: memref<4x1x384xf32, #tpu.memory_space<vmem>>, %arg5: memref<4x128x128xbf16, #tpu.memory_space<vmem>>, %arg6: memref<4x1x128xf32, #tpu.memory_space<vmem>>, %arg7: memref<4x1x128xf32, #tpu.memory_space<vmem>>, %arg8: memref<4x1x128xf32, #tpu.memory_space<vmem>>, %arg9: memref<4x1x128xf32, #tpu.memory_space<vmem>>, %arg10: memref<4x1x128xf32, #tpu.memory_space<vmem>>, %arg11: memref<4x128x256xbf16, #tpu.memory_space<vmem>>, %arg12: memref<4x1x256xf32, #tpu.memory_space<vmem>>, %arg13: memref<4x256x128xbf16, #tpu.memory_space<vmem>>, %arg14: memref<4x1x128xf32, #tpu.memory_space<vmem>>, %arg15: memref<1x16x128xf32, #tpu.memory_space<vmem>>, %arg16: memref<1x16x128xf32, #tpu.memory_space<vmem>>) attributes {dimension_semantics = [#tpu.dimension_semantics<parallel>], iteration_bounds = array<i64: 2>, scalar_prefetch = 0 : i64, scratch_operands = 0 : i64, tpu.core_type = #tpu.core_type<tc>, window_params = [{transform_indices = @transform_0, window_bounds = array<i64: 1, 3, 16, 128>}, {transform_indices = @transform_1, window_bounds = array<i64: 3>}, {pipeline_mode = #tpu.pipeline_mode<synchronous>, transform_indices = @transform_2, window_bounds = array<i64: 4, 128, 384>}, {pipeline_mode = #tpu.pipeline_mode<synchronous>, transform_indices = @transform_3, window_bounds = array<i64: 4, 1, 384>}, {pipeline_mode = #tpu.pipeline_mode<synchronous>, transform_indices = @transform_4, window_bounds = array<i64: 4, 128, 128>}, {pipeline_mode = #tpu.pipeline_mode<synchronous>, transform_indices = @transform_5, window_bounds = array<i64: 4, 1, 128>}, {pipeline_mode = #tpu.pipeline_mode<synchronous>, transform_indices = @transform_6, window_bounds = array<i64: 4, 1, 128>}, {pipeline_mode = #tpu.pipeline_mode<synchronous>, transform_indices = @transform_7, window_bounds = array<i64: 4, 1, 128>}, {pipeline_mode = #tpu.pipeline_mode<synchronous>, transform_indices = @transform_8, window_bounds = array<i64: 4, 1, 128>}, {pipeline_mode = #tpu.pipeline_mode<synchronous>, transform_indices = @transform_9, window_bounds = array<i64: 4, 1, 128>}, {pipeline_mode = #tpu.pipeline_mode<synchronous>, transform_indices = @transform_10, window_bounds = array<i64: 4, 128, 256>}, {pipeline_mode = #tpu.pipeline_mode<synchronous>, transform_indices = @transform_11, window_bounds = array<i64: 4, 1, 256>}, {pipeline_mode = #tpu.pipeline_mode<synchronous>, transform_indices = @transform_12, window_bounds = array<i64: 4, 256, 128>}, {pipeline_mode = #tpu.pipeline_mode<synchronous>, transform_indices = @transform_13, window_bounds = array<i64: 4, 1, 128>}, {transform_indices = @transform_14, window_bounds = array<i64: 1, 16, 128>}, {transform_indices = @transform_15, window_bounds = array<i64: 1, 16, 128>}]} {
    %c0 = arith.constant 0 : index
    %c0_0 = arith.constant 0 : index
    %c0_1 = arith.constant 0 : index
    %c0_2 = arith.constant 0 : index
    %0 = vector.load %arg1[%c0, %c0_0, %c0_1, %c0_2] : memref<1x3x16x128xf32, #tpu.memory_space<vmem>>, vector<1x3x16x128xf32>
    %1 = vector.shape_cast %0 : vector<1x3x16x128xf32> to vector<3x16x128xf32>
    %2 = vector.shape_cast %1 : vector<3x16x128xf32> to vector<48x128xf32>
    %3 = arith.truncf %2 : vector<48x128xf32> to vector<48x128xbf16>
    %c0_3 = arith.constant 0 : index
    %c0_4 = arith.constant 0 : index
    %c0_5 = arith.constant 0 : index
    %4 = vector.load %arg3[%c0_3, %c0_4, %c0_5] : memref<4x128x384xbf16, #tpu.memory_space<vmem>>, vector<1x128x384xbf16>
    %5 = vector.shape_cast %4 : vector<1x128x384xbf16> to vector<128x384xbf16>
    %cst = arith.constant dense<0.000000e+00> : vector<48x384xf32>
    %6 = tpu.matmul %3, %5, %cst {dimension_numbers = #tpu.dot_dimension_numbers<[1], [0], [0], [1], [0, 0, 1, 1], [], []>} : vector<48x128xbf16>, vector<128x384xbf16>, vector<48x384xf32> -> vector<48x384xf32>
    %c0_6 = arith.constant 0 : index
    %c0_7 = arith.constant 0 : index
    %c0_8 = arith.constant 0 : index
    %7 = vector.load %arg4[%c0_6, %c0_7, %c0_8] : memref<4x1x384xf32, #tpu.memory_space<vmem>>, vector<1x1x384xf32>
    %8 = vector.shape_cast %7 : vector<1x1x384xf32> to vector<1x384xf32>
    %9 = vector.broadcast %8 : vector<1x384xf32> to vector<48x384xf32>
    %10 = arith.addf %6, %9 : vector<48x384xf32>
    %11 = vector.extract_strided_slice %10 {offsets = [0, 0], sizes = [48, 128], strides = [1, 1]} : vector<48x384xf32> to vector<48x128xf32>
    %12 = vector.shape_cast %11 : vector<48x128xf32> to vector<3x16x128xf32>
    %13 = arith.truncf %12 : vector<3x16x128xf32> to vector<3x16x128xbf16>
    %14 = vector.extract_strided_slice %10 {offsets = [0, 128], sizes = [48, 128], strides = [1, 1]} : vector<48x384xf32> to vector<48x128xf32>
    %15 = vector.shape_cast %14 : vector<48x128xf32> to vector<3x16x128xf32>
    %16 = arith.truncf %15 : vector<3x16x128xf32> to vector<3x16x128xbf16>
    %17 = vector.extract_strided_slice %10 {offsets = [0, 256], sizes = [48, 128], strides = [1, 1]} : vector<48x384xf32> to vector<48x128xf32>
    %18 = vector.shape_cast %17 : vector<48x128xf32> to vector<3x16x128xf32>
    %19 = arith.truncf %18 : vector<3x16x128xf32> to vector<3x16x128xbf16>
    %c0_9 = arith.constant 0 : index
    %c0_10 = arith.constant 0 : index
    %c0_11 = arith.constant 0 : index
    %20 = vector.load %arg5[%c0_9, %c0_10, %c0_11] : memref<4x128x128xbf16, #tpu.memory_space<vmem>>, vector<1x128x128xbf16>
    %21 = vector.shape_cast %20 : vector<1x128x128xbf16> to vector<128x128xbf16>
    %cst_12 = arith.constant 0.000000e+00 : f32
    %22 = vector.broadcast %cst_12 : f32 to vector<48x128xf32>
    %23 = vector.extract_strided_slice %13 {offsets = [0, 0, 0], sizes = [3, 16, 32], strides = [1, 1, 1]} : vector<3x16x128xbf16> to vector<3x16x32xbf16>
    %24 = vector.extract_strided_slice %16 {offsets = [0, 0, 0], sizes = [3, 16, 32], strides = [1, 1, 1]} : vector<3x16x128xbf16> to vector<3x16x32xbf16>
    %25 = vector.extract_strided_slice %19 {offsets = [0, 0, 0], sizes = [3, 16, 32], strides = [1, 1, 1]} : vector<3x16x128xbf16> to vector<3x16x32xbf16>
    "tpu.trace_start"() <{level = 10 : i32, message = "bqd,bkd->bqk"}> : () -> ()
    %cst_13 = arith.constant dense<0.000000e+00> : vector<3x16x16xf32>
    %26 = tpu.matmul %23, %24, %cst_13 {dimension_numbers = #tpu.dot_dimension_numbers<[2], [2], [1], [1], [0, 0, 0, 1, 1, 1], [0], [0]>} : vector<3x16x32xbf16>, vector<3x16x32xbf16>, vector<3x16x16xf32> -> vector<3x16x16xf32>
    "tpu.trace_stop"() : () -> ()
    %cst_14 = arith.constant dense<0xFF800000> : vector<3x16xf32>
    %27 = vector.multi_reduction <maximumf>, %26, %cst_14 [2] : vector<3x16x16xf32> to vector<3x16xf32>
    %28 = vector.shape_cast %27 : vector<3x16xf32> to vector<3x16x1xf32>
    %29 = vector.broadcast %28 : vector<3x16x1xf32> to vector<3x16x16xf32>
    %30 = arith.subf %26, %29 : vector<3x16x16xf32>
    %31 = math.exp %30 : vector<3x16x16xf32>
    %cst_15 = arith.constant dense<0.000000e+00> : vector<3x16xf32>
    %32 = vector.multi_reduction <add>, %31, %cst_15 [2] : vector<3x16x16xf32> to vector<3x16xf32>
    %33 = vector.shape_cast %32 : vector<3x16xf32> to vector<3x16x1xf32>
    %34 = tpu.reciprocal %33 {approx = true} : vector<3x16x1xf32> -> vector<3x16x1xf32>
    %35 = vector.broadcast %34 : vector<3x16x1xf32> to vector<3x16x16xf32>
    %36 = arith.mulf %31, %35 : vector<3x16x16xf32>
    %37 = arith.truncf %36 : vector<3x16x16xf32> to vector<3x16x16xbf16>
    "tpu.trace_start"() <{level = 10 : i32, message = "bqk,bkd->bqd"}> : () -> ()
    %cst_16 = arith.constant dense<0.000000e+00> : vector<3x16x32xf32>
    %38 = tpu.matmul %37, %25, %cst_16 {dimension_numbers = #tpu.dot_dimension_numbers<[2], [1], [1], [2], [0, 0, 0, 1, 1, 2], [0], [0]>} : vector<3x16x16xbf16>, vector<3x16x32xbf16>, vector<3x16x32xf32> -> vector<3x16x32xf32>
    "tpu.trace_stop"() : () -> ()
    %39 = vector.shape_cast %38 : vector<3x16x32xf32> to vector<48x32xf32>
    %40 = arith.truncf %39 : vector<48x32xf32> to vector<48x32xbf16>
    %41 = vector.extract_strided_slice %21 {offsets = [0, 0], sizes = [32, 128], strides = [1, 1]} : vector<128x128xbf16> to vector<32x128xbf16>
    %cst_17 = arith.constant dense<0.000000e+00> : vector<48x128xf32>
    %42 = tpu.matmul %40, %41, %cst_17 {dimension_numbers = #tpu.dot_dimension_numbers<[1], [0], [0], [1], [0, 0, 1, 1], [], []>} : vector<48x32xbf16>, vector<32x128xbf16>, vector<48x128xf32> -> vector<48x128xf32>
    %43 = arith.addf %22, %42 : vector<48x128xf32>
    %44 = vector.extract_strided_slice %13 {offsets = [0, 0, 32], sizes = [3, 16, 32], strides = [1, 1, 1]} : vector<3x16x128xbf16> to vector<3x16x32xbf16>
    %45 = vector.extract_strided_slice %16 {offsets = [0, 0, 32], sizes = [3, 16, 32], strides = [1, 1, 1]} : vector<3x16x128xbf16> to vector<3x16x32xbf16>
    %46 = vector.extract_strided_slice %19 {offsets = [0, 0, 32], sizes = [3, 16, 32], strides = [1, 1, 1]} : vector<3x16x128xbf16> to vector<3x16x32xbf16>
    "tpu.trace_start"() <{level = 10 : i32, message = "bqd,bkd->bqk"}> : () -> ()
    %cst_18 = arith.constant dense<0.000000e+00> : vector<3x16x16xf32>
    %47 = tpu.matmul %44, %45, %cst_18 {dimension_numbers = #tpu.dot_dimension_numbers<[2], [2], [1], [1], [0, 0, 0, 1, 1, 1], [0], [0]>} : vector<3x16x32xbf16>, vector<3x16x32xbf16>, vector<3x16x16xf32> -> vector<3x16x16xf32>
    "tpu.trace_stop"() : () -> ()
    %cst_19 = arith.constant dense<0xFF800000> : vector<3x16xf32>
    %48 = vector.multi_reduction <maximumf>, %47, %cst_19 [2] : vector<3x16x16xf32> to vector<3x16xf32>
    %49 = vector.shape_cast %48 : vector<3x16xf32> to vector<3x16x1xf32>
    %50 = vector.broadcast %49 : vector<3x16x1xf32> to vector<3x16x16xf32>
    %51 = arith.subf %47, %50 : vector<3x16x16xf32>
    %52 = math.exp %51 : vector<3x16x16xf32>
    %cst_20 = arith.constant dense<0.000000e+00> : vector<3x16xf32>
    %53 = vector.multi_reduction <add>, %52, %cst_20 [2] : vector<3x16x16xf32> to vector<3x16xf32>
    %54 = vector.shape_cast %53 : vector<3x16xf32> to vector<3x16x1xf32>
    %55 = tpu.reciprocal %54 {approx = true} : vector<3x16x1xf32> -> vector<3x16x1xf32>
    %56 = vector.broadcast %55 : vector<3x16x1xf32> to vector<3x16x16xf32>
    %57 = arith.mulf %52, %56 : vector<3x16x16xf32>
    %58 = arith.truncf %57 : vector<3x16x16xf32> to vector<3x16x16xbf16>
    "tpu.trace_start"() <{level = 10 : i32, message = "bqk,bkd->bqd"}> : () -> ()
    %cst_21 = arith.constant dense<0.000000e+00> : vector<3x16x32xf32>
    %59 = tpu.matmul %58, %46, %cst_21 {dimension_numbers = #tpu.dot_dimension_numbers<[2], [1], [1], [2], [0, 0, 0, 1, 1, 2], [0], [0]>} : vector<3x16x16xbf16>, vector<3x16x32xbf16>, vector<3x16x32xf32> -> vector<3x16x32xf32>
    "tpu.trace_stop"() : () -> ()
    %60 = vector.shape_cast %59 : vector<3x16x32xf32> to vector<48x32xf32>
    %61 = arith.truncf %60 : vector<48x32xf32> to vector<48x32xbf16>
    %62 = vector.extract_strided_slice %21 {offsets = [32, 0], sizes = [32, 128], strides = [1, 1]} : vector<128x128xbf16> to vector<32x128xbf16>
    %cst_22 = arith.constant dense<0.000000e+00> : vector<48x128xf32>
    %63 = tpu.matmul %61, %62, %cst_22 {dimension_numbers = #tpu.dot_dimension_numbers<[1], [0], [0], [1], [0, 0, 1, 1], [], []>} : vector<48x32xbf16>, vector<32x128xbf16>, vector<48x128xf32> -> vector<48x128xf32>
    %64 = arith.addf %43, %63 : vector<48x128xf32>
    %65 = vector.extract_strided_slice %13 {offsets = [0, 0, 64], sizes = [3, 16, 32], strides = [1, 1, 1]} : vector<3x16x128xbf16> to vector<3x16x32xbf16>
    %66 = vector.extract_strided_slice %16 {offsets = [0, 0, 64], sizes = [3, 16, 32], strides = [1, 1, 1]} : vector<3x16x128xbf16> to vector<3x16x32xbf16>
    %67 = vector.extract_strided_slice %19 {offsets = [0, 0, 64], sizes = [3, 16, 32], strides = [1, 1, 1]} : vector<3x16x128xbf16> to vector<3x16x32xbf16>
    "tpu.trace_start"() <{level = 10 : i32, message = "bqd,bkd->bqk"}> : () -> ()
    %cst_23 = arith.constant dense<0.000000e+00> : vector<3x16x16xf32>
    %68 = tpu.matmul %65, %66, %cst_23 {dimension_numbers = #tpu.dot_dimension_numbers<[2], [2], [1], [1], [0, 0, 0, 1, 1, 1], [0], [0]>} : vector<3x16x32xbf16>, vector<3x16x32xbf16>, vector<3x16x16xf32> -> vector<3x16x16xf32>
    "tpu.trace_stop"() : () -> ()
    %cst_24 = arith.constant dense<0xFF800000> : vector<3x16xf32>
    %69 = vector.multi_reduction <maximumf>, %68, %cst_24 [2] : vector<3x16x16xf32> to vector<3x16xf32>
    %70 = vector.shape_cast %69 : vector<3x16xf32> to vector<3x16x1xf32>
    %71 = vector.broadcast %70 : vector<3x16x1xf32> to vector<3x16x16xf32>
    %72 = arith.subf %68, %71 : vector<3x16x16xf32>
    %73 = math.exp %72 : vector<3x16x16xf32>
    %cst_25 = arith.constant dense<0.000000e+00> : vector<3x16xf32>
    %74 = vector.multi_reduction <add>, %73, %cst_25 [2] : vector<3x16x16xf32> to vector<3x16xf32>
    %75 = vector.shape_cast %74 : vector<3x16xf32> to vector<3x16x1xf32>
    %76 = tpu.reciprocal %75 {approx = true} : vector<3x16x1xf32> -> vector<3x16x1xf32>
    %77 = vector.broadcast %76 : vector<3x16x1xf32> to vector<3x16x16xf32>
    %78 = arith.mulf %73, %77 : vector<3x16x16xf32>
    %79 = arith.truncf %78 : vector<3x16x16xf32> to vector<3x16x16xbf16>
    "tpu.trace_start"() <{level = 10 : i32, message = "bqk,bkd->bqd"}> : () -> ()
    %cst_26 = arith.constant dense<0.000000e+00> : vector<3x16x32xf32>
    %80 = tpu.matmul %79, %67, %cst_26 {dimension_numbers = #tpu.dot_dimension_numbers<[2], [1], [1], [2], [0, 0, 0, 1, 1, 2], [0], [0]>} : vector<3x16x16xbf16>, vector<3x16x32xbf16>, vector<3x16x32xf32> -> vector<3x16x32xf32>
    "tpu.trace_stop"() : () -> ()
    %81 = vector.shape_cast %80 : vector<3x16x32xf32> to vector<48x32xf32>
    %82 = arith.truncf %81 : vector<48x32xf32> to vector<48x32xbf16>
    %83 = vector.extract_strided_slice %21 {offsets = [64, 0], sizes = [32, 128], strides = [1, 1]} : vector<128x128xbf16> to vector<32x128xbf16>
    %cst_27 = arith.constant dense<0.000000e+00> : vector<48x128xf32>
    %84 = tpu.matmul %82, %83, %cst_27 {dimension_numbers = #tpu.dot_dimension_numbers<[1], [0], [0], [1], [0, 0, 1, 1], [], []>} : vector<48x32xbf16>, vector<32x128xbf16>, vector<48x128xf32> -> vector<48x128xf32>
    %85 = arith.addf %64, %84 : vector<48x128xf32>
    %86 = vector.extract_strided_slice %13 {offsets = [0, 0, 96], sizes = [3, 16, 32], strides = [1, 1, 1]} : vector<3x16x128xbf16> to vector<3x16x32xbf16>
    %87 = vector.extract_strided_slice %16 {offsets = [0, 0, 96], sizes = [3, 16, 32], strides = [1, 1, 1]} : vector<3x16x128xbf16> to vector<3x16x32xbf16>
    %88 = vector.extract_strided_slice %19 {offsets = [0, 0, 96], sizes = [3, 16, 32], strides = [1, 1, 1]} : vector<3x16x128xbf16> to vector<3x16x32xbf16>
    "tpu.trace_start"() <{level = 10 : i32, message = "bqd,bkd->bqk"}> : () -> ()
    %cst_28 = arith.constant dense<0.000000e+00> : vector<3x16x16xf32>
    %89 = tpu.matmul %86, %87, %cst_28 {dimension_numbers = #tpu.dot_dimension_numbers<[2], [2], [1], [1], [0, 0, 0, 1, 1, 1], [0], [0]>} : vector<3x16x32xbf16>, vector<3x16x32xbf16>, vector<3x16x16xf32> -> vector<3x16x16xf32>
    "tpu.trace_stop"() : () -> ()
    %cst_29 = arith.constant dense<0xFF800000> : vector<3x16xf32>
    %90 = vector.multi_reduction <maximumf>, %89, %cst_29 [2] : vector<3x16x16xf32> to vector<3x16xf32>
    %91 = vector.shape_cast %90 : vector<3x16xf32> to vector<3x16x1xf32>
    %92 = vector.broadcast %91 : vector<3x16x1xf32> to vector<3x16x16xf32>
    %93 = arith.subf %89, %92 : vector<3x16x16xf32>
    %94 = math.exp %93 : vector<3x16x16xf32>
    %cst_30 = arith.constant dense<0.000000e+00> : vector<3x16xf32>
    %95 = vector.multi_reduction <add>, %94, %cst_30 [2] : vector<3x16x16xf32> to vector<3x16xf32>
    %96 = vector.shape_cast %95 : vector<3x16xf32> to vector<3x16x1xf32>
    %97 = tpu.reciprocal %96 {approx = true} : vector<3x16x1xf32> -> vector<3x16x1xf32>
    %98 = vector.broadcast %97 : vector<3x16x1xf32> to vector<3x16x16xf32>
    %99 = arith.mulf %94, %98 : vector<3x16x16xf32>
    %100 = arith.truncf %99 : vector<3x16x16xf32> to vector<3x16x16xbf16>
    "tpu.trace_start"() <{level = 10 : i32, message = "bqk,bkd->bqd"}> : () -> ()
    %cst_31 = arith.constant dense<0.000000e+00> : vector<3x16x32xf32>
    %101 = tpu.matmul %100, %88, %cst_31 {dimension_numbers = #tpu.dot_dimension_numbers<[2], [1], [1], [2], [0, 0, 0, 1, 1, 2], [0], [0]>} : vector<3x16x16xbf16>, vector<3x16x32xbf16>, vector<3x16x32xf32> -> vector<3x16x32xf32>
    "tpu.trace_stop"() : () -> ()
    %102 = vector.shape_cast %101 : vector<3x16x32xf32> to vector<48x32xf32>
    %103 = arith.truncf %102 : vector<48x32xf32> to vector<48x32xbf16>
    %104 = vector.extract_strided_slice %21 {offsets = [96, 0], sizes = [32, 128], strides = [1, 1]} : vector<128x128xbf16> to vector<32x128xbf16>
    %cst_32 = arith.constant dense<0.000000e+00> : vector<48x128xf32>
    %105 = tpu.matmul %103, %104, %cst_32 {dimension_numbers = #tpu.dot_dimension_numbers<[1], [0], [0], [1], [0, 0, 1, 1], [], []>} : vector<48x32xbf16>, vector<32x128xbf16>, vector<48x128xf32> -> vector<48x128xf32>
    %106 = arith.addf %85, %105 : vector<48x128xf32>
    %c0_33 = arith.constant 0 : index
    %c0_34 = arith.constant 0 : index
    %c0_35 = arith.constant 0 : index
    %107 = vector.load %arg6[%c0_33, %c0_34, %c0_35] : memref<4x1x128xf32, #tpu.memory_space<vmem>>, vector<1x1x128xf32>
    %108 = vector.shape_cast %107 : vector<1x1x128xf32> to vector<1x128xf32>
    %109 = vector.broadcast %108 : vector<1x128xf32> to vector<48x128xf32>
    %110 = arith.addf %106, %109 : vector<48x128xf32>
    %111 = arith.addf %2, %110 : vector<48x128xf32>
    %c0_36 = arith.constant 0 : index
    %c0_37 = arith.constant 0 : index
    %c0_38 = arith.constant 0 : index
    %112 = vector.load %arg7[%c0_36, %c0_37, %c0_38] : memref<4x1x128xf32, #tpu.memory_space<vmem>>, vector<1x1x128xf32>
    %113 = vector.shape_cast %112 : vector<1x1x128xf32> to vector<1x128xf32>
    %c0_39 = arith.constant 0 : index
    %c0_40 = arith.constant 0 : index
    %c0_41 = arith.constant 0 : index
    %114 = vector.load %arg8[%c0_39, %c0_40, %c0_41] : memref<4x1x128xf32, #tpu.memory_space<vmem>>, vector<1x1x128xf32>
    %115 = vector.shape_cast %114 : vector<1x1x128xf32> to vector<1x128xf32>
    %cst_42 = arith.constant dense<0.000000e+00> : vector<48xf32>
    %116 = vector.multi_reduction <add>, %111, %cst_42 [1] : vector<48x128xf32> to vector<48xf32>
    %117 = vector.shape_cast %116 : vector<48xf32> to vector<48x1xf32>
    %cst_43 = arith.constant 1.280000e+02 : f32
    %118 = vector.broadcast %cst_43 : f32 to vector<48x1xf32>
    %119 = arith.divf %117, %118 : vector<48x1xf32>
    %120 = vector.broadcast %119 : vector<48x1xf32> to vector<48x128xf32>
    %121 = arith.subf %111, %120 : vector<48x128xf32>
    %122 = arith.mulf %121, %121 : vector<48x128xf32>
    %cst_44 = arith.constant dense<0.000000e+00> : vector<48xf32>
    %123 = vector.multi_reduction <add>, %122, %cst_44 [1] : vector<48x128xf32> to vector<48xf32>
    %124 = vector.shape_cast %123 : vector<48xf32> to vector<48x1xf32>
    %cst_45 = arith.constant 1.280000e+02 : f32
    %125 = vector.broadcast %cst_45 : f32 to vector<48x1xf32>
    %126 = arith.divf %124, %125 : vector<48x1xf32>
    %127 = vector.broadcast %119 : vector<48x1xf32> to vector<48x128xf32>
    %128 = arith.subf %111, %127 : vector<48x128xf32>
    %cst_46 = arith.constant 9.99999974E-6 : f32
    %129 = vector.broadcast %cst_46 : f32 to vector<48x1xf32>
    %130 = arith.addf %126, %129 : vector<48x1xf32>
    %131 = math.rsqrt %130 : vector<48x1xf32>
    %132 = vector.broadcast %131 : vector<48x1xf32> to vector<48x128xf32>
    %133 = arith.mulf %128, %132 : vector<48x128xf32>
    %134 = vector.broadcast %113 : vector<1x128xf32> to vector<48x128xf32>
    %135 = arith.mulf %133, %134 : vector<48x128xf32>
    %136 = vector.broadcast %115 : vector<1x128xf32> to vector<48x128xf32>
    %137 = arith.addf %135, %136 : vector<48x128xf32>
    %138 = arith.truncf %137 : vector<48x128xf32> to vector<48x128xbf16>
    %c0_47 = arith.constant 0 : index
    %c0_48 = arith.constant 0 : index
    %c0_49 = arith.constant 0 : index
    %139 = vector.load %arg11[%c0_47, %c0_48, %c0_49] : memref<4x128x256xbf16, #tpu.memory_space<vmem>>, vector<1x128x256xbf16>
    %140 = vector.shape_cast %139 : vector<1x128x256xbf16> to vector<128x256xbf16>
    %cst_50 = arith.constant dense<0.000000e+00> : vector<48x256xf32>
    %141 = tpu.matmul %138, %140, %cst_50 {dimension_numbers = #tpu.dot_dimension_numbers<[1], [0], [0], [1], [0, 0, 1, 1], [], []>} : vector<48x128xbf16>, vector<128x256xbf16>, vector<48x256xf32> -> vector<48x256xf32>
    %c0_51 = arith.constant 0 : index
    %c0_52 = arith.constant 0 : index
    %c0_53 = arith.constant 0 : index
    %142 = vector.load %arg12[%c0_51, %c0_52, %c0_53] : memref<4x1x256xf32, #tpu.memory_space<vmem>>, vector<1x1x256xf32>
    %143 = vector.shape_cast %142 : vector<1x1x256xf32> to vector<1x256xf32>
    %144 = vector.broadcast %143 : vector<1x256xf32> to vector<48x256xf32>
    %145 = arith.addf %141, %144 : vector<48x256xf32>
    %cst_54 = arith.constant 0.000000e+00 : f32
    %146 = vector.broadcast %cst_54 : f32 to vector<48x256xf32>
    %147 = arith.maximumf %145, %146 : vector<48x256xf32>
    %148 = arith.truncf %147 : vector<48x256xf32> to vector<48x256xbf16>
    %c0_55 = arith.constant 0 : index
    %c0_56 = arith.constant 0 : index
    %c0_57 = arith.constant 0 : index
    %149 = vector.load %arg13[%c0_55, %c0_56, %c0_57] : memref<4x256x128xbf16, #tpu.memory_space<vmem>>, vector<1x256x128xbf16>
    %150 = vector.shape_cast %149 : vector<1x256x128xbf16> to vector<256x128xbf16>
    %cst_58 = arith.constant dense<0.000000e+00> : vector<48x128xf32>
    %151 = tpu.matmul %148, %150, %cst_58 {dimension_numbers = #tpu.dot_dimension_numbers<[1], [0], [0], [1], [0, 0, 1, 1], [], []>} : vector<48x256xbf16>, vector<256x128xbf16>, vector<48x128xf32> -> vector<48x128xf32>
    %c0_59 = arith.constant 0 : index
    %c0_60 = arith.constant 0 : index
    %c0_61 = arith.constant 0 : index
    %152 = vector.load %arg14[%c0_59, %c0_60, %c0_61] : memref<4x1x128xf32, #tpu.memory_space<vmem>>, vector<1x1x128xf32>
    %153 = vector.shape_cast %152 : vector<1x1x128xf32> to vector<1x128xf32>
    %154 = vector.broadcast %153 : vector<1x128xf32> to vector<48x128xf32>
    %155 = arith.addf %151, %154 : vector<48x128xf32>
    %156 = arith.addf %137, %155 : vector<48x128xf32>
    %c0_62 = arith.constant 0 : index
    %c0_63 = arith.constant 0 : index
    %c0_64 = arith.constant 0 : index
    %157 = vector.load %arg9[%c0_62, %c0_63, %c0_64] : memref<4x1x128xf32, #tpu.memory_space<vmem>>, vector<1x1x128xf32>
    %158 = vector.shape_cast %157 : vector<1x1x128xf32> to vector<1x128xf32>
    %c0_65 = arith.constant 0 : index
    %c0_66 = arith.constant 0 : index
    %c0_67 = arith.constant 0 : index
    %159 = vector.load %arg10[%c0_65, %c0_66, %c0_67] : memref<4x1x128xf32, #tpu.memory_space<vmem>>, vector<1x1x128xf32>
    %160 = vector.shape_cast %159 : vector<1x1x128xf32> to vector<1x128xf32>
    %cst_68 = arith.constant dense<0.000000e+00> : vector<48xf32>
    %161 = vector.multi_reduction <add>, %156, %cst_68 [1] : vector<48x128xf32> to vector<48xf32>
    %162 = vector.shape_cast %161 : vector<48xf32> to vector<48x1xf32>
    %cst_69 = arith.constant 1.280000e+02 : f32
    %163 = vector.broadcast %cst_69 : f32 to vector<48x1xf32>
    %164 = arith.divf %162, %163 : vector<48x1xf32>
    %165 = vector.broadcast %164 : vector<48x1xf32> to vector<48x128xf32>
    %166 = arith.subf %156, %165 : vector<48x128xf32>
    %167 = arith.mulf %166, %166 : vector<48x128xf32>
    %cst_70 = arith.constant dense<0.000000e+00> : vector<48xf32>
    %168 = vector.multi_reduction <add>, %167, %cst_70 [1] : vector<48x128xf32> to vector<48xf32>
    %169 = vector.shape_cast %168 : vector<48xf32> to vector<48x1xf32>
    %cst_71 = arith.constant 1.280000e+02 : f32
    %170 = vector.broadcast %cst_71 : f32 to vector<48x1xf32>
    %171 = arith.divf %169, %170 : vector<48x1xf32>
    %172 = vector.broadcast %164 : vector<48x1xf32> to vector<48x128xf32>
    %173 = arith.subf %156, %172 : vector<48x128xf32>
    %cst_72 = arith.constant 9.99999974E-6 : f32
    %174 = vector.broadcast %cst_72 : f32 to vector<48x1xf32>
    %175 = arith.addf %171, %174 : vector<48x1xf32>
    %176 = math.rsqrt %175 : vector<48x1xf32>
    %177 = vector.broadcast %176 : vector<48x1xf32> to vector<48x128xf32>
    %178 = arith.mulf %173, %177 : vector<48x128xf32>
    %179 = vector.broadcast %158 : vector<1x128xf32> to vector<48x128xf32>
    %180 = arith.mulf %178, %179 : vector<48x128xf32>
    %181 = vector.broadcast %160 : vector<1x128xf32> to vector<48x128xf32>
    %182 = arith.addf %180, %181 : vector<48x128xf32>
    %183 = vector.shape_cast %182 : vector<48x128xf32> to vector<3x16x128xf32>
    %184 = vector.extract_strided_slice %183 {offsets = [0, 0, 0], sizes = [1, 16, 128], strides = [1, 1, 1]} : vector<3x16x128xf32> to vector<1x16x128xf32>
    %185 = vector.shape_cast %184 : vector<1x16x128xf32> to vector<16x128xf32>
    %c0_73 = arith.constant 0 : index
    %186 = memref.load %arg2[%c0_73] : memref<3xf32, #tpu.memory_space<smem>>
    %187 = vector.broadcast %186 : f32 to vector<16x128xf32>
    %188 = arith.mulf %185, %187 : vector<16x128xf32>
    %189 = vector.extract_strided_slice %183 {offsets = [1, 0, 0], sizes = [1, 16, 128], strides = [1, 1, 1]} : vector<3x16x128xf32> to vector<1x16x128xf32>
    %190 = vector.shape_cast %189 : vector<1x16x128xf32> to vector<16x128xf32>
    %c1 = arith.constant 1 : index
    %191 = memref.load %arg2[%c1] : memref<3xf32, #tpu.memory_space<smem>>
    %192 = vector.broadcast %191 : f32 to vector<16x128xf32>
    %193 = arith.mulf %190, %192 : vector<16x128xf32>
    %194 = arith.addf %188, %193 : vector<16x128xf32>
    %195 = vector.extract_strided_slice %183 {offsets = [2, 0, 0], sizes = [1, 16, 128], strides = [1, 1, 1]} : vector<3x16x128xf32> to vector<1x16x128xf32>
    %196 = vector.shape_cast %195 : vector<1x16x128xf32> to vector<16x128xf32>
    %c2 = arith.constant 2 : index
    %197 = memref.load %arg2[%c2] : memref<3xf32, #tpu.memory_space<smem>>
    %198 = vector.broadcast %197 : f32 to vector<16x128xf32>
    %199 = arith.mulf %196, %198 : vector<16x128xf32>
    %200 = arith.addf %194, %199 : vector<16x128xf32>
    %cst_74 = arith.constant 0.000000e+00 : f32
    %201 = vector.broadcast %cst_74 : f32 to vector<16x128xf32>
    %202 = arith.maximumf %200, %201 : vector<16x128xf32>
    %203 = arith.truncf %202 : vector<16x128xf32> to vector<16x128xbf16>
    %c1_75 = arith.constant 1 : index
    %c0_76 = arith.constant 0 : index
    %c0_77 = arith.constant 0 : index
    %204 = vector.load %arg3[%c1_75, %c0_76, %c0_77] : memref<4x128x384xbf16, #tpu.memory_space<vmem>>, vector<1x128x384xbf16>
    %205 = vector.shape_cast %204 : vector<1x128x384xbf16> to vector<128x384xbf16>
    %cst_78 = arith.constant dense<0.000000e+00> : vector<16x384xf32>
    %206 = tpu.matmul %203, %205, %cst_78 {dimension_numbers = #tpu.dot_dimension_numbers<[1], [0], [0], [1], [0, 0, 1, 1], [], []>} : vector<16x128xbf16>, vector<128x384xbf16>, vector<16x384xf32> -> vector<16x384xf32>
    %c1_79 = arith.constant 1 : index
    %c0_80 = arith.constant 0 : index
    %c0_81 = arith.constant 0 : index
    %207 = vector.load %arg4[%c1_79, %c0_80, %c0_81] : memref<4x1x384xf32, #tpu.memory_space<vmem>>, vector<1x1x384xf32>
    %208 = vector.shape_cast %207 : vector<1x1x384xf32> to vector<1x384xf32>
    %209 = vector.broadcast %208 : vector<1x384xf32> to vector<16x384xf32>
    %210 = arith.addf %206, %209 : vector<16x384xf32>
    %211 = vector.extract_strided_slice %210 {offsets = [0, 0], sizes = [16, 128], strides = [1, 1]} : vector<16x384xf32> to vector<16x128xf32>
    %212 = vector.shape_cast %211 : vector<16x128xf32> to vector<1x16x128xf32>
    %213 = arith.truncf %212 : vector<1x16x128xf32> to vector<1x16x128xbf16>
    %214 = vector.extract_strided_slice %210 {offsets = [0, 128], sizes = [16, 128], strides = [1, 1]} : vector<16x384xf32> to vector<16x128xf32>
    %215 = vector.shape_cast %214 : vector<16x128xf32> to vector<1x16x128xf32>
    %216 = arith.truncf %215 : vector<1x16x128xf32> to vector<1x16x128xbf16>
    %217 = vector.extract_strided_slice %210 {offsets = [0, 256], sizes = [16, 128], strides = [1, 1]} : vector<16x384xf32> to vector<16x128xf32>
    %218 = vector.shape_cast %217 : vector<16x128xf32> to vector<1x16x128xf32>
    %219 = arith.truncf %218 : vector<1x16x128xf32> to vector<1x16x128xbf16>
    %c1_82 = arith.constant 1 : index
    %c0_83 = arith.constant 0 : index
    %c0_84 = arith.constant 0 : index
    %220 = vector.load %arg5[%c1_82, %c0_83, %c0_84] : memref<4x128x128xbf16, #tpu.memory_space<vmem>>, vector<1x128x128xbf16>
    %221 = vector.shape_cast %220 : vector<1x128x128xbf16> to vector<128x128xbf16>
    %cst_85 = arith.constant 0.000000e+00 : f32
    %222 = vector.broadcast %cst_85 : f32 to vector<16x128xf32>
    %223 = vector.extract_strided_slice %213 {offsets = [0, 0, 0], sizes = [1, 16, 32], strides = [1, 1, 1]} : vector<1x16x128xbf16> to vector<1x16x32xbf16>
    %224 = vector.extract_strided_slice %216 {offsets = [0, 0, 0], sizes = [1, 16, 32], strides = [1, 1, 1]} : vector<1x16x128xbf16> to vector<1x16x32xbf16>
    %225 = vector.extract_strided_slice %219 {offsets = [0, 0, 0], sizes = [1, 16, 32], strides = [1, 1, 1]} : vector<1x16x128xbf16> to vector<1x16x32xbf16>
    "tpu.trace_start"() <{level = 10 : i32, message = "bqd,bkd->bqk"}> : () -> ()
    %cst_86 = arith.constant dense<0.000000e+00> : vector<1x16x16xf32>
    %226 = tpu.matmul %223, %224, %cst_86 {dimension_numbers = #tpu.dot_dimension_numbers<[2], [2], [1], [1], [0, 0, 0, 1, 1, 1], [0], [0]>} : vector<1x16x32xbf16>, vector<1x16x32xbf16>, vector<1x16x16xf32> -> vector<1x16x16xf32>
    "tpu.trace_stop"() : () -> ()
    %cst_87 = arith.constant dense<0xFF800000> : vector<1x16xf32>
    %227 = vector.multi_reduction <maximumf>, %226, %cst_87 [2] : vector<1x16x16xf32> to vector<1x16xf32>
    %228 = vector.shape_cast %227 : vector<1x16xf32> to vector<1x16x1xf32>
    %229 = vector.broadcast %228 : vector<1x16x1xf32> to vector<1x16x16xf32>
    %230 = arith.subf %226, %229 : vector<1x16x16xf32>
    %231 = math.exp %230 : vector<1x16x16xf32>
    %cst_88 = arith.constant dense<0.000000e+00> : vector<1x16xf32>
    %232 = vector.multi_reduction <add>, %231, %cst_88 [2] : vector<1x16x16xf32> to vector<1x16xf32>
    %233 = vector.shape_cast %232 : vector<1x16xf32> to vector<1x16x1xf32>
    %234 = tpu.reciprocal %233 {approx = true} : vector<1x16x1xf32> -> vector<1x16x1xf32>
    %235 = vector.broadcast %234 : vector<1x16x1xf32> to vector<1x16x16xf32>
    %236 = arith.mulf %231, %235 : vector<1x16x16xf32>
    %237 = arith.truncf %236 : vector<1x16x16xf32> to vector<1x16x16xbf16>
    "tpu.trace_start"() <{level = 10 : i32, message = "bqk,bkd->bqd"}> : () -> ()
    %cst_89 = arith.constant dense<0.000000e+00> : vector<1x16x32xf32>
    %238 = tpu.matmul %237, %225, %cst_89 {dimension_numbers = #tpu.dot_dimension_numbers<[2], [1], [1], [2], [0, 0, 0, 1, 1, 2], [0], [0]>} : vector<1x16x16xbf16>, vector<1x16x32xbf16>, vector<1x16x32xf32> -> vector<1x16x32xf32>
    "tpu.trace_stop"() : () -> ()
    %239 = vector.shape_cast %238 : vector<1x16x32xf32> to vector<16x32xf32>
    %240 = arith.truncf %239 : vector<16x32xf32> to vector<16x32xbf16>
    %241 = vector.extract_strided_slice %221 {offsets = [0, 0], sizes = [32, 128], strides = [1, 1]} : vector<128x128xbf16> to vector<32x128xbf16>
    %cst_90 = arith.constant dense<0.000000e+00> : vector<16x128xf32>
    %242 = tpu.matmul %240, %241, %cst_90 {dimension_numbers = #tpu.dot_dimension_numbers<[1], [0], [0], [1], [0, 0, 1, 1], [], []>} : vector<16x32xbf16>, vector<32x128xbf16>, vector<16x128xf32> -> vector<16x128xf32>
    %243 = arith.addf %222, %242 : vector<16x128xf32>
    %244 = vector.extract_strided_slice %213 {offsets = [0, 0, 32], sizes = [1, 16, 32], strides = [1, 1, 1]} : vector<1x16x128xbf16> to vector<1x16x32xbf16>
    %245 = vector.extract_strided_slice %216 {offsets = [0, 0, 32], sizes = [1, 16, 32], strides = [1, 1, 1]} : vector<1x16x128xbf16> to vector<1x16x32xbf16>
    %246 = vector.extract_strided_slice %219 {offsets = [0, 0, 32], sizes = [1, 16, 32], strides = [1, 1, 1]} : vector<1x16x128xbf16> to vector<1x16x32xbf16>
    "tpu.trace_start"() <{level = 10 : i32, message = "bqd,bkd->bqk"}> : () -> ()
    %cst_91 = arith.constant dense<0.000000e+00> : vector<1x16x16xf32>
    %247 = tpu.matmul %244, %245, %cst_91 {dimension_numbers = #tpu.dot_dimension_numbers<[2], [2], [1], [1], [0, 0, 0, 1, 1, 1], [0], [0]>} : vector<1x16x32xbf16>, vector<1x16x32xbf16>, vector<1x16x16xf32> -> vector<1x16x16xf32>
    "tpu.trace_stop"() : () -> ()
    %cst_92 = arith.constant dense<0xFF800000> : vector<1x16xf32>
    %248 = vector.multi_reduction <maximumf>, %247, %cst_92 [2] : vector<1x16x16xf32> to vector<1x16xf32>
    %249 = vector.shape_cast %248 : vector<1x16xf32> to vector<1x16x1xf32>
    %250 = vector.broadcast %249 : vector<1x16x1xf32> to vector<1x16x16xf32>
    %251 = arith.subf %247, %250 : vector<1x16x16xf32>
    %252 = math.exp %251 : vector<1x16x16xf32>
    %cst_93 = arith.constant dense<0.000000e+00> : vector<1x16xf32>
    %253 = vector.multi_reduction <add>, %252, %cst_93 [2] : vector<1x16x16xf32> to vector<1x16xf32>
    %254 = vector.shape_cast %253 : vector<1x16xf32> to vector<1x16x1xf32>
    %255 = tpu.reciprocal %254 {approx = true} : vector<1x16x1xf32> -> vector<1x16x1xf32>
    %256 = vector.broadcast %255 : vector<1x16x1xf32> to vector<1x16x16xf32>
    %257 = arith.mulf %252, %256 : vector<1x16x16xf32>
    %258 = arith.truncf %257 : vector<1x16x16xf32> to vector<1x16x16xbf16>
    "tpu.trace_start"() <{level = 10 : i32, message = "bqk,bkd->bqd"}> : () -> ()
    %cst_94 = arith.constant dense<0.000000e+00> : vector<1x16x32xf32>
    %259 = tpu.matmul %258, %246, %cst_94 {dimension_numbers = #tpu.dot_dimension_numbers<[2], [1], [1], [2], [0, 0, 0, 1, 1, 2], [0], [0]>} : vector<1x16x16xbf16>, vector<1x16x32xbf16>, vector<1x16x32xf32> -> vector<1x16x32xf32>
    "tpu.trace_stop"() : () -> ()
    %260 = vector.shape_cast %259 : vector<1x16x32xf32> to vector<16x32xf32>
    %261 = arith.truncf %260 : vector<16x32xf32> to vector<16x32xbf16>
    %262 = vector.extract_strided_slice %221 {offsets = [32, 0], sizes = [32, 128], strides = [1, 1]} : vector<128x128xbf16> to vector<32x128xbf16>
    %cst_95 = arith.constant dense<0.000000e+00> : vector<16x128xf32>
    %263 = tpu.matmul %261, %262, %cst_95 {dimension_numbers = #tpu.dot_dimension_numbers<[1], [0], [0], [1], [0, 0, 1, 1], [], []>} : vector<16x32xbf16>, vector<32x128xbf16>, vector<16x128xf32> -> vector<16x128xf32>
    %264 = arith.addf %243, %263 : vector<16x128xf32>
    %265 = vector.extract_strided_slice %213 {offsets = [0, 0, 64], sizes = [1, 16, 32], strides = [1, 1, 1]} : vector<1x16x128xbf16> to vector<1x16x32xbf16>
    %266 = vector.extract_strided_slice %216 {offsets = [0, 0, 64], sizes = [1, 16, 32], strides = [1, 1, 1]} : vector<1x16x128xbf16> to vector<1x16x32xbf16>
    %267 = vector.extract_strided_slice %219 {offsets = [0, 0, 64], sizes = [1, 16, 32], strides = [1, 1, 1]} : vector<1x16x128xbf16> to vector<1x16x32xbf16>
    "tpu.trace_start"() <{level = 10 : i32, message = "bqd,bkd->bqk"}> : () -> ()
    %cst_96 = arith.constant dense<0.000000e+00> : vector<1x16x16xf32>
    %268 = tpu.matmul %265, %266, %cst_96 {dimension_numbers = #tpu.dot_dimension_numbers<[2], [2], [1], [1], [0, 0, 0, 1, 1, 1], [0], [0]>} : vector<1x16x32xbf16>, vector<1x16x32xbf16>, vector<1x16x16xf32> -> vector<1x16x16xf32>
    "tpu.trace_stop"() : () -> ()
    %cst_97 = arith.constant dense<0xFF800000> : vector<1x16xf32>
    %269 = vector.multi_reduction <maximumf>, %268, %cst_97 [2] : vector<1x16x16xf32> to vector<1x16xf32>
    %270 = vector.shape_cast %269 : vector<1x16xf32> to vector<1x16x1xf32>
    %271 = vector.broadcast %270 : vector<1x16x1xf32> to vector<1x16x16xf32>
    %272 = arith.subf %268, %271 : vector<1x16x16xf32>
    %273 = math.exp %272 : vector<1x16x16xf32>
    %cst_98 = arith.constant dense<0.000000e+00> : vector<1x16xf32>
    %274 = vector.multi_reduction <add>, %273, %cst_98 [2] : vector<1x16x16xf32> to vector<1x16xf32>
    %275 = vector.shape_cast %274 : vector<1x16xf32> to vector<1x16x1xf32>
    %276 = tpu.reciprocal %275 {approx = true} : vector<1x16x1xf32> -> vector<1x16x1xf32>
    %277 = vector.broadcast %276 : vector<1x16x1xf32> to vector<1x16x16xf32>
    %278 = arith.mulf %273, %277 : vector<1x16x16xf32>
    %279 = arith.truncf %278 : vector<1x16x16xf32> to vector<1x16x16xbf16>
    "tpu.trace_start"() <{level = 10 : i32, message = "bqk,bkd->bqd"}> : () -> ()
    %cst_99 = arith.constant dense<0.000000e+00> : vector<1x16x32xf32>
    %280 = tpu.matmul %279, %267, %cst_99 {dimension_numbers = #tpu.dot_dimension_numbers<[2], [1], [1], [2], [0, 0, 0, 1, 1, 2], [0], [0]>} : vector<1x16x16xbf16>, vector<1x16x32xbf16>, vector<1x16x32xf32> -> vector<1x16x32xf32>
    "tpu.trace_stop"() : () -> ()
    %281 = vector.shape_cast %280 : vector<1x16x32xf32> to vector<16x32xf32>
    %282 = arith.truncf %281 : vector<16x32xf32> to vector<16x32xbf16>
    %283 = vector.extract_strided_slice %221 {offsets = [64, 0], sizes = [32, 128], strides = [1, 1]} : vector<128x128xbf16> to vector<32x128xbf16>
    %cst_100 = arith.constant dense<0.000000e+00> : vector<16x128xf32>
    %284 = tpu.matmul %282, %283, %cst_100 {dimension_numbers = #tpu.dot_dimension_numbers<[1], [0], [0], [1], [0, 0, 1, 1], [], []>} : vector<16x32xbf16>, vector<32x128xbf16>, vector<16x128xf32> -> vector<16x128xf32>
    %285 = arith.addf %264, %284 : vector<16x128xf32>
    %286 = vector.extract_strided_slice %213 {offsets = [0, 0, 96], sizes = [1, 16, 32], strides = [1, 1, 1]} : vector<1x16x128xbf16> to vector<1x16x32xbf16>
    %287 = vector.extract_strided_slice %216 {offsets = [0, 0, 96], sizes = [1, 16, 32], strides = [1, 1, 1]} : vector<1x16x128xbf16> to vector<1x16x32xbf16>
    %288 = vector.extract_strided_slice %219 {offsets = [0, 0, 96], sizes = [1, 16, 32], strides = [1, 1, 1]} : vector<1x16x128xbf16> to vector<1x16x32xbf16>
    "tpu.trace_start"() <{level = 10 : i32, message = "bqd,bkd->bqk"}> : () -> ()
    %cst_101 = arith.constant dense<0.000000e+00> : vector<1x16x16xf32>
    %289 = tpu.matmul %286, %287, %cst_101 {dimension_numbers = #tpu.dot_dimension_numbers<[2], [2], [1], [1], [0, 0, 0, 1, 1, 1], [0], [0]>} : vector<1x16x32xbf16>, vector<1x16x32xbf16>, vector<1x16x16xf32> -> vector<1x16x16xf32>
    "tpu.trace_stop"() : () -> ()
    %cst_102 = arith.constant dense<0xFF800000> : vector<1x16xf32>
    %290 = vector.multi_reduction <maximumf>, %289, %cst_102 [2] : vector<1x16x16xf32> to vector<1x16xf32>
    %291 = vector.shape_cast %290 : vector<1x16xf32> to vector<1x16x1xf32>
    %292 = vector.broadcast %291 : vector<1x16x1xf32> to vector<1x16x16xf32>
    %293 = arith.subf %289, %292 : vector<1x16x16xf32>
    %294 = math.exp %293 : vector<1x16x16xf32>
    %cst_103 = arith.constant dense<0.000000e+00> : vector<1x16xf32>
    %295 = vector.multi_reduction <add>, %294, %cst_103 [2] : vector<1x16x16xf32> to vector<1x16xf32>
    %296 = vector.shape_cast %295 : vector<1x16xf32> to vector<1x16x1xf32>
    %297 = tpu.reciprocal %296 {approx = true} : vector<1x16x1xf32> -> vector<1x16x1xf32>
    %298 = vector.broadcast %297 : vector<1x16x1xf32> to vector<1x16x16xf32>
    %299 = arith.mulf %294, %298 : vector<1x16x16xf32>
    %300 = arith.truncf %299 : vector<1x16x16xf32> to vector<1x16x16xbf16>
    "tpu.trace_start"() <{level = 10 : i32, message = "bqk,bkd->bqd"}> : () -> ()
    %cst_104 = arith.constant dense<0.000000e+00> : vector<1x16x32xf32>
    %301 = tpu.matmul %300, %288, %cst_104 {dimension_numbers = #tpu.dot_dimension_numbers<[2], [1], [1], [2], [0, 0, 0, 1, 1, 2], [0], [0]>} : vector<1x16x16xbf16>, vector<1x16x32xbf16>, vector<1x16x32xf32> -> vector<1x16x32xf32>
    "tpu.trace_stop"() : () -> ()
    %302 = vector.shape_cast %301 : vector<1x16x32xf32> to vector<16x32xf32>
    %303 = arith.truncf %302 : vector<16x32xf32> to vector<16x32xbf16>
    %304 = vector.extract_strided_slice %221 {offsets = [96, 0], sizes = [32, 128], strides = [1, 1]} : vector<128x128xbf16> to vector<32x128xbf16>
    %cst_105 = arith.constant dense<0.000000e+00> : vector<16x128xf32>
    %305 = tpu.matmul %303, %304, %cst_105 {dimension_numbers = #tpu.dot_dimension_numbers<[1], [0], [0], [1], [0, 0, 1, 1], [], []>} : vector<16x32xbf16>, vector<32x128xbf16>, vector<16x128xf32> -> vector<16x128xf32>
    %306 = arith.addf %285, %305 : vector<16x128xf32>
    %c1_106 = arith.constant 1 : index
    %c0_107 = arith.constant 0 : index
    %c0_108 = arith.constant 0 : index
    %307 = vector.load %arg6[%c1_106, %c0_107, %c0_108] : memref<4x1x128xf32, #tpu.memory_space<vmem>>, vector<1x1x128xf32>
    %308 = vector.shape_cast %307 : vector<1x1x128xf32> to vector<1x128xf32>
    %309 = vector.broadcast %308 : vector<1x128xf32> to vector<16x128xf32>
    %310 = arith.addf %306, %309 : vector<16x128xf32>
    %311 = arith.addf %202, %310 : vector<16x128xf32>
    %c1_109 = arith.constant 1 : index
    %c0_110 = arith.constant 0 : index
    %c0_111 = arith.constant 0 : index
    %312 = vector.load %arg7[%c1_109, %c0_110, %c0_111] : memref<4x1x128xf32, #tpu.memory_space<vmem>>, vector<1x1x128xf32>
    %313 = vector.shape_cast %312 : vector<1x1x128xf32> to vector<1x128xf32>
    %c1_112 = arith.constant 1 : index
    %c0_113 = arith.constant 0 : index
    %c0_114 = arith.constant 0 : index
    %314 = vector.load %arg8[%c1_112, %c0_113, %c0_114] : memref<4x1x128xf32, #tpu.memory_space<vmem>>, vector<1x1x128xf32>
    %315 = vector.shape_cast %314 : vector<1x1x128xf32> to vector<1x128xf32>
    %cst_115 = arith.constant dense<0.000000e+00> : vector<16xf32>
    %316 = vector.multi_reduction <add>, %311, %cst_115 [1] : vector<16x128xf32> to vector<16xf32>
    %317 = vector.shape_cast %316 : vector<16xf32> to vector<16x1xf32>
    %cst_116 = arith.constant 1.280000e+02 : f32
    %318 = vector.broadcast %cst_116 : f32 to vector<16x1xf32>
    %319 = arith.divf %317, %318 : vector<16x1xf32>
    %320 = vector.broadcast %319 : vector<16x1xf32> to vector<16x128xf32>
    %321 = arith.subf %311, %320 : vector<16x128xf32>
    %322 = arith.mulf %321, %321 : vector<16x128xf32>
    %cst_117 = arith.constant dense<0.000000e+00> : vector<16xf32>
    %323 = vector.multi_reduction <add>, %322, %cst_117 [1] : vector<16x128xf32> to vector<16xf32>
    %324 = vector.shape_cast %323 : vector<16xf32> to vector<16x1xf32>
    %cst_118 = arith.constant 1.280000e+02 : f32
    %325 = vector.broadcast %cst_118 : f32 to vector<16x1xf32>
    %326 = arith.divf %324, %325 : vector<16x1xf32>
    %327 = vector.broadcast %319 : vector<16x1xf32> to vector<16x128xf32>
    %328 = arith.subf %311, %327 : vector<16x128xf32>
    %cst_119 = arith.constant 9.99999974E-6 : f32
    %329 = vector.broadcast %cst_119 : f32 to vector<16x1xf32>
    %330 = arith.addf %326, %329 : vector<16x1xf32>
    %331 = math.rsqrt %330 : vector<16x1xf32>
    %332 = vector.broadcast %331 : vector<16x1xf32> to vector<16x128xf32>
    %333 = arith.mulf %328, %332 : vector<16x128xf32>
    %334 = vector.broadcast %313 : vector<1x128xf32> to vector<16x128xf32>
    %335 = arith.mulf %333, %334 : vector<16x128xf32>
    %336 = vector.broadcast %315 : vector<1x128xf32> to vector<16x128xf32>
    %337 = arith.addf %335, %336 : vector<16x128xf32>
    %338 = arith.truncf %337 : vector<16x128xf32> to vector<16x128xbf16>
    %c1_120 = arith.constant 1 : index
    %c0_121 = arith.constant 0 : index
    %c0_122 = arith.constant 0 : index
    %339 = vector.load %arg11[%c1_120, %c0_121, %c0_122] : memref<4x128x256xbf16, #tpu.memory_space<vmem>>, vector<1x128x256xbf16>
    %340 = vector.shape_cast %339 : vector<1x128x256xbf16> to vector<128x256xbf16>
    %cst_123 = arith.constant dense<0.000000e+00> : vector<16x256xf32>
    %341 = tpu.matmul %338, %340, %cst_123 {dimension_numbers = #tpu.dot_dimension_numbers<[1], [0], [0], [1], [0, 0, 1, 1], [], []>} : vector<16x128xbf16>, vector<128x256xbf16>, vector<16x256xf32> -> vector<16x256xf32>
    %c1_124 = arith.constant 1 : index
    %c0_125 = arith.constant 0 : index
    %c0_126 = arith.constant 0 : index
    %342 = vector.load %arg12[%c1_124, %c0_125, %c0_126] : memref<4x1x256xf32, #tpu.memory_space<vmem>>, vector<1x1x256xf32>
    %343 = vector.shape_cast %342 : vector<1x1x256xf32> to vector<1x256xf32>
    %344 = vector.broadcast %343 : vector<1x256xf32> to vector<16x256xf32>
    %345 = arith.addf %341, %344 : vector<16x256xf32>
    %cst_127 = arith.constant 0.000000e+00 : f32
    %346 = vector.broadcast %cst_127 : f32 to vector<16x256xf32>
    %347 = arith.maximumf %345, %346 : vector<16x256xf32>
    %348 = arith.truncf %347 : vector<16x256xf32> to vector<16x256xbf16>
    %c1_128 = arith.constant 1 : index
    %c0_129 = arith.constant 0 : index
    %c0_130 = arith.constant 0 : index
    %349 = vector.load %arg13[%c1_128, %c0_129, %c0_130] : memref<4x256x128xbf16, #tpu.memory_space<vmem>>, vector<1x256x128xbf16>
    %350 = vector.shape_cast %349 : vector<1x256x128xbf16> to vector<256x128xbf16>
    %cst_131 = arith.constant dense<0.000000e+00> : vector<16x128xf32>
    %351 = tpu.matmul %348, %350, %cst_131 {dimension_numbers = #tpu.dot_dimension_numbers<[1], [0], [0], [1], [0, 0, 1, 1], [], []>} : vector<16x256xbf16>, vector<256x128xbf16>, vector<16x128xf32> -> vector<16x128xf32>
    %c1_132 = arith.constant 1 : index
    %c0_133 = arith.constant 0 : index
    %c0_134 = arith.constant 0 : index
    %352 = vector.load %arg14[%c1_132, %c0_133, %c0_134] : memref<4x1x128xf32, #tpu.memory_space<vmem>>, vector<1x1x128xf32>
    %353 = vector.shape_cast %352 : vector<1x1x128xf32> to vector<1x128xf32>
    %354 = vector.broadcast %353 : vector<1x128xf32> to vector<16x128xf32>
    %355 = arith.addf %351, %354 : vector<16x128xf32>
    %356 = arith.addf %337, %355 : vector<16x128xf32>
    %c1_135 = arith.constant 1 : index
    %c0_136 = arith.constant 0 : index
    %c0_137 = arith.constant 0 : index
    %357 = vector.load %arg9[%c1_135, %c0_136, %c0_137] : memref<4x1x128xf32, #tpu.memory_space<vmem>>, vector<1x1x128xf32>
    %358 = vector.shape_cast %357 : vector<1x1x128xf32> to vector<1x128xf32>
    %c1_138 = arith.constant 1 : index
    %c0_139 = arith.constant 0 : index
    %c0_140 = arith.constant 0 : index
    %359 = vector.load %arg10[%c1_138, %c0_139, %c0_140] : memref<4x1x128xf32, #tpu.memory_space<vmem>>, vector<1x1x128xf32>
    %360 = vector.shape_cast %359 : vector<1x1x128xf32> to vector<1x128xf32>
    %cst_141 = arith.constant dense<0.000000e+00> : vector<16xf32>
    %361 = vector.multi_reduction <add>, %356, %cst_141 [1] : vector<16x128xf32> to vector<16xf32>
    %362 = vector.shape_cast %361 : vector<16xf32> to vector<16x1xf32>
    %cst_142 = arith.constant 1.280000e+02 : f32
    %363 = vector.broadcast %cst_142 : f32 to vector<16x1xf32>
    %364 = arith.divf %362, %363 : vector<16x1xf32>
    %365 = vector.broadcast %364 : vector<16x1xf32> to vector<16x128xf32>
    %366 = arith.subf %356, %365 : vector<16x128xf32>
    %367 = arith.mulf %366, %366 : vector<16x128xf32>
    %cst_143 = arith.constant dense<0.000000e+00> : vector<16xf32>
    %368 = vector.multi_reduction <add>, %367, %cst_143 [1] : vector<16x128xf32> to vector<16xf32>
    %369 = vector.shape_cast %368 : vector<16xf32> to vector<16x1xf32>
    %cst_144 = arith.constant 1.280000e+02 : f32
    %370 = vector.broadcast %cst_144 : f32 to vector<16x1xf32>
    %371 = arith.divf %369, %370 : vector<16x1xf32>
    %372 = vector.broadcast %364 : vector<16x1xf32> to vector<16x128xf32>
    %373 = arith.subf %356, %372 : vector<16x128xf32>
    %cst_145 = arith.constant 9.99999974E-6 : f32
    %374 = vector.broadcast %cst_145 : f32 to vector<16x1xf32>
    %375 = arith.addf %371, %374 : vector<16x1xf32>
    %376 = math.rsqrt %375 : vector<16x1xf32>
    %377 = vector.broadcast %376 : vector<16x1xf32> to vector<16x128xf32>
    %378 = arith.mulf %373, %377 : vector<16x128xf32>
    %379 = vector.broadcast %358 : vector<1x128xf32> to vector<16x128xf32>
    %380 = arith.mulf %378, %379 : vector<16x128xf32>
    %381 = vector.broadcast %360 : vector<1x128xf32> to vector<16x128xf32>
    %382 = arith.addf %380, %381 : vector<16x128xf32>
    %383 = arith.truncf %382 : vector<16x128xf32> to vector<16x128xbf16>
    %c2_146 = arith.constant 2 : index
    %c0_147 = arith.constant 0 : index
    %c0_148 = arith.constant 0 : index
    %384 = vector.load %arg3[%c2_146, %c0_147, %c0_148] : memref<4x128x384xbf16, #tpu.memory_space<vmem>>, vector<1x128x384xbf16>
    %385 = vector.shape_cast %384 : vector<1x128x384xbf16> to vector<128x384xbf16>
    %cst_149 = arith.constant dense<0.000000e+00> : vector<16x384xf32>
    %386 = tpu.matmul %383, %385, %cst_149 {dimension_numbers = #tpu.dot_dimension_numbers<[1], [0], [0], [1], [0, 0, 1, 1], [], []>} : vector<16x128xbf16>, vector<128x384xbf16>, vector<16x384xf32> -> vector<16x384xf32>
    %c2_150 = arith.constant 2 : index
    %c0_151 = arith.constant 0 : index
    %c0_152 = arith.constant 0 : index
    %387 = vector.load %arg4[%c2_150, %c0_151, %c0_152] : memref<4x1x384xf32, #tpu.memory_space<vmem>>, vector<1x1x384xf32>
    %388 = vector.shape_cast %387 : vector<1x1x384xf32> to vector<1x384xf32>
    %389 = vector.broadcast %388 : vector<1x384xf32> to vector<16x384xf32>
    %390 = arith.addf %386, %389 : vector<16x384xf32>
    %391 = vector.extract_strided_slice %390 {offsets = [0, 0], sizes = [16, 128], strides = [1, 1]} : vector<16x384xf32> to vector<16x128xf32>
    %392 = vector.shape_cast %391 : vector<16x128xf32> to vector<1x16x128xf32>
    %393 = arith.truncf %392 : vector<1x16x128xf32> to vector<1x16x128xbf16>
    %394 = vector.extract_strided_slice %390 {offsets = [0, 128], sizes = [16, 128], strides = [1, 1]} : vector<16x384xf32> to vector<16x128xf32>
    %395 = vector.shape_cast %394 : vector<16x128xf32> to vector<1x16x128xf32>
    %396 = arith.truncf %395 : vector<1x16x128xf32> to vector<1x16x128xbf16>
    %397 = vector.extract_strided_slice %390 {offsets = [0, 256], sizes = [16, 128], strides = [1, 1]} : vector<16x384xf32> to vector<16x128xf32>
    %398 = vector.shape_cast %397 : vector<16x128xf32> to vector<1x16x128xf32>
    %399 = arith.truncf %398 : vector<1x16x128xf32> to vector<1x16x128xbf16>
    %c2_153 = arith.constant 2 : index
    %c0_154 = arith.constant 0 : index
    %c0_155 = arith.constant 0 : index
    %400 = vector.load %arg5[%c2_153, %c0_154, %c0_155] : memref<4x128x128xbf16, #tpu.memory_space<vmem>>, vector<1x128x128xbf16>
    %401 = vector.shape_cast %400 : vector<1x128x128xbf16> to vector<128x128xbf16>
    %cst_156 = arith.constant 0.000000e+00 : f32
    %402 = vector.broadcast %cst_156 : f32 to vector<16x128xf32>
    %403 = vector.extract_strided_slice %393 {offsets = [0, 0, 0], sizes = [1, 16, 32], strides = [1, 1, 1]} : vector<1x16x128xbf16> to vector<1x16x32xbf16>
    %404 = vector.extract_strided_slice %396 {offsets = [0, 0, 0], sizes = [1, 16, 32], strides = [1, 1, 1]} : vector<1x16x128xbf16> to vector<1x16x32xbf16>
    %405 = vector.extract_strided_slice %399 {offsets = [0, 0, 0], sizes = [1, 16, 32], strides = [1, 1, 1]} : vector<1x16x128xbf16> to vector<1x16x32xbf16>
    "tpu.trace_start"() <{level = 10 : i32, message = "bqd,bkd->bqk"}> : () -> ()
    %cst_157 = arith.constant dense<0.000000e+00> : vector<1x16x16xf32>
    %406 = tpu.matmul %403, %404, %cst_157 {dimension_numbers = #tpu.dot_dimension_numbers<[2], [2], [1], [1], [0, 0, 0, 1, 1, 1], [0], [0]>} : vector<1x16x32xbf16>, vector<1x16x32xbf16>, vector<1x16x16xf32> -> vector<1x16x16xf32>
    "tpu.trace_stop"() : () -> ()
    %cst_158 = arith.constant dense<0xFF800000> : vector<1x16xf32>
    %407 = vector.multi_reduction <maximumf>, %406, %cst_158 [2] : vector<1x16x16xf32> to vector<1x16xf32>
    %408 = vector.shape_cast %407 : vector<1x16xf32> to vector<1x16x1xf32>
    %409 = vector.broadcast %408 : vector<1x16x1xf32> to vector<1x16x16xf32>
    %410 = arith.subf %406, %409 : vector<1x16x16xf32>
    %411 = math.exp %410 : vector<1x16x16xf32>
    %cst_159 = arith.constant dense<0.000000e+00> : vector<1x16xf32>
    %412 = vector.multi_reduction <add>, %411, %cst_159 [2] : vector<1x16x16xf32> to vector<1x16xf32>
    %413 = vector.shape_cast %412 : vector<1x16xf32> to vector<1x16x1xf32>
    %414 = tpu.reciprocal %413 {approx = true} : vector<1x16x1xf32> -> vector<1x16x1xf32>
    %415 = vector.broadcast %414 : vector<1x16x1xf32> to vector<1x16x16xf32>
    %416 = arith.mulf %411, %415 : vector<1x16x16xf32>
    %417 = arith.truncf %416 : vector<1x16x16xf32> to vector<1x16x16xbf16>
    "tpu.trace_start"() <{level = 10 : i32, message = "bqk,bkd->bqd"}> : () -> ()
    %cst_160 = arith.constant dense<0.000000e+00> : vector<1x16x32xf32>
    %418 = tpu.matmul %417, %405, %cst_160 {dimension_numbers = #tpu.dot_dimension_numbers<[2], [1], [1], [2], [0, 0, 0, 1, 1, 2], [0], [0]>} : vector<1x16x16xbf16>, vector<1x16x32xbf16>, vector<1x16x32xf32> -> vector<1x16x32xf32>
    "tpu.trace_stop"() : () -> ()
    %419 = vector.shape_cast %418 : vector<1x16x32xf32> to vector<16x32xf32>
    %420 = arith.truncf %419 : vector<16x32xf32> to vector<16x32xbf16>
    %421 = vector.extract_strided_slice %401 {offsets = [0, 0], sizes = [32, 128], strides = [1, 1]} : vector<128x128xbf16> to vector<32x128xbf16>
    %cst_161 = arith.constant dense<0.000000e+00> : vector<16x128xf32>
    %422 = tpu.matmul %420, %421, %cst_161 {dimension_numbers = #tpu.dot_dimension_numbers<[1], [0], [0], [1], [0, 0, 1, 1], [], []>} : vector<16x32xbf16>, vector<32x128xbf16>, vector<16x128xf32> -> vector<16x128xf32>
    %423 = arith.addf %402, %422 : vector<16x128xf32>
    %424 = vector.extract_strided_slice %393 {offsets = [0, 0, 32], sizes = [1, 16, 32], strides = [1, 1, 1]} : vector<1x16x128xbf16> to vector<1x16x32xbf16>
    %425 = vector.extract_strided_slice %396 {offsets = [0, 0, 32], sizes = [1, 16, 32], strides = [1, 1, 1]} : vector<1x16x128xbf16> to vector<1x16x32xbf16>
    %426 = vector.extract_strided_slice %399 {offsets = [0, 0, 32], sizes = [1, 16, 32], strides = [1, 1, 1]} : vector<1x16x128xbf16> to vector<1x16x32xbf16>
    "tpu.trace_start"() <{level = 10 : i32, message = "bqd,bkd->bqk"}> : () -> ()
    %cst_162 = arith.constant dense<0.000000e+00> : vector<1x16x16xf32>
    %427 = tpu.matmul %424, %425, %cst_162 {dimension_numbers = #tpu.dot_dimension_numbers<[2], [2], [1], [1], [0, 0, 0, 1, 1, 1], [0], [0]>} : vector<1x16x32xbf16>, vector<1x16x32xbf16>, vector<1x16x16xf32> -> vector<1x16x16xf32>
    "tpu.trace_stop"() : () -> ()
    %cst_163 = arith.constant dense<0xFF800000> : vector<1x16xf32>
    %428 = vector.multi_reduction <maximumf>, %427, %cst_163 [2] : vector<1x16x16xf32> to vector<1x16xf32>
    %429 = vector.shape_cast %428 : vector<1x16xf32> to vector<1x16x1xf32>
    %430 = vector.broadcast %429 : vector<1x16x1xf32> to vector<1x16x16xf32>
    %431 = arith.subf %427, %430 : vector<1x16x16xf32>
    %432 = math.exp %431 : vector<1x16x16xf32>
    %cst_164 = arith.constant dense<0.000000e+00> : vector<1x16xf32>
    %433 = vector.multi_reduction <add>, %432, %cst_164 [2] : vector<1x16x16xf32> to vector<1x16xf32>
    %434 = vector.shape_cast %433 : vector<1x16xf32> to vector<1x16x1xf32>
    %435 = tpu.reciprocal %434 {approx = true} : vector<1x16x1xf32> -> vector<1x16x1xf32>
    %436 = vector.broadcast %435 : vector<1x16x1xf32> to vector<1x16x16xf32>
    %437 = arith.mulf %432, %436 : vector<1x16x16xf32>
    %438 = arith.truncf %437 : vector<1x16x16xf32> to vector<1x16x16xbf16>
    "tpu.trace_start"() <{level = 10 : i32, message = "bqk,bkd->bqd"}> : () -> ()
    %cst_165 = arith.constant dense<0.000000e+00> : vector<1x16x32xf32>
    %439 = tpu.matmul %438, %426, %cst_165 {dimension_numbers = #tpu.dot_dimension_numbers<[2], [1], [1], [2], [0, 0, 0, 1, 1, 2], [0], [0]>} : vector<1x16x16xbf16>, vector<1x16x32xbf16>, vector<1x16x32xf32> -> vector<1x16x32xf32>
    "tpu.trace_stop"() : () -> ()
    %440 = vector.shape_cast %439 : vector<1x16x32xf32> to vector<16x32xf32>
    %441 = arith.truncf %440 : vector<16x32xf32> to vector<16x32xbf16>
    %442 = vector.extract_strided_slice %401 {offsets = [32, 0], sizes = [32, 128], strides = [1, 1]} : vector<128x128xbf16> to vector<32x128xbf16>
    %cst_166 = arith.constant dense<0.000000e+00> : vector<16x128xf32>
    %443 = tpu.matmul %441, %442, %cst_166 {dimension_numbers = #tpu.dot_dimension_numbers<[1], [0], [0], [1], [0, 0, 1, 1], [], []>} : vector<16x32xbf16>, vector<32x128xbf16>, vector<16x128xf32> -> vector<16x128xf32>
    %444 = arith.addf %423, %443 : vector<16x128xf32>
    %445 = vector.extract_strided_slice %393 {offsets = [0, 0, 64], sizes = [1, 16, 32], strides = [1, 1, 1]} : vector<1x16x128xbf16> to vector<1x16x32xbf16>
    %446 = vector.extract_strided_slice %396 {offsets = [0, 0, 64], sizes = [1, 16, 32], strides = [1, 1, 1]} : vector<1x16x128xbf16> to vector<1x16x32xbf16>
    %447 = vector.extract_strided_slice %399 {offsets = [0, 0, 64], sizes = [1, 16, 32], strides = [1, 1, 1]} : vector<1x16x128xbf16> to vector<1x16x32xbf16>
    "tpu.trace_start"() <{level = 10 : i32, message = "bqd,bkd->bqk"}> : () -> ()
    %cst_167 = arith.constant dense<0.000000e+00> : vector<1x16x16xf32>
    %448 = tpu.matmul %445, %446, %cst_167 {dimension_numbers = #tpu.dot_dimension_numbers<[2], [2], [1], [1], [0, 0, 0, 1, 1, 1], [0], [0]>} : vector<1x16x32xbf16>, vector<1x16x32xbf16>, vector<1x16x16xf32> -> vector<1x16x16xf32>
    "tpu.trace_stop"() : () -> ()
    %cst_168 = arith.constant dense<0xFF800000> : vector<1x16xf32>
    %449 = vector.multi_reduction <maximumf>, %448, %cst_168 [2] : vector<1x16x16xf32> to vector<1x16xf32>
    %450 = vector.shape_cast %449 : vector<1x16xf32> to vector<1x16x1xf32>
    %451 = vector.broadcast %450 : vector<1x16x1xf32> to vector<1x16x16xf32>
    %452 = arith.subf %448, %451 : vector<1x16x16xf32>
    %453 = math.exp %452 : vector<1x16x16xf32>
    %cst_169 = arith.constant dense<0.000000e+00> : vector<1x16xf32>
    %454 = vector.multi_reduction <add>, %453, %cst_169 [2] : vector<1x16x16xf32> to vector<1x16xf32>
    %455 = vector.shape_cast %454 : vector<1x16xf32> to vector<1x16x1xf32>
    %456 = tpu.reciprocal %455 {approx = true} : vector<1x16x1xf32> -> vector<1x16x1xf32>
    %457 = vector.broadcast %456 : vector<1x16x1xf32> to vector<1x16x16xf32>
    %458 = arith.mulf %453, %457 : vector<1x16x16xf32>
    %459 = arith.truncf %458 : vector<1x16x16xf32> to vector<1x16x16xbf16>
    "tpu.trace_start"() <{level = 10 : i32, message = "bqk,bkd->bqd"}> : () -> ()
    %cst_170 = arith.constant dense<0.000000e+00> : vector<1x16x32xf32>
    %460 = tpu.matmul %459, %447, %cst_170 {dimension_numbers = #tpu.dot_dimension_numbers<[2], [1], [1], [2], [0, 0, 0, 1, 1, 2], [0], [0]>} : vector<1x16x16xbf16>, vector<1x16x32xbf16>, vector<1x16x32xf32> -> vector<1x16x32xf32>
    "tpu.trace_stop"() : () -> ()
    %461 = vector.shape_cast %460 : vector<1x16x32xf32> to vector<16x32xf32>
    %462 = arith.truncf %461 : vector<16x32xf32> to vector<16x32xbf16>
    %463 = vector.extract_strided_slice %401 {offsets = [64, 0], sizes = [32, 128], strides = [1, 1]} : vector<128x128xbf16> to vector<32x128xbf16>
    %cst_171 = arith.constant dense<0.000000e+00> : vector<16x128xf32>
    %464 = tpu.matmul %462, %463, %cst_171 {dimension_numbers = #tpu.dot_dimension_numbers<[1], [0], [0], [1], [0, 0, 1, 1], [], []>} : vector<16x32xbf16>, vector<32x128xbf16>, vector<16x128xf32> -> vector<16x128xf32>
    %465 = arith.addf %444, %464 : vector<16x128xf32>
    %466 = vector.extract_strided_slice %393 {offsets = [0, 0, 96], sizes = [1, 16, 32], strides = [1, 1, 1]} : vector<1x16x128xbf16> to vector<1x16x32xbf16>
    %467 = vector.extract_strided_slice %396 {offsets = [0, 0, 96], sizes = [1, 16, 32], strides = [1, 1, 1]} : vector<1x16x128xbf16> to vector<1x16x32xbf16>
    %468 = vector.extract_strided_slice %399 {offsets = [0, 0, 96], sizes = [1, 16, 32], strides = [1, 1, 1]} : vector<1x16x128xbf16> to vector<1x16x32xbf16>
    "tpu.trace_start"() <{level = 10 : i32, message = "bqd,bkd->bqk"}> : () -> ()
    %cst_172 = arith.constant dense<0.000000e+00> : vector<1x16x16xf32>
    %469 = tpu.matmul %466, %467, %cst_172 {dimension_numbers = #tpu.dot_dimension_numbers<[2], [2], [1], [1], [0, 0, 0, 1, 1, 1], [0], [0]>} : vector<1x16x32xbf16>, vector<1x16x32xbf16>, vector<1x16x16xf32> -> vector<1x16x16xf32>
    "tpu.trace_stop"() : () -> ()
    %cst_173 = arith.constant dense<0xFF800000> : vector<1x16xf32>
    %470 = vector.multi_reduction <maximumf>, %469, %cst_173 [2] : vector<1x16x16xf32> to vector<1x16xf32>
    %471 = vector.shape_cast %470 : vector<1x16xf32> to vector<1x16x1xf32>
    %472 = vector.broadcast %471 : vector<1x16x1xf32> to vector<1x16x16xf32>
    %473 = arith.subf %469, %472 : vector<1x16x16xf32>
    %474 = math.exp %473 : vector<1x16x16xf32>
    %cst_174 = arith.constant dense<0.000000e+00> : vector<1x16xf32>
    %475 = vector.multi_reduction <add>, %474, %cst_174 [2] : vector<1x16x16xf32> to vector<1x16xf32>
    %476 = vector.shape_cast %475 : vector<1x16xf32> to vector<1x16x1xf32>
    %477 = tpu.reciprocal %476 {approx = true} : vector<1x16x1xf32> -> vector<1x16x1xf32>
    %478 = vector.broadcast %477 : vector<1x16x1xf32> to vector<1x16x16xf32>
    %479 = arith.mulf %474, %478 : vector<1x16x16xf32>
    %480 = arith.truncf %479 : vector<1x16x16xf32> to vector<1x16x16xbf16>
    "tpu.trace_start"() <{level = 10 : i32, message = "bqk,bkd->bqd"}> : () -> ()
    %cst_175 = arith.constant dense<0.000000e+00> : vector<1x16x32xf32>
    %481 = tpu.matmul %480, %468, %cst_175 {dimension_numbers = #tpu.dot_dimension_numbers<[2], [1], [1], [2], [0, 0, 0, 1, 1, 2], [0], [0]>} : vector<1x16x16xbf16>, vector<1x16x32xbf16>, vector<1x16x32xf32> -> vector<1x16x32xf32>
    "tpu.trace_stop"() : () -> ()
    %482 = vector.shape_cast %481 : vector<1x16x32xf32> to vector<16x32xf32>
    %483 = arith.truncf %482 : vector<16x32xf32> to vector<16x32xbf16>
    %484 = vector.extract_strided_slice %401 {offsets = [96, 0], sizes = [32, 128], strides = [1, 1]} : vector<128x128xbf16> to vector<32x128xbf16>
    %cst_176 = arith.constant dense<0.000000e+00> : vector<16x128xf32>
    %485 = tpu.matmul %483, %484, %cst_176 {dimension_numbers = #tpu.dot_dimension_numbers<[1], [0], [0], [1], [0, 0, 1, 1], [], []>} : vector<16x32xbf16>, vector<32x128xbf16>, vector<16x128xf32> -> vector<16x128xf32>
    %486 = arith.addf %465, %485 : vector<16x128xf32>
    %c2_177 = arith.constant 2 : index
    %c0_178 = arith.constant 0 : index
    %c0_179 = arith.constant 0 : index
    %487 = vector.load %arg6[%c2_177, %c0_178, %c0_179] : memref<4x1x128xf32, #tpu.memory_space<vmem>>, vector<1x1x128xf32>
    %488 = vector.shape_cast %487 : vector<1x1x128xf32> to vector<1x128xf32>
    %489 = vector.broadcast %488 : vector<1x128xf32> to vector<16x128xf32>
    %490 = arith.addf %486, %489 : vector<16x128xf32>
    %491 = arith.addf %382, %490 : vector<16x128xf32>
    %c2_180 = arith.constant 2 : index
    %c0_181 = arith.constant 0 : index
    %c0_182 = arith.constant 0 : index
    %492 = vector.load %arg7[%c2_180, %c0_181, %c0_182] : memref<4x1x128xf32, #tpu.memory_space<vmem>>, vector<1x1x128xf32>
    %493 = vector.shape_cast %492 : vector<1x1x128xf32> to vector<1x128xf32>
    %c2_183 = arith.constant 2 : index
    %c0_184 = arith.constant 0 : index
    %c0_185 = arith.constant 0 : index
    %494 = vector.load %arg8[%c2_183, %c0_184, %c0_185] : memref<4x1x128xf32, #tpu.memory_space<vmem>>, vector<1x1x128xf32>
    %495 = vector.shape_cast %494 : vector<1x1x128xf32> to vector<1x128xf32>
    %cst_186 = arith.constant dense<0.000000e+00> : vector<16xf32>
    %496 = vector.multi_reduction <add>, %491, %cst_186 [1] : vector<16x128xf32> to vector<16xf32>
    %497 = vector.shape_cast %496 : vector<16xf32> to vector<16x1xf32>
    %cst_187 = arith.constant 1.280000e+02 : f32
    %498 = vector.broadcast %cst_187 : f32 to vector<16x1xf32>
    %499 = arith.divf %497, %498 : vector<16x1xf32>
    %500 = vector.broadcast %499 : vector<16x1xf32> to vector<16x128xf32>
    %501 = arith.subf %491, %500 : vector<16x128xf32>
    %502 = arith.mulf %501, %501 : vector<16x128xf32>
    %cst_188 = arith.constant dense<0.000000e+00> : vector<16xf32>
    %503 = vector.multi_reduction <add>, %502, %cst_188 [1] : vector<16x128xf32> to vector<16xf32>
    %504 = vector.shape_cast %503 : vector<16xf32> to vector<16x1xf32>
    %cst_189 = arith.constant 1.280000e+02 : f32
    %505 = vector.broadcast %cst_189 : f32 to vector<16x1xf32>
    %506 = arith.divf %504, %505 : vector<16x1xf32>
    %507 = vector.broadcast %499 : vector<16x1xf32> to vector<16x128xf32>
    %508 = arith.subf %491, %507 : vector<16x128xf32>
    %cst_190 = arith.constant 9.99999974E-6 : f32
    %509 = vector.broadcast %cst_190 : f32 to vector<16x1xf32>
    %510 = arith.addf %506, %509 : vector<16x1xf32>
    %511 = math.rsqrt %510 : vector<16x1xf32>
    %512 = vector.broadcast %511 : vector<16x1xf32> to vector<16x128xf32>
    %513 = arith.mulf %508, %512 : vector<16x128xf32>
    %514 = vector.broadcast %493 : vector<1x128xf32> to vector<16x128xf32>
    %515 = arith.mulf %513, %514 : vector<16x128xf32>
    %516 = vector.broadcast %495 : vector<1x128xf32> to vector<16x128xf32>
    %517 = arith.addf %515, %516 : vector<16x128xf32>
    %518 = arith.truncf %517 : vector<16x128xf32> to vector<16x128xbf16>
    %c2_191 = arith.constant 2 : index
    %c0_192 = arith.constant 0 : index
    %c0_193 = arith.constant 0 : index
    %519 = vector.load %arg11[%c2_191, %c0_192, %c0_193] : memref<4x128x256xbf16, #tpu.memory_space<vmem>>, vector<1x128x256xbf16>
    %520 = vector.shape_cast %519 : vector<1x128x256xbf16> to vector<128x256xbf16>
    %cst_194 = arith.constant dense<0.000000e+00> : vector<16x256xf32>
    %521 = tpu.matmul %518, %520, %cst_194 {dimension_numbers = #tpu.dot_dimension_numbers<[1], [0], [0], [1], [0, 0, 1, 1], [], []>} : vector<16x128xbf16>, vector<128x256xbf16>, vector<16x256xf32> -> vector<16x256xf32>
    %c2_195 = arith.constant 2 : index
    %c0_196 = arith.constant 0 : index
    %c0_197 = arith.constant 0 : index
    %522 = vector.load %arg12[%c2_195, %c0_196, %c0_197] : memref<4x1x256xf32, #tpu.memory_space<vmem>>, vector<1x1x256xf32>
    %523 = vector.shape_cast %522 : vector<1x1x256xf32> to vector<1x256xf32>
    %524 = vector.broadcast %523 : vector<1x256xf32> to vector<16x256xf32>
    %525 = arith.addf %521, %524 : vector<16x256xf32>
    %cst_198 = arith.constant 0.000000e+00 : f32
    %526 = vector.broadcast %cst_198 : f32 to vector<16x256xf32>
    %527 = arith.maximumf %525, %526 : vector<16x256xf32>
    %528 = arith.truncf %527 : vector<16x256xf32> to vector<16x256xbf16>
    %c2_199 = arith.constant 2 : index
    %c0_200 = arith.constant 0 : index
    %c0_201 = arith.constant 0 : index
    %529 = vector.load %arg13[%c2_199, %c0_200, %c0_201] : memref<4x256x128xbf16, #tpu.memory_space<vmem>>, vector<1x256x128xbf16>
    %530 = vector.shape_cast %529 : vector<1x256x128xbf16> to vector<256x128xbf16>
    %cst_202 = arith.constant dense<0.000000e+00> : vector<16x128xf32>
    %531 = tpu.matmul %528, %530, %cst_202 {dimension_numbers = #tpu.dot_dimension_numbers<[1], [0], [0], [1], [0, 0, 1, 1], [], []>} : vector<16x256xbf16>, vector<256x128xbf16>, vector<16x128xf32> -> vector<16x128xf32>
    %c2_203 = arith.constant 2 : index
    %c0_204 = arith.constant 0 : index
    %c0_205 = arith.constant 0 : index
    %532 = vector.load %arg14[%c2_203, %c0_204, %c0_205] : memref<4x1x128xf32, #tpu.memory_space<vmem>>, vector<1x1x128xf32>
    %533 = vector.shape_cast %532 : vector<1x1x128xf32> to vector<1x128xf32>
    %534 = vector.broadcast %533 : vector<1x128xf32> to vector<16x128xf32>
    %535 = arith.addf %531, %534 : vector<16x128xf32>
    %536 = arith.addf %517, %535 : vector<16x128xf32>
    %c2_206 = arith.constant 2 : index
    %c0_207 = arith.constant 0 : index
    %c0_208 = arith.constant 0 : index
    %537 = vector.load %arg9[%c2_206, %c0_207, %c0_208] : memref<4x1x128xf32, #tpu.memory_space<vmem>>, vector<1x1x128xf32>
    %538 = vector.shape_cast %537 : vector<1x1x128xf32> to vector<1x128xf32>
    %c2_209 = arith.constant 2 : index
    %c0_210 = arith.constant 0 : index
    %c0_211 = arith.constant 0 : index
    %539 = vector.load %arg10[%c2_209, %c0_210, %c0_211] : memref<4x1x128xf32, #tpu.memory_space<vmem>>, vector<1x1x128xf32>
    %540 = vector.shape_cast %539 : vector<1x1x128xf32> to vector<1x128xf32>
    %cst_212 = arith.constant dense<0.000000e+00> : vector<16xf32>
    %541 = vector.multi_reduction <add>, %536, %cst_212 [1] : vector<16x128xf32> to vector<16xf32>
    %542 = vector.shape_cast %541 : vector<16xf32> to vector<16x1xf32>
    %cst_213 = arith.constant 1.280000e+02 : f32
    %543 = vector.broadcast %cst_213 : f32 to vector<16x1xf32>
    %544 = arith.divf %542, %543 : vector<16x1xf32>
    %545 = vector.broadcast %544 : vector<16x1xf32> to vector<16x128xf32>
    %546 = arith.subf %536, %545 : vector<16x128xf32>
    %547 = arith.mulf %546, %546 : vector<16x128xf32>
    %cst_214 = arith.constant dense<0.000000e+00> : vector<16xf32>
    %548 = vector.multi_reduction <add>, %547, %cst_214 [1] : vector<16x128xf32> to vector<16xf32>
    %549 = vector.shape_cast %548 : vector<16xf32> to vector<16x1xf32>
    %cst_215 = arith.constant 1.280000e+02 : f32
    %550 = vector.broadcast %cst_215 : f32 to vector<16x1xf32>
    %551 = arith.divf %549, %550 : vector<16x1xf32>
    %552 = vector.broadcast %544 : vector<16x1xf32> to vector<16x128xf32>
    %553 = arith.subf %536, %552 : vector<16x128xf32>
    %cst_216 = arith.constant 9.99999974E-6 : f32
    %554 = vector.broadcast %cst_216 : f32 to vector<16x1xf32>
    %555 = arith.addf %551, %554 : vector<16x1xf32>
    %556 = math.rsqrt %555 : vector<16x1xf32>
    %557 = vector.broadcast %556 : vector<16x1xf32> to vector<16x128xf32>
    %558 = arith.mulf %553, %557 : vector<16x128xf32>
    %559 = vector.broadcast %538 : vector<1x128xf32> to vector<16x128xf32>
    %560 = arith.mulf %558, %559 : vector<16x128xf32>
    %561 = vector.broadcast %540 : vector<1x128xf32> to vector<16x128xf32>
    %562 = arith.addf %560, %561 : vector<16x128xf32>
    %563 = arith.negf %562 : vector<16x128xf32>
    %564 = math.exp %563 : vector<16x128xf32>
    %cst_217 = arith.constant 1.000000e+00 : f32
    %565 = vector.broadcast %cst_217 : f32 to vector<16x128xf32>
    %566 = arith.addf %565, %564 : vector<16x128xf32>
    %567 = arith.divf %565, %566 : vector<16x128xf32>
    %c0_218 = arith.constant 0 : index
    %c0_219 = arith.constant 0 : index
    %c0_220 = arith.constant 0 : index
    %568 = vector.load %arg15[%c0_218, %c0_219, %c0_220] : memref<1x16x128xf32, #tpu.memory_space<vmem>>, vector<1x16x128xf32>
    %569 = vector.shape_cast %568 : vector<1x16x128xf32> to vector<16x128xf32>
    %570 = vector.shape_cast %567 : vector<16x128xf32> to vector<1x16x128xf32>
    tpu.vector_store %arg15[%c0_218, %c0_219, %c0_220], %570 {strides = array<i32>} : memref<1x16x128xf32, #tpu.memory_space<vmem>>, vector<1x16x128xf32>,
    %571 = arith.truncf %382 : vector<16x128xf32> to vector<16x128xbf16>
    %c3 = arith.constant 3 : index
    %c0_221 = arith.constant 0 : index
    %c0_222 = arith.constant 0 : index
    %572 = vector.load %arg3[%c3, %c0_221, %c0_222] : memref<4x128x384xbf16, #tpu.memory_space<vmem>>, vector<1x128x384xbf16>
    %573 = vector.shape_cast %572 : vector<1x128x384xbf16> to vector<128x384xbf16>
    %cst_223 = arith.constant dense<0.000000e+00> : vector<16x384xf32>
    %574 = tpu.matmul %571, %573, %cst_223 {dimension_numbers = #tpu.dot_dimension_numbers<[1], [0], [0], [1], [0, 0, 1, 1], [], []>} : vector<16x128xbf16>, vector<128x384xbf16>, vector<16x384xf32> -> vector<16x384xf32>
    %c3_224 = arith.constant 3 : index
    %c0_225 = arith.constant 0 : index
    %c0_226 = arith.constant 0 : index
    %575 = vector.load %arg4[%c3_224, %c0_225, %c0_226] : memref<4x1x384xf32, #tpu.memory_space<vmem>>, vector<1x1x384xf32>
    %576 = vector.shape_cast %575 : vector<1x1x384xf32> to vector<1x384xf32>
    %577 = vector.broadcast %576 : vector<1x384xf32> to vector<16x384xf32>
    %578 = arith.addf %574, %577 : vector<16x384xf32>
    %579 = vector.extract_strided_slice %578 {offsets = [0, 0], sizes = [16, 128], strides = [1, 1]} : vector<16x384xf32> to vector<16x128xf32>
    %580 = vector.shape_cast %579 : vector<16x128xf32> to vector<1x16x128xf32>
    %581 = arith.truncf %580 : vector<1x16x128xf32> to vector<1x16x128xbf16>
    %582 = vector.extract_strided_slice %578 {offsets = [0, 128], sizes = [16, 128], strides = [1, 1]} : vector<16x384xf32> to vector<16x128xf32>
    %583 = vector.shape_cast %582 : vector<16x128xf32> to vector<1x16x128xf32>
    %584 = arith.truncf %583 : vector<1x16x128xf32> to vector<1x16x128xbf16>
    %585 = vector.extract_strided_slice %578 {offsets = [0, 256], sizes = [16, 128], strides = [1, 1]} : vector<16x384xf32> to vector<16x128xf32>
    %586 = vector.shape_cast %585 : vector<16x128xf32> to vector<1x16x128xf32>
    %587 = arith.truncf %586 : vector<1x16x128xf32> to vector<1x16x128xbf16>
    %c3_227 = arith.constant 3 : index
    %c0_228 = arith.constant 0 : index
    %c0_229 = arith.constant 0 : index
    %588 = vector.load %arg5[%c3_227, %c0_228, %c0_229] : memref<4x128x128xbf16, #tpu.memory_space<vmem>>, vector<1x128x128xbf16>
    %589 = vector.shape_cast %588 : vector<1x128x128xbf16> to vector<128x128xbf16>
    %cst_230 = arith.constant 0.000000e+00 : f32
    %590 = vector.broadcast %cst_230 : f32 to vector<16x128xf32>
    %591 = vector.extract_strided_slice %581 {offsets = [0, 0, 0], sizes = [1, 16, 32], strides = [1, 1, 1]} : vector<1x16x128xbf16> to vector<1x16x32xbf16>
    %592 = vector.extract_strided_slice %584 {offsets = [0, 0, 0], sizes = [1, 16, 32], strides = [1, 1, 1]} : vector<1x16x128xbf16> to vector<1x16x32xbf16>
    %593 = vector.extract_strided_slice %587 {offsets = [0, 0, 0], sizes = [1, 16, 32], strides = [1, 1, 1]} : vector<1x16x128xbf16> to vector<1x16x32xbf16>
    "tpu.trace_start"() <{level = 10 : i32, message = "bqd,bkd->bqk"}> : () -> ()
    %cst_231 = arith.constant dense<0.000000e+00> : vector<1x16x16xf32>
    %594 = tpu.matmul %591, %592, %cst_231 {dimension_numbers = #tpu.dot_dimension_numbers<[2], [2], [1], [1], [0, 0, 0, 1, 1, 1], [0], [0]>} : vector<1x16x32xbf16>, vector<1x16x32xbf16>, vector<1x16x16xf32> -> vector<1x16x16xf32>
    "tpu.trace_stop"() : () -> ()
    %cst_232 = arith.constant dense<0xFF800000> : vector<1x16xf32>
    %595 = vector.multi_reduction <maximumf>, %594, %cst_232 [2] : vector<1x16x16xf32> to vector<1x16xf32>
    %596 = vector.shape_cast %595 : vector<1x16xf32> to vector<1x16x1xf32>
    %597 = vector.broadcast %596 : vector<1x16x1xf32> to vector<1x16x16xf32>
    %598 = arith.subf %594, %597 : vector<1x16x16xf32>
    %599 = math.exp %598 : vector<1x16x16xf32>
    %cst_233 = arith.constant dense<0.000000e+00> : vector<1x16xf32>
    %600 = vector.multi_reduction <add>, %599, %cst_233 [2] : vector<1x16x16xf32> to vector<1x16xf32>
    %601 = vector.shape_cast %600 : vector<1x16xf32> to vector<1x16x1xf32>
    %602 = tpu.reciprocal %601 {approx = true} : vector<1x16x1xf32> -> vector<1x16x1xf32>
    %603 = vector.broadcast %602 : vector<1x16x1xf32> to vector<1x16x16xf32>
    %604 = arith.mulf %599, %603 : vector<1x16x16xf32>
    %605 = arith.truncf %604 : vector<1x16x16xf32> to vector<1x16x16xbf16>
    "tpu.trace_start"() <{level = 10 : i32, message = "bqk,bkd->bqd"}> : () -> ()
    %cst_234 = arith.constant dense<0.000000e+00> : vector<1x16x32xf32>
    %606 = tpu.matmul %605, %593, %cst_234 {dimension_numbers = #tpu.dot_dimension_numbers<[2], [1], [1], [2], [0, 0, 0, 1, 1, 2], [0], [0]>} : vector<1x16x16xbf16>, vector<1x16x32xbf16>, vector<1x16x32xf32> -> vector<1x16x32xf32>
    "tpu.trace_stop"() : () -> ()
    %607 = vector.shape_cast %606 : vector<1x16x32xf32> to vector<16x32xf32>
    %608 = arith.truncf %607 : vector<16x32xf32> to vector<16x32xbf16>
    %609 = vector.extract_strided_slice %589 {offsets = [0, 0], sizes = [32, 128], strides = [1, 1]} : vector<128x128xbf16> to vector<32x128xbf16>
    %cst_235 = arith.constant dense<0.000000e+00> : vector<16x128xf32>
    %610 = tpu.matmul %608, %609, %cst_235 {dimension_numbers = #tpu.dot_dimension_numbers<[1], [0], [0], [1], [0, 0, 1, 1], [], []>} : vector<16x32xbf16>, vector<32x128xbf16>, vector<16x128xf32> -> vector<16x128xf32>
    %611 = arith.addf %590, %610 : vector<16x128xf32>
    %612 = vector.extract_strided_slice %581 {offsets = [0, 0, 32], sizes = [1, 16, 32], strides = [1, 1, 1]} : vector<1x16x128xbf16> to vector<1x16x32xbf16>
    %613 = vector.extract_strided_slice %584 {offsets = [0, 0, 32], sizes = [1, 16, 32], strides = [1, 1, 1]} : vector<1x16x128xbf16> to vector<1x16x32xbf16>
    %614 = vector.extract_strided_slice %587 {offsets = [0, 0, 32], sizes = [1, 16, 32], strides = [1, 1, 1]} : vector<1x16x128xbf16> to vector<1x16x32xbf16>
    "tpu.trace_start"() <{level = 10 : i32, message = "bqd,bkd->bqk"}> : () -> ()
    %cst_236 = arith.constant dense<0.000000e+00> : vector<1x16x16xf32>
    %615 = tpu.matmul %612, %613, %cst_236 {dimension_numbers = #tpu.dot_dimension_numbers<[2], [2], [1], [1], [0, 0, 0, 1, 1, 1], [0], [0]>} : vector<1x16x32xbf16>, vector<1x16x32xbf16>, vector<1x16x16xf32> -> vector<1x16x16xf32>
    "tpu.trace_stop"() : () -> ()
    %cst_237 = arith.constant dense<0xFF800000> : vector<1x16xf32>
    %616 = vector.multi_reduction <maximumf>, %615, %cst_237 [2] : vector<1x16x16xf32> to vector<1x16xf32>
    %617 = vector.shape_cast %616 : vector<1x16xf32> to vector<1x16x1xf32>
    %618 = vector.broadcast %617 : vector<1x16x1xf32> to vector<1x16x16xf32>
    %619 = arith.subf %615, %618 : vector<1x16x16xf32>
    %620 = math.exp %619 : vector<1x16x16xf32>
    %cst_238 = arith.constant dense<0.000000e+00> : vector<1x16xf32>
    %621 = vector.multi_reduction <add>, %620, %cst_238 [2] : vector<1x16x16xf32> to vector<1x16xf32>
    %622 = vector.shape_cast %621 : vector<1x16xf32> to vector<1x16x1xf32>
    %623 = tpu.reciprocal %622 {approx = true} : vector<1x16x1xf32> -> vector<1x16x1xf32>
    %624 = vector.broadcast %623 : vector<1x16x1xf32> to vector<1x16x16xf32>
    %625 = arith.mulf %620, %624 : vector<1x16x16xf32>
    %626 = arith.truncf %625 : vector<1x16x16xf32> to vector<1x16x16xbf16>
    "tpu.trace_start"() <{level = 10 : i32, message = "bqk,bkd->bqd"}> : () -> ()
    %cst_239 = arith.constant dense<0.000000e+00> : vector<1x16x32xf32>
    %627 = tpu.matmul %626, %614, %cst_239 {dimension_numbers = #tpu.dot_dimension_numbers<[2], [1], [1], [2], [0, 0, 0, 1, 1, 2], [0], [0]>} : vector<1x16x16xbf16>, vector<1x16x32xbf16>, vector<1x16x32xf32> -> vector<1x16x32xf32>
    "tpu.trace_stop"() : () -> ()
    %628 = vector.shape_cast %627 : vector<1x16x32xf32> to vector<16x32xf32>
    %629 = arith.truncf %628 : vector<16x32xf32> to vector<16x32xbf16>
    %630 = vector.extract_strided_slice %589 {offsets = [32, 0], sizes = [32, 128], strides = [1, 1]} : vector<128x128xbf16> to vector<32x128xbf16>
    %cst_240 = arith.constant dense<0.000000e+00> : vector<16x128xf32>
    %631 = tpu.matmul %629, %630, %cst_240 {dimension_numbers = #tpu.dot_dimension_numbers<[1], [0], [0], [1], [0, 0, 1, 1], [], []>} : vector<16x32xbf16>, vector<32x128xbf16>, vector<16x128xf32> -> vector<16x128xf32>
    %632 = arith.addf %611, %631 : vector<16x128xf32>
    %633 = vector.extract_strided_slice %581 {offsets = [0, 0, 64], sizes = [1, 16, 32], strides = [1, 1, 1]} : vector<1x16x128xbf16> to vector<1x16x32xbf16>
    %634 = vector.extract_strided_slice %584 {offsets = [0, 0, 64], sizes = [1, 16, 32], strides = [1, 1, 1]} : vector<1x16x128xbf16> to vector<1x16x32xbf16>
    %635 = vector.extract_strided_slice %587 {offsets = [0, 0, 64], sizes = [1, 16, 32], strides = [1, 1, 1]} : vector<1x16x128xbf16> to vector<1x16x32xbf16>
    "tpu.trace_start"() <{level = 10 : i32, message = "bqd,bkd->bqk"}> : () -> ()
    %cst_241 = arith.constant dense<0.000000e+00> : vector<1x16x16xf32>
    %636 = tpu.matmul %633, %634, %cst_241 {dimension_numbers = #tpu.dot_dimension_numbers<[2], [2], [1], [1], [0, 0, 0, 1, 1, 1], [0], [0]>} : vector<1x16x32xbf16>, vector<1x16x32xbf16>, vector<1x16x16xf32> -> vector<1x16x16xf32>
    "tpu.trace_stop"() : () -> ()
    %cst_242 = arith.constant dense<0xFF800000> : vector<1x16xf32>
    %637 = vector.multi_reduction <maximumf>, %636, %cst_242 [2] : vector<1x16x16xf32> to vector<1x16xf32>
    %638 = vector.shape_cast %637 : vector<1x16xf32> to vector<1x16x1xf32>
    %639 = vector.broadcast %638 : vector<1x16x1xf32> to vector<1x16x16xf32>
    %640 = arith.subf %636, %639 : vector<1x16x16xf32>
    %641 = math.exp %640 : vector<1x16x16xf32>
    %cst_243 = arith.constant dense<0.000000e+00> : vector<1x16xf32>
    %642 = vector.multi_reduction <add>, %641, %cst_243 [2] : vector<1x16x16xf32> to vector<1x16xf32>
    %643 = vector.shape_cast %642 : vector<1x16xf32> to vector<1x16x1xf32>
    %644 = tpu.reciprocal %643 {approx = true} : vector<1x16x1xf32> -> vector<1x16x1xf32>
    %645 = vector.broadcast %644 : vector<1x16x1xf32> to vector<1x16x16xf32>
    %646 = arith.mulf %641, %645 : vector<1x16x16xf32>
    %647 = arith.truncf %646 : vector<1x16x16xf32> to vector<1x16x16xbf16>
    "tpu.trace_start"() <{level = 10 : i32, message = "bqk,bkd->bqd"}> : () -> ()
    %cst_244 = arith.constant dense<0.000000e+00> : vector<1x16x32xf32>
    %648 = tpu.matmul %647, %635, %cst_244 {dimension_numbers = #tpu.dot_dimension_numbers<[2], [1], [1], [2], [0, 0, 0, 1, 1, 2], [0], [0]>} : vector<1x16x16xbf16>, vector<1x16x32xbf16>, vector<1x16x32xf32> -> vector<1x16x32xf32>
    "tpu.trace_stop"() : () -> ()
    %649 = vector.shape_cast %648 : vector<1x16x32xf32> to vector<16x32xf32>
    %650 = arith.truncf %649 : vector<16x32xf32> to vector<16x32xbf16>
    %651 = vector.extract_strided_slice %589 {offsets = [64, 0], sizes = [32, 128], strides = [1, 1]} : vector<128x128xbf16> to vector<32x128xbf16>
    %cst_245 = arith.constant dense<0.000000e+00> : vector<16x128xf32>
    %652 = tpu.matmul %650, %651, %cst_245 {dimension_numbers = #tpu.dot_dimension_numbers<[1], [0], [0], [1], [0, 0, 1, 1], [], []>} : vector<16x32xbf16>, vector<32x128xbf16>, vector<16x128xf32> -> vector<16x128xf32>
    %653 = arith.addf %632, %652 : vector<16x128xf32>
    %654 = vector.extract_strided_slice %581 {offsets = [0, 0, 96], sizes = [1, 16, 32], strides = [1, 1, 1]} : vector<1x16x128xbf16> to vector<1x16x32xbf16>
    %655 = vector.extract_strided_slice %584 {offsets = [0, 0, 96], sizes = [1, 16, 32], strides = [1, 1, 1]} : vector<1x16x128xbf16> to vector<1x16x32xbf16>
    %656 = vector.extract_strided_slice %587 {offsets = [0, 0, 96], sizes = [1, 16, 32], strides = [1, 1, 1]} : vector<1x16x128xbf16> to vector<1x16x32xbf16>
    "tpu.trace_start"() <{level = 10 : i32, message = "bqd,bkd->bqk"}> : () -> ()
    %cst_246 = arith.constant dense<0.000000e+00> : vector<1x16x16xf32>
    %657 = tpu.matmul %654, %655, %cst_246 {dimension_numbers = #tpu.dot_dimension_numbers<[2], [2], [1], [1], [0, 0, 0, 1, 1, 1], [0], [0]>} : vector<1x16x32xbf16>, vector<1x16x32xbf16>, vector<1x16x16xf32> -> vector<1x16x16xf32>
    "tpu.trace_stop"() : () -> ()
    %cst_247 = arith.constant dense<0xFF800000> : vector<1x16xf32>
    %658 = vector.multi_reduction <maximumf>, %657, %cst_247 [2] : vector<1x16x16xf32> to vector<1x16xf32>
    %659 = vector.shape_cast %658 : vector<1x16xf32> to vector<1x16x1xf32>
    %660 = vector.broadcast %659 : vector<1x16x1xf32> to vector<1x16x16xf32>
    %661 = arith.subf %657, %660 : vector<1x16x16xf32>
    %662 = math.exp %661 : vector<1x16x16xf32>
    %cst_248 = arith.constant dense<0.000000e+00> : vector<1x16xf32>
    %663 = vector.multi_reduction <add>, %662, %cst_248 [2] : vector<1x16x16xf32> to vector<1x16xf32>
    %664 = vector.shape_cast %663 : vector<1x16xf32> to vector<1x16x1xf32>
    %665 = tpu.reciprocal %664 {approx = true} : vector<1x16x1xf32> -> vector<1x16x1xf32>
    %666 = vector.broadcast %665 : vector<1x16x1xf32> to vector<1x16x16xf32>
    %667 = arith.mulf %662, %666 : vector<1x16x16xf32>
    %668 = arith.truncf %667 : vector<1x16x16xf32> to vector<1x16x16xbf16>
    "tpu.trace_start"() <{level = 10 : i32, message = "bqk,bkd->bqd"}> : () -> ()
    %cst_249 = arith.constant dense<0.000000e+00> : vector<1x16x32xf32>
    %669 = tpu.matmul %668, %656, %cst_249 {dimension_numbers = #tpu.dot_dimension_numbers<[2], [1], [1], [2], [0, 0, 0, 1, 1, 2], [0], [0]>} : vector<1x16x16xbf16>, vector<1x16x32xbf16>, vector<1x16x32xf32> -> vector<1x16x32xf32>
    "tpu.trace_stop"() : () -> ()
    %670 = vector.shape_cast %669 : vector<1x16x32xf32> to vector<16x32xf32>
    %671 = arith.truncf %670 : vector<16x32xf32> to vector<16x32xbf16>
    %672 = vector.extract_strided_slice %589 {offsets = [96, 0], sizes = [32, 128], strides = [1, 1]} : vector<128x128xbf16> to vector<32x128xbf16>
    %cst_250 = arith.constant dense<0.000000e+00> : vector<16x128xf32>
    %673 = tpu.matmul %671, %672, %cst_250 {dimension_numbers = #tpu.dot_dimension_numbers<[1], [0], [0], [1], [0, 0, 1, 1], [], []>} : vector<16x32xbf16>, vector<32x128xbf16>, vector<16x128xf32> -> vector<16x128xf32>
    %674 = arith.addf %653, %673 : vector<16x128xf32>
    %c3_251 = arith.constant 3 : index
    %c0_252 = arith.constant 0 : index
    %c0_253 = arith.constant 0 : index
    %675 = vector.load %arg6[%c3_251, %c0_252, %c0_253] : memref<4x1x128xf32, #tpu.memory_space<vmem>>, vector<1x1x128xf32>
    %676 = vector.shape_cast %675 : vector<1x1x128xf32> to vector<1x128xf32>
    %677 = vector.broadcast %676 : vector<1x128xf32> to vector<16x128xf32>
    %678 = arith.addf %674, %677 : vector<16x128xf32>
    %679 = arith.addf %382, %678 : vector<16x128xf32>
    %c3_254 = arith.constant 3 : index
    %c0_255 = arith.constant 0 : index
    %c0_256 = arith.constant 0 : index
    %680 = vector.load %arg7[%c3_254, %c0_255, %c0_256] : memref<4x1x128xf32, #tpu.memory_space<vmem>>, vector<1x1x128xf32>
    %681 = vector.shape_cast %680 : vector<1x1x128xf32> to vector<1x128xf32>
    %c3_257 = arith.constant 3 : index
    %c0_258 = arith.constant 0 : index
    %c0_259 = arith.constant 0 : index
    %682 = vector.load %arg8[%c3_257, %c0_258, %c0_259] : memref<4x1x128xf32, #tpu.memory_space<vmem>>, vector<1x1x128xf32>
    %683 = vector.shape_cast %682 : vector<1x1x128xf32> to vector<1x128xf32>
    %cst_260 = arith.constant dense<0.000000e+00> : vector<16xf32>
    %684 = vector.multi_reduction <add>, %679, %cst_260 [1] : vector<16x128xf32> to vector<16xf32>
    %685 = vector.shape_cast %684 : vector<16xf32> to vector<16x1xf32>
    %cst_261 = arith.constant 1.280000e+02 : f32
    %686 = vector.broadcast %cst_261 : f32 to vector<16x1xf32>
    %687 = arith.divf %685, %686 : vector<16x1xf32>
    %688 = vector.broadcast %687 : vector<16x1xf32> to vector<16x128xf32>
    %689 = arith.subf %679, %688 : vector<16x128xf32>
    %690 = arith.mulf %689, %689 : vector<16x128xf32>
    %cst_262 = arith.constant dense<0.000000e+00> : vector<16xf32>
    %691 = vector.multi_reduction <add>, %690, %cst_262 [1] : vector<16x128xf32> to vector<16xf32>
    %692 = vector.shape_cast %691 : vector<16xf32> to vector<16x1xf32>
    %cst_263 = arith.constant 1.280000e+02 : f32
    %693 = vector.broadcast %cst_263 : f32 to vector<16x1xf32>
    %694 = arith.divf %692, %693 : vector<16x1xf32>
    %695 = vector.broadcast %687 : vector<16x1xf32> to vector<16x128xf32>
    %696 = arith.subf %679, %695 : vector<16x128xf32>
    %cst_264 = arith.constant 9.99999974E-6 : f32
    %697 = vector.broadcast %cst_264 : f32 to vector<16x1xf32>
    %698 = arith.addf %694, %697 : vector<16x1xf32>
    %699 = math.rsqrt %698 : vector<16x1xf32>
    %700 = vector.broadcast %699 : vector<16x1xf32> to vector<16x128xf32>
    %701 = arith.mulf %696, %700 : vector<16x128xf32>
    %702 = vector.broadcast %681 : vector<1x128xf32> to vector<16x128xf32>
    %703 = arith.mulf %701, %702 : vector<16x128xf32>
    %704 = vector.broadcast %683 : vector<1x128xf32> to vector<16x128xf32>
    %705 = arith.addf %703, %704 : vector<16x128xf32>
    %706 = arith.truncf %705 : vector<16x128xf32> to vector<16x128xbf16>
    %c3_265 = arith.constant 3 : index
    %c0_266 = arith.constant 0 : index
    %c0_267 = arith.constant 0 : index
    %707 = vector.load %arg11[%c3_265, %c0_266, %c0_267] : memref<4x128x256xbf16, #tpu.memory_space<vmem>>, vector<1x128x256xbf16>
    %708 = vector.shape_cast %707 : vector<1x128x256xbf16> to vector<128x256xbf16>
    %cst_268 = arith.constant dense<0.000000e+00> : vector<16x256xf32>
    %709 = tpu.matmul %706, %708, %cst_268 {dimension_numbers = #tpu.dot_dimension_numbers<[1], [0], [0], [1], [0, 0, 1, 1], [], []>} : vector<16x128xbf16>, vector<128x256xbf16>, vector<16x256xf32> -> vector<16x256xf32>
    %c3_269 = arith.constant 3 : index
    %c0_270 = arith.constant 0 : index
    %c0_271 = arith.constant 0 : index
    %710 = vector.load %arg12[%c3_269, %c0_270, %c0_271] : memref<4x1x256xf32, #tpu.memory_space<vmem>>, vector<1x1x256xf32>
    %711 = vector.shape_cast %710 : vector<1x1x256xf32> to vector<1x256xf32>
    %712 = vector.broadcast %711 : vector<1x256xf32> to vector<16x256xf32>
    %713 = arith.addf %709, %712 : vector<16x256xf32>
    %cst_272 = arith.constant 0.000000e+00 : f32
    %714 = vector.broadcast %cst_272 : f32 to vector<16x256xf32>
    %715 = arith.maximumf %713, %714 : vector<16x256xf32>
    %716 = arith.truncf %715 : vector<16x256xf32> to vector<16x256xbf16>
    %c3_273 = arith.constant 3 : index
    %c0_274 = arith.constant 0 : index
    %c0_275 = arith.constant 0 : index
    %717 = vector.load %arg13[%c3_273, %c0_274, %c0_275] : memref<4x256x128xbf16, #tpu.memory_space<vmem>>, vector<1x256x128xbf16>
    %718 = vector.shape_cast %717 : vector<1x256x128xbf16> to vector<256x128xbf16>
    %cst_276 = arith.constant dense<0.000000e+00> : vector<16x128xf32>
    %719 = tpu.matmul %716, %718, %cst_276 {dimension_numbers = #tpu.dot_dimension_numbers<[1], [0], [0], [1], [0, 0, 1, 1], [], []>} : vector<16x256xbf16>, vector<256x128xbf16>, vector<16x128xf32> -> vector<16x128xf32>
    %c3_277 = arith.constant 3 : index
    %c0_278 = arith.constant 0 : index
    %c0_279 = arith.constant 0 : index
    %720 = vector.load %arg14[%c3_277, %c0_278, %c0_279] : memref<4x1x128xf32, #tpu.memory_space<vmem>>, vector<1x1x128xf32>
    %721 = vector.shape_cast %720 : vector<1x1x128xf32> to vector<1x128xf32>
    %722 = vector.broadcast %721 : vector<1x128xf32> to vector<16x128xf32>
    %723 = arith.addf %719, %722 : vector<16x128xf32>
    %724 = arith.addf %705, %723 : vector<16x128xf32>
    %c3_280 = arith.constant 3 : index
    %c0_281 = arith.constant 0 : index
    %c0_282 = arith.constant 0 : index
    %725 = vector.load %arg9[%c3_280, %c0_281, %c0_282] : memref<4x1x128xf32, #tpu.memory_space<vmem>>, vector<1x1x128xf32>
    %726 = vector.shape_cast %725 : vector<1x1x128xf32> to vector<1x128xf32>
    %c3_283 = arith.constant 3 : index
    %c0_284 = arith.constant 0 : index
    %c0_285 = arith.constant 0 : index
    %727 = vector.load %arg10[%c3_283, %c0_284, %c0_285] : memref<4x1x128xf32, #tpu.memory_space<vmem>>, vector<1x1x128xf32>
    %728 = vector.shape_cast %727 : vector<1x1x128xf32> to vector<1x128xf32>
    %cst_286 = arith.constant dense<0.000000e+00> : vector<16xf32>
    %729 = vector.multi_reduction <add>, %724, %cst_286 [1] : vector<16x128xf32> to vector<16xf32>
    %730 = vector.shape_cast %729 : vector<16xf32> to vector<16x1xf32>
    %cst_287 = arith.constant 1.280000e+02 : f32
    %731 = vector.broadcast %cst_287 : f32 to vector<16x1xf32>
    %732 = arith.divf %730, %731 : vector<16x1xf32>
    %733 = vector.broadcast %732 : vector<16x1xf32> to vector<16x128xf32>
    %734 = arith.subf %724, %733 : vector<16x128xf32>
    %735 = arith.mulf %734, %734 : vector<16x128xf32>
    %cst_288 = arith.constant dense<0.000000e+00> : vector<16xf32>
    %736 = vector.multi_reduction <add>, %735, %cst_288 [1] : vector<16x128xf32> to vector<16xf32>
    %737 = vector.shape_cast %736 : vector<16xf32> to vector<16x1xf32>
    %cst_289 = arith.constant 1.280000e+02 : f32
    %738 = vector.broadcast %cst_289 : f32 to vector<16x1xf32>
    %739 = arith.divf %737, %738 : vector<16x1xf32>
    %740 = vector.broadcast %732 : vector<16x1xf32> to vector<16x128xf32>
    %741 = arith.subf %724, %740 : vector<16x128xf32>
    %cst_290 = arith.constant 9.99999974E-6 : f32
    %742 = vector.broadcast %cst_290 : f32 to vector<16x1xf32>
    %743 = arith.addf %739, %742 : vector<16x1xf32>
    %744 = math.rsqrt %743 : vector<16x1xf32>
    %745 = vector.broadcast %744 : vector<16x1xf32> to vector<16x128xf32>
    %746 = arith.mulf %741, %745 : vector<16x128xf32>
    %747 = vector.broadcast %726 : vector<1x128xf32> to vector<16x128xf32>
    %748 = arith.mulf %746, %747 : vector<16x128xf32>
    %749 = vector.broadcast %728 : vector<1x128xf32> to vector<16x128xf32>
    %750 = arith.addf %748, %749 : vector<16x128xf32>
    %751 = arith.negf %750 : vector<16x128xf32>
    %752 = math.exp %751 : vector<16x128xf32>
    %cst_291 = arith.constant 1.000000e+00 : f32
    %753 = vector.broadcast %cst_291 : f32 to vector<16x128xf32>
    %754 = arith.addf %753, %752 : vector<16x128xf32>
    %755 = arith.divf %753, %754 : vector<16x128xf32>
    %c0_292 = arith.constant 0 : index
    %c0_293 = arith.constant 0 : index
    %c0_294 = arith.constant 0 : index
    %756 = vector.load %arg16[%c0_292, %c0_293, %c0_294] : memref<1x16x128xf32, #tpu.memory_space<vmem>>, vector<1x16x128xf32>
    %757 = vector.shape_cast %756 : vector<1x16x128xf32> to vector<16x128xf32>
    %758 = vector.shape_cast %755 : vector<16x128xf32> to vector<1x16x128xf32>
    tpu.vector_store %arg16[%c0_292, %c0_293, %c0_294], %758 {strides = array<i32>} : memref<1x16x128xf32, #tpu.memory_space<vmem>>, vector<1x16x128xf32>,
    return
  }
  func.func @transform_0(%arg0: i32) -> (i32, i32, i32, i32) {
    %c0_i32 = arith.constant 0 : i32
    %c0_i32_0 = arith.constant 0 : i32
    %c0_i32_1 = arith.constant 0 : i32
    %c0_i32_2 = arith.constant 0 : i32
    return %arg0, %c0_i32, %c0_i32_0, %c0_i32_1 : i32, i32, i32, i32
  }
  func.func @transform_1(%arg0: i32) -> i32 {
    %c0_i32 = arith.constant 0 : i32
    %c0_i32_0 = arith.constant 0 : i32
    return %c0_i32 : i32
  }
  func.func @transform_2(%arg0: i32) -> (i32, i32, i32) {
    %c0_i32 = arith.constant 0 : i32
    %c0_i32_0 = arith.constant 0 : i32
    %c0_i32_1 = arith.constant 0 : i32
    %c0_i32_2 = arith.constant 0 : i32
    return %c0_i32, %c0_i32_0, %c0_i32_1 : i32, i32, i32
  }
  func.func @transform_3(%arg0: i32) -> (i32, i32, i32) {
    %c0_i32 = arith.constant 0 : i32
    %c0_i32_0 = arith.constant 0 : i32
    %c0_i32_1 = arith.constant 0 : i32
    %c0_i32_2 = arith.constant 0 : i32
    return %c0_i32, %c0_i32_0, %c0_i32_1 : i32, i32, i32
  }
  func.func @transform_4(%arg0: i32) -> (i32, i32, i32) {
    %c0_i32 = arith.constant 0 : i32
    %c0_i32_0 = arith.constant 0 : i32
    %c0_i32_1 = arith.constant 0 : i32
    %c0_i32_2 = arith.constant 0 : i32
    return %c0_i32, %c0_i32_0, %c0_i32_1 : i32, i32, i32
  }
  func.func @transform_5(%arg0: i32) -> (i32, i32, i32) {
    %c0_i32 = arith.constant 0 : i32
    %c0_i32_0 = arith.constant 0 : i32
    %c0_i32_1 = arith.constant 0 : i32
    %c0_i32_2 = arith.constant 0 : i32
    return %c0_i32, %c0_i32_0, %c0_i32_1 : i32, i32, i32
  }
  func.func @transform_6(%arg0: i32) -> (i32, i32, i32) {
    %c0_i32 = arith.constant 0 : i32
    %c0_i32_0 = arith.constant 0 : i32
    %c0_i32_1 = arith.constant 0 : i32
    %c0_i32_2 = arith.constant 0 : i32
    return %c0_i32, %c0_i32_0, %c0_i32_1 : i32, i32, i32
  }
  func.func @transform_7(%arg0: i32) -> (i32, i32, i32) {
    %c0_i32 = arith.constant 0 : i32
    %c0_i32_0 = arith.constant 0 : i32
    %c0_i32_1 = arith.constant 0 : i32
    %c0_i32_2 = arith.constant 0 : i32
    return %c0_i32, %c0_i32_0, %c0_i32_1 : i32, i32, i32
  }
  func.func @transform_8(%arg0: i32) -> (i32, i32, i32) {
    %c0_i32 = arith.constant 0 : i32
    %c0_i32_0 = arith.constant 0 : i32
    %c0_i32_1 = arith.constant 0 : i32
    %c0_i32_2 = arith.constant 0 : i32
    return %c0_i32, %c0_i32_0, %c0_i32_1 : i32, i32, i32
  }
  func.func @transform_9(%arg0: i32) -> (i32, i32, i32) {
    %c0_i32 = arith.constant 0 : i32
    %c0_i32_0 = arith.constant 0 : i32
    %c0_i32_1 = arith.constant 0 : i32
    %c0_i32_2 = arith.constant 0 : i32
    return %c0_i32, %c0_i32_0, %c0_i32_1 : i32, i32, i32
  }
  func.func @transform_10(%arg0: i32) -> (i32, i32, i32) {
    %c0_i32 = arith.constant 0 : i32
    %c0_i32_0 = arith.constant 0 : i32
    %c0_i32_1 = arith.constant 0 : i32
    %c0_i32_2 = arith.constant 0 : i32
    return %c0_i32, %c0_i32_0, %c0_i32_1 : i32, i32, i32
  }
  func.func @transform_11(%arg0: i32) -> (i32, i32, i32) {
    %c0_i32 = arith.constant 0 : i32
    %c0_i32_0 = arith.constant 0 : i32
    %c0_i32_1 = arith.constant 0 : i32
    %c0_i32_2 = arith.constant 0 : i32
    return %c0_i32, %c0_i32_0, %c0_i32_1 : i32, i32, i32
  }
  func.func @transform_12(%arg0: i32) -> (i32, i32, i32) {
    %c0_i32 = arith.constant 0 : i32
    %c0_i32_0 = arith.constant 0 : i32
    %c0_i32_1 = arith.constant 0 : i32
    %c0_i32_2 = arith.constant 0 : i32
    return %c0_i32, %c0_i32_0, %c0_i32_1 : i32, i32, i32
  }
  func.func @transform_13(%arg0: i32) -> (i32, i32, i32) {
    %c0_i32 = arith.constant 0 : i32
    %c0_i32_0 = arith.constant 0 : i32
    %c0_i32_1 = arith.constant 0 : i32
    %c0_i32_2 = arith.constant 0 : i32
    return %c0_i32, %c0_i32_0, %c0_i32_1 : i32, i32, i32
  }
  func.func @transform_14(%arg0: i32) -> (i32, i32, i32) {
    %c0_i32 = arith.constant 0 : i32
    %c0_i32_0 = arith.constant 0 : i32
    %c0_i32_1 = arith.constant 0 : i32
    return %arg0, %c0_i32, %c0_i32_0 : i32, i32, i32
  }
  func.func @transform_15(%arg0: i32) -> (i32, i32, i32) {
    %c0_i32 = arith.constant 0 : i32
    %c0_i32_0 = arith.constant 0 : i32
    %c0_i32_1 = arith.constant 0 : i32
    return %arg0, %c0_i32, %c0_i32_0 : i32, i32, i32
  }
}

</mosaic_0001>

<bundles_post_ra>
// kernel: vit_object_detection_network2.1
= control target key start
LH: loop header
LB: loop body
LE: loop exit
PB: predicated region body
PF: predicated region fallthrough
CT: control target
= control target key end

     0   :  { %s11795_s0 = inlined_call_operand.hbm [shape: f32[2,3,16,128], index: 0, kind: input, shape index: {}]   ;;  %s11796_s1 = inlined_call_operand.hbm [shape: f32[3], index: 1, kind: input, shape index: {}]   ;;  %s11797_s2 = inlined_call_operand.hbm [shape: bf16[4,128,384], index: 2, kind: input, shape index: {}]   ;;  %s11798_s3 = inlined_call_operand.hbm [shape: f32[4,1,384], index: 3, kind: input, shape index: {}]   ;;  %s11799_s4 = inlined_call_operand.hbm [shape: bf16[4,128,128], index: 4, kind: input, shape index: {}]   ;;  %s11800_s5 = inlined_call_operand.vmem [shape: f32[4,1,128], index: 5, kind: input, shape index: {}]   ;;  %s11801_s6 = inlined_call_operand.vmem [shape: f32[4,1,128], index: 6, kind: input, shape index: {}]   ;;  %s11802_s7 = inlined_call_operand.hbm [shape: f32[4,1,128], index: 7, kind: input, shape index: {}]   ;;  %s11803_s8 = inlined_call_operand.vmem [shape: f32[4,1,128], index: 8, kind: input, shape index: {}]   ;;  %s11804_s9 = inlined_call_operand.hbm [shape: f32[4,1,128], index: 9, kind: input, shape index: {}]   ;;  %s11805_s10 = inlined_call_operand.hbm [shape: bf16[4,128,256], index: 10, kind: input, shape index: {}]   ;;  %s11806_s11 = inlined_call_operand.hbm [shape: f32[4,1,256], index: 11, kind: input, shape index: {}]   ;;  %s11807_s12 = inlined_call_operand.hbm [shape: bf16[4,256,128], index: 12, kind: input, shape index: {}]   ;;  %s11808_s13 = inlined_call_operand.hbm [shape: f32[4,1,128], index: 13, kind: input, shape index: {}]   ;;  %s11809_s14 = inlined_call_operand.hbm [shape: f32[2,16,128], index: 14, kind: output, shape index: {0}]   ;;  %s11810_s15 = inlined_call_operand.hbm [shape: f32[2,16,128], index: 15, kind: output, shape index: {1}]  }
   0x1   :  { %11829 = sst [smem:[#allocation33_spill]] %s11796_s1 }
   0x2   :  { %11830 = sst [smem:[#allocation34_spill]] %s11797_s2 }
   0x3   :  { %11831 = sst [smem:[#allocation35_spill]] %s11798_s3 }
   0x4   :  { %11832 = sst [smem:[#allocation36_spill]] %s11799_s4 }
   0x5   :  { %11833 = sst [smem:[#allocation37_spill]] %s11802_s7 }
   0x6   :  { %11834 = sst [smem:[#allocation38_spill]] %s11803_s8 }
   0x7   :  { %11835 = sst [smem:[#allocation39_spill]] %s11804_s9 }
   0x8   :  { %11836 = sst [smem:[#allocation40_spill]] %s11809_s14 }
   0x9   :  { %11837 = sst [smem:[#allocation41_spill]] %s11810_s15 }
   0xa   :  { %21 = vsyncpa [#allocation3], 0 }
   0xb   :  { %23 = vsyncpa [#allocation3 + $0x1], 0 }
   0xc   :  { %24 = vsyncpa [#allocation5], 0 }
   0xd   :  { %25 = vsyncpa [#allocation8], 0 }
   0xe   :  { %26 = vsyncpa [#allocation11], 0 }
   0xf   :  { %27 = vsyncpa [#allocation14], 0 }
  0x10   :  { %28 = vsyncpa [#allocation17], 0 }
  0x11   :  { %29 = vsyncpa [#allocation20], 0 }
  0x12   :  { %30 = vsyncpa [#allocation4], 0 }
  0x13   :  { %32 = vsyncpa [#allocation4 + $0x1], 0 }
  0x14   :  { %33 = vsyncpa [#allocation23], 0 }
  0x15   :  { %35 = vsyncpa [#allocation23 + $0x1], 0  ;;  %s10443_s18 = smov 0   ;;  %s10445_s19 = smov 0  }
  0x16   :  { %s10447_s20 = smov 0   ;;  %s10449_s21 = smov 0  }
  0x17 LB: > { %s10330_s22 = smov [#allocation7]   ;;  %s10464_s24 = sadd.s32 4294967295, %s10328_s21   ;;  %s10328_s21 = sphi %s10449_s21, %s11884_s21   ;;  %s10324_s20 = sphi %s10447_s20, %s11883_s20   ;;  %s10320_s19 = sphi %s10445_s19, %s11882_s19   ;;  %s10316_s18 = sphi %s10443_s18, %s11881_s18  }
  0x18   : > { %s418_s23 = sshll.u32 %s10330_s22, 4  ;;  %p7951_p0 = scmp.ge.s32.totalorder %s10328_s21, 1  ;;  %s419_s23 = int_to_ptr.vmem [resolvable:$true] %s418_s23 }
  0x19   : > { %p11812_p1 = scmp.eq.s32.totalorder %s10464_s24, 0  ;;  %p397_p2 = scmp.lt.s32.totalorder %s10328_s21, 3 }
  0x1a   : > { %s10331_s26 = smov [#allocation10]   ;;  %s9948_s30 = scalar_lea.vmem %s419_s23, 12288 }
  0x1b   : > { %p10469_p3 = pnand %p7951_p0, %p397_p2  ;;  %s444_s27 = sshll.u32 %s10331_s26, 4  ;;  %s445_s27 = int_to_ptr.vmem [resolvable:$true] %s444_s27 }
  0x1c   : > { %p9949_p8 = scmp.ne.s32.totalorder %s419_s23, %s9948_s30  ;;  %p9956_p11 = scmp.lt.s32.totalorder %s419_s23, %s419_s23 }
  0x1d   : > { %s11838_s25 = scalar_select %p10469_p3, 1, 0 }
  0x1e   : > { %p9229_p5 = pneg %p10469_p3  ;;  %p9957_p12 = scmp.lt.s32.totalorder %s9948_s30, %s9948_s30 }
  0x20   : > { %p10478_p6 = pnand %p9229_p5, %p11812_p1  ;;  %p9958_p13 = por %p9957_p12, %p9956_p11 }
  0x22   : > { %p10484_p7 = pneg %p10478_p6 }
  0x24   : > { %p9951_p9 = pnand %p9949_p8, %p10484_p7 }
  0x26   : > { %p9952_p10 = pneg %p9951_p9 }
  0x28   : > { %p9959_p0 = pnand %p9958_p13, %p9952_p10 }
  0x2a   : > { %9962 = shalt.err (!%p9959_p0)
}
  0x2b   : > { %s10332_s16 = smov 192   ;;  %s10333_s17 = smov 12  }
  0x2c   : > { %s11841_s2 = sld [smem:[#allocation34_spill]]  ;;  %s9974_s15 = scalar_lea.vmem %s445_s27, 4096 }
  0x2d   : > { %p9975_p2 = scmp.ne.s32.totalorder %s445_s27, %s9974_s15  ;;  %p9982_p9 = scmp.lt.s32.totalorder %s445_s27, %s445_s27 }
  0x2e   : > { %p9983_p4 = scmp.lt.s32.totalorder %s9974_s15, %s9974_s15 }
  0x2f   : > { %p9977_p5 = pnand %p9975_p2, %p10484_p7 }
  0x30   : > { %p9984_p1 = por %p9983_p4, %p9982_p9 }
  0x31   : > { %p9978_p8 = pneg %p9977_p5 }
  0x32   : > { %9235 = dma.hbm_to_vmem [thread:$0]  (!%p10478_p6), %s11841_s2, 12288, %s419_s23, [#allocation8], %s10332_s16, %s10332_s16, %s10333_s17  }
  0x33   : > { %p9985_p11 = pnand %p9984_p1, %p9978_p8 }
  0x35   : > { %9988 = shalt.err (!%p9985_p11)
}
  0x36   : > { %s11815_s30 = smov 64   ;;  %s11816_s14 = smov 4  }
  0x37   : > { %s11842_s4 = sld [smem:[#allocation36_spill]]  ;;  %s10336_s16 = smov [#allocation13]  }
  0x38   : > { %s479_s17 = sshll.u32 %s10336_s16, 4  ;;  %s10337_s26 = smov [#allocation16]   ;;  %s480_s17 = int_to_ptr.vmem [resolvable:$true] %s479_s17 }
  0x39   : > { %s505_s2 = sshll.u32 %s10337_s26, 4  ;;  %s10000_s15 = scalar_lea.vmem %s480_s17, 64  ;;  %s506_s2 = int_to_ptr.vmem [resolvable:$true] %s505_s2 }
  0x3a   : > { %p10001_p1 = scmp.ne.s32.totalorder %s480_s17, %s10000_s15  ;;  %p10008_p12 = scmp.lt.s32.totalorder %s480_s17, %s480_s17 }
  0x3b   : > { %p10009_p13 = scmp.lt.s32.totalorder %s10000_s15, %s10000_s15 }
  0x3c   : > { %p10003_p4 = pnand %p10001_p1, %p10484_p7 }
  0x3d   : > { %9241 = dma.hbm_to_vmem [thread:$0]  (!%p10478_p6), %s11842_s4, 4096, %s445_s27, [#allocation11], %s11815_s30, %s11815_s30, %s11816_s14  }
  0x3e   : > { %p10004_p10 = pneg %p10003_p4  ;;  %p10010_p0 = por %p10009_p13, %p10008_p12 }
  0x40   : > { %p10011_p2 = pnand %p10010_p0, %p10004_p10 }
  0x42   : > { %10014 = shalt.err (!%p10011_p2)
}
  0x43   : > { %s11817_s8 = smov 16   ;;  %s11819_s27 = smov 1  }
  0x44   : > { %s11843_s9 = sld [smem:[#allocation39_spill]]  ;;  %s10026_s16 = scalar_lea.vmem %s506_s2, 128 }
  0x45   : > { %p10027_p5 = scmp.ne.s32.totalorder %s506_s2, %s10026_s16  ;;  %p10034_p11 = scmp.lt.s32.totalorder %s506_s2, %s506_s2 }
  0x46   : > { %p10035_p1 = scmp.lt.s32.totalorder %s10026_s16, %s10026_s16 }
  0x47   : > { %p10029_p8 = pnand %p10027_p5, %p10484_p7 }
  0x48   : > { %p10036_p4 = por %p10035_p1, %p10034_p11 }
  0x49   : > { %p10030_p9 = pneg %p10029_p8 }
  0x4a   : > { %9247 = dma.hbm_to_vmem [thread:$0]  (!%p10478_p6), %s11843_s9, 64, %s480_s17, [#allocation14], %s11817_s8, %s11817_s8, %s11819_s27  }
  0x4b   : > { %p10037_p10 = pnand %p10036_p4, %p10030_p9 }
  0x4d   : > { %10040 = shalt.err (!%p10037_p10)
}
  0x4e   : > { %s10340_s26 = smov 32   ;;  %s10341_s15 = smov 2  }
  0x4f   : > { %9253 = dma.hbm_to_vmem [thread:$0]  (!%p10478_p6), %s11806_s11, 128, %s506_s2, [#allocation17], %s10340_s26, %s10340_s26, %s10341_s15  }
  0x50   : > { %s10342_s17 = smov [#allocation6]   ;;  %s11844_s1 = sld [smem:[#allocation33_spill]] }
  0x51   : > { %s10343_s16 = smov [#allocation9]  }
  0x52   : > { %s431_s8 = sshll.u32 %s10343_s16, 4  ;;  %s432_s8 = int_to_ptr.vmem [resolvable:$true] %s431_s8 }
  0x53   : > { %s10063_s27 = scalar_lea.vmem %s432_s8, 192  ;;  %p10071_p2 = scmp.lt.s32.totalorder %s432_s8, %s432_s8 }
  0x54   : > { %p10064_p12 = scmp.ne.s32.totalorder %s432_s8, %s10063_s27  ;;  %p10072_p5 = scmp.lt.s32.totalorder %s10063_s27, %s10063_s27 }
  0x56   : > { %9232 = dma.hbm_to_smem (!%p10478_p6), %s11844_s1, 16, %s10342_s17, [#allocation5]  }
  0x57   : > { %p10066_p13 = pnand %p10064_p12, %p10484_p7  ;;  %p10073_p8 = por %p10072_p5, %p10071_p2 }
  0x59   : > { %p10067_p0 = pneg %p10066_p13 }
  0x5b   : > { %p10074_p9 = pnand %p10073_p8, %p10067_p0 }
  0x5d   : > { %10077 = shalt.err (!%p10074_p9)
}
  0x5e   : > { %s10344_s2 = smov 48   ;;  %s10345_s14 = smov 3  }
  0x5f   : > { %s11845_s3 = sld [smem:[#allocation35_spill]]  ;;  %s10346_s15 = smov [#allocation12]  }
  0x60   : > { %s463_s17 = sshll.u32 %s10346_s15, 4  ;;  %s10347_s22 = smov [#allocation15]   ;;  %s464_s17 = int_to_ptr.vmem [resolvable:$true] %s463_s17 }
  0x61   : > { %s492_s23 = sshll.u32 %s10347_s22, 4  ;;  %s10089_s16 = scalar_lea.vmem %s464_s17, 64  ;;  %s493_s23 = int_to_ptr.vmem [resolvable:$true] %s492_s23 }
  0x62   : > { %p10090_p11 = scmp.ne.s32.totalorder %s464_s17, %s10089_s16  ;;  %p10097_p10 = scmp.lt.s32.totalorder %s464_s17, %s464_s17 }
  0x63   : > { %p10098_p12 = scmp.lt.s32.totalorder %s10089_s16, %s10089_s16 }
  0x64   : > { %p10092_p1 = pnand %p10090_p11, %p10484_p7 }
  0x65   : > { %9238 = dma.hbm_to_vmem [thread:$0]  (!%p10478_p6), %s11845_s3, 192, %s432_s8, [#allocation8], %s10344_s2, %s10344_s2, %s10345_s14  }
  0x66   : > { %p10093_p4 = pneg %p10092_p1  ;;  %p10099_p13 = por %p10098_p12, %p10097_p10 }
  0x68   : > { %p10100_p0 = pnand %p10099_p13, %p10093_p4 }
  0x6a   : > { %10103 = shalt.err (!%p10100_p0)
}
  0x6b   : > { %s11846_s27 = smov 1   ;;  %s11847_s8 = smov 16  }
  0x6c   : > { %s11848_s7 = sld [smem:[#allocation37_spill]]  ;;  %s10115_s30 = scalar_lea.vmem %s493_s23, 8192 }
  0x6d   : > { %p10116_p2 = scmp.ne.s32.totalorder %s493_s23, %s10115_s30  ;;  %p10123_p9 = scmp.lt.s32.totalorder %s493_s23, %s493_s23 }
  0x6e   : > { %p10124_p11 = scmp.lt.s32.totalorder %s10115_s30, %s10115_s30 }
  0x6f   : > { %p10118_p5 = pnand %p10116_p2, %p10484_p7 }
  0x70   : > { %p10125_p1 = por %p10124_p11, %p10123_p9 }
  0x71   : > { %p10119_p8 = pneg %p10118_p5 }
  0x72   : > { %9244 = dma.hbm_to_vmem [thread:$0]  (!%p10478_p6), %s11848_s7, 64, %s464_s17, [#allocation11], %s11847_s8, %s11847_s8, %s11846_s27  }
  0x73   : > { %p10126_p4 = pnand %p10125_p1, %p10119_p8 }
  0x75   : > { %10129 = shalt.err (!%p10126_p4)
}
  0x76   : > { %s11821_s26 = smov 128   ;;  %s11822_s15 = smov 8  }
  0x77   : > { %9250 = dma.hbm_to_vmem [thread:$0]  (!%p10478_p6), %s11805_s10, 8192, %s493_s23, [#allocation14], %s11821_s26, %s11821_s26, %s11822_s15  }
  0x78   : > { %s10350_s16 = smov [#allocation18]   ;;  %s10351_s14 = smov [#allocation19]  }
  0x79   : > { %s518_s2 = sshll.u32 %s10350_s16, 4  ;;  %s531_s1 = sshll.u32 %s10351_s14, 4  ;;  %s519_s2 = int_to_ptr.vmem [resolvable:$true] %s518_s2  ;;  %s532_s1 = int_to_ptr.vmem [resolvable:$true] %s531_s1 }
  0x7a   : > { %s10141_s30 = scalar_lea.vmem %s519_s2, 8192  ;;  %p10149_p0 = scmp.lt.s32.totalorder %s519_s2, %s519_s2 }
  0x7b   : > { %p10142_p10 = scmp.ne.s32.totalorder %s519_s2, %s10141_s30  ;;  %p10150_p2 = scmp.lt.s32.totalorder %s10141_s30, %s10141_s30 }
  0x7d   : > { %p10144_p12 = pnand %p10142_p10, %p10484_p7  ;;  %p10151_p5 = por %p10150_p2, %p10149_p0 }
  0x7f   : > { %p10145_p13 = pneg %p10144_p12 }
  0x81   : > { %p10152_p8 = pnand %p10151_p5, %p10145_p13 }
  0x83   : > { %10155 = shalt.err (!%p10152_p8)
}
  0x84   : > { %s11849_s22 = smov 4   ;;  %s11850_s23 = smov 64  }
  0x85   : > { %9256 = dma.hbm_to_vmem [thread:$0]  (!%p10478_p6), %s11807_s12, 8192, %s519_s2, [#allocation17], %s11850_s23, %s11850_s23, %s11849_s22  }
  0x86   : > { %s10167_s14 = scalar_lea.vmem %s532_s1, 64  ;;  %p10175_p4 = scmp.lt.s32.totalorder %s532_s1, %s532_s1 }
  0x87   : > { %p10168_p9 = scmp.ne.s32.totalorder %s532_s1, %s10167_s14  ;;  %p10176_p10 = scmp.lt.s32.totalorder %s10167_s14, %s10167_s14 }
  0x89   : > { %p10170_p11 = pnand %p10168_p9, %p10484_p7  ;;  %p10177_p12 = por %p10176_p10, %p10175_p4 }
  0x8b   : > { %p10171_p1 = pneg %p10170_p11 }
  0x8d   : > { %p10178_p13 = pnand %p10177_p12, %p10171_p1 }
  0x8f   : > { %10181 = shalt.err (!%p10178_p13)
}
  0x90   : > { %9259 = dma.hbm_to_vmem [thread:$0]  (!%p10478_p6), %s11808_s13, 64, %s532_s1, [#allocation20], %s11847_s8, %s11847_s8, %s11846_s27  }
  0x91   : > { %s7950_s28 = sadd.s32 4294967294, %s10328_s21   ;;  %s10576_s29 = sadd.s32 1, %s10328_s21  }
  0x92   : > { %s45_s26 = ssub.s32 %s10328_s21, %s10576_s29  ;;  %s48_s2 = sadd.s32 1, %s10324_s20 }
  0x93   : > { %p46_p7 = scmp.eq.s32.totalorder %s45_s26, 0  ;;  %p55_p0 = scmp.ne.s32.totalorder %s10324_s20, %s10320_s19 }
  0x94   : > { %p56_p2 = scmp.eq.s32.totalorder %s10328_s21, 0  ;;  %p61_p5 = scmp.ne.s32.totalorder %s10320_s19, %s10316_s18 }
  0x95   : > { %s10587_s22 = scalar_select %p46_p7, %s10324_s20, %s48_s2  }
  0x96   : > { %p57_p8 = por %p56_p2, %p55_p0  ;;  %p11851_p9 = scmp.eq.s32.totalorder %s10464_s24, 0 }
  0x97   : > { %p358_p6 = scmp.eq.s32.totalorder %s10464_s24, 1  ;;  %p364_p1 = scmp.eq.s32.totalorder %s7950_s28, 1 }
  0x98   : > { %p10591_p11 = por %p11851_p9, %p61_p5  ;;  %p9281_p4 = scmp.lt.s32.totalorder %s10328_s21, 2 }
  0x99   : > { %s545_s1 = sand.u32 1, %s10324_s20   ;;  %p10598_p10 = por %p358_p6, %p55_p0 }
  0x9a   : > { %s11852_s23 = scalar_select %p10591_p11, 1, 0 }
  0x9b   : > { %s11853_s27 = scalar_select %p10598_p10, 1, 0 }
  0x9c   : > { %p10602_p12 = por %p364_p1, %p61_p5  ;;  %s9180_s17 = smul.u32 48, %s545_s1 }
  0x9d   : > { %s9181_s16 = smul.u32 768, %s10328_s21  ;;  %p10607_p13 = pnand %p9281_p4, %p57_p8 }
  0x9e   : > { %s11854_s8 = scalar_select %p10602_p12, 1, 0 }
  0x9f   : > { %s10614_s28 = scalar_lea.hbm %s11795_s0, %s9181_s16  ;;  %s549_s2 = scalar_lea.vmem [#allocation2], %s9180_s17 }
  0xa0   : > { %s556_s15 = sshll.u32 %s549_s2, 4  ;;  %s10618_s3 = scalar_lea.sflag [#allocation3], %s545_s1  ;;  %s10616_s15 = int_to_ptr.vmem [resolvable:$true] %s556_s15 }
  0xa1   : > { %s10182_s4 = scalar_lea.hbm %s10614_s28, 768  ;;  %p10184_p0 = pneg %p10607_p13 }
  0xa2   : > { %p10183_p7 = scmp.ne.s32.totalorder %s10614_s28, %s10182_s4  ;;  %s10187_s16 = scalar_lea.hbm %s11795_s0, 1536 }
  0xa3   : > { %p10188_p8 = scmp.lt.s32.totalorder %s10614_s28, %s11795_s0  ;;  %p10189_p9 = scmp.lt.s32.totalorder %s10187_s16, %s10182_s4 }
  0xa4   : > { %p10185_p2 = pnand %p10184_p0, %p10183_p7 }
  0xa5   : > { %p10190_p6 = por %p10189_p9, %p10188_p8 }
  0xa6   : > { %p10186_p5 = pneg %p10185_p2 }
  0xa8   : > { %p10191_p1 = pnand %p10190_p6, %p10186_p5 }
  0xaa   : > { %10194 = shalt.err (!%p10191_p1)
}
  0xab   : > { %s10195_s1 = scalar_lea.vmem %s10616_s15, 768  ;;  %s10352_s17 = smov [#allocation2]  }
  0xac   : > { %p10196_p4 = scmp.ne.s32.totalorder %s10616_s15, %s10195_s1  ;;  %s10200_s2 = sshll.u32 %s10352_s17, 4  ;;  %s10201_s2 = int_to_ptr.vmem [resolvable:$false] %s10200_s2 }
  0xad   : > { %s10202_s7 = scalar_lea.vmem %s10201_s2, 1536  ;;  %p10203_p2 = scmp.lt.s32.totalorder %s10616_s15, %s10201_s2 }
  0xae   : > { %p10198_p12 = pnand %p10196_p4, %p10184_p0  ;;  %p10204_p10 = scmp.lt.s32.totalorder %s10202_s7, %s10195_s1 }
  0xb0   : > { %p10199_p7 = pneg %p10198_p12  ;;  %p10205_p11 = por %p10204_p10, %p10203_p2 }
  0xb2   : > { %p10206_p3 = pnand %p10205_p11, %p10199_p7 }
  0xb4   : > { %10209 = shalt.err (!%p10206_p3)
}
  0xb5   : > { %s11856_s4 = smov 8   ;;  %s11857_s9 = smov 128  }
  0xb6   : > { %9263 = dma.hbm_to_vmem [thread:$0]  (!%p10607_p13), %s10614_s28, 768, %s10616_s15, %s10618_s3, %s11857_s9, %s11857_s9, %s11856_s4  }
  0xb7   : > { %p11858_p12 = scmp.ne.s32.totalorder %s11838_s25, 0 }
  0xb8   : > { %s10645_s30 = sand.u32 (!%p11858_p12), 1, %s10320_s19   ;;  %p11859_p3 = scmp.ne.s32.totalorder (!%p11858_p12), %s11852_s23, 0 }
  0xb9   : > { %568 = sbr.rel (%p11858_p12) target bundleno = 14119 (0x3727), region = 76  ;;  %s571_s26 = scalar_lea.sflag (!%p11858_p12), [#allocation3], %s10645_s30 }
  0xba   : > { %s9182_s16 = smul.u32 (!%p11858_p12), 48, %s10645_s30 }
  0xbc   : > { %s10649_s1 = scalar_lea.vmem (!%p11858_p12), [#allocation2], %s9182_s16 }
  0xbe   : > { %10279 = dma.done.wait (%p11859_p3), %s571_s26, 768  }
  0xbf   : > { %10281 = vsyncadd (%p11859_p3), %s571_s26, 4294966528  ;;  %p11860_p11 = scmp.eq.s32.totalorder %s10464_s24, 0 }
  0xc1   : > { %10283 = dma.done.wait (%p11860_p11), [#allocation5], 16   ;;  %p11861_p10 = pmov %p11860_p11 }
  0xc3   : > { %10285 = vsyncadd (%p11861_p10), [#allocation5], 4294967280  ;;  %p11862_p13 = pmov %p11861_p10 }
  0xc4   : > { %p11863_p0 = pmov %p11861_p10 }
  0xc5   : > { %10287 = dma.done.wait (%p11862_p13), [#allocation8], 12480  }
  0xc6   : > { %10289 = vsyncadd (%p11863_p0), [#allocation8], 4294954816  ;;  %p11864_p5 = pmov %p11863_p0 }
  0xc7   : > { %p11865_p8 = pmov %p11863_p0 }
  0xc8   : > { %10291 = dma.done.wait (%p11864_p5), [#allocation11], 4160  }
  0xc9   : > { %10293 = vsyncadd (%p11865_p8), [#allocation11], 4294963136  ;;  %p11866_p9 = pmov %p11863_p0 }
  0xca   : > { %p11867_p6 = pmov %p11863_p0 }
  0xcb   : > { %10295 = dma.done.wait (%p11866_p9), [#allocation14], 8256  }
  0xcc   : > { %10297 = vsyncadd (%p11867_p6), [#allocation14], 4294959040  ;;  %p11868_p1 = pmov %p11863_p0 }
  0xcd   : > { %p11869_p4 = pmov %p11863_p0 }
  0xce   : > { %10299 = dma.done.wait (%p11868_p1), [#allocation17], 8320  }
  0xcf   : > { %10301 = vsyncadd (%p11869_p4), [#allocation17], 4294958976  ;;  %p11870_p7 = pmov %p11863_p0 }
  0xd0   : > { %p11871_p2 = pmov %p11863_p0 }
  0xd1   : > { %10303 = dma.done.wait (%p11870_p7), [#allocation20], 64  }
  0xd2   : > { %10305 = vsyncadd (%p11871_p2), [#allocation20], 4294967232 }
  0xd3   : > { %619 = sfence }
  0xd4   : > { %v9355_v0 = vld [vmem:[#allocation7 + $0xac] ss:$12 sps:$4 sm:$0xff]   ;;  %v9357_v1 = vld [vmem:[#allocation7 + $0xa8] ss:$12 sps:$4 sm:$0xff]   ;;  %v10353_v2 = vmov 0   ;;  %v10354_v3 = vmov 0.0   ;;  %v711_v35 = vlaneseq }
  0xd5   : > { %886 = vmatprep.mubr.bf16.mxu0 %v10353_v2  ;;  %8644 = vmatprep.subr.bf16.mxu1 %v10354_v3  ;;  %v9358_v4 = vld [vmem:[#allocation7 + $0x94] ss:$12 sps:$4 sm:$0xff]   ;;  %v9360_v5 = vld [vmem:[#allocation7 + $0x90] ss:$12 sps:$4 sm:$0xff]   ;;  %v9363_v7 = vld [vmem:[#allocation7 + $0x78] ss:$12 sps:$4 sm:$0xff]  }
  0xd6   : > { %854 = vmatprep.subr.bf16.mxu0 %v9355_v0  ;;  %v9361_v6 = vld [vmem:[#allocation7 + $0x7c] ss:$12 sps:$4 sm:$0xff]   ;;  %v9364_v8 = vld [vmem:[#allocation7 + $0x64] ss:$12 sps:$4 sm:$0xff]   ;;  %v9366_v9 = vld [vmem:[#allocation7 + $0x60] ss:$12 sps:$4 sm:$0xff]  }
  0xd7   : > { %855 = vmatpush1.bf16.msra.mxu0 %v9357_v1  ;;  %v9367_v10 = vld [vmem:[#allocation7 + $0x4c] ss:$12 sps:$4 sm:$0xff]   ;;  %v9379_v11 = vld [vmem:[#allocation7 + $0xb0] ss:$12 sps:$4 sm:$0xff]   ;;  %v9369_v12 = vld [vmem:[#allocation7 + $0x48] ss:$12 sps:$4 sm:$0xff]  }
  0xd8   : > { %856 = vmatprep.subr.bf16.mxu0 %v9358_v4  ;;  %8645 = vmatpush3.bf16.msra.mxu1 %v9379_v11  ;;  %v9380_v13 = vld [vmem:[#allocation7 + $0x98] ss:$12 sps:$4 sm:$0xff]   ;;  %v9370_v14 = vld [vmem:[#allocation7 + $0x34] ss:$12 sps:$4 sm:$0xff]   ;;  %v9372_v15 = vld [vmem:[#allocation7 + $0x30] ss:$12 sps:$4 sm:$0xff]  }
  0xd9   : > { %8646 = vmatprep.subr.bf16.mxu1 %v10354_v3  ;;  %v9373_v16 = vld [vmem:[#allocation7 + $0x1c] ss:$12 sps:$4 sm:$0xff]   ;;  %v9381_v17 = vld [vmem:[#allocation7 + $0x80] ss:$12 sps:$4 sm:$0xff]   ;;  %v9375_v18 = vld [vmem:[#allocation7 + $0x18] ss:$12 sps:$4 sm:$0xff]  }
  0xda   : > { %v9382_v19 = vld [vmem:[#allocation7 + $0x68] ss:$12 sps:$4 sm:$0xff]   ;;  %v9376_v20 = vld [vmem:[#allocation7 + $0x4] ss:$12 sps:$4 sm:$0xff]   ;;  %v9378_v21 = vld [vmem:[#allocation7] ss:$12 sps:$4 sm:$0xff]  }
  0xdb   : > { %857 = vmatpush1.bf16.msra.mxu0 %v9360_v5  ;;  %v668_v22 = vld [vmem:[%s10649_s1] sm:$0xff]  ;;  %v669_v23 = vld [vmem:[%s10649_s1 + $0x8] sm:$0xff]  ;;  %v670_v27 = vld [vmem:[%s10649_s1 + $0x10] sm:$0xff]  ;;  %vm10355_vm0 = vmmov 0   ;;  %v712_v36 = vshrl.u32 %v711_v35, 7  ;;  %vm999_vm1 = vcmask 261120  }
  0xdc   : > { %858 = vmatprep.subr.bf16.mxu0 %v9361_v6  ;;  %8647 = vmatpush3.bf16.msra.mxu1 %v9380_v13  ;;  %v9383_v24 = vld [vmem:[#allocation7 + $0x50] ss:$12 sps:$4 sm:$0xff]   ;;  %v9384_v25 = vld [vmem:[#allocation7 + $0x38] ss:$12 sps:$4 sm:$0xff]   ;;  %v674_v26 = vpack.c.bf16 %v669_v23, %v668_v22  ;;  %v9385_v29 = vld [vmem:[#allocation7 + $0x20] ss:$12 sps:$4 sm:$0xff]  }
  0xdd   : > { %8648 = vmatprep.subr.bf16.mxu1 %v10354_v3  ;;  %v671_v28 = vld [vmem:[%s10649_s1 + $0x18] sm:$0xff]  ;;  %v672_v31 = vld [vmem:[%s10649_s1 + $0x20] sm:$0xff]  ;;  %v673_v32 = vld [vmem:[%s10649_s1 + $0x28] sm:$0xff]  ;;  %8660 = vmatprep.mubr.msk.bf16.mxu1 %vm10355_vm0, %v10354_v3  ;;  %v10708_v37 = vsub.s32 1, %v712_v36  ;;  %v10711_v44 = vsub.s32 0, %v712_v36  ;;  %v10747_v13 = vsub.s32 2, %v712_v36 }
  0xde   : > { %v675_v30 = vpack.c.bf16 %v671_v28, %v670_v27  ;;  %v676_v33 = vpack.c.bf16 %v673_v32, %v672_v31  ;;  %v9386_v34 = vld [vmem:[#allocation7 + $0x8] ss:$12 sps:$4 sm:$0xff]   ;;  %v709_v39 = vld [vmem:[#allocation9] sm:$0x7]  ;;  %vm1141_vm2 = vcmask 130048   ;;  %s10356_s3 = smov 96  }
  0xdf   : > { %859 = vmatpush1.bf16.msra.mxu0 %v9363_v7  ;;  %v718_v41 = vrot.slane %v709_v39, %v10708_v37  ;;  %v714_v50 = vrot.slane %v709_v39, %v10711_v44  ;;  %s10357_s25 = smov 64   ;;  %s10358_s15 = smov 32  }
  0xe0   : > { %860 = vmatprep.subr.bf16.mxu0 %v9364_v8  ;;  %8649 = vmatpush3.bf16.msra.mxu1 %v9381_v17  ;;  %s8083_s2 = sld [smem:[#allocation6 + $0x1]]  ;;  %s11827_s28 = sshll.u32 %s10645_s30, 4 }
  0xe1   : > { %8650 = vmatprep.subr.bf16.mxu1 %v10354_v3  ;;  %s3371_s7 = sld [smem:[#allocation6]]  ;;  %s11826_s17 = sshll.u32 %s10464_s24, 8 }
  0xe2   : > { %s11872_s16 = sld [smem:[#allocation38_spill]]  ;;  %p11874_p3 = scmp.ne.s32.totalorder %s11853_s27, 0 }
  0xe3   : > { %861 = vmatpush1.bf16.msra.mxu0 %v9366_v9  ;;  %s8084_s26 = sld [smem:[#allocation6 + $0x2]] }
  0xe4   : > { %862 = vmatprep.subr.bf16.mxu0 %v9367_v10  ;;  %8651 = vmatpush3.bf16.msra.mxu1 %v9382_v19 }
  0xe5   : > { %8652 = vmatprep.subr.bf16.mxu1 %v10354_v3 }
  0xe7   : > { %863 = vmatpush1.bf16.msra.mxu0 %v9369_v12 }
  0xe8   : > { %864 = vmatprep.subr.bf16.mxu0 %v9370_v14  ;;  %8653 = vmatpush3.bf16.msra.mxu1 %v9383_v24  ;;  %v722_v14 = vrot.slane %v709_v39, %v10747_v13 }
  0xe9   : > { %8654 = vmatprep.subr.bf16.mxu1 %v10354_v3 }
  0xeb   : > { %865 = vmatpush1.bf16.msra.mxu0 %v9372_v15 }
  0xec   : > { %866 = vmatprep.subr.bf16.mxu0 %v9373_v16  ;;  %8655 = vmatpush3.bf16.msra.mxu1 %v9384_v25 }
  0xed   : > { %8656 = vmatprep.subr.bf16.mxu1 %v10354_v3 }
  0xef   : > { %867 = vmatpush1.bf16.msra.mxu0 %v9375_v18 }
  0xf0   : > { %868 = vmatprep.subr.bf16.mxu0 %v9376_v20  ;;  %8657 = vmatpush3.bf16.msra.mxu1 %v9385_v29 }
  0xf1   : > { %8658 = vmatprep.subr.bf16.mxu1 %v10354_v3 }
  0xf3   : > { %869 = vmatpush1.bf16.msra.mxu0 %v9378_v21 }
  0xf4   : > { %8672 = vmatprep.subr.bf16.mxu0 %v10354_v3  ;;  %8659 = vmatpush3.bf16.msra.mxu1 %v9386_v34 }
  0xf5   : > { %8678 = vmatprep.subr.bf16.mxu1 %v10354_v3 }
  0xf6   : > { %887 = vmatmul.mubr.bf16.vlgmr.msra.gmra.mxu0 %v674_v26 }
  0xf7   : > { %896 = vmatprep.mubr.bf16.mxu0 %v10353_v2  ;;  %8661 = vmatmul.mubr.bf16.vlgmr.msra.gmra.mxu1 %v674_v26 }
  0xf8   : > { %8664 = vmatprep.mubr.msk.bf16.mxu1 %vm10355_vm0, %v10354_v3 }
  0xfe   : > { %897 = vmatmul.mubr.bf16.gmra.mxu0 %v675_v30 }
  0xff   : > { %906 = vmatprep.mubr.bf16.mxu0 %v10353_v2  ;;  %8665 = vmatmul.mubr.bf16.gmra.mxu1 %v675_v30 }
 0x100   : > { %8668 = vmatprep.mubr.msk.bf16.mxu1 %vm10355_vm0, %v10354_v3 }
 0x106   : > { %907 = vmatmul.mubr.bf16.gmra.mxu0 %v676_v33 }
 0x107   : > { %8674 = vmatprep.mubr.msk.bf16.mxu0 %vm10355_vm0, %v10354_v3  ;;  %8669 = vmatmul.mubr.bf16.gmra.mxu1 %v676_v33 }
 0x108   : > { %8680 = vmatprep.mubr.msk.bf16.mxu1 %vm10355_vm0, %v10354_v3 }
 0x1b6   : > { %v888_v38 = vpop.f32.mrf.mxu0 }
 0x1b7   : > { %v889_v55 = vadd.f32 %v888_v38, %v714_v50  ;;  %v951_v15 = vpop.f32.mrf.mxu1 }
 0x1b8   : > { %v890_v40 = vpop.f32.mrf.mxu0  ;;  %v952_v17 = vadd.f32 %v951_v15, %v722_v14 }
 0x1b9   : > { %v891_v45 = vadd.f32 %v890_v40, %v718_v41  ;;  %v8662_v16 = vpop.f32.mrf.mxu1 }
 0x1ba   : > { %v892_v42 = vpop.f32.mrf.mxu0 }
 0x1bb   : > { %v893_v53 = vadd.f32 %v892_v42, %v714_v50  ;;  %v954_v18 = vpop.f32.mrf.mxu1 }
 0x1bc   : > { %v894_v43 = vpop.f32.mrf.mxu0  ;;  %v955_v19 = vadd.f32 %v954_v18, %v722_v14 }
 0x1bd   : > { %v895_v46 = vadd.f32 %v894_v43, %v718_v41  ;;  %v10719_v59 = vpack.c.bf16 %v893_v53, %v889_v55  ;;  %v8663_v20 = vpop.f32.mrf.mxu1 }
 0x1be   : > { %v898_v47 = vpop.f32.mrf.mxu0  ;;  %v10750_v21 = vpack.c.bf16 %v955_v19, %v952_v17 }
 0x1bf   : > { %v10713_v48 = vpack.c.bf16 %v895_v46, %v891_v45  ;;  %v899_v5 = vadd.f32 %v898_v47, %v714_v50  ;;  %v959_v22 = vpop.f32.mrf.mxu1 }
 0x1c0   : > { %v900_v49 = vpop.f32.mrf.mxu0  ;;  %v960_v24 = vadd.f32 %v959_v22, %v722_v14 }
 0x1c1   : > { %v1004_v51 = vsel %vm999_vm1, %v10713_v48, 0  ;;  %v901_v56 = vadd.f32 %v900_v49, %v718_v41  ;;  %v8666_v23 = vpop.f32.mrf.mxu1 }
 0x1c2   : > { %v902_v52 = vpop.f32.mrf.mxu0  ;;  %8673 = vmatpush3.bf16.xpose.msra.mxu0 %v1004_v51 }
 0x1c3   : > { %8684 = vmatprep.subr.bf16.mxu0 %v10354_v3  ;;  %v903_v0 = vadd.f32 %v902_v52, %v714_v50  ;;  %v962_v25 = vpop.f32.mrf.mxu1 }
 0x1c4   : > { %v904_v54 = vpop.f32.mrf.mxu0  ;;  %v963_v26 = vadd.f32 %v962_v25, %v722_v14 }
 0x1c5   : > { %v905_v57 = vadd.f32 %v904_v54, %v718_v41  ;;  %v10730_v7 = vpack.c.bf16 %v903_v0, %v899_v5  ;;  %v8667_v27 = vpop.f32.mrf.mxu1 }
 0x1c6   : > { %v908_v58 = vpop.f32.mrf.mxu0  ;;  %v10754_v28 = vpack.c.bf16 %v963_v26, %v960_v24 }
 0x1c7   : > { %v10721_v60 = vpack.c.bf16 %v905_v57, %v901_v56  ;;  %v909_v10 = vadd.f32 %v908_v58, %v714_v50  ;;  %v967_v29 = vpop.f32.mrf.mxu1 }
 0x1c8   : > { %v910_v61 = vpop.f32.mrf.mxu0  ;;  %v968_v30 = vadd.f32 %v967_v29, %v722_v14 }
 0x1c9   : > { %8675 = vmatmul.mubr.msk.bf16.vlgmr.msra.gmra.mxu0 %vm999_vm1, %v10719_v59  ;;  %v1051_v62 = vsel %vm999_vm1, %v10721_v60, 0  ;;  %v911_v1 = vadd.f32 %v910_v61, %v718_v41  ;;  %v8670_v31 = vpop.f32.mrf.mxu1 }
 0x1ca   : > { %v912_v63 = vpop.f32.mrf.mxu0  ;;  %8679 = vmatpush3.bf16.xpose.msra.mxu1 %v1051_v62  ;;  %8686 = vmatprep.mubr.msk.bf16.mxu0 %vm10355_vm0, %v10354_v3 }
 0x1cb   : > { %8690 = vmatprep.subr.bf16.mxu1 %v10354_v3  ;;  %v913_v11 = vadd.f32 %v912_v63, %v714_v50  ;;  %v970_v32 = vpop.f32.mrf.mxu1 }
 0x1cc   : > { %v914_v4 = vpop.f32.mrf.mxu0  ;;  %v971_v34 = vadd.f32 %v970_v32, %v722_v14 }
 0x1cd   : > { %v915_v6 = vadd.f32 %v914_v4, %v718_v41  ;;  %v10741_v12 = vpack.c.bf16 %v913_v11, %v909_v10  ;;  %v8671_v33 = vpop.f32.mrf.mxu1 }
 0x1ce   : > { %v10758_v35 = vpack.c.bf16 %v971_v34, %v968_v30 }
 0x1cf   : > { %v10732_v8 = vpack.c.bf16 %v915_v6, %v911_v1 }
 0x1d1   : > { %8681 = vmatmul.mubr.msk.bf16.vlgmr.msra.gmra.mxu1 %vm999_vm1, %v10730_v7  ;;  %v1098_v9 = vsel %vm999_vm1, %v10732_v8, 0 }
 0x1d2   : > { %8685 = vmatpush3.bf16.xpose.msra.mxu0 %v1098_v9  ;;  %8692 = vmatprep.mubr.msk.bf16.mxu1 %vm10355_vm0, %v10354_v3 }
 0x1d3   : > { %8696 = vmatprep.subr.bf16.mxu0 %v10354_v3  ;;  %8691 = vmatpush3.bf16.msra.mxu1 %v10750_v21 }
 0x1d4   : > { %8702 = vmatprep.subr.bf16.mxu1 %v10354_v3 }
 0x1d9   : > { %8687 = vmatmul.mubr.msk.bf16.vlgmr.msra.gmra.mxu0 %vm999_vm1, %v10741_v12 }
 0x1da   : > { %8698 = vmatprep.mubr.msk.bf16.mxu0 %vm10355_vm0, %v10354_v3  ;;  %8697 = vmatpush3.bf16.msra.mxu0 %v10754_v28 }
 0x1db   : > { %8708 = vmatprep.subr.bf16.mxu0 %v10354_v3 }
 0x289   : > { %v1040_v36 = vpop.f32.mrf.mxu0 }
 0x28a   : > { %v1142_v38 = vsel %vm1141_vm2, %v1040_v36, -inf }
 0x28b   : > { %1143 = vmax.xlane.f32.xlu0 %v1142_v38  ;;  %v8676_v39 = vpop.f32.mrf.mxu0 }
 0x28d   : > { %v1043_v40 = vpop.f32.mrf.mxu0 }
 0x28e   : > { %v1145_v41 = vsel %vm1141_vm2, %v1043_v40, -inf }
 0x28f   : > { %1146 = vmax.xlane.f32.xlu0 %v1145_v41  ;;  %v8677_v42 = vpop.f32.mrf.mxu0 }
 0x291   : > { %v1087_v43 = vpop.f32.mrf.mxu1 }
 0x292   : > { %v1148_v45 = vsel %vm1141_vm2, %v1087_v43, -inf }
 0x293   : > { %1149 = vmax.xlane.f32.xlu1 %v1148_v45  ;;  %v8682_v46 = vpop.f32.mrf.mxu1 }
 0x295   : > { %v1090_v47 = vpop.f32.mrf.mxu1 }
 0x296   : > { %v1151_v49 = vsel %vm1141_vm2, %v1090_v47, -inf }
 0x297   : > { %1152 = vmax.xlane.f32.xlu1 %v1151_v49  ;;  %v8683_v50 = vpop.f32.mrf.mxu1 }
 0x299   : > { %v1134_v51 = vpop.f32.mrf.mxu0 }
 0x29a   : > { %v1154_v52 = vsel %vm1141_vm2, %v1134_v51, -inf }
 0x29b   : > { %1155 = vmax.xlane.f32.xlu0 %v1154_v52  ;;  %v8688_v53 = vpop.f32.mrf.mxu0 }
 0x29d   : > { %v1137_v54 = vpop.f32.mrf.mxu0 }
 0x29e   : > { %v1157_v55 = vsel %vm1141_vm2, %v1137_v54, -inf }
 0x29f   : > { %1158 = vmax.xlane.f32.xlu1 %v1157_v55  ;;  %v8689_v56 = vpop.f32.mrf.mxu0 }
 0x314   : > { %v1144_v57 = vpop.xlane.xlu0 %1143 }
 0x315   : > { %v1160_v58 = vsub.f32 %v1040_v36, %v1144_v57 }
 0x317   : > { %v1166_v61 = vmul.f32 1.442695, %v1160_v58 }
 0x318   : > { %v1147_v62 = vpop.xlane.xlu0 %1146 }
 0x319   : > { %9675 = vpow2.f32 %v1166_v61  ;;  %v1161_v63 = vsub.f32 %v1043_v40, %v1147_v62 }
 0x31b   : > { %v1168_v0 = vmul.f32 1.442695, %v1161_v63 }
 0x31c   : > { %v1150_v1 = vpop.xlane.xlu1 %1149 }
 0x31d   : > { %9677 = vpow2.f32 %v1168_v0  ;;  %v1162_v4 = vsub.f32 %v1087_v43, %v1150_v1 }
 0x31f   : > { %v1170_v5 = vmul.f32 1.442695, %v1162_v4 }
 0x320   : > { %v1153_v6 = vpop.xlane.xlu1 %1152 }
 0x321   : > { %9679 = vpow2.f32 %v1170_v5  ;;  %v1163_v9 = vsub.f32 %v1090_v47, %v1153_v6 }
 0x323   : > { %v1172_v10 = vmul.f32 1.442695, %v1163_v9 }
 0x324   : > { %v1156_v11 = vpop.xlane.xlu0 %1155 }
 0x325   : > { %9681 = vpow2.f32 %v1172_v10  ;;  %v1164_v14 = vsub.f32 %v1134_v51, %v1156_v11 }
 0x326   : > { %v9676_v15 = vpop.eup %9675 }
 0x327   : > { %v1174_v16 = vmul.f32 1.442695, %v1164_v14  ;;  %v1178_v17 = vsel %vm1141_vm2, %v9676_v15, 0.0 }
 0x328   : > { %1179 = vadd.xlane.f32.xlu0 %v1178_v17  ;;  %v1159_v27 = vpop.xlane.xlu1 %1158 }
 0x329   : > { %9683 = vpow2.f32 %v1174_v16  ;;  %v1165_v29 = vsub.f32 %v1137_v54, %v1159_v27 }
 0x32a   : > { %v9678_v18 = vpop.eup %9677 }
 0x32b   : > { %v1181_v19 = vsel %vm1141_vm2, %v9678_v18, 0.0  ;;  %v1176_v30 = vmul.f32 1.442695, %v1165_v29 }
 0x32c   : > { %1182 = vadd.xlane.f32.xlu1 %v1181_v19 }
 0x32d   : > { %9685 = vpow2.f32 %v1176_v30 }
 0x32e   : > { %v9680_v20 = vpop.eup %9679 }
 0x32f   : > { %v1184_v22 = vsel %vm1141_vm2, %v9680_v20, 0.0 }
 0x330   : > { %1185 = vadd.xlane.f32.xlu0 %v1184_v22 }
 0x332   : > { %v9682_v23 = vpop.eup %9681 }
 0x333   : > { %v1187_v24 = vsel %vm1141_vm2, %v9682_v23, 0.0 }
 0x334   : > { %1188 = vadd.xlane.f32.xlu1 %v1187_v24 }
 0x336   : > { %v10770_v25 = vpop.eup %9683 }
 0x337   : > { %v1190_v26 = vsel %vm1141_vm2, %v10770_v25, 0.0 }
 0x338   : > { %1191 = vadd.xlane.f32.xlu0 %v1190_v26 }
 0x33a   : > { %v9686_v31 = vpop.eup %9685 }
 0x33b   : > { %v1193_v32 = vsel %vm1141_vm2, %v9686_v31, 0.0 }
 0x345   : > { %1347 = vrot.lane.b32.xlu1 %v10719_v59, %s10356_s3 }
 0x34e   : > { %1350 = vrot.lane.b32.xlu0 %v10713_v48, %s10356_s3 }
 0x352   : > { %1456 = vrot.lane.b32.xlu0 %v10732_v8, %s10356_s3 }
 0x369   : > { %1194 = vadd.xlane.f32.xlu1 %v1193_v32 }
 0x37a   : > { %1403 = vrot.lane.b32.xlu1 %v10721_v60, %s10356_s3 }
 0x37e   : > { %1400 = vrot.lane.b32.xlu1 %v10730_v7, %s10356_s3 }
 0x382   : > { %1453 = vrot.lane.b32.xlu1 %v10741_v12, %s10356_s3 }
 0x3b1   : > { %v1180_v33 = vpop.xlane.xlu0 %1179 }
 0x3b2   : > { %9687 = vrcp.f32 %v1180_v33 }
 0x3b5   : > { %v1183_v34 = vpop.xlane.xlu1 %1182 }
 0x3b6   : > { %9689 = vrcp.f32 %v1183_v34 }
 0x3b9   : > { %v1186_v36 = vpop.xlane.xlu0 %1185 }
 0x3ba   : > { %9691 = vrcp.f32 %v1186_v36 }
 0x3bd   : > { %v1189_v38 = vpop.xlane.xlu1 %1188 }
 0x3be   : > { %9693 = vrcp.f32 %v1189_v38 }
 0x3bf   : > { %v9688_v39 = vpop.eup %9687 }
 0x3c0   : > { %v1202_v41 = vmul.f32 %v9688_v39, %v9676_v15 }
 0x3c1   : > { %v1192_v45 = vpop.xlane.xlu0 %1191  ;;  %v1348_v55 = vpop.permute.xlu1 %1347 }
 0x3c2   : > { %9695 = vrcp.f32 %v1192_v45 }
 0x3c3   : > { %v9690_v40 = vpop.eup %9689 }
 0x3c4   : > { %v1203_v42 = vmul.f32 %v9690_v40, %v9678_v18 }
 0x3c5   : > { %v1351_v51 = vpop.permute.xlu0 %1350 }
 0x3c6   : > { %v1208_v43 = vpack.c.bf16 %v1203_v42, %v1202_v41  ;;  %v1356_v53 = vsel %vm999_vm1, %v1351_v51, 0 }
 0x3c7   : > { %v9692_v46 = vpop.eup %9691 }
 0x3c8   : > { %8693 = vmatmul.mubr.msk.bf16.vlgmr.msra.gmra.mxu1 %vm1141_vm2, %v1208_v43  ;;  %v1204_v49 = vmul.f32 %v9692_v46, %v9680_v20 }
 0x3c9   : > { %8703 = vmatpush3.bf16.msra.mxu1 %v10758_v35  ;;  %8704 = vmatprep.mubr.msk.bf16.mxu1 %vm10355_vm0, %v10354_v3  ;;  %v1457_v54 = vpop.permute.xlu0 %1456 }
 0x3ca   : > { %8714 = vmatprep.subr.bf16.mxu1 %v10354_v3  ;;  %v1462_v56 = vsel %vm999_vm1, %v1457_v54, 0 }
 0x3cb   : > { %v9694_v47 = vpop.eup %9693 }
 0x3cc   : > { %v1205_v50 = vmul.f32 %v9694_v47, %v9682_v23 }
 0x3ce   : > { %v1209_v52 = vpack.c.bf16 %v1205_v50, %v1204_v49 }
 0x3cf   : > { %v9696_v62 = vpop.eup %9695 }
 0x3d0   : > { %8699 = vmatmul.mubr.msk.bf16.vlgmr.msra.gmra.mxu0 %vm1141_vm2, %v1209_v52  ;;  %v1206_v1 = vmul.f32 %v9696_v62, %v10770_v25 }
 0x3d1   : > { %8709 = vmatpush3.bf16.xpose.msra.mxu0 %v1356_v53  ;;  %8710 = vmatprep.mubr.msk.bf16.mxu0 %vm10355_vm0, %v10354_v3 }
 0x3d2   : > { %8720 = vmatprep.subr.bf16.mxu0 %v10354_v3 }
 0x3d8   : > { %8711 = vmatmul.mubr.msk.bf16.vlgmr.msra.gmra.mxu0 %vm999_vm1, %v1348_v55 }
 0x3d9   : > { %8721 = vmatpush3.bf16.xpose.msra.mxu0 %v1462_v56  ;;  %8722 = vmatprep.mubr.msk.bf16.mxu0 %vm10355_vm0, %v10354_v3 }
 0x3da   : > { %8732 = vmatprep.subr.bf16.mxu0 %v10354_v3 }
 0x3f2   : > { %v1195_v57 = vpop.xlane.xlu1 %1194 }
 0x3f3   : > { %9697 = vrcp.f32 %v1195_v57 }
 0x3f6   : > { %v1404_v58 = vpop.permute.xlu1 %1403 }
 0x3f7   : > { %v1409_v6 = vsel %vm999_vm1, %v1404_v58, 0 }
 0x3fa   : > { %v1401_v61 = vpop.permute.xlu1 %1400 }
 0x3fe   : > { %v1454_v63 = vpop.permute.xlu1 %1453 }
 0x3ff   : > { %8723 = vmatmul.mubr.msk.bf16.vlgmr.msra.gmra.mxu0 %vm999_vm1, %v1454_v63 }
 0x400   : > { %v9698_v0 = vpop.eup %9697  ;;  %8734 = vmatprep.mubr.msk.bf16.mxu0 %vm10355_vm0, %v10354_v3 }
 0x401   : > { %v1207_v4 = vmul.f32 %v9698_v0, %v9686_v31 }
 0x403   : > { %v1210_v5 = vpack.c.bf16 %v1207_v4, %v1206_v1 }
 0x405   : > { %8705 = vmatmul.mubr.msk.bf16.vlgmr.msra.gmra.mxu1 %vm1141_vm2, %v1210_v5 }
 0x406   : > { %8715 = vmatpush3.bf16.xpose.msra.mxu1 %v1409_v6  ;;  %8716 = vmatprep.mubr.msk.bf16.mxu1 %vm10355_vm0, %v10354_v3 }
 0x407   : > { %8726 = vmatprep.subr.bf16.mxu1 %v10354_v3 }
 0x40d   : > { %8717 = vmatmul.mubr.msk.bf16.vlgmr.msra.gmra.mxu1 %vm999_vm1, %v1401_v61 }
 0x40e   : > { %8728 = vmatprep.mubr.msk.bf16.mxu1 %vm10355_vm0, %v10354_v3 }
 0x488   : > { %v10814_v9 = vpop.f32.mrf.mxu1 }
 0x48a   : > { %v8694_v10 = vpop.f32.mrf.mxu1 }
 0x48c   : > { %v10816_v11 = vpop.f32.mrf.mxu1 }
 0x48d   : > { %v1343_v14 = vpack.c.bf16 %v10816_v11, %v10814_v9 }
 0x48e   : > { %v8695_v15 = vpop.f32.mrf.mxu1 }
 0x490   : > { %v10820_v16 = vpop.f32.mrf.mxu0 }
 0x492   : > { %v8700_v17 = vpop.f32.mrf.mxu0 }
 0x494   : > { %v10822_v18 = vpop.f32.mrf.mxu0 }
 0x495   : > { %v1344_v19 = vpack.c.bf16 %v10822_v18, %v10820_v16 }
 0x496   : > { %v8701_v20 = vpop.f32.mrf.mxu0 }
 0x498   : > { %v1392_v22 = vpop.f32.mrf.mxu0 }
 0x499   : > { %v1505_v23 = vsel %vm1141_vm2, %v1392_v22, -inf }
 0x49a   : > { %1506 = vmax.xlane.f32.xlu0 %v1505_v23  ;;  %v8712_v24 = vpop.f32.mrf.mxu0 }
 0x49c   : > { %v1395_v25 = vpop.f32.mrf.mxu0 }
 0x49d   : > { %v1508_v26 = vsel %vm1141_vm2, %v1395_v25, -inf }
 0x49e   : > { %1509 = vmax.xlane.f32.xlu1 %v1508_v26  ;;  %v8713_v27 = vpop.f32.mrf.mxu0 }
 0x4bf   : > { %v1498_v29 = vpop.f32.mrf.mxu0 }
 0x4c0   : > { %v1517_v49 = vsel %vm1141_vm2, %v1498_v29, -inf }
 0x4c1   : > { %v8724_v30 = vpop.f32.mrf.mxu0 }
 0x4c3   : > { %v1501_v31 = vpop.f32.mrf.mxu0 }
 0x4c4   : > { %v1520_v32 = vsel %vm1141_vm2, %v1501_v31, -inf }
 0x4c5   : > { %v10829_v33 = vpop.f32.mrf.mxu1  ;;  %1521 = vmax.xlane.f32.xlu1 %v1520_v32  ;;  %v8725_v34 = vpop.f32.mrf.mxu0 }
 0x4c7   : > { %v8706_v36 = vpop.f32.mrf.mxu1 }
 0x4c9   : > { %v10831_v38 = vpop.f32.mrf.mxu1 }
 0x4ca   : > { %v1345_v39 = vpack.c.bf16 %v10831_v38, %v10829_v33 }
 0x4cb   : > { %v8707_v40 = vpop.f32.mrf.mxu1 }
 0x4cd   : > { %v1445_v41 = vpop.f32.mrf.mxu1 }
 0x4ce   : > { %v1511_v42 = vsel %vm1141_vm2, %v1445_v41, -inf }
 0x4cf   : > { %v8718_v43 = vpop.f32.mrf.mxu1  ;;  %1512 = vmax.xlane.f32.xlu0 %v1511_v42 }
 0x4d1   : > { %v1448_v45 = vpop.f32.mrf.mxu1 }
 0x4d2   : > { %v1514_v46 = vsel %vm1141_vm2, %v1448_v45, -inf }
 0x4d3   : > { %v8719_v47 = vpop.f32.mrf.mxu1  ;;  %1515 = vmax.xlane.f32.xlu0 %v1514_v46 }
 0x4d7   : > { %1518 = vmax.xlane.f32.xlu0 %v1517_v49 }
 0x523   : > { %v1507_v50 = vpop.xlane.xlu0 %1506 }
 0x524   : > { %v1523_v51 = vsub.f32 %v1392_v22, %v1507_v50 }
 0x526   : > { %v1529_v52 = vmul.f32 1.442695, %v1523_v51 }
 0x527   : > { %v1510_v53 = vpop.xlane.xlu1 %1509 }
 0x528   : > { %9699 = vpow2.f32 %v1529_v52  ;;  %v1524_v54 = vsub.f32 %v1395_v25, %v1510_v53 }
 0x52a   : > { %v1531_v55 = vmul.f32 1.442695, %v1524_v54 }
 0x52c   : > { %9701 = vpow2.f32 %v1531_v55 }
 0x535   : > { %v10838_v56 = vpop.eup %9699 }
 0x536   : > { %v1541_v57 = vsel %vm1141_vm2, %v10838_v56, 0.0 }
 0x537   : > { %1542 = vadd.xlane.f32.xlu0 %v1541_v57 }
 0x539   : > { %v9702_v58 = vpop.eup %9701 }
 0x53a   : > { %v1544_v61 = vsel %vm1141_vm2, %v9702_v58, 0.0 }
 0x53b   : > { %1545 = vadd.xlane.f32.xlu1 %v1544_v61 }
 0x54c   : > { %1623 = vrot.lane.b32.xlu1 %v10754_v28, %s10356_s3 }
 0x54e   : > { %v1522_v62 = vpop.xlane.xlu1 %1521 }
 0x54f   : > { %v1528_v1 = vsub.f32 %v1501_v31, %v1522_v62 }
 0x551   : > { %v1539_v10 = vmul.f32 1.442695, %v1528_v1 }
 0x558   : > { %v1513_v63 = vpop.xlane.xlu0 %1512 }
 0x559   : > { %v1525_v0 = vsub.f32 %v1445_v41, %v1513_v63 }
 0x55b   : > { %v1533_v4 = vmul.f32 1.442695, %v1525_v0 }
 0x55c   : > { %v1516_v5 = vpop.xlane.xlu0 %1515 }
 0x55d   : > { %9703 = vpow2.f32 %v1533_v4  ;;  %v1526_v6 = vsub.f32 %v1448_v45, %v1516_v5  ;;  %v9387_v4 = vld [vmem:[#allocation10 + $0x8] sm:$0xff]  }
 0x55f   : > { %v1535_v15 = vmul.f32 1.442695, %v1526_v6 }
 0x560   : > { %v1519_v17 = vpop.xlane.xlu0 %1518 }
 0x561   : > { %9705 = vpow2.f32 %v1535_v15  ;;  %v1527_v20 = vsub.f32 %v1498_v29, %v1519_v17 }
 0x562   : > { %9707 = vpow2.f32 %v1539_v10  ;;  %v9388_v10 = vld [vmem:[#allocation10] sm:$0xff]  }
 0x563   : > { %v1537_v22 = vmul.f32 1.442695, %v1527_v20 }
 0x565   : > { %9709 = vpow2.f32 %v1537_v22 }
 0x56a   : > { %v9704_v23 = vpop.eup %9703 }
 0x56b   : > { %v1547_v24 = vsel %vm1141_vm2, %v9704_v23, 0.0 }
 0x56c   : > { %1548 = vadd.xlane.f32.xlu0 %v1547_v24 }
 0x56e   : > { %v9706_v25 = vpop.eup %9705 }
 0x56f   : > { %v1550_v26 = vsel %vm1141_vm2, %v9706_v25, 0.0  ;;  %v9708_v27 = vpop.eup %9707 }
 0x570   : > { %1551 = vadd.xlane.f32.xlu1 %v1550_v26  ;;  %v1556_v32 = vsel %vm1141_vm2, %v9708_v27, 0.0 }
 0x572   : > { %v9710_v30 = vpop.eup %9709 }
 0x573   : > { %v1553_v31 = vsel %vm1141_vm2, %v9710_v30, 0.0 }
 0x574   : > { %1554 = vadd.xlane.f32.xlu0 %v1553_v31  ;;  %1557 = vadd.xlane.f32.xlu1 %v1556_v32 }
 0x585   : > { %1671 = vrot.lane.b32.xlu1 %v10758_v35, %s10356_s3 }
 0x589   : > { %1879 = vrot.lane.b32.xlu1 %v10713_v48, %s10357_s25 }
 0x58a   : > { %1575 = vrot.lane.b32.xlu0 %v10750_v21, %s10356_s3 }
 0x58d   : > { %1981 = vrot.lane.b32.xlu1 %v10732_v8, %s10357_s25 }
 0x58e   : > { %1877 = vrot.lane.b32.xlu0 %v10719_v59, %s10357_s25 }
 0x591   : > { %1930 = vrot.lane.b32.xlu1 %v10721_v60, %s10357_s25 }
 0x592   : > { %1979 = vrot.lane.b32.xlu0 %v10741_v12, %s10357_s25 }
 0x596   : > { %1928 = vrot.lane.b32.xlu0 %v10730_v7, %s10357_s25 }
 0x5c0   : > { %v1543_v36 = vpop.xlane.xlu0 %1542 }
 0x5c4   : > { %v1546_v29 = vpop.xlane.xlu1 %1545 }
 0x5c5   : > { %9711 = vrcp.f32 %v1546_v29 }
 0x5c6   : > { %9713 = vrcp.f32 %v1543_v36 }
 0x5c8   : > { %v1624_v34 = vpop.permute.xlu1 %1623 }
 0x5c9   : > { %8733 = vmatpush3.bf16.msra.mxu0 %v1624_v34 }
 0x5ca   : > { %8744 = vmatprep.subr.bf16.mxu0 %v10354_v3 }
 0x5d2   : > { %v9712_v42 = vpop.eup %9711 }
 0x5d3   : > { %v9714_v46 = vpop.eup %9713  ;;  %v1566_v47 = vmul.f32 %v9712_v42, %v9702_v58  ;;  %v9389_v58 = vld [vmem:[#allocation10 + $0x18] sm:$0xff]  }
 0x5d4   : > { %v1565_v50 = vmul.f32 %v9714_v46, %v10838_v56 }
 0x5d6   : > { %v1571_v51 = vpack.c.bf16 %v1566_v47, %v1565_v50 }
 0x5f5   : > { %v1549_v40 = vpop.xlane.xlu0 %1548 }
 0x5f6   : > { %9715 = vrcp.f32 %v1549_v40 }
 0x5f9   : > { %v1552_v41 = vpop.xlane.xlu1 %1551 }
 0x5fa   : > { %9717 = vrcp.f32 %v1552_v41 }
 0x5fd   : > { %v1555_v43 = vpop.xlane.xlu0 %1554  ;;  %v1558_v45 = vpop.xlane.xlu1 %1557 }
 0x5fe   : > { %9719 = vrcp.f32 %v1555_v43 }
 0x5ff   : > { %9721 = vrcp.f32 %v1558_v45 }
 0x601   : > { %v1576_v49 = vpop.permute.xlu0 %1575  ;;  %v1672_v52 = vpop.permute.xlu1 %1671 }
 0x602   : > { %8727 = vmatpush3.bf16.msra.mxu1 %v1576_v49 }
 0x603   : > { %8738 = vmatprep.subr.bf16.mxu1 %v10354_v3  ;;  %v9716_v53 = vpop.eup %9715 }
 0x604   : > { %v1567_v55 = vmul.f32 %v9716_v53, %v9704_v23 }
 0x605   : > { %8729 = vmatmul.mubr.msk.bf16.vlgmr.msra.gmra.mxu1 %vm1141_vm2, %v1571_v51  ;;  %v1880_v61 = vpop.permute.xlu1 %1879  ;;  %v1878_v20 = vpop.permute.xlu0 %1877 }
 0x606   : > { %8739 = vmatpush3.bf16.msra.mxu1 %v1672_v52  ;;  %8740 = vmatprep.mubr.msk.bf16.mxu1 %vm10355_vm0, %v10354_v3 }
 0x607   : > { %v9718_v54 = vpop.eup %9717  ;;  %8760 = vmatprep.subr.bf16.mxu1 %v10354_v3 }
 0x608   : > { %v1568_v57 = vmul.f32 %v9718_v54, %v9706_v25 }
 0x609   : > { %v1982_v6 = vpop.permute.xlu1 %1981  ;;  %v1980_v9 = vpop.permute.xlu0 %1979 }
 0x60a   : > { %v1572_v56 = vpack.c.bf16 %v1568_v57, %v1567_v55  ;;  %v1987_v45 = vsel %vm999_vm1, %v1982_v6, 0 }
 0x60b   : > { %v9720_v62 = vpop.eup %9719 }
 0x60c   : > { %v9722_v63 = vpop.eup %9721  ;;  %8735 = vmatmul.mubr.msk.bf16.vlgmr.msra.gmra.mxu0 %vm1141_vm2, %v1572_v56  ;;  %v1569_v0 = vmul.f32 %v9720_v62, %v9710_v30 }
 0x60d   : > { %v1570_v1 = vmul.f32 %v9722_v63, %v9708_v27  ;;  %8745 = vmatpush3.bf16.msra.mxu0 %v9389_v58  ;;  %8748 = vmatprep.mubr.msk.bf16.mxu0 %vm10355_vm0, %v10354_v3  ;;  %v1931_v15 = vpop.permute.xlu1 %1930  ;;  %v1929_v11 = vpop.permute.xlu0 %1928 }
 0x60e   : > { %8746 = vmatprep.subr.bf16.mxu0 %v10354_v3  ;;  %v1936_v17 = vsel %vm999_vm1, %v1931_v15, 0 }
 0x60f   : > { %v1573_v5 = vpack.c.bf16 %v1570_v1, %v1569_v0 }
 0x611   : > { %8741 = vmatmul.mubr.msk.bf16.vlgmr.msra.gmra.mxu1 %vm1141_vm2, %v1573_v5 }
 0x612   : > { %8761 = vmatpush3.bf16.msra.mxu1 %v9387_v4  ;;  %8764 = vmatprep.mubr.msk.bf16.mxu1 %vm10355_vm0, %v10354_v3 }
 0x613   : > { %8762 = vmatprep.subr.bf16.mxu1 %v10354_v3 }
 0x616   : > { %8763 = vmatpush3.bf16.msra.mxu1 %v9388_v10 }
 0x617   : > { %8782 = vmatprep.subr.bf16.mxu1 %v10354_v3 }
 0x619   : > { %8765 = vmatmul.mubr.msk.bf16.vlgmr.msra.gmra.mxu1 %vm999_vm1, %v1343_v14  ;;  %v9390_v14 = vld [vmem:[#allocation10 + $0x10] sm:$0xff]  }
 0x61a   : > { %8783 = vmatpush3.bf16.xpose.msra.mxu1 %v1936_v17  ;;  %8768 = vmatprep.mubr.msk.bf16.mxu1 %vm10355_vm0, %v10354_v3 }
 0x61b   : > { %8794 = vmatprep.subr.bf16.mxu1 %v10354_v3  ;;  %8747 = vmatpush3.bf16.msra.mxu0 %v9390_v14 }
 0x61c   : > { %8776 = vmatprep.subr.bf16.mxu0 %v10354_v3 }
 0x621   : > { %8769 = vmatmul.mubr.msk.bf16.gmra.mxu1 %vm999_vm1, %v1344_v19 }
 0x622   : > { %8772 = vmatprep.mubr.msk.bf16.mxu1 %vm10355_vm0, %v10354_v3 }
 0x629   : > { %8773 = vmatmul.mubr.msk.bf16.gmra.mxu1 %vm999_vm1, %v1345_v39  ;;  %v1885_v39 = vsel %vm999_vm1, %v1880_v61, 0 }
 0x62a   : > { %8784 = vmatprep.mubr.msk.bf16.mxu1 %vm10355_vm0, %v10354_v3 }
 0x631   : > { %8785 = vmatmul.mubr.msk.bf16.vlgmr.msra.gmra.mxu1 %vm999_vm1, %v1929_v11 }
 0x632   : > { %8796 = vmatprep.mubr.msk.bf16.mxu1 %vm10355_vm0, %v10354_v3 }
 0x6c5   : > { %v1615_v16 = vpop.f32.mrf.mxu1 }
 0x6c7   : > { %v8730_v18 = vpop.f32.mrf.mxu1 }
 0x6c9   : > { %v1618_v19 = vpop.f32.mrf.mxu1 }
 0x6ca   : > { %v1718_v33 = vpack.c.bf16 %v1618_v19, %v1615_v16 }
 0x6cb   : > { %v8731_v38 = vpop.f32.mrf.mxu1 }
 0x6cc   : > { %v1663_v22 = vpop.f32.mrf.mxu0  ;;  %8749 = vmatmul.mubr.msk.bf16.vlgmr.msra.gmra.mxu0 %vm999_vm1, %v1718_v33 }
 0x6cd   : > { %8777 = vmatpush3.bf16.xpose.msra.mxu0 %v1885_v39  ;;  %8752 = vmatprep.mubr.msk.bf16.mxu0 %vm10355_vm0, %v10354_v3 }
 0x6ce   : > { %v8736_v23 = vpop.f32.mrf.mxu0  ;;  %8788 = vmatprep.subr.bf16.mxu0 %v10354_v3 }
 0x6d0   : > { %v1666_v24 = vpop.f32.mrf.mxu0 }
 0x6d1   : > { %v1719_v25 = vpack.c.bf16 %v1666_v24, %v1663_v22  ;;  %v1711_v26 = vpop.f32.mrf.mxu1 }
 0x6d2   : > { %v8737_v27 = vpop.f32.mrf.mxu0 }
 0x6d3   : > { %v8742_v30 = vpop.f32.mrf.mxu1 }
 0x6d4   : > { %8753 = vmatmul.mubr.msk.bf16.gmra.mxu0 %vm999_vm1, %v1719_v25 }
 0x6d5   : > { %v1714_v31 = vpop.f32.mrf.mxu1  ;;  %8756 = vmatprep.mubr.msk.bf16.mxu0 %vm10355_vm0, %v10354_v3 }
 0x6d6   : > { %v1720_v34 = vpack.c.bf16 %v1714_v31, %v1711_v26 }
 0x6d7   : > { %v8743_v32 = vpop.f32.mrf.mxu1 }
 0x6d9   : > { %v10913_v29 = vpop.f32.mrf.mxu1 }
 0x6db   : > { %v8766_v36 = vpop.f32.mrf.mxu1 }
 0x6dc   : > { %8757 = vmatmul.mubr.msk.bf16.gmra.mxu0 %vm999_vm1, %v1720_v34 }
 0x6dd   : > { %v10916_v40 = vpop.f32.mrf.mxu1  ;;  %8778 = vmatprep.mubr.msk.bf16.mxu0 %vm10355_vm0, %v10354_v3 }
 0x6df   : > { %v8767_v41 = vpop.f32.mrf.mxu1 }
 0x6e1   : > { %v10920_v42 = vpop.f32.mrf.mxu1 }
 0x6e3   : > { %v8770_v43 = vpop.f32.mrf.mxu1 }
 0x6e4   : > { %8779 = vmatmul.mubr.msk.bf16.vlgmr.msra.gmra.mxu0 %vm999_vm1, %v1878_v20 }
 0x6e5   : > { %v10924_v46 = vpop.f32.mrf.mxu1  ;;  %8789 = vmatpush3.bf16.xpose.msra.mxu0 %v1987_v45  ;;  %8790 = vmatprep.mubr.msk.bf16.mxu0 %vm10355_vm0, %v10354_v3 }
 0x6e6   : > { %8800 = vmatprep.subr.bf16.mxu0 %v10354_v3 }
 0x6e7   : > { %v8771_v47 = vpop.f32.mrf.mxu1 }
 0x6e9   : > { %v10929_v49 = vpop.f32.mrf.mxu1 }
 0x6eb   : > { %v8774_v50 = vpop.f32.mrf.mxu1 }
 0x6ec   : > { %8791 = vmatmul.mubr.msk.bf16.vlgmr.msra.gmra.mxu0 %vm999_vm1, %v1980_v9 }
 0x6ed   : > { %v10932_v51 = vpop.f32.mrf.mxu1  ;;  %8802 = vmatprep.mubr.msk.bf16.mxu0 %vm10355_vm0, %v10354_v3 }
 0x6ef   : > { %v8775_v52 = vpop.f32.mrf.mxu1 }
 0x6f1   : > { %v10936_v53 = vpop.f32.mrf.mxu1 }
 0x6f3   : > { %v8786_v54 = vpop.f32.mrf.mxu1 }
 0x6f5   : > { %v10938_v55 = vpop.f32.mrf.mxu1 }
 0x6f7   : > { %v8787_v57 = vpop.f32.mrf.mxu1 }
 0x78c   : > { %v10940_v58 = vpop.f32.mrf.mxu0 }
 0x78e   : > { %v8750_v61 = vpop.f32.mrf.mxu0 }
 0x790   : > { %v10942_v56 = vpop.f32.mrf.mxu0 }
 0x792   : > { %v8751_v62 = vpop.f32.mrf.mxu0 }
 0x794   : > { %v10944_v63 = vpop.f32.mrf.mxu0 }
 0x796   : > { %v8754_v0 = vpop.f32.mrf.mxu0 }
 0x798   : > { %v10946_v1 = vpop.f32.mrf.mxu0 }
 0x79a   : > { %v8755_v4 = vpop.f32.mrf.mxu0 }
 0x79c   : > { %v10948_v5 = vpop.f32.mrf.mxu0 }
 0x79e   : > { %v8758_v6 = vpop.f32.mrf.mxu0 }
 0x7a0   : > { %v10950_v10 = vpop.f32.mrf.mxu0 }
 0x7a2   : > { %v8759_v15 = vpop.f32.mrf.mxu0 }
 0x7a4   : > { %v1921_v17 = vpop.f32.mrf.mxu0 }
 0x7a5   : > { %v2030_v20 = vsel %vm1141_vm2, %v1921_v17, -inf }
 0x7a6   : > { %2031 = vmax.xlane.f32.xlu1 %v2030_v20  ;;  %v8780_v9 = vpop.f32.mrf.mxu0 }
 0x7a8   : > { %v1924_v11 = vpop.f32.mrf.mxu0 }
 0x7a9   : > { %v2033_v14 = vsel %vm1141_vm2, %v1924_v11, -inf }
 0x7aa   : > { %2034 = vmax.xlane.f32.xlu0 %v2033_v14  ;;  %v8781_v16 = vpop.f32.mrf.mxu0 }
 0x7ac   : > { %v2023_v18 = vpop.f32.mrf.mxu0 }
 0x7ad   : > { %v2042_v19 = vsel %vm1141_vm2, %v2023_v18, -inf }
 0x7ae   : > { %2043 = vmax.xlane.f32.xlu0 %v2042_v19  ;;  %v8792_v33 = vpop.f32.mrf.mxu0 }
 0x7b0   : > { %v2026_v38 = vpop.f32.mrf.mxu0 }
 0x7b1   : > { %v2045_v39 = vsel %vm1141_vm2, %v2026_v38, -inf }
 0x7b2   : > { %2046 = vmax.xlane.f32.xlu0 %v2045_v39  ;;  %v8793_v22 = vpop.f32.mrf.mxu0 }
 0x7b7   : > { %2099 = vrot.lane.b32.xlu1 %v10750_v21, %s10357_s25 }
 0x82f   : > { %v2032_v23 = vpop.xlane.xlu1 %2031 }
 0x830   : > { %v2048_v24 = vsub.f32 %v1921_v17, %v2032_v23 }
 0x832   : > { %v2054_v25 = vmul.f32 1.442695, %v2048_v24 }
 0x833   : > { %v2100_v26 = vpop.permute.xlu1 %2099  ;;  %v2035_v27 = vpop.xlane.xlu0 %2034 }
 0x834   : > { %9723 = vpow2.f32 %v2054_v25  ;;  %v2049_v30 = vsub.f32 %v1924_v11, %v2035_v27  ;;  %8795 = vmatpush3.bf16.msra.mxu1 %v2100_v26 }
 0x835   : > { %8806 = vmatprep.subr.bf16.mxu1 %v10354_v3 }
 0x836   : > { %v2056_v31 = vmul.f32 1.442695, %v2049_v30 }
 0x837   : > { %v2044_v32 = vpop.xlane.xlu0 %2043 }
 0x838   : > { %9725 = vpow2.f32 %v2056_v31  ;;  %v2052_v34 = vsub.f32 %v2023_v18, %v2044_v32 }
 0x83a   : > { %v2062_v36 = vmul.f32 1.442695, %v2052_v34 }
 0x83b   : > { %v2047_v41 = vpop.xlane.xlu0 %2046 }
 0x83c   : > { %9727 = vpow2.f32 %v2062_v36  ;;  %v2053_v43 = vsub.f32 %v2026_v38, %v2047_v41 }
 0x83e   : > { %v2064_v45 = vmul.f32 1.442695, %v2053_v43 }
 0x840   : > { %9729 = vpow2.f32 %v2064_v45 }
 0x841   : > { %v9724_v47 = vpop.eup %9723 }
 0x842   : > { %v2066_v50 = vsel %vm1141_vm2, %v9724_v47, 0.0 }
 0x843   : > { %2067 = vadd.xlane.f32.xlu1 %v2066_v50 }
 0x845   : > { %v9726_v52 = vpop.eup %9725 }
 0x846   : > { %v2069_v54 = vsel %vm1141_vm2, %v9726_v52, 0.0 }
 0x847   : > { %2070 = vadd.xlane.f32.xlu0 %v2069_v54 }
 0x849   : > { %v9728_v57 = vpop.eup %9727 }
 0x84a   : > { %v2078_v61 = vsel %vm1141_vm2, %v9728_v57, 0.0 }
 0x84b   : > { %2079 = vadd.xlane.f32.xlu1 %v2078_v61 }
 0x84d   : > { %v9730_v62 = vpop.eup %9729 }
 0x84e   : > { %v2081_v0 = vsel %vm1141_vm2, %v9730_v62, 0.0 }
 0x84f   : > { %2082 = vadd.xlane.f32.xlu0 %v2081_v0 }
 0x85c   : > { %2329 = vrot.lane.b32.xlu1 %v10713_v48, %s10358_s15  ;;  %v2036_v48 = vsel %vm1141_vm2, %v10936_v53, -inf }
 0x860   : > { %2327 = vrot.lane.b32.xlu1 %v10719_v59, %s10358_s15  ;;  %v2039_v59 = vsel %vm1141_vm2, %v10938_v55, -inf }
 0x864   : > { %2380 = vrot.lane.b32.xlu1 %v10721_v60, %s10358_s15 }
 0x865   : > { %2193 = vrot.lane.b32.xlu0 %v10758_v35, %s10357_s25 }
 0x868   : > { %2431 = vrot.lane.b32.xlu1 %v10732_v8, %s10358_s15 }
 0x869   : > { %2378 = vrot.lane.b32.xlu0 %v10730_v7, %s10358_s15 }
 0x86d   : > { %2429 = vrot.lane.b32.xlu0 %v10741_v12, %s10358_s15 }
 0x88c   : > { %2037 = vmax.xlane.f32.xlu1 %v2036_v48  ;;  %2040 = vmax.xlane.f32.xlu0 %v2039_v59 }
 0x89d   : > { %2146 = vrot.lane.b32.xlu1 %v10754_v28, %s10357_s25 }
 0x8cc   : > { %v2068_v60 = vpop.xlane.xlu1 %2067 }
 0x8cd   : > { %9731 = vrcp.f32 %v2068_v60 }
 0x8d0   : > { %v2071_v8 = vpop.xlane.xlu0 %2070 }
 0x8d1   : > { %9733 = vrcp.f32 %v2071_v8 }
 0x8d4   : > { %v2080_v4 = vpop.xlane.xlu1 %2079 }
 0x8d5   : > { %9735 = vrcp.f32 %v2080_v4 }
 0x8d8   : > { %v2083_v7 = vpop.xlane.xlu0 %2082  ;;  %v2330_v14 = vpop.permute.xlu1 %2329 }
 0x8d9   : > { %9737 = vrcp.f32 %v2083_v7  ;;  %v2335_v39 = vsel %vm999_vm1, %v2330_v14, 0 }
 0x8da   : > { %v9732_v12 = vpop.eup %9731 }
 0x8db   : > { %v2090_v15 = vmul.f32 %v9732_v12, %v9724_v47 }
 0x8dc   : > { %v2194_v9 = vpop.permute.xlu0 %2193  ;;  %v2328_v38 = vpop.permute.xlu1 %2327 }
 0x8de   : > { %v9734_v6 = vpop.eup %9733 }
 0x8df   : > { %v2091_v17 = vmul.f32 %v9734_v6, %v9726_v52 }
 0x8e0   : > { %v2381_v22 = vpop.permute.xlu1 %2380  ;;  %v2379_v25 = vpop.permute.xlu0 %2378 }
 0x8e1   : > { %v2096_v20 = vpack.c.bf16 %v2091_v17, %v2090_v15  ;;  %v2386_v23 = vsel %vm999_vm1, %v2381_v22, 0 }
 0x8e2   : > { %v9736_v11 = vpop.eup %9735 }
 0x8e3   : > { %8797 = vmatmul.mubr.msk.bf16.vlgmr.msra.gmra.mxu1 %vm1141_vm2, %v2096_v20  ;;  %v2094_v18 = vmul.f32 %v9736_v11, %v9728_v57 }
 0x8e4   : > { %8807 = vmatpush3.bf16.msra.mxu1 %v2194_v9  ;;  %8808 = vmatprep.mubr.msk.bf16.mxu1 %vm10355_vm0, %v10354_v3  ;;  %v2432_v24 = vpop.permute.xlu1 %2431  ;;  %v2430_v27 = vpop.permute.xlu0 %2429 }
 0x8e5   : > { %8828 = vmatprep.subr.bf16.mxu1 %v10354_v3  ;;  %v2437_v26 = vsel %vm999_vm1, %v2432_v24, 0 }
 0x8e6   : > { %v9738_v16 = vpop.eup %9737 }
 0x8e7   : > { %v2095_v19 = vmul.f32 %v9738_v16, %v9730_v62 }
 0x8e9   : > { %v2098_v33 = vpack.c.bf16 %v2095_v19, %v2094_v18 }
 0x8eb   : > { %8809 = vmatmul.mubr.msk.bf16.vlgmr.msra.gmra.mxu1 %vm1141_vm2, %v2098_v33 }
 0x8ec   : > { %8829 = vmatpush3.bf16.xpose.msra.mxu1 %v2335_v39  ;;  %8830 = vmatprep.mubr.msk.bf16.mxu1 %vm10355_vm0, %v10354_v3 }
 0x8ed   : > { %8834 = vmatprep.subr.bf16.mxu1 %v10354_v3 }
 0x8f3   : > { %8831 = vmatmul.mubr.msk.bf16.vlgmr.msra.gmra.mxu1 %vm999_vm1, %v2328_v38 }
 0x8f4   : > { %8835 = vmatpush3.bf16.xpose.msra.mxu1 %v2386_v23  ;;  %8836 = vmatprep.mubr.msk.bf16.mxu1 %vm10355_vm0, %v10354_v3 }
 0x8f5   : > { %8840 = vmatprep.subr.bf16.mxu1 %v10354_v3 }
 0x8fb   : > { %8837 = vmatmul.mubr.msk.bf16.vlgmr.msra.gmra.mxu1 %vm999_vm1, %v2379_v25  ;;  %v9391_v25 = vld [vmem:[#allocation10 + $0x28] sm:$0xff]  }
 0x8fc   : > { %8841 = vmatpush3.bf16.xpose.msra.mxu1 %v2437_v26  ;;  %8842 = vmatprep.mubr.msk.bf16.mxu1 %vm10355_vm0, %v10354_v3 }
 0x8fd   : > { %8852 = vmatprep.subr.bf16.mxu1 %v10354_v3 }
 0x903   : > { %8843 = vmatmul.mubr.msk.bf16.vlgmr.msra.gmra.mxu1 %vm999_vm1, %v2430_v27 }
 0x904   : > { %8854 = vmatprep.mubr.msk.bf16.mxu1 %vm10355_vm0, %v10354_v3 }
 0x915   : > { %v2038_v30 = vpop.xlane.xlu1 %2037  ;;  %v2041_v31 = vpop.xlane.xlu0 %2040 }
 0x916   : > { %v2050_v32 = vsub.f32 %v10936_v53, %v2038_v30  ;;  %v2051_v34 = vsub.f32 %v10938_v55, %v2041_v31 }
 0x918   : > { %v2058_v36 = vmul.f32 1.442695, %v2050_v32  ;;  %v2060_v41 = vmul.f32 1.442695, %v2051_v34  ;;  %v9392_v32 = vld [vmem:[#allocation10 + $0x20] sm:$0xff]  }
 0x919   : > { %v2147_v43 = vpop.permute.xlu1 %2146 }
 0x91a   : > { %9739 = vpow2.f32 %v2058_v36  ;;  %8801 = vmatpush3.bf16.msra.mxu0 %v2147_v43 }
 0x91b   : > { %8812 = vmatprep.subr.bf16.mxu0 %v10354_v3  ;;  %9741 = vpow2.f32 %v2060_v41 }
 0x927   : > { %v9740_v45 = vpop.eup %9739 }
 0x928   : > { %v2072_v47 = vsel %vm1141_vm2, %v9740_v45, 0.0  ;;  %v9742_v50 = vpop.eup %9741 }
 0x929   : > { %2073 = vadd.xlane.f32.xlu0 %v2072_v47  ;;  %v2075_v52 = vsel %vm1141_vm2, %v9742_v50, 0.0 }
 0x92d   : > { %2076 = vadd.xlane.f32.xlu0 %v2075_v52 }
 0x9a3   : > { %v2139_v54 = vpop.f32.mrf.mxu1 }
 0x9a5   : > { %v8798_v53 = vpop.f32.mrf.mxu1 }
 0x9a7   : > { %v2142_v57 = vpop.f32.mrf.mxu1 }
 0x9a8   : > { %v2240_v34 = vpack.c.bf16 %v2142_v57, %v2139_v54 }
 0x9a9   : > { %v8799_v55 = vpop.f32.mrf.mxu1 }
 0x9ab   : > { %v11010_v61 = vpop.f32.mrf.mxu1 }
 0x9ad   : > { %v8810_v62 = vpop.f32.mrf.mxu1 }
 0x9af   : > { %v11012_v0 = vpop.f32.mrf.mxu1 }
 0x9b0   : > { %v2242_v48 = vpack.c.bf16 %v11012_v0, %v11010_v61 }
 0x9b1   : > { %v8811_v59 = vpop.f32.mrf.mxu1 }
 0x9b2   : > { %v2074_v60 = vpop.xlane.xlu0 %2073 }
 0x9b3   : > { %v2371_v8 = vpop.f32.mrf.mxu1  ;;  %9743 = vrcp.f32 %v2074_v60 }
 0x9b4   : > { %v2480_v4 = vsel %vm1141_vm2, %v2371_v8, -inf }
 0x9b5   : > { %v8832_v7 = vpop.f32.mrf.mxu1  ;;  %2481 = vmax.xlane.f32.xlu0 %v2480_v4 }
 0x9b6   : > { %v2077_v12 = vpop.xlane.xlu0 %2076 }
 0x9b7   : > { %9745 = vrcp.f32 %v2077_v12  ;;  %v2374_v6 = vpop.f32.mrf.mxu1 }
 0x9b8   : > { %v2483_v15 = vsel %vm1141_vm2, %v2374_v6, -inf }
 0x9b9   : > { %v8833_v17 = vpop.f32.mrf.mxu1  ;;  %2484 = vmax.xlane.f32.xlu0 %v2483_v15 }
 0x9bb   : > { %v2422_v20 = vpop.f32.mrf.mxu1 }
 0x9bc   : > { %v2486_v9 = vsel %vm1141_vm2, %v2422_v20, -inf }
 0x9bd   : > { %v8838_v11 = vpop.f32.mrf.mxu1  ;;  %2487 = vmax.xlane.f32.xlu0 %v2486_v9 }
 0x9bf   : > { %v2425_v14 = vpop.f32.mrf.mxu1 }
 0x9c0   : > { %v2489_v16 = vsel %vm1141_vm2, %v2425_v14, -inf  ;;  %v9744_v19 = vpop.eup %9743 }
 0x9c1   : > { %v8839_v18 = vpop.f32.mrf.mxu1  ;;  %2490 = vmax.xlane.f32.xlu0 %v2489_v16  ;;  %v2092_v23 = vmul.f32 %v9744_v19, %v9740_v45 }
 0x9c3   : > { %v2473_v33 = vpop.f32.mrf.mxu1 }
 0x9c4   : > { %v9746_v38 = vpop.eup %9745  ;;  %v2492_v39 = vsel %vm1141_vm2, %v2473_v33, -inf }
 0x9c5   : > { %2493 = vmax.xlane.f32.xlu1 %v2492_v39  ;;  %v8844_v22 = vpop.f32.mrf.mxu1  ;;  %v2093_v24 = vmul.f32 %v9746_v38, %v9742_v50 }
 0x9c7   : > { %v2476_v26 = vpop.f32.mrf.mxu1  ;;  %v2097_v27 = vpack.c.bf16 %v2093_v24, %v2092_v23 }
 0x9c8   : > { %v2495_v30 = vsel %vm1141_vm2, %v2476_v26, -inf }
 0x9c9   : > { %v8845_v31 = vpop.f32.mrf.mxu1  ;;  %2496 = vmax.xlane.f32.xlu0 %v2495_v30  ;;  %8803 = vmatmul.mubr.msk.bf16.vlgmr.msra.gmra.mxu0 %vm1141_vm2, %v2097_v27 }
 0x9ca   : > { %8813 = vmatpush3.bf16.msra.mxu0 %v9391_v25  ;;  %8816 = vmatprep.mubr.msk.bf16.mxu0 %vm10355_vm0, %v10354_v3 }
 0x9cb   : > { %8814 = vmatprep.subr.bf16.mxu0 %v10354_v3 }
 0x9ce   : > { %8815 = vmatpush3.bf16.msra.mxu0 %v9392_v32 }
 0x9cf   : > { %8846 = vmatprep.subr.bf16.mxu0 %v10354_v3 }
 0x9d1   : > { %8817 = vmatmul.mubr.msk.bf16.vlgmr.msra.gmra.mxu0 %vm999_vm1, %v2240_v34 }
 0x9d2   : > { %8820 = vmatprep.mubr.msk.bf16.mxu0 %vm10355_vm0, %v10354_v3 }
 0x9d6   : > { %2596 = vrot.lane.b32.xlu1 %v10754_v28, %s10358_s15 }
 0x9df   : > { %2549 = vrot.lane.b32.xlu0 %v10750_v21, %s10358_s15 }
 0xa3e   : > { %v2482_v36 = vpop.xlane.xlu0 %2481 }
 0xa3f   : > { %v2498_v41 = vsub.f32 %v2371_v8, %v2482_v36 }
 0xa41   : > { %v2504_v43 = vmul.f32 1.442695, %v2498_v41 }
 0xa42   : > { %v2485_v45 = vpop.xlane.xlu0 %2484 }
 0xa43   : > { %9747 = vpow2.f32 %v2504_v43  ;;  %v2499_v47 = vsub.f32 %v2374_v6, %v2485_v45 }
 0xa45   : > { %v2506_v50 = vmul.f32 1.442695, %v2499_v47 }
 0xa46   : > { %v2488_v52 = vpop.xlane.xlu0 %2487 }
 0xa47   : > { %9749 = vpow2.f32 %v2506_v50  ;;  %v2500_v54 = vsub.f32 %v2422_v20, %v2488_v52 }
 0xa49   : > { %v2508_v53 = vmul.f32 1.442695, %v2500_v54 }
 0xa4a   : > { %v2491_v57 = vpop.xlane.xlu0 %2490 }
 0xa4b   : > { %9751 = vpow2.f32 %v2508_v53  ;;  %v2501_v55 = vsub.f32 %v2425_v14, %v2491_v57 }
 0xa4d   : > { %v2510_v62 = vmul.f32 1.442695, %v2501_v55 }
 0xa4e   : > { %v2494_v59 = vpop.xlane.xlu1 %2493 }
 0xa4f   : > { %9753 = vpow2.f32 %v2510_v62  ;;  %v2502_v28 = vsub.f32 %v2473_v33, %v2494_v59 }
 0xa50   : > { %v9748_v60 = vpop.eup %9747 }
 0xa51   : > { %v2512_v21 = vmul.f32 1.442695, %v2502_v28  ;;  %v2516_v8 = vsel %vm1141_vm2, %v9748_v60, 0.0 }
 0xa52   : > { %v2597_v4 = vpop.permute.xlu1 %2596  ;;  %2517 = vadd.xlane.f32.xlu0 %v2516_v8  ;;  %v2497_v7 = vpop.xlane.xlu0 %2496  ;;  %v9393_v8 = vld [vmem:[#allocation10 + $0x38] sm:$0xff]  }
 0xa53   : > { %9755 = vpow2.f32 %v2512_v21  ;;  %v2503_v12 = vsub.f32 %v2476_v26, %v2497_v7  ;;  %8853 = vmatpush3.bf16.msra.mxu1 %v2597_v4  ;;  %v1855_v26 = vadd.f32 %v10913_v29, %v10940_v58  ;;  %v9394_v4 = vld [vmem:[#allocation10 + $0x30] sm:$0xff]   ;;  %v1863_v7 = vadd.f32 %v10920_v42, %v10944_v63 }
 0xa54   : > { %v9750_v6 = vpop.eup %9749  ;;  %8864 = vmatprep.subr.bf16.mxu1 %v10354_v3 }
 0xa55   : > { %v2514_v15 = vmul.f32 1.442695, %v2503_v12  ;;  %v2519_v17 = vsel %vm1141_vm2, %v9750_v6, 0.0 }
 0xa56   : > { %2520 = vadd.xlane.f32.xlu0 %v2519_v17  ;;  %v2550_v20 = vpop.permute.xlu0 %2549  ;;  %v1866_v17 = vadd.f32 %v10924_v46, %v10946_v1 }
 0xa57   : > { %9757 = vpow2.f32 %v2514_v15  ;;  %8847 = vmatpush3.bf16.msra.mxu0 %v2550_v20 }
 0xa58   : > { %v9752_v9 = vpop.eup %9751  ;;  %8858 = vmatprep.subr.bf16.mxu0 %v10354_v3 }
 0xa59   : > { %v2522_v11 = vsel %vm1141_vm2, %v9752_v9, 0.0 }
 0xa5a   : > { %2523 = vadd.xlane.f32.xlu0 %v2522_v11 }
 0xa5c   : > { %v9754_v14 = vpop.eup %9753 }
 0xa5d   : > { %v2525_v16 = vsel %vm1141_vm2, %v9754_v14, 0.0 }
 0xa5e   : > { %2526 = vadd.xlane.f32.xlu0 %v2525_v16 }
 0xa60   : > { %v9756_v18 = vpop.eup %9755 }
 0xa61   : > { %v2528_v19 = vsel %vm1141_vm2, %v9756_v18, 0.0 }
 0xa62   : > { %2529 = vadd.xlane.f32.xlu0 %v2528_v19 }
 0xa64   : > { %v9758_v33 = vpop.eup %9757 }
 0xa65   : > { %v2531_v38 = vsel %vm1141_vm2, %v9758_v33, 0.0 }
 0xa66   : > { %2532 = vadd.xlane.f32.xlu0 %v2531_v38 }
 0xa7c   : > { %2643 = vrot.lane.b32.xlu0 %v10758_v35, %s10358_s15  ;;  %v1858_v35 = vadd.f32 %v10916_v40, %v10942_v56 }
 0xa89   : > { %v2186_v39 = vpop.f32.mrf.mxu0 }
 0xa8b   : > { %v8804_v22 = vpop.f32.mrf.mxu0 }
 0xa8d   : > { %v2189_v23 = vpop.f32.mrf.mxu0 }
 0xa8e   : > { %v2241_v24 = vpack.c.bf16 %v2189_v23, %v2186_v39 }
 0xa8f   : > { %v8805_v25 = vpop.f32.mrf.mxu0 }
 0xa90   : > { %8821 = vmatmul.mubr.msk.bf16.gmra.mxu0 %vm999_vm1, %v2241_v24 }
 0xa91   : > { %v2298_v27 = vpop.f32.mrf.mxu0  ;;  %8824 = vmatprep.mubr.msk.bf16.mxu0 %vm10355_vm0, %v10354_v3 }
 0xa92   : > { %v11049_v30 = vadd.f32 %v2298_v27, %v1855_v26 }
 0xa93   : > { %v8818_v31 = vpop.f32.mrf.mxu0 }
 0xa95   : > { %v2301_v32 = vpop.f32.mrf.mxu0 }
 0xa96   : > { %v11053_v34 = vadd.f32 %v2301_v32, %v1858_v35 }
 0xa97   : > { %v8819_v36 = vpop.f32.mrf.mxu0 }
 0xa98   : > { %8825 = vmatmul.mubr.msk.bf16.gmra.mxu0 %vm999_vm1, %v2242_v48  ;;  %v8045_v36 = vld [vmem:[%s11800_s5] ss:$0 sm:$0xff] }
 0xa99   : > { %8848 = vmatprep.mubr.msk.bf16.mxu0 %vm10355_vm0, %v10354_v3 }
 0xadb   : > { %v2518_v29 = vpop.xlane.xlu0 %2517 }
 0xadc   : > { %9759 = vrcp.f32 %v2518_v29 }
 0xadf   : > { %v2521_v58 = vpop.xlane.xlu0 %2520 }
 0xae0   : > { %9761 = vrcp.f32 %v2521_v58 }
 0xae3   : > { %v2524_v41 = vpop.xlane.xlu0 %2523 }
 0xae4   : > { %9763 = vrcp.f32 %v2524_v41 }
 0xae7   : > { %v2527_v43 = vpop.xlane.xlu0 %2526 }
 0xae8   : > { %9765 = vrcp.f32 %v2527_v43 }
 0xae9   : > { %v9760_v40 = vpop.eup %9759 }
 0xaea   : > { %v2540_v47 = vmul.f32 %v9760_v40, %v9748_v60 }
 0xaeb   : > { %v2530_v56 = vpop.xlane.xlu0 %2529 }
 0xaec   : > { %9767 = vrcp.f32 %v2530_v56  ;;  %v9931_v56 = vld [vmem:[%s10649_s1] sm:$0xff] }
 0xaed   : > { %v9762_v45 = vpop.eup %9761 }
 0xaee   : > { %v2541_v50 = vmul.f32 %v9762_v45, %v9750_v6 }
 0xaef   : > { %v2533_v61 = vpop.xlane.xlu0 %2532 }
 0xaf0   : > { %9769 = vrcp.f32 %v2533_v61  ;;  %v2546_v0 = vpack.c.bf16 %v2541_v50, %v2540_v47 }
 0xaf1   : > { %v9764_v48 = vpop.eup %9763 }
 0xaf2   : > { %8849 = vmatmul.mubr.msk.bf16.vlgmr.msra.gmra.mxu0 %vm1141_vm2, %v2546_v0  ;;  %v2542_v53 = vmul.f32 %v9764_v48, %v9752_v9  ;;  %v9932_v48 = vld [vmem:[%s10649_s1 + $0x8] sm:$0xff] }
 0xaf3   : > { %v2644_v52 = vpop.permute.xlu0 %2643  ;;  %8860 = vmatprep.mubr.msk.bf16.mxu0 %vm10355_vm0, %v10354_v3 }
 0xaf4   : > { %8859 = vmatpush3.bf16.msra.mxu0 %v2644_v52 }
 0xaf5   : > { %v9766_v54 = vpop.eup %9765 }
 0xaf6   : > { %v2543_v57 = vmul.f32 %v9766_v54, %v9754_v14  ;;  %v1871_v14 = vadd.f32 %v10929_v49, %v10948_v5 }
 0xaf8   : > { %v2547_v55 = vpack.c.bf16 %v2543_v57, %v2542_v53 }
 0xaf9   : > { %v9768_v62 = vpop.eup %9767 }
 0xafa   : > { %8855 = vmatmul.mubr.msk.bf16.vlgmr.msra.gmra.mxu1 %vm1141_vm2, %v2547_v55  ;;  %v2544_v28 = vmul.f32 %v9768_v62, %v9756_v18  ;;  %v9933_v55 = vld [vmem:[%s10649_s1 + $0x10] sm:$0xff] }
 0xafb   : > { %8868 = vmatprep.mubr.msk.bf16.mxu1 %vm10355_vm0, %v10354_v3  ;;  %8865 = vmatpush3.bf16.msra.mxu1 %v9393_v8 }
 0xafc   : > { %8866 = vmatprep.subr.bf16.mxu1 %v10354_v3 }
 0xafd   : > { %v9770_v59 = vpop.eup %9769 }
 0xafe   : > { %v2545_v60 = vmul.f32 %v9770_v59, %v9758_v33  ;;  %v1874_v33 = vadd.f32 %v10932_v51, %v10950_v10 }
 0xaff   : > { %8867 = vmatpush3.bf16.msra.mxu1 %v9394_v4 }
 0xb00   : > { %v2548_v21 = vpack.c.bf16 %v2545_v60, %v2544_v28 }
 0xb02   : > { %8861 = vmatmul.mubr.msk.bf16.vlgmr.msra.gmra.mxu0 %vm1141_vm2, %v2548_v21  ;;  %v9934_v21 = vld [vmem:[%s10649_s1 + $0x18] sm:$0xff] }
 0xb03   : > { %3032 = vmatprep.mubr.bf16.mxu0 %v10353_v2 }
 0xb50   : > { %v2306_v12 = vpop.f32.mrf.mxu0 }
 0xb51   : > { %v2323_v6 = vadd.f32 %v2306_v12, %v1863_v7 }
 0xb52   : > { %v8822_v15 = vpop.f32.mrf.mxu0 }
 0xb53   : > { %v9935_v15 = vld [vmem:[%s10649_s1 + $0x20] sm:$0xff] }
 0xb54   : > { %v2309_v20 = vpop.f32.mrf.mxu0 }
 0xb55   : > { %v2324_v9 = vadd.f32 %v2309_v20, %v1866_v17 }
 0xb56   : > { %v8823_v11 = vpop.f32.mrf.mxu0 }
 0xb58   : > { %v2314_v16 = vpop.f32.mrf.mxu0 }
 0xb59   : > { %v2325_v18 = vadd.f32 %v2314_v16, %v1871_v14  ;;  %v9395_v16 = vld [vmem:[#allocation15 + $0x70] ss:$8 sps:$4 sm:$0xff]  }
 0xb5a   : > { %v8826_v19 = vpop.f32.mrf.mxu0 }
 0xb5b   : > { %v9397_v19 = vld [vmem:[#allocation15 + $0x74] ss:$8 sps:$4 sm:$0xff]  }
 0xb5c   : > { %v2317_v38 = vpop.f32.mrf.mxu0  ;;  %3000 = vmatprep.subr.bf16.mxu0 %v9397_v19 }
 0xb5d   : > { %v2326_v42 = vadd.f32 %v2317_v38, %v1874_v33  ;;  %3001 = vmatpush1.bf16.msra.mxu0 %v9395_v16 }
 0xb5e   : > { %v8827_v63 = vpop.f32.mrf.mxu0 }
 0xbb2   : > { %v2589_v39 = vpop.f32.mrf.mxu0 }
 0xbb4   : > { %v8850_v22 = vpop.f32.mrf.mxu0 }
 0xbb6   : > { %v2592_v23 = vpop.f32.mrf.mxu0 }
 0xbb7   : > { %v2690_v24 = vpack.c.bf16 %v2592_v23, %v2589_v39 }
 0xbb8   : > { %v8851_v46 = vpop.f32.mrf.mxu0 }
 0xbb9   : > { %8869 = vmatmul.mubr.msk.bf16.vlgmr.msra.gmra.mxu1 %vm999_vm1, %v2690_v24 }
 0xbba   : > { %v2636_v1 = vpop.f32.mrf.mxu1  ;;  %8872 = vmatprep.mubr.msk.bf16.mxu1 %vm10355_vm0, %v10354_v3 }
 0xbbc   : > { %v8856_v49 = vpop.f32.mrf.mxu1 }
 0xbbe   : > { %v2639_v5 = vpop.f32.mrf.mxu1 }
 0xbbf   : > { %v2691_v25 = vpack.c.bf16 %v2639_v5, %v2636_v1 }
 0xbc0   : > { %v8857_v26 = vpop.f32.mrf.mxu1 }
 0xbc1   : > { %8873 = vmatmul.mubr.msk.bf16.gmra.mxu1 %vm999_vm1, %v2691_v25 }
 0xbc2   : > { %v2683_v51 = vpop.f32.mrf.mxu0  ;;  %8876 = vmatprep.mubr.msk.bf16.mxu1 %vm10355_vm0, %v10354_v3 }
 0xbc4   : > { %v8862_v10 = vpop.f32.mrf.mxu0 }
 0xbc6   : > { %v2686_v27 = vpop.f32.mrf.mxu0 }
 0xbc7   : > { %v2692_v31 = vpack.c.bf16 %v2686_v27, %v2683_v51 }
 0xbc8   : > { %v8863_v35 = vpop.f32.mrf.mxu0 }
 0xbc9   : > { %8877 = vmatmul.mubr.msk.bf16.gmra.mxu1 %vm999_vm1, %v2692_v31  ;;  %v9400_v35 = vld [vmem:[#allocation15 + $0x64] ss:$8 sps:$4 sm:$0xff]  }
 0xbca   : > { %3002 = vmatprep.subr.bf16.mxu0 %v9400_v35 }
 0xc79   : > { %v2748_v32 = vpop.f32.mrf.mxu1 }
 0xc7a   : > { %v2771_v29 = vadd.f32 %v2748_v32, %v11049_v30 }
 0xc7b   : > { %v8870_v58 = vpop.f32.mrf.mxu1 }
 0xc7c   : > { %v2784_v41 = vadd.f32 %v8045_v36, %v2771_v29 }
 0xc7d   : > { %v2751_v43 = vpop.f32.mrf.mxu1 }
 0xc7e   : > { %v2772_v40 = vadd.f32 %v2751_v43, %v11053_v34  ;;  %v2790_v45 = vadd.f32 %v9931_v56, %v2784_v41  ;;  %v9403_v43 = vld [vmem:[#allocation15 + $0x54] ss:$8 sps:$4 sm:$0xff]  }
 0xc7f   : > { %v8871_v47 = vpop.f32.mrf.mxu1 }
 0xc80   : > { %v2785_v50 = vadd.f32 %v8045_v36, %v2772_v40  ;;  %2798 = vadd.xlane.f32.xlu1 %v2790_v45  ;;  %v9401_v40 = vld [vmem:[#allocation15 + $0x50] ss:$8 sps:$4 sm:$0xff]   ;;  %v9404_v47 = vld [vmem:[#allocation15 + $0x40] ss:$8 sps:$4 sm:$0xff]  }
 0xc81   : > { %v2756_v61 = vpop.f32.mrf.mxu1 }
 0xc82   : > { %v2773_v0 = vadd.f32 %v2756_v61, %v2323_v6  ;;  %v2791_v52 = vadd.f32 %v9932_v48, %v2785_v50  ;;  %v9409_v50 = vld [vmem:[#allocation15 + $0x34] ss:$8 sps:$4 sm:$0xff]   ;;  %v9407_v61 = vld [vmem:[#allocation15 + $0x30] ss:$8 sps:$4 sm:$0xff]   ;;  %v9410_v48 = vld [vmem:[#allocation15 + $0x20] ss:$8 sps:$4 sm:$0xff]  }
 0xc83   : > { %v8874_v54 = vpop.f32.mrf.mxu1 }
 0xc84   : > { %v2786_v53 = vadd.f32 %v8045_v36, %v2773_v0  ;;  %2800 = vadd.xlane.f32.xlu0 %v2791_v52  ;;  %v9412_v0 = vld [vmem:[#allocation15 + $0x24] ss:$8 sps:$4 sm:$0xff]   ;;  %v9413_v54 = vld [vmem:[#allocation15 + $0x10] ss:$8 sps:$4 sm:$0xff]  }
 0xc85   : > { %v2759_v30 = vpop.f32.mrf.mxu1 }
 0xc86   : > { %v2774_v57 = vadd.f32 %v2759_v30, %v2324_v9  ;;  %v2792_v62 = vadd.f32 %v9933_v55, %v2786_v53  ;;  %v9936_v9 = vld [vmem:[%s10649_s1 + $0x28] sm:$0xff]  ;;  %s10359_s1 = smov [#allocation21]  }
 0xc87   : > { %v8875_v59 = vpop.f32.mrf.mxu1  ;;  %v9418_v53 = vld [vmem:[#allocation15 + $0x4] ss:$8 sps:$4 sm:$0xff]   ;;  %v9416_v30 = vld [vmem:[#allocation15] ss:$8 sps:$4 sm:$0xff]   ;;  %s10214_s23 = sshll.u32 %s10359_s1, 4  ;;  %s10215_s23 = int_to_ptr.vmem [resolvable:$false] %s10214_s23 }
 0xc88   : > { %v2787_v34 = vadd.f32 %v8045_v36, %v2774_v57  ;;  %2802 = vadd.xlane.f32.xlu0 %v2792_v62  ;;  %v9419_v57 = vld [vmem:[#allocation18 + $0x78] sm:$0xff]   ;;  %v9422_v59 = vld [vmem:[#allocation18 + $0x30] sm:$0xff]   ;;  %s10216_s14 = scalar_lea.vmem %s10215_s23, 512 }
 0xc89   : > { %v2764_v28 = vpop.f32.mrf.mxu1  ;;  %v9420_v55 = vld [vmem:[#allocation18 + $0x38] sm:$0xff]   ;;  %8433 = vmatprep.subr.bf16.mxu1 %v9419_v57  ;;  %v9430_v57 = vld [vmem:[#allocation18 + $0x10] sm:$0xff]  }
 0xc8a   : > { %v2775_v60 = vadd.f32 %v2764_v28, %v2325_v18  ;;  %v2793_v8 = vadd.f32 %v9934_v21, %v2787_v34  ;;  %8434 = vmatpush3.bf16.msra.mxu1 %v9420_v55  ;;  %v9423_v34 = vld [vmem:[#allocation18 + $0x68] sm:$0xff]   ;;  %v9426_v21 = vld [vmem:[#allocation18 + $0x20] sm:$0xff]  }
 0xc8b   : > { %v8878_v4 = vpop.f32.mrf.mxu1  ;;  %v9424_v28 = vld [vmem:[#allocation18 + $0x28] sm:$0xff]  }
 0xc8c   : > { %v2788_v7 = vadd.f32 %v8045_v36, %v2775_v60  ;;  %2804 = vadd.xlane.f32.xlu1 %v2793_v8  ;;  %v9425_v60 = vld [vmem:[#allocation18 + $0x60] sm:$0xff]   ;;  %v9428_v4 = vld [vmem:[#allocation18 + $0x18] sm:$0xff]   ;;  %v9431_v55 = vld [vmem:[#allocation18 + $0x48] sm:$0xff]  }
 0xc8d   : > { %v2767_v12 = vpop.f32.mrf.mxu1 }
 0xc8e   : > { %v2776_v6 = vadd.f32 %v2767_v12, %v2326_v42  ;;  %v2794_v17 = vadd.f32 %v9935_v15, %v2788_v7 }
 0xc8f   : > { %v8879_v20 = vpop.f32.mrf.mxu1 }
 0xc90   : > { %v2789_v11 = vadd.f32 %v8045_v36, %v2776_v6  ;;  %2806 = vadd.xlane.f32.xlu0 %v2794_v17  ;;  %v9398_v36 = vld [vmem:[#allocation15 + $0x60] ss:$8 sps:$4 sm:$0xff]  }
 0xc91   : > { %3003 = vmatpush1.bf16.msra.mxu0 %v9398_v36 }
 0xc92   : > { %v2795_v14 = vadd.f32 %v9936_v9, %v2789_v11  ;;  %3004 = vmatprep.subr.bf16.mxu0 %v9403_v43 }
 0xc94   : > { %2808 = vadd.xlane.f32.xlu1 %v2795_v14 }
 0xc95   : > { %3005 = vmatpush1.bf16.msra.mxu0 %v9401_v40 }
 0xd09   : > { %v2799_v18 = vpop.xlane.xlu1 %2798 }
 0xd0a   : > { %v2811_v33 = vmul.f32 0.0078125, %v2799_v18 }
 0xd0c   : > { %v11096_v38 = vsub.f32 %v2790_v45, %v2811_v33  ;;  %v9406_v45 = vld [vmem:[#allocation15 + $0x44] ss:$8 sps:$4 sm:$0xff]  }
 0xd0d   : > { %v2801_v63 = vpop.xlane.xlu0 %2800  ;;  %3006 = vmatprep.subr.bf16.mxu0 %v9406_v45 }
 0xd0e   : > { %v2812_v39 = vmul.f32 0.0078125, %v2801_v63  ;;  %v2823_v42 = vmul.f32 %v11096_v38, %v11096_v38  ;;  %3007 = vmatpush1.bf16.msra.mxu0 %v9404_v47 }
 0xd0f   : > { %3008 = vmatprep.subr.bf16.mxu0 %v9409_v50 }
 0xd10   : > { %2829 = vadd.xlane.f32.xlu0 %v2823_v42  ;;  %v11100_v22 = vsub.f32 %v2791_v52, %v2812_v39  ;;  %v9415_v52 = vld [vmem:[#allocation15 + $0x14] ss:$8 sps:$4 sm:$0xff]  }
 0xd11   : > { %v2803_v23 = vpop.xlane.xlu0 %2802 }
 0xd12   : > { %v2813_v24 = vmul.f32 0.0078125, %v2803_v23  ;;  %v2824_v46 = vmul.f32 %v11100_v22, %v11100_v22  ;;  %3009 = vmatpush1.bf16.msra.mxu0 %v9407_v61 }
 0xd13   : > { %3010 = vmatprep.subr.bf16.mxu0 %v9412_v0 }
 0xd14   : > { %2831 = vadd.xlane.f32.xlu1 %v2824_v46  ;;  %v11104_v1 = vsub.f32 %v2792_v62, %v2813_v24  ;;  %v9421_v62 = vld [vmem:[#allocation18 + $0x70] sm:$0xff]   ;;  %v8046_v46 = vld [vmem:[%s11801_s6] ss:$0 sm:$0xff] }
 0xd15   : > { %v2805_v49 = vpop.xlane.xlu1 %2804  ;;  %8435 = vmatprep.subr.bf16.mxu1 %v9421_v62  ;;  %v9433_v62 = vld [vmem:[#allocation18 + $0x40] sm:$0xff]  }
 0xd16   : > { %v2814_v5 = vmul.f32 0.0078125, %v2805_v49  ;;  %v2825_v25 = vmul.f32 %v11104_v1, %v11104_v1  ;;  %3011 = vmatpush1.bf16.msra.mxu0 %v9410_v48  ;;  %8436 = vmatpush3.bf16.msra.mxu1 %v9422_v59  ;;  %v9434_v59 = vld [vmem:[#allocation18] sm:$0xff]  }
 0xd17   : > { %3012 = vmatprep.subr.bf16.mxu0 %v9415_v52  ;;  %8437 = vmatprep.subr.bf16.mxu1 %v9423_v34  ;;  %v2908_v34 = vld [vmem:[#allocation16] sm:$0x3] }
 0xd18   : > { %2833 = vadd.xlane.f32.xlu0 %v2825_v25  ;;  %v11108_v26 = vsub.f32 %v2793_v8, %v2814_v5  ;;  %v9427_v8 = vld [vmem:[#allocation18 + $0x58] sm:$0xff]  }
 0xd19   : > { %v2807_v51 = vpop.xlane.xlu0 %2806 }
 0xd1a   : > { %v2815_v10 = vmul.f32 0.0078125, %v2807_v51  ;;  %v2826_v27 = vmul.f32 %v11108_v26, %v11108_v26  ;;  %3013 = vmatpush1.bf16.msra.mxu0 %v9413_v54  ;;  %8438 = vmatpush3.bf16.msra.mxu1 %v9424_v28 }
 0xd1b   : > { %3014 = vmatprep.subr.bf16.mxu0 %v9418_v53  ;;  %8439 = vmatprep.subr.bf16.mxu1 %v9425_v60  ;;  %v2917_v60 = vrot.slane %v2908_v34, %v10708_v37 }
 0xd1c   : > { %2835 = vadd.xlane.f32.xlu1 %v2826_v27  ;;  %v11112_v31 = vsub.f32 %v2794_v17, %v2815_v10  ;;  %v8047_v27 = vld [vmem:[#allocation12] ss:$0 sm:$0xff] }
 0xd1d   : > { %v2809_v32 = vpop.xlane.xlu1 %2808 }
 0xd1e   : > { %v2816_v29 = vmul.f32 0.0078125, %v2809_v32  ;;  %v2827_v58 = vmul.f32 %v11112_v31, %v11112_v31  ;;  %3015 = vmatpush1.bf16.msra.mxu0 %v9416_v30  ;;  %8440 = vmatpush3.bf16.msra.mxu1 %v9426_v21  ;;  %v2913_v21 = vrot.slane %v2908_v34, %v10711_v44 }
 0xd1f   : > { %8441 = vmatprep.subr.bf16.mxu1 %v9427_v8 }
 0xd20   : > { %2837 = vadd.xlane.f32.xlu0 %v2827_v58  ;;  %v11116_v41 = vsub.f32 %v2795_v14, %v2816_v29 }
 0xd22   : > { %v2828_v56 = vmul.f32 %v11116_v41, %v11116_v41  ;;  %8442 = vmatpush3.bf16.msra.mxu1 %v9428_v4 }
 0xd24   : > { %2839 = vadd.xlane.f32.xlu1 %v2828_v56 }
 0xd99   : > { %v2830_v7 = vpop.xlane.xlu0 %2829 }
 0xd9a   : > { %v2841_v12 = vmul.f32 0.0078125, %v2830_v7 }
 0xd9c   : > { %v2847_v6 = vadd.f32 1e-05, %v2841_v12 }
 0xd9d   : > { %v2832_v15 = vpop.xlane.xlu1 %2831 }
 0xd9e   : > { %9771 = vrsqrt.f32 %v2847_v6  ;;  %v2842_v17 = vmul.f32 0.0078125, %v2832_v15 }
 0xda0   : > { %v2848_v20 = vadd.f32 1e-05, %v2842_v17 }
 0xda1   : > { %v2834_v11 = vpop.xlane.xlu0 %2833 }
 0xda2   : > { %9773 = vrsqrt.f32 %v2848_v20  ;;  %v2843_v9 = vmul.f32 0.0078125, %v2834_v11 }
 0xda4   : > { %v2849_v14 = vadd.f32 1e-05, %v2843_v9 }
 0xda5   : > { %v2836_v16 = vpop.xlane.xlu1 %2835 }
 0xda6   : > { %9775 = vrsqrt.f32 %v2849_v14  ;;  %v2844_v19 = vmul.f32 0.0078125, %v2836_v16 }
 0xda8   : > { %v2850_v18 = vadd.f32 1e-05, %v2844_v19 }
 0xda9   : > { %v2838_v33 = vpop.xlane.xlu0 %2837 }
 0xdaa   : > { %9777 = vrsqrt.f32 %v2850_v18  ;;  %v2845_v63 = vmul.f32 0.0078125, %v2838_v33 }
 0xdab   : > { %v9772_v39 = vpop.eup %9771 }
 0xdac   : > { %v2851_v42 = vadd.f32 1e-05, %v2845_v63  ;;  %v2859_v23 = vmul.f32 %v9772_v39, %v11096_v38 }
 0xdad   : > { %v2840_v24 = vpop.xlane.xlu1 %2839 }
 0xdae   : > { %9779 = vrsqrt.f32 %v2851_v42  ;;  %v2846_v49 = vmul.f32 0.0078125, %v2840_v24  ;;  %v2871_v10 = vmul.f32 %v8046_v46, %v2859_v23 }
 0xdaf   : > { %v9774_v5 = vpop.eup %9773 }
 0xdb0   : > { %v2852_v25 = vadd.f32 1e-05, %v2846_v49  ;;  %v2860_v51 = vmul.f32 %v9774_v5, %v11100_v22  ;;  %v11125_v36 = vadd.f32 %v8047_v27, %v2871_v10 }
 0xdb2   : > { %9781 = vrsqrt.f32 %v2852_v25  ;;  %v2872_v35 = vmul.f32 %v8046_v46, %v2860_v51 }
 0xdb3   : > { %v9776_v32 = vpop.eup %9775 }
 0xdb4   : > { %v11127_v29 = vadd.f32 %v8047_v27, %v2872_v35  ;;  %v2861_v38 = vmul.f32 %v9776_v32, %v11104_v1 }
 0xdb6   : > { %v2889_v58 = vpack.c.bf16 %v11127_v29, %v11125_v36  ;;  %v2873_v56 = vmul.f32 %v8046_v46, %v2861_v38 }
 0xdb7   : > { %v9778_v43 = vpop.eup %9777 }
 0xdb8   : > { %3033 = vmatmul.mubr.bf16.vlgmr.msra.gmra.mxu0 %v2889_v58  ;;  %v2862_v40 = vmul.f32 %v9778_v43, %v11108_v26  ;;  %v11134_v47 = vadd.f32 %v8047_v27, %v2873_v56 }
 0xdb9   : > { %3042 = vmatprep.mubr.bf16.mxu0 %v10353_v2 }
 0xdba   : > { %v2874_v22 = vmul.f32 %v8046_v46, %v2862_v40 }
 0xdbb   : > { %v9780_v45 = vpop.eup %9779 }
 0xdbc   : > { %v11136_v50 = vadd.f32 %v8047_v27, %v2874_v22  ;;  %v2863_v61 = vmul.f32 %v9780_v45, %v11112_v31  ;;  %v9429_v31 = vld [vmem:[#allocation18 + $0x50] sm:$0xff]  }
 0xdbd   : > { %8443 = vmatprep.subr.bf16.mxu1 %v9429_v31 }
 0xdbe   : > { %v2890_v1 = vpack.c.bf16 %v11136_v50, %v11134_v47  ;;  %v2875_v52 = vmul.f32 %v8046_v46, %v2863_v61  ;;  %8444 = vmatpush3.bf16.msra.mxu1 %v9430_v57 }
 0xdbf   : > { %v9782_v0 = vpop.eup %9781  ;;  %8445 = vmatprep.subr.bf16.mxu1 %v9431_v55 }
 0xdc0   : > { %3043 = vmatmul.mubr.bf16.gmra.mxu0 %v2890_v1  ;;  %v2864_v48 = vmul.f32 %v9782_v0, %v11116_v41  ;;  %v11143_v54 = vadd.f32 %v8047_v27, %v2875_v52  ;;  %v9432_v41 = vld [vmem:[#allocation18 + $0x8] sm:$0xff]  }
 0xdc1   : > { %3052 = vmatprep.mubr.bf16.mxu0 %v10353_v2 }
 0xdc2   : > { %v2876_v26 = vmul.f32 %v8046_v46, %v2864_v48  ;;  %8446 = vmatpush3.bf16.msra.mxu1 %v9432_v41 }
 0xdc3   : > { %8447 = vmatprep.subr.bf16.mxu1 %v9433_v62 }
 0xdc4   : > { %v11145_v53 = vadd.f32 %v8047_v27, %v2876_v26 }
 0xdc6   : > { %v2891_v30 = vpack.c.bf16 %v11145_v53, %v11143_v54  ;;  %8448 = vmatpush3.bf16.msra.mxu1 %v9434_v59 }
 0xdc7   : > { %8880 = vmatprep.subr.bf16.mxu1 %v10354_v3 }
 0xdc8   : > { %3053 = vmatmul.mubr.bf16.gmra.mxu0 %v2891_v30  ;;  %v8064_v30 = vld [vmem:[#allocation19] ss:$0 sm:$0xff] }
 0xdc9   : > { %3601 = vmatprep.mubr.bf16.mxu0 %v10353_v2 }
 0xe78   : > { %v3034_v28 = vpop.f32.mrf.mxu0 }
 0xe79   : > { %v3035_v6 = vadd.f32 %v3034_v28, %v2913_v21 }
 0xe7a   : > { %v3036_v8 = vpop.f32.mrf.mxu0 }
 0xe7b   : > { %v3037_v7 = vadd.f32 %v3036_v8, %v2917_v60  ;;  %v3063_v16 = vmax.f32 %v3035_v6, 0.0 }
 0xe7c   : > { %v3038_v4 = vpop.f32.mrf.mxu0 }
 0xe7d   : > { %v3039_v12 = vadd.f32 %v3038_v4, %v2913_v21  ;;  %v3064_v9 = vmax.f32 %v3037_v7, 0.0 }
 0xe7e   : > { %v3040_v15 = vpop.f32.mrf.mxu0 }
 0xe7f   : > { %v3041_v17 = vadd.f32 %v3040_v15, %v2917_v60  ;;  %v3065_v20 = vmax.f32 %v3039_v12, 0.0 }
 0xe80   : > { %v3044_v11 = vpop.f32.mrf.mxu0 }
 0xe81   : > { %v3066_v14 = vmax.f32 %v3041_v17, 0.0  ;;  %v3075_v33 = vpack.c.bf16 %v3065_v20, %v3063_v16  ;;  %v3045_v23 = vadd.f32 %v3044_v11, %v2913_v21 }
 0xe82   : > { %v3046_v19 = vpop.f32.mrf.mxu0 }
 0xe83   : > { %v3076_v18 = vpack.c.bf16 %v3066_v14, %v3064_v9  ;;  %v3047_v39 = vadd.f32 %v3046_v19, %v2917_v60  ;;  %v3067_v10 = vmax.f32 %v3045_v23, 0.0 }
 0xe84   : > { %v3048_v63 = vpop.f32.mrf.mxu0 }
 0xe85   : > { %v3049_v42 = vadd.f32 %v3048_v63, %v2913_v21  ;;  %3248 = vmatprep.mubr.bf16.mxu1 %v3076_v18  ;;  %v3068_v25 = vmax.f32 %v3047_v39, 0.0 }
 0xe86   : > { %v3050_v24 = vpop.f32.mrf.mxu0  ;;  %3249 = vmatmul.mubr.bf16.vlgmr.msra.gmra.mxu1 %v3075_v33 }
 0xe87   : > { %v3051_v46 = vadd.f32 %v3050_v24, %v2917_v60  ;;  %v3069_v49 = vmax.f32 %v3049_v42, 0.0 }
 0xe88   : > { %v3054_v5 = vpop.f32.mrf.mxu0 }
 0xe89   : > { %v3070_v51 = vmax.f32 %v3051_v46, 0.0  ;;  %v3077_v32 = vpack.c.bf16 %v3069_v49, %v3067_v10  ;;  %v3055_v40 = vadd.f32 %v3054_v5, %v2913_v21 }
 0xe8a   : > { %v3056_v27 = vpop.f32.mrf.mxu0 }
 0xe8b   : > { %v3078_v35 = vpack.c.bf16 %v3070_v51, %v3068_v25  ;;  %v3057_v58 = vadd.f32 %v3056_v27, %v2917_v60  ;;  %v3071_v0 = vmax.f32 %v3055_v40, 0.0 }
 0xe8c   : > { %v3058_v38 = vpop.f32.mrf.mxu0 }
 0xe8d   : > { %v3059_v43 = vadd.f32 %v3058_v38, %v2913_v21  ;;  %3256 = vmatprep.mubr.bf16.mxu1 %v3078_v35  ;;  %v3072_v61 = vmax.f32 %v3057_v58, 0.0 }
 0xe8e   : > { %v3060_v56 = vpop.f32.mrf.mxu0  ;;  %3257 = vmatmul.mubr.bf16.gmra.mxu1 %v3077_v32 }
 0xe8f   : > { %v3061_v22 = vadd.f32 %v3060_v56, %v2917_v60  ;;  %v3073_v45 = vmax.f32 %v3059_v43, 0.0 }
 0xe91   : > { %v3074_v1 = vmax.f32 %v3061_v22, 0.0  ;;  %v3079_v52 = vpack.c.bf16 %v3073_v45, %v3071_v0  ;;  %v9435_v0 = vld [vmem:[#allocation7 + $0x168] ss:$12 sps:$4 sm:$0xff]  }
 0xe93   : > { %v3080_v48 = vpack.c.bf16 %v3074_v1, %v3072_v61  ;;  %v9437_v1 = vld [vmem:[#allocation7 + $0x16c] ss:$12 sps:$4 sm:$0xff]  }
 0xe94   : > { %3569 = vmatprep.subr.bf16.mxu0 %v9437_v1 }
 0xe95   : > { %3264 = vmatprep.mubr.bf16.mxu1 %v3080_v48  ;;  %v9438_v48 = vld [vmem:[#allocation7 + $0x170] ss:$12 sps:$4 sm:$0xff]   ;;  %3570 = vmatpush1.bf16.msra.mxu0 %v9435_v0 }
 0xe96   : > { %3265 = vmatmul.mubr.bf16.gmra.mxu1 %v3079_v52  ;;  %v9441_v52 = vld [vmem:[#allocation7 + $0x154] ss:$12 sps:$4 sm:$0xff]  }
 0xe97   : > { %8896 = vmatprep.mubr.msk.bf16.mxu1 %vm10355_vm0, %v10354_v3  ;;  %8881 = vmatpush3.bf16.msra.mxu1 %v9438_v48 }
 0xe98   : > { %8882 = vmatprep.subr.bf16.mxu1 %v10354_v3  ;;  %3571 = vmatprep.subr.bf16.mxu0 %v9441_v52 }
 0xf46   : > { %v8449_v26 = vpop.f32.mrf.mxu1 }
 0xf48   : > { %v8450_v31 = vpop.f32.mrf.mxu1 }
 0xf49   : > { %v8451_v57 = vadd.f32 %v8450_v31, %v8449_v26  ;;  %v9439_v26 = vld [vmem:[#allocation7 + $0x150] ss:$12 sps:$4 sm:$0xff]  }
 0xf4a   : > { %v8452_v55 = vpop.f32.mrf.mxu1  ;;  %3572 = vmatpush1.bf16.msra.mxu0 %v9439_v26  ;;  %v9445_v31 = vld [vmem:[#allocation7 + $0x13c] ss:$12 sps:$4 sm:$0xff]   ;;  %v3376_v26 = vstv %s8083_s2  ;;  %s659_s2 = scalar_lea.vmem [#allocation21], %s11827_s28 }
 0xf4b   : > { %v3251_v41 = vadd.f32 %v8451_v57, %v8064_v30  ;;  %v9443_v57 = vld [vmem:[#allocation7 + $0x138] ss:$12 sps:$4 sm:$0xff]   ;;  %3573 = vmatprep.subr.bf16.mxu0 %v9445_v31 }
 0xf4c   : > { %v8453_v62 = vpop.f32.mrf.mxu1 }
 0xf4d   : > { %v8454_v59 = vadd.f32 %v8453_v62, %v8452_v55  ;;  %v3273_v34 = vadd.f32 %v3251_v41, %v11125_v36  ;;  %v9446_v55 = vld [vmem:[#allocation7 + $0x140] ss:$12 sps:$4 sm:$0xff]   ;;  %v9449_v41 = vld [vmem:[#allocation7 + $0x124] ss:$12 sps:$4 sm:$0xff]  }
 0xf4e   : > { %v8455_v28 = vpop.f32.mrf.mxu1  ;;  %3574 = vmatpush1.bf16.msra.mxu0 %v9443_v57  ;;  %v9447_v62 = vld [vmem:[#allocation7 + $0x120] ss:$12 sps:$4 sm:$0xff]  }
 0xf4f   : > { %v3254_v60 = vadd.f32 %v8454_v59, %v8064_v30  ;;  %3281 = vadd.xlane.f32.xlu0 %v3273_v34  ;;  %v9450_v59 = vld [vmem:[#allocation7 + $0x128] ss:$12 sps:$4 sm:$0xff]   ;;  %3575 = vmatprep.subr.bf16.mxu0 %v9449_v41  ;;  %v3372_v41 = vstv %s3371_s7  ;;  %s7731_s7 = sshll.u32 %s659_s2, 4  ;;  %s11709_s7 = int_to_ptr.vmem [resolvable:$true] %s7731_s7 }
 0xf50   : > { %v8456_v21 = vpop.f32.mrf.mxu1  ;;  %p10217_p13 = scmp.lt.s32.totalorder %s11709_s7, %s10215_s23 }
 0xf51   : > { %v8457_v8 = vadd.f32 %v8456_v21, %v8455_v28  ;;  %v3274_v4 = vadd.f32 %v3254_v60, %v11127_v29  ;;  %v9451_v28 = vld [vmem:[#allocation7 + $0x108] ss:$12 sps:$4 sm:$0xff]   ;;  %v9454_v60 = vld [vmem:[#allocation7 + $0x110] ss:$12 sps:$4 sm:$0xff]  }
 0xf52   : > { %v8458_v7 = vpop.f32.mrf.mxu1  ;;  %3576 = vmatpush1.bf16.msra.mxu0 %v9447_v62  ;;  %v9455_v21 = vld [vmem:[#allocation7 + $0xf0] ss:$12 sps:$4 sm:$0xff]   ;;  %v3382_v62 = vstv %s8084_s26  ;;  %s11873_s26 = sld [smem:[#allocation40_spill]] }
 0xf53   : > { %v3259_v12 = vadd.f32 %v8457_v8, %v8064_v30  ;;  %3283 = vadd.xlane.f32.xlu1 %v3274_v4  ;;  %v9457_v8 = vld [vmem:[#allocation7 + $0xf4] ss:$12 sps:$4 sm:$0xff]  }
 0xf54   : > { %v8459_v6 = vpop.f32.mrf.mxu1 }
 0xf55   : > { %v8460_v15 = vadd.f32 %v8459_v6, %v8458_v7  ;;  %v3275_v17 = vadd.f32 %v3259_v12, %v11134_v47  ;;  %v9461_v7 = vld [vmem:[#allocation7 + $0xdc] ss:$12 sps:$4 sm:$0xff]   ;;  %v9459_v12 = vld [vmem:[#allocation7 + $0xd8] ss:$12 sps:$4 sm:$0xff]   ;;  %v9462_v6 = vld [vmem:[#allocation7 + $0xe0] ss:$12 sps:$4 sm:$0xff]  }
 0xf56   : > { %v8461_v20 = vpop.f32.mrf.mxu1 }
 0xf57   : > { %v3262_v11 = vadd.f32 %v8460_v15, %v8064_v30  ;;  %3285 = vadd.xlane.f32.xlu0 %v3275_v17  ;;  %v9465_v15 = vld [vmem:[#allocation7 + $0xc4] ss:$12 sps:$4 sm:$0xff]  }
 0xf58   : > { %v8462_v9 = vpop.f32.mrf.mxu1 }
 0xf59   : > { %v8463_v14 = vadd.f32 %v8462_v9, %v8461_v20  ;;  %v3276_v36 = vadd.f32 %v3262_v11, %v11136_v50  ;;  %v9466_v20 = vld [vmem:[#allocation7 + $0xc8] ss:$12 sps:$4 sm:$0xff]  }
 0xf5a   : > { %v8464_v16 = vpop.f32.mrf.mxu1 }
 0xf5b   : > { %v3267_v19 = vadd.f32 %v8463_v14, %v8064_v30  ;;  %3287 = vadd.xlane.f32.xlu1 %v3276_v36 }
 0xf5c   : > { %v8465_v18 = vpop.f32.mrf.mxu1 }
 0xf5d   : > { %v8466_v33 = vadd.f32 %v8465_v18, %v8464_v16  ;;  %v3277_v29 = vadd.f32 %v3267_v19, %v11143_v54 }
 0xf5f   : > { %v3270_v63 = vadd.f32 %v8466_v33, %v8064_v30  ;;  %3289 = vadd.xlane.f32.xlu0 %v3277_v29  ;;  %v9442_v30 = vld [vmem:[#allocation7 + $0x158] ss:$12 sps:$4 sm:$0xff]  }
 0xf60   : > { %8883 = vmatpush3.bf16.msra.mxu1 %v9442_v30 }
 0xf61   : > { %v3278_v39 = vadd.f32 %v3270_v63, %v11145_v53  ;;  %8884 = vmatprep.subr.bf16.mxu1 %v10354_v3 }
 0xf63   : > { %3291 = vadd.xlane.f32.xlu1 %v3278_v39 }
 0xf64   : > { %8885 = vmatpush3.bf16.msra.mxu1 %v9446_v55 }
 0xf65   : > { %8886 = vmatprep.subr.bf16.mxu1 %v10354_v3 }
 0xf68   : > { %8887 = vmatpush3.bf16.msra.mxu1 %v9450_v59 }
 0xf69   : > { %8888 = vmatprep.subr.bf16.mxu1 %v10354_v3 }
 0xf6c   : > { %8889 = vmatpush3.bf16.msra.mxu1 %v9454_v60 }
 0xf6d   : > { %8890 = vmatprep.subr.bf16.mxu1 %v10354_v3 }
 0xfd8   : > { %v3282_v47 = vpop.xlane.xlu0 %3281 }
 0xfd9   : > { %v3293_v42 = vmul.f32 0.0078125, %v3282_v47 }
 0xfdb   : > { %v11161_v23 = vsub.f32 %v3273_v34, %v3293_v42  ;;  %v9453_v34 = vld [vmem:[#allocation7 + $0x10c] ss:$12 sps:$4 sm:$0xff]  }
 0xfdc   : > { %v3284_v24 = vpop.xlane.xlu1 %3283  ;;  %3577 = vmatprep.subr.bf16.mxu0 %v9453_v34 }
 0xfdd   : > { %v3294_v46 = vmul.f32 0.0078125, %v3284_v24  ;;  %v3305_v50 = vmul.f32 %v11161_v23, %v11161_v23  ;;  %3578 = vmatpush1.bf16.msra.mxu0 %v9451_v28 }
 0xfde   : > { %3579 = vmatprep.subr.bf16.mxu0 %v9457_v8 }
 0xfdf   : > { %3311 = vadd.xlane.f32.xlu0 %v3305_v50  ;;  %v11165_v49 = vsub.f32 %v3274_v4, %v3294_v46  ;;  %v9458_v4 = vld [vmem:[#allocation7 + $0xf8] ss:$12 sps:$4 sm:$0xff]  }
 0xfe0   : > { %v3286_v5 = vpop.xlane.xlu0 %3285  ;;  %8891 = vmatpush3.bf16.msra.mxu1 %v9458_v4 }
 0xfe1   : > { %v3295_v25 = vmul.f32 0.0078125, %v3286_v5  ;;  %v3306_v54 = vmul.f32 %v11165_v49, %v11165_v49  ;;  %3580 = vmatpush1.bf16.msra.mxu0 %v9455_v21  ;;  %8892 = vmatprep.subr.bf16.mxu1 %v10354_v3 }
 0xfe2   : > { %3581 = vmatprep.subr.bf16.mxu0 %v9461_v7 }
 0xfe3   : > { %v11169_v51 = vsub.f32 %v3275_v17, %v3295_v25  ;;  %3313 = vadd.xlane.f32.xlu1 %v3306_v54  ;;  %v9463_v17 = vld [vmem:[#allocation7 + $0xc0] ss:$12 sps:$4 sm:$0xff]  }
 0xfe4   : > { %v3288_v53 = vpop.xlane.xlu1 %3287  ;;  %8893 = vmatpush3.bf16.msra.mxu1 %v9462_v6 }
 0xfe5   : > { %v3296_v10 = vmul.f32 0.0078125, %v3288_v53  ;;  %v3307_v27 = vmul.f32 %v11169_v51, %v11169_v51  ;;  %3582 = vmatpush1.bf16.msra.mxu0 %v9459_v12  ;;  %8894 = vmatprep.subr.bf16.mxu1 %v10354_v3 }
 0xfe6   : > { %3583 = vmatprep.subr.bf16.mxu0 %v9465_v15 }
 0xfe7   : > { %3315 = vadd.xlane.f32.xlu0 %v3307_v27  ;;  %v11173_v35 = vsub.f32 %v3276_v36, %v3296_v10 }
 0xfe8   : > { %v3290_v32 = vpop.xlane.xlu0 %3289  ;;  %8895 = vmatpush3.bf16.msra.mxu1 %v9466_v20 }
 0xfe9   : > { %v3297_v38 = vmul.f32 0.0078125, %v3290_v32  ;;  %v3308_v58 = vmul.f32 %v11173_v35, %v11173_v35  ;;  %3584 = vmatpush1.bf16.msra.mxu0 %v9463_v17  ;;  %8906 = vmatprep.subr.bf16.mxu1 %v10354_v3 }
 0xfea   : > { %8900 = vmatprep.subr.bf16.mxu0 %v10354_v3 }
 0xfeb   : > { %v11177_v43 = vsub.f32 %v3277_v29, %v3297_v38  ;;  %3317 = vadd.xlane.f32.xlu1 %v3308_v58  ;;  %v8081_v58 = vld [vmem:[%s11872_s16] ss:$0 sm:$0xff] }
 0xfec   : > { %v3292_v40 = vpop.xlane.xlu1 %3291 }
 0xfed   : > { %v3298_v56 = vmul.f32 0.0078125, %v3292_v40  ;;  %v3309_v22 = vmul.f32 %v11177_v43, %v11177_v43 }
 0xfef   : > { %3319 = vadd.xlane.f32.xlu0 %v3309_v22  ;;  %v11181_v45 = vsub.f32 %v3278_v39, %v3298_v56 }
 0xff1   : > { %v3310_v61 = vmul.f32 %v11181_v45, %v11181_v45 }
 0xff3   : > { %3321 = vadd.xlane.f32.xlu1 %v3310_v61 }
0x1068   : > { %v3312_v11 = vpop.xlane.xlu0 %3311 }
0x1069   : > { %v3323_v9 = vmul.f32 0.0078125, %v3312_v11 }
0x106b   : > { %v3329_v16 = vadd.f32 1e-05, %v3323_v9  ;;  %v3424_v9 = vld [vmem:[#allocation9 + $0x3] sm:$0x7] }
0x106c   : > { %v3314_v14 = vpop.xlane.xlu1 %3313 }
0x106d   : > { %v3324_v36 = vmul.f32 0.0078125, %v3314_v14  ;;  %9783 = vrsqrt.f32 %v3329_v16  ;;  %v3429_v16 = vrot.slane %v3424_v9, %v10711_v44 }
0x106f   : > { %v3330_v33 = vadd.f32 1e-05, %v3324_v36 }
0x1070   : > { %v3316_v19 = vpop.xlane.xlu0 %3315 }
0x1071   : > { %v3325_v18 = vmul.f32 0.0078125, %v3316_v19  ;;  %v3437_v19 = vrot.slane %v3424_v9, %v10747_v13 }
0x1073   : > { %v3331_v29 = vadd.f32 1e-05, %v3325_v18 }
0x1074   : > { %v3318_v63 = vpop.xlane.xlu1 %3317 }
0x1075   : > { %9785 = vrsqrt.f32 %v3331_v29  ;;  %v3326_v39 = vmul.f32 0.0078125, %v3318_v63  ;;  %v3433_v29 = vrot.slane %v3424_v9, %v10708_v37 }
0x1076   : > { %9787 = vrsqrt.f32 %v3330_v33 }
0x1077   : > { %v3332_v47 = vadd.f32 1e-05, %v3326_v39 }
0x1078   : > { %v3320_v42 = vpop.xlane.xlu0 %3319 }
0x1079   : > { %9789 = vrsqrt.f32 %v3332_v47  ;;  %v3327_v24 = vmul.f32 0.0078125, %v3320_v42 }
0x107a   : > { %v9784_v54 = vpop.eup %9783 }
0x107b   : > { %v3333_v46 = vadd.f32 1e-05, %v3327_v24  ;;  %v3341_v32 = vmul.f32 %v9784_v54, %v11161_v23 }
0x107c   : > { %v3322_v50 = vpop.xlane.xlu1 %3321 }
0x107d   : > { %9791 = vrsqrt.f32 %v3333_v46  ;;  %v3328_v5 = vmul.f32 0.0078125, %v3322_v50  ;;  %v3353_v61 = vmul.f32 %v8081_v58, %v3341_v32 }
0x107f   : > { %v3334_v25 = vadd.f32 1e-05, %v3328_v5 }
0x1081   : > { %9793 = vrsqrt.f32 %v3334_v25 }
0x1082   : > { %v9786_v53 = vpop.eup %9785 }
0x1083   : > { %v3343_v10 = vmul.f32 %v9786_v53, %v11169_v51  ;;  %v9788_v27 = vpop.eup %9787  ;;  %v8082_v51 = vld [vmem:[#allocation13] ss:$0 sm:$0xff] }
0x1084   : > { %v3342_v40 = vmul.f32 %v9788_v27, %v11165_v49  ;;  %v3365_v30 = vadd.f32 %v8082_v51, %v3353_v61 }
0x1085   : > { %v3355_v56 = vmul.f32 %v8081_v58, %v3343_v10 }
0x1086   : > { %v9790_v38 = vpop.eup %9789  ;;  %v3354_v48 = vmul.f32 %v8081_v58, %v3342_v40  ;;  %v3373_v60 = vmul.f32 %v3372_v41, %v3365_v30 }
0x1087   : > { %v3344_v22 = vmul.f32 %v9790_v38, %v11173_v35  ;;  %v3367_v52 = vadd.f32 %v8082_v51, %v3355_v56 }
0x1088   : > { %v3366_v59 = vadd.f32 %v8082_v51, %v3354_v48 }
0x1089   : > { %v3356_v1 = vmul.f32 %v8081_v58, %v3344_v22  ;;  %v3377_v35 = vmul.f32 %v3376_v26, %v3367_v52 }
0x108a   : > { %v9792_v0 = vpop.eup %9791  ;;  %v3374_v7 = vmul.f32 %v3372_v41, %v3366_v59 }
0x108b   : > { %v3345_v23 = vmul.f32 %v9792_v0, %v11177_v43  ;;  %v3368_v57 = vadd.f32 %v8082_v51, %v3356_v1  ;;  %v3379_v12 = vadd.f32 %v3377_v35, %v3373_v60 }
0x108d   : > { %v3357_v31 = vmul.f32 %v8081_v58, %v3345_v23  ;;  %v3378_v21 = vmul.f32 %v3376_v26, %v3368_v57 }
0x108e   : > { %v9794_v55 = vpop.eup %9793 }
0x108f   : > { %v3346_v49 = vmul.f32 %v9794_v55, %v11181_v45  ;;  %v3369_v34 = vadd.f32 %v8082_v51, %v3357_v31  ;;  %v3380_v43 = vadd.f32 %v3378_v21, %v3374_v7 }
0x1091   : > { %v3358_v28 = vmul.f32 %v8081_v58, %v3346_v49  ;;  %v3383_v8 = vmul.f32 %v3382_v62, %v3369_v34 }
0x1093   : > { %v3370_v4 = vadd.f32 %v8082_v51, %v3358_v28  ;;  %v11203_v15 = vadd.f32 %v3383_v8, %v3379_v12 }
0x1095   : > { %v3384_v6 = vmul.f32 %v3382_v62, %v3370_v4  ;;  %v3387_v20 = vmax.f32 %v11203_v15, 0.0 }
0x1097   : > { %v11205_v17 = vadd.f32 %v3384_v6, %v3380_v43 }
0x1099   : > { %v3388_v45 = vmax.f32 %v11205_v17, 0.0 }
0x109b   : > { %v3389_v11 = vpack.c.bf16 %v3388_v45, %v3387_v20 }
0x109d   : > { %3602 = vmatmul.mubr.bf16.vlgmr.msra.gmra.mxu0 %v3389_v11  ;;  %8897 = vmatmul.mubr.bf16.vlgmr.msra.gmra.mxu1 %v3389_v11 }
0x109e   : > { %8902 = vmatprep.mubr.msk.bf16.mxu0 %vm10355_vm0, %v10354_v3  ;;  %8908 = vmatprep.mubr.msk.bf16.mxu1 %vm10355_vm0, %v10354_v3 }
0x115d   : > { %v3603_v14 = vpop.f32.mrf.mxu0  ;;  %v3646_v36 = vpop.f32.mrf.mxu1 }
0x115e   : > { %v3604_v47 = vadd.f32 %v3603_v14, %v3429_v16  ;;  %v3647_v42 = vadd.f32 %v3646_v36, %v3437_v19 }
0x115f   : > { %v3605_v18 = vpop.f32.mrf.mxu0  ;;  %v8898_v33 = vpop.f32.mrf.mxu1 }
0x1160   : > { %v3606_v25 = vadd.f32 %v3605_v18, %v3433_v29 }
0x1161   : > { %v3607_v63 = vpop.f32.mrf.mxu0  ;;  %v3649_v39 = vpop.f32.mrf.mxu1 }
0x1162   : > { %v3608_v24 = vadd.f32 %v3607_v63, %v3429_v16  ;;  %v3650_v46 = vadd.f32 %v3649_v39, %v3437_v19  ;;  %v9469_v39 = vld [vmem:[#allocation10 + $0x58] sm:$0xff]  }
0x1163   : > { %v3609_v50 = vpop.f32.mrf.mxu0  ;;  %v8899_v5 = vpop.f32.mrf.mxu1 }
0x1164   : > { %v11220_v54 = vpack.c.bf16 %v3608_v24, %v3604_v47  ;;  %v11222_v53 = vpack.c.bf16 %v3650_v46, %v3647_v42  ;;  %v3610_v10 = vadd.f32 %v3609_v50, %v3433_v29 }
0x1166   : > { %v11224_v27 = vpack.c.bf16 %v3610_v10, %v3606_v25  ;;  %8907 = vmatpush3.bf16.msra.mxu1 %v11222_v53  ;;  %3789 = vrot.lane.b32.xlu1 %v11220_v54, %s10356_s3  ;;  %v9467_v10 = vld [vmem:[#allocation10 + $0x48] sm:$0xff]  }
0x1167   : > { %8918 = vmatprep.subr.bf16.mxu1 %v10354_v3 }
0x1168   : > { %3792 = vrot.lane.b32.xlu0 %v11224_v27, %s10356_s3  ;;  %v3677_v32 = vsel %vm999_vm1, %v11224_v27, 0 }
0x1169   : > { %8901 = vmatpush3.bf16.xpose.msra.mxu0 %v3677_v32 }
0x116a   : > { %8912 = vmatprep.subr.bf16.mxu0 %v10354_v3 }
0x1170   : > { %8903 = vmatmul.mubr.msk.bf16.vlgmr.msra.gmra.mxu0 %vm999_vm1, %v11220_v54 }
0x1171   : > { %8914 = vmatprep.mubr.msk.bf16.mxu0 %vm10355_vm0, %v10354_v3 }
0x11d8   : > { %v3790_v40 = vpop.permute.xlu1 %3789 }
0x11da   : > { %v3793_v38 = vpop.permute.xlu0 %3792 }
0x11db   : > { %v3798_v58 = vsel %vm999_vm1, %v3793_v38, 0  ;;  %v9468_v38 = vld [vmem:[#allocation10 + $0x40] sm:$0xff]  }
0x11dc   : > { %8913 = vmatpush3.bf16.xpose.msra.mxu0 %v3798_v58  ;;  %v9470_v58 = vld [vmem:[#allocation10 + $0x50] sm:$0xff]  }
0x11dd   : > { %8924 = vmatprep.subr.bf16.mxu0 %v10354_v3 }
0x11e3   : > { %8915 = vmatmul.mubr.msk.bf16.vlgmr.msra.gmra.mxu0 %vm999_vm1, %v3790_v40 }
0x11e4   : > { %8928 = vmatprep.mubr.msk.bf16.mxu0 %vm10355_vm0, %v10354_v3  ;;  %8925 = vmatpush3.bf16.msra.mxu0 %v9469_v39 }
0x11e5   : > { %8926 = vmatprep.subr.bf16.mxu0 %v10354_v3 }
0x11e8   : > { %8927 = vmatpush3.bf16.msra.mxu0 %v9470_v58 }
0x11e9   : > { %8940 = vmatprep.subr.bf16.mxu0 %v10354_v3 }
0x1230   : > { %v3713_v56 = vpop.f32.mrf.mxu0 }
0x1231   : > { %v3720_v22 = vsel %vm1141_vm2, %v3713_v56, -inf }
0x1232   : > { %3721 = vmax.xlane.f32.xlu1 %v3720_v22  ;;  %v8904_v61 = vpop.f32.mrf.mxu0 }
0x1234   : > { %v3716_v1 = vpop.f32.mrf.mxu0 }
0x1235   : > { %v3723_v0 = vsel %vm1141_vm2, %v3716_v1, -inf }
0x1236   : > { %3724 = vmax.xlane.f32.xlu0 %v3723_v0  ;;  %v8905_v51 = vpop.f32.mrf.mxu0 }
0x12a3   : > { %v3834_v48 = vpop.f32.mrf.mxu0 }
0x12a4   : > { %v3841_v52 = vsel %vm1141_vm2, %v3834_v48, -inf }
0x12a5   : > { %3842 = vmax.xlane.f32.xlu0 %v3841_v52  ;;  %v8916_v23 = vpop.f32.mrf.mxu0 }
0x12a7   : > { %v3837_v26 = vpop.f32.mrf.mxu0 }
0x12a8   : > { %v3844_v30 = vsel %vm1141_vm2, %v3837_v26, -inf }
0x12a9   : > { %3845 = vmax.xlane.f32.xlu1 %v3844_v30  ;;  %v8917_v31 = vpop.f32.mrf.mxu0 }
0x12bb   : > { %v3722_v57 = vpop.xlane.xlu1 %3721 }
0x12bc   : > { %v3726_v55 = vsub.f32 %v3713_v56, %v3722_v57 }
0x12be   : > { %v3728_v41 = vmul.f32 1.442695, %v3726_v55 }
0x12bf   : > { %v3725_v62 = vpop.xlane.xlu0 %3724 }
0x12c0   : > { %9795 = vpow2.f32 %v3728_v41  ;;  %v3727_v49 = vsub.f32 %v3716_v1, %v3725_v62 }
0x12c2   : > { %v3730_v59 = vmul.f32 1.442695, %v3727_v49 }
0x12c4   : > { %9797 = vpow2.f32 %v3730_v59 }
0x12cd   : > { %v9796_v34 = vpop.eup %9795 }
0x12ce   : > { %v3732_v35 = vsel %vm1141_vm2, %v9796_v34, 0.0 }
0x12cf   : > { %3733 = vadd.xlane.f32.xlu0 %v3732_v35 }
0x12d1   : > { %v9798_v28 = vpop.eup %9797 }
0x12d2   : > { %v3735_v60 = vsel %vm1141_vm2, %v9798_v28, 0.0 }
0x12d3   : > { %3736 = vadd.xlane.f32.xlu1 %v3735_v60 }
0x132e   : > { %v3843_v21 = vpop.xlane.xlu0 %3842 }
0x132f   : > { %v3847_v8 = vsub.f32 %v3834_v48, %v3843_v21 }
0x1331   : > { %v3849_v4 = vmul.f32 1.442695, %v3847_v8 }
0x1332   : > { %v3846_v7 = vpop.xlane.xlu1 %3845 }
0x1333   : > { %9799 = vpow2.f32 %v3849_v4  ;;  %v3848_v12 = vsub.f32 %v3837_v26, %v3846_v7 }
0x1335   : > { %v3851_v43 = vmul.f32 1.442695, %v3848_v12 }
0x1337   : > { %9801 = vpow2.f32 %v3851_v43 }
0x1340   : > { %v9800_v6 = vpop.eup %9799 }
0x1341   : > { %v3853_v11 = vsel %vm1141_vm2, %v9800_v6, 0.0 }
0x1342   : > { %3854 = vadd.xlane.f32.xlu0 %v3853_v11 }
0x1344   : > { %v9802_v9 = vpop.eup %9801 }
0x1345   : > { %v3856_v14 = vsel %vm1141_vm2, %v9802_v9, 0.0 }
0x1346   : > { %3857 = vadd.xlane.f32.xlu1 %v3856_v14 }
0x1357   : > { %4027 = vrot.lane.b32.xlu1 %v11224_v27, %s10357_s25 }
0x1358   : > { %3865 = vrot.lane.b32.xlu0 %v11222_v53, %s10356_s3  ;;  %v3734_v36 = vpop.xlane.xlu0 %3733 }
0x1359   : > { %9803 = vrcp.f32 %v3734_v36 }
0x135b   : > { %4025 = vrot.lane.b32.xlu1 %v11220_v54, %s10357_s25 }
0x135c   : > { %v3737_v16 = vpop.xlane.xlu1 %3736 }
0x135d   : > { %9805 = vrcp.f32 %v3737_v16 }
0x1366   : > { %v9804_v19 = vpop.eup %9803 }
0x1367   : > { %v3740_v33 = vmul.f32 %v9804_v19, %v9796_v34 }
0x136a   : > { %v9806_v18 = vpop.eup %9805 }
0x136b   : > { %v3741_v29 = vmul.f32 %v9806_v18, %v9798_v28 }
0x136d   : > { %v3742_v63 = vpack.c.bf16 %v3741_v29, %v3740_v33 }
0x136f   : > { %8909 = vmatmul.mubr.msk.bf16.vlgmr.msra.gmra.mxu1 %vm1141_vm2, %v3742_v63 }
0x1370   : > { %8920 = vmatprep.mubr.msk.bf16.mxu1 %vm10355_vm0, %v10354_v3 }
0x13cb   : > { %v3855_v47 = vpop.xlane.xlu0 %3854 }
0x13cc   : > { %9807 = vrcp.f32 %v3855_v47 }
0x13cf   : > { %v3866_v42 = vpop.permute.xlu0 %3865  ;;  %v3858_v24 = vpop.xlane.xlu1 %3857 }
0x13d0   : > { %9809 = vrcp.f32 %v3858_v24  ;;  %8919 = vmatpush3.bf16.msra.mxu1 %v3866_v42 }
0x13d1   : > { %8932 = vmatprep.subr.bf16.mxu1 %v10354_v3 }
0x13d3   : > { %v4028_v48 = vpop.permute.xlu1 %4027 }
0x13d4   : > { %v4033_v30 = vsel %vm999_vm1, %v4028_v48, 0 }
0x13d7   : > { %v4026_v31 = vpop.permute.xlu1 %4025 }
0x13d9   : > { %v9808_v46 = vpop.eup %9807 }
0x13da   : > { %v3861_v5 = vmul.f32 %v9808_v46, %v9800_v6 }
0x13dd   : > { %v9810_v50 = vpop.eup %9809 }
0x13de   : > { %v3862_v25 = vmul.f32 %v9810_v50, %v9802_v9 }
0x13e0   : > { %v3863_v32 = vpack.c.bf16 %v3862_v25, %v3861_v5  ;;  %v9471_v5 = vld [vmem:[#allocation10 + $0x68] sm:$0xff]   ;;  %v9472_v25 = vld [vmem:[#allocation10 + $0x60] sm:$0xff]  }
0x13e2   : > { %8921 = vmatmul.mubr.msk.bf16.vlgmr.msra.gmra.mxu1 %vm1141_vm2, %v3863_v32 }
0x13e3   : > { %8933 = vmatpush3.bf16.msra.mxu1 %v9467_v10  ;;  %8936 = vmatprep.mubr.msk.bf16.mxu1 %vm10355_vm0, %v10354_v3 }
0x13e4   : > { %8934 = vmatprep.subr.bf16.mxu1 %v10354_v3 }
0x13e7   : > { %8935 = vmatpush3.bf16.msra.mxu1 %v9468_v38 }
0x13e8   : > { %8946 = vmatprep.subr.bf16.mxu1 %v10354_v3 }
0x142f   : > { %v3780_v40 = vpop.f32.mrf.mxu1 }
0x1431   : > { %v8910_v56 = vpop.f32.mrf.mxu1 }
0x1433   : > { %v3783_v22 = vpop.f32.mrf.mxu1 }
0x1434   : > { %v3787_v61 = vpack.c.bf16 %v3783_v22, %v3780_v40 }
0x1435   : > { %v8911_v1 = vpop.f32.mrf.mxu1 }
0x1436   : > { %8937 = vmatmul.mubr.msk.bf16.vlgmr.msra.gmra.mxu1 %vm999_vm1, %v3787_v61 }
0x1437   : > { %8948 = vmatprep.mubr.msk.bf16.mxu1 %vm10355_vm0, %v10354_v3 }
0x14a2   : > { %v3905_v0 = vpop.f32.mrf.mxu1 }
0x14a4   : > { %v8922_v51 = vpop.f32.mrf.mxu1 }
0x14a6   : > { %v3908_v52 = vpop.f32.mrf.mxu1 }
0x14a7   : > { %v3912_v23 = vpack.c.bf16 %v3908_v52, %v3905_v0 }
0x14a8   : > { %v8923_v26 = vpop.f32.mrf.mxu1 }
0x14a9   : > { %8929 = vmatmul.mubr.msk.bf16.vlgmr.msra.gmra.mxu0 %vm999_vm1, %v3912_v23 }
0x14aa   : > { %8941 = vmatpush3.bf16.xpose.msra.mxu0 %v4033_v30  ;;  %8942 = vmatprep.mubr.msk.bf16.mxu0 %vm10355_vm0, %v10354_v3 }
0x14ab   : > { %8952 = vmatprep.subr.bf16.mxu0 %v10354_v3 }
0x14b1   : > { %8943 = vmatmul.mubr.msk.bf16.vlgmr.msra.gmra.mxu0 %vm999_vm1, %v4026_v31 }
0x14b2   : > { %8956 = vmatprep.mubr.msk.bf16.mxu0 %vm10355_vm0, %v10354_v3  ;;  %8953 = vmatpush3.bf16.msra.mxu0 %v9471_v5 }
0x14b3   : > { %8954 = vmatprep.subr.bf16.mxu0 %v10354_v3 }
0x14b6   : > { %8955 = vmatpush3.bf16.msra.mxu0 %v9472_v25 }
0x14b7   : > { %8966 = vmatprep.subr.bf16.mxu0 %v10354_v3 }
0x14f6   : > { %v11280_v57 = vpop.f32.mrf.mxu1 }
0x14f8   : > { %v8938_v55 = vpop.f32.mrf.mxu1 }
0x14fa   : > { %v11282_v41 = vpop.f32.mrf.mxu1 }
0x14fc   : > { %v8939_v62 = vpop.f32.mrf.mxu1 }
0x1569   : > { %v11284_v49 = vpop.f32.mrf.mxu0 }
0x156b   : > { %v8930_v59 = vpop.f32.mrf.mxu0 }
0x156d   : > { %v11286_v34 = vpop.f32.mrf.mxu0 }
0x156f   : > { %v8931_v35 = vpop.f32.mrf.mxu0 }
0x1571   : > { %v4069_v28 = vpop.f32.mrf.mxu0 }
0x1572   : > { %v4076_v60 = vsel %vm1141_vm2, %v4069_v28, -inf }
0x1573   : > { %4077 = vmax.xlane.f32.xlu0 %v4076_v60  ;;  %v8944_v21 = vpop.f32.mrf.mxu0 }
0x1575   : > { %v4072_v8 = vpop.f32.mrf.mxu0 }
0x1576   : > { %v4079_v4 = vsel %vm1141_vm2, %v4072_v8, -inf }
0x1577   : > { %4080 = vmax.xlane.f32.xlu1 %v4079_v4  ;;  %v8945_v7 = vpop.f32.mrf.mxu0  ;;  %v4022_v4 = vadd.f32 %v11282_v41, %v11286_v34  ;;  %v9474_v41 = vld [vmem:[#allocation10 + $0x70] sm:$0xff]  }
0x1588   : > { %4099 = vrot.lane.b32.xlu1 %v11222_v53, %s10357_s25 }
0x158c   : > { %4205 = vrot.lane.b32.xlu1 %v11220_v54, %s10358_s15 }
0x15fc   : > { %v4078_v12 = vpop.xlane.xlu0 %4077 }
0x15fd   : > { %v4082_v43 = vsub.f32 %v4069_v28, %v4078_v12  ;;  %v4019_v28 = vadd.f32 %v11280_v57, %v11284_v49  ;;  %v9473_v49 = vld [vmem:[#allocation10 + $0x78] sm:$0xff]  }
0x15ff   : > { %v4084_v6 = vmul.f32 1.442695, %v4082_v43 }
0x1600   : > { %v4081_v11 = vpop.xlane.xlu1 %4080 }
0x1601   : > { %9811 = vpow2.f32 %v4084_v6  ;;  %v4083_v9 = vsub.f32 %v4072_v8, %v4081_v11 }
0x1603   : > { %v4086_v14 = vmul.f32 1.442695, %v4083_v9 }
0x1604   : > { %v4100_v36 = vpop.permute.xlu1 %4099 }
0x1605   : > { %9813 = vpow2.f32 %v4086_v14  ;;  %8947 = vmatpush3.bf16.msra.mxu1 %v4100_v36 }
0x1606   : > { %8960 = vmatprep.subr.bf16.mxu1 %v10354_v3 }
0x160e   : > { %v9812_v16 = vpop.eup %9811 }
0x160f   : > { %v4088_v19 = vsel %vm1141_vm2, %v9812_v16, 0.0 }
0x1610   : > { %4089 = vadd.xlane.f32.xlu0 %v4088_v19 }
0x1612   : > { %v9814_v18 = vpop.eup %9813 }
0x1613   : > { %v4091_v33 = vsel %vm1141_vm2, %v9814_v18, 0.0 }
0x1614   : > { %4092 = vadd.xlane.f32.xlu0 %v4091_v33 }
0x162a   : > { %4207 = vrot.lane.b32.xlu0 %v11224_v27, %s10358_s15  ;;  %v4206_v27 = vpop.permute.xlu1 %4205 }
0x1699   : > { %v4090_v54 = vpop.xlane.xlu0 %4089 }
0x169a   : > { %9815 = vrcp.f32 %v4090_v54 }
0x169d   : > { %v4093_v29 = vpop.xlane.xlu0 %4092 }
0x169e   : > { %9817 = vrcp.f32 %v4093_v29 }
0x16a1   : > { %v4208_v24 = vpop.permute.xlu0 %4207 }
0x16a2   : > { %v4213_v50 = vsel %vm999_vm1, %v4208_v24, 0 }
0x16a7   : > { %v9816_v63 = vpop.eup %9815 }
0x16a8   : > { %v4096_v47 = vmul.f32 %v9816_v63, %v9812_v16  ;;  %v8130_v63 = vld [vmem:[%s11800_s5 + $0x1] ss:$0 sm:$0xff] }
0x16ab   : > { %v9818_v39 = vpop.eup %9817 }
0x16ac   : > { %v4097_v42 = vmul.f32 %v9818_v39, %v9814_v18 }
0x16ae   : > { %v4098_v46 = vpack.c.bf16 %v4097_v42, %v4096_v47 }
0x16b0   : > { %8949 = vmatmul.mubr.msk.bf16.vlgmr.msra.gmra.mxu1 %vm1141_vm2, %v4098_v46 }
0x16b1   : > { %8961 = vmatpush3.bf16.xpose.msra.mxu1 %v4213_v50  ;;  %8962 = vmatprep.mubr.msk.bf16.mxu1 %vm10355_vm0, %v10354_v3 }
0x16b2   : > { %8972 = vmatprep.subr.bf16.mxu1 %v10354_v3 }
0x16b8   : > { %8963 = vmatmul.mubr.msk.bf16.vlgmr.msra.gmra.mxu1 %vm999_vm1, %v4206_v27 }
0x16b9   : > { %8976 = vmatprep.mubr.msk.bf16.mxu1 %vm10355_vm0, %v10354_v3  ;;  %8973 = vmatpush3.bf16.msra.mxu1 %v9473_v49 }
0x16ba   : > { %8974 = vmatprep.subr.bf16.mxu1 %v10354_v3 }
0x16bd   : > { %8975 = vmatpush3.bf16.msra.mxu1 %v9474_v41  ;;  %v8132_v41 = vld [vmem:[%s11801_s6 + $0x1] ss:$0 sm:$0xff] }
0x1770   : > { %v4139_v10 = vpop.f32.mrf.mxu1 }
0x1772   : > { %v8950_v32 = vpop.f32.mrf.mxu1 }
0x1773   : > { %v9477_v32 = vld [vmem:[#allocation15 + $0xf4] ss:$8 sps:$4 sm:$0xff]  }
0x1774   : > { %v4142_v38 = vpop.f32.mrf.mxu1 }
0x1775   : > { %v4146_v58 = vpack.c.bf16 %v4142_v38, %v4139_v10  ;;  %v9475_v10 = vld [vmem:[#allocation15 + $0xf0] ss:$8 sps:$4 sm:$0xff]  }
0x1776   : > { %v8951_v40 = vpop.f32.mrf.mxu1 }
0x1777   : > { %8957 = vmatmul.mubr.msk.bf16.vlgmr.msra.gmra.mxu0 %vm999_vm1, %v4146_v58 }
0x1778   : > { %v4249_v56 = vpop.f32.mrf.mxu1  ;;  %8968 = vmatprep.mubr.msk.bf16.mxu0 %vm10355_vm0, %v10354_v3 }
0x1779   : > { %v4256_v22 = vsel %vm1141_vm2, %v4249_v56, -inf }
0x177a   : > { %4257 = vmax.xlane.f32.xlu1 %v4256_v22  ;;  %v8964_v61 = vpop.f32.mrf.mxu1 }
0x177b   : > { %v9478_v61 = vld [vmem:[#allocation15 + $0xe0] ss:$8 sps:$4 sm:$0xff]  }
0x177c   : > { %v4252_v1 = vpop.f32.mrf.mxu1 }
0x177d   : > { %v4259_v0 = vsel %vm1141_vm2, %v4252_v1, -inf }
0x177e   : > { %4260 = vmax.xlane.f32.xlu0 %v4259_v0  ;;  %v8965_v51 = vpop.f32.mrf.mxu1  ;;  %v9481_v0 = vld [vmem:[#allocation15 + $0xd0] ss:$8 sps:$4 sm:$0xff]  }
0x177f   : > { %v9486_v51 = vld [vmem:[#allocation15 + $0xc4] ss:$8 sps:$4 sm:$0xff]  }
0x1803   : > { %v4258_v48 = vpop.xlane.xlu1 %4257 }
0x1804   : > { %v4262_v52 = vsub.f32 %v4249_v56, %v4258_v48  ;;  %v9484_v48 = vld [vmem:[#allocation15 + $0xc0] ss:$8 sps:$4 sm:$0xff]  }
0x1806   : > { %v4264_v23 = vmul.f32 1.442695, %v4262_v52  ;;  %v9489_v52 = vld [vmem:[#allocation15 + $0xb4] ss:$8 sps:$4 sm:$0xff]  }
0x1807   : > { %v4261_v26 = vpop.xlane.xlu0 %4260 }
0x1808   : > { %9819 = vpow2.f32 %v4264_v23  ;;  %v4263_v30 = vsub.f32 %v4252_v1, %v4261_v26  ;;  %v9483_v1 = vld [vmem:[#allocation15 + $0xd4] ss:$8 sps:$4 sm:$0xff]   ;;  %v9487_v23 = vld [vmem:[#allocation15 + $0xb0] ss:$8 sps:$4 sm:$0xff]   ;;  %v9492_v26 = vld [vmem:[#allocation15 + $0xa4] ss:$8 sps:$4 sm:$0xff]  }
0x180a   : > { %v4266_v31 = vmul.f32 1.442695, %v4263_v30  ;;  %v9490_v30 = vld [vmem:[#allocation15 + $0xa0] ss:$8 sps:$4 sm:$0xff]  }
0x180c   : > { %9821 = vpow2.f32 %v4266_v31  ;;  %v9493_v31 = vld [vmem:[#allocation15 + $0x90] ss:$8 sps:$4 sm:$0xff]  }
0x1815   : > { %v9820_v55 = vpop.eup %9819 }
0x1816   : > { %v4268_v62 = vsel %vm1141_vm2, %v9820_v55, 0.0 }
0x1817   : > { %4269 = vadd.xlane.f32.xlu0 %v4268_v62  ;;  %v9498_v62 = vld [vmem:[#allocation15 + $0x84] ss:$8 sps:$4 sm:$0xff]  }
0x1819   : > { %v9822_v59 = vpop.eup %9821 }
0x181a   : > { %v4271_v35 = vsel %vm1141_vm2, %v9822_v59, 0.0 }
0x181b   : > { %4272 = vadd.xlane.f32.xlu1 %v4271_v35  ;;  %v9499_v35 = vld [vmem:[#allocation18 + $0xf8] sm:$0xff]  }
0x181c   : > { %8504 = vmatprep.subr.bf16.mxu1 %v9499_v35 }
0x182d   : > { %4279 = vrot.lane.b32.xlu0 %v11222_v53, %s10358_s15 }
0x1837   : > { %v4196_v60 = vpop.f32.mrf.mxu0 }
0x1838   : > { %v4203_v21 = vadd.f32 %v4196_v60, %v4019_v28  ;;  %v9500_v28 = vld [vmem:[#allocation18 + $0xb8] sm:$0xff]   ;;  %v9501_v60 = vld [vmem:[#allocation18 + $0xf0] sm:$0xff]  }
0x1839   : > { %v8958_v8 = vpop.f32.mrf.mxu0 }
0x183a   : > { %v9503_v8 = vld [vmem:[#allocation18 + $0xe8] sm:$0xff]  }
0x183b   : > { %v4199_v7 = vpop.f32.mrf.mxu0 }
0x183c   : > { %v4204_v12 = vadd.f32 %v4199_v7, %v4022_v4  ;;  %v9504_v4 = vld [vmem:[#allocation18 + $0xa8] sm:$0xff]   ;;  %v9505_v7 = vld [vmem:[#allocation18 + $0xe0] sm:$0xff]  }
0x183d   : > { %v8959_v43 = vpop.f32.mrf.mxu0 }
0x183e   : > { %v9507_v43 = vld [vmem:[#allocation18 + $0xd8] sm:$0xff]  }
0x18a0   : > { %v4270_v6 = vpop.xlane.xlu0 %4269 }
0x18a1   : > { %9823 = vrcp.f32 %v4270_v6  ;;  %v9508_v6 = vld [vmem:[#allocation18 + $0x98] sm:$0xff]  }
0x18a4   : > { %v4273_v11 = vpop.xlane.xlu1 %4272  ;;  %v4280_v9 = vpop.permute.xlu0 %4279 }
0x18a5   : > { %9825 = vrcp.f32 %v4273_v11  ;;  %8967 = vmatpush3.bf16.msra.mxu0 %v4280_v9 }
0x18a6   : > { %4550 = vmatprep.subr.bf16.mxu0 %v9477_v32 }
0x18ae   : > { %v9824_v14 = vpop.eup %9823 }
0x18af   : > { %v4276_v36 = vmul.f32 %v9824_v14, %v9820_v55  ;;  %v9495_v55 = vld [vmem:[#allocation15 + $0x94] ss:$8 sps:$4 sm:$0xff]  }
0x18b2   : > { %v9826_v53 = vpop.eup %9825 }
0x18b3   : > { %v4277_v16 = vmul.f32 %v9826_v53, %v9822_v59  ;;  %v9496_v59 = vld [vmem:[#allocation15 + $0x80] ss:$8 sps:$4 sm:$0xff]  }
0x18b5   : > { %v4278_v57 = vpack.c.bf16 %v4277_v16, %v4276_v36 }
0x18b7   : > { %8969 = vmatmul.mubr.msk.bf16.vlgmr.msra.gmra.mxu0 %vm1141_vm2, %v4278_v57 }
0x18b8   : > { %4582 = vmatprep.mubr.bf16.mxu0 %v10353_v2  ;;  %4551 = vmatpush1.bf16.msra.mxu0 %v9475_v10 }
0x1977   : > { %v4319_v34 = vpop.f32.mrf.mxu0 }
0x1979   : > { %v8970_v19 = vpop.f32.mrf.mxu0 }
0x197b   : > { %v4322_v18 = vpop.f32.mrf.mxu0 }
0x197c   : > { %v4326_v33 = vpack.c.bf16 %v4322_v18, %v4319_v34 }
0x197d   : > { %v8971_v54 = vpop.f32.mrf.mxu0 }
0x197e   : > { %8977 = vmatmul.mubr.msk.bf16.vlgmr.msra.gmra.mxu1 %vm999_vm1, %v4326_v33  ;;  %v8133_v33 = vld [vmem:[#allocation12 + $0x1] ss:$0 sm:$0xff] }
0x197f   : > { %8505 = vmatpush3.bf16.msra.mxu1 %v9500_v28 }
0x1980   : > { %8506 = vmatprep.subr.bf16.mxu1 %v9501_v60  ;;  %v9515_v60 = vld [vmem:[#allocation7 + $0x228] ss:$12 sps:$4 sm:$0xff]  }
0x1a3e   : > { %v4376_v29 = vpop.f32.mrf.mxu1 }
0x1a3f   : > { %v4383_v39 = vadd.f32 %v4376_v29, %v4203_v21  ;;  %v9502_v21 = vld [vmem:[#allocation18 + $0xb0] sm:$0xff]  }
0x1a40   : > { %v8978_v47 = vpop.f32.mrf.mxu1  ;;  %8507 = vmatpush3.bf16.msra.mxu1 %v9502_v21  ;;  %v9517_v21 = vld [vmem:[#allocation7 + $0x22c] ss:$12 sps:$4 sm:$0xff]  }
0x1a41   : > { %v4393_v42 = vadd.f32 %v8130_v63, %v4383_v39  ;;  %8508 = vmatprep.subr.bf16.mxu1 %v9503_v8  ;;  %v9509_v47 = vld [vmem:[#allocation18 + $0xd0] sm:$0xff]  }
0x1a42   : > { %v4379_v24 = vpop.f32.mrf.mxu1  ;;  %v9518_v8 = vld [vmem:[#allocation7 + $0x230] ss:$12 sps:$4 sm:$0xff]  }
0x1a43   : > { %v4384_v46 = vadd.f32 %v4379_v24, %v4204_v12  ;;  %v4395_v50 = vadd.f32 %v4393_v42, %v3387_v20  ;;  %v9506_v12 = vld [vmem:[#allocation18 + $0xa0] sm:$0xff]   ;;  %v9510_v42 = vld [vmem:[#allocation18 + $0x90] sm:$0xff]   ;;  %v9511_v24 = vld [vmem:[#allocation18 + $0xc8] sm:$0xff]  }
0x1a44   : > { %v8979_v27 = vpop.f32.mrf.mxu1  ;;  %8509 = vmatpush3.bf16.msra.mxu1 %v9504_v4 }
0x1a45   : > { %v4394_v5 = vadd.f32 %v8130_v63, %v4384_v46  ;;  %4401 = vadd.xlane.f32.xlu1 %v4395_v50  ;;  %8510 = vmatprep.subr.bf16.mxu1 %v9505_v7  ;;  %v9512_v46 = vld [vmem:[#allocation18 + $0x88] sm:$0xff]   ;;  %v9514_v27 = vld [vmem:[#allocation18 + $0x80] sm:$0xff]  }
0x1a47   : > { %v4396_v25 = vadd.f32 %v4394_v5, %v3388_v45  ;;  %v9480_v45 = vld [vmem:[#allocation15 + $0xe4] ss:$8 sps:$4 sm:$0xff]   ;;  %v4458_v5 = vld [vmem:[#allocation16 + $0x2] sm:$0x3] }
0x1a48   : > { %4552 = vmatprep.subr.bf16.mxu0 %v9480_v45  ;;  %8511 = vmatpush3.bf16.msra.mxu1 %v9506_v12  ;;  %v4467_v10 = vrot.slane %v4458_v5, %v10708_v37  ;;  %v4463_v32 = vrot.slane %v4458_v5, %v10711_v44  ;;  %v9546_v5 = vld [vmem:[#allocation7 + $0x188] ss:$12 sps:$4 sm:$0xff]  }
0x1a49   : > { %4403 = vadd.xlane.f32.xlu1 %v4396_v25  ;;  %4553 = vmatpush1.bf16.msra.mxu0 %v9478_v61 }
0x1a4a   : > { %4554 = vmatprep.subr.bf16.mxu0 %v9483_v1  ;;  %8512 = vmatprep.subr.bf16.mxu1 %v9507_v43 }
0x1a4c   : > { %8513 = vmatpush3.bf16.msra.mxu1 %v9508_v6 }
0x1a4d   : > { %4555 = vmatpush1.bf16.msra.mxu0 %v9481_v0  ;;  %8514 = vmatprep.subr.bf16.mxu1 %v9509_v47  ;;  %v9538_v47 = vld [vmem:[#allocation7 + $0x1b8] ss:$12 sps:$4 sm:$0xff]  }
0x1a4e   : > { %4556 = vmatprep.subr.bf16.mxu0 %v9486_v51 }
0x1a50   : > { %8515 = vmatpush3.bf16.msra.mxu1 %v9510_v42  ;;  %v9541_v42 = vld [vmem:[#allocation7 + $0x19c] ss:$12 sps:$4 sm:$0xff]  }
0x1a51   : > { %4557 = vmatpush1.bf16.msra.mxu0 %v9484_v48  ;;  %8516 = vmatprep.subr.bf16.mxu1 %v9511_v24  ;;  %v9539_v24 = vld [vmem:[#allocation7 + $0x198] ss:$12 sps:$4 sm:$0xff]  }
0x1a52   : > { %4558 = vmatprep.subr.bf16.mxu0 %v9489_v52  ;;  %v8150_v52 = vld [vmem:[#allocation19 + $0x1] ss:$0 sm:$0xff] }
0x1a54   : > { %8517 = vmatpush3.bf16.msra.mxu1 %v9512_v46  ;;  %v9542_v46 = vld [vmem:[#allocation7 + $0x1a0] ss:$12 sps:$4 sm:$0xff]  }
0x1a55   : > { %4559 = vmatpush1.bf16.msra.mxu0 %v9487_v23 }
0x1a56   : > { %4560 = vmatprep.subr.bf16.mxu0 %v9492_v26 }
0x1a59   : > { %4561 = vmatpush1.bf16.msra.mxu0 %v9490_v30 }
0x1a5a   : > { %4562 = vmatprep.subr.bf16.mxu0 %v9495_v55 }
0x1a5d   : > { %4563 = vmatpush1.bf16.msra.mxu0 %v9493_v31 }
0x1a5e   : > { %4564 = vmatprep.subr.bf16.mxu0 %v9498_v62 }
0x1a61   : > { %4565 = vmatpush1.bf16.msra.mxu0 %v9496_v59 }
0x1a62   : > { %5001 = vmatprep.subr.bf16.mxu0 %v9517_v21 }
0x1ace   : > { %v4402_v38 = vpop.xlane.xlu1 %4401 }
0x1acf   : > { %v4405_v58 = vmul.f32 0.0078125, %v4402_v38 }
0x1ad1   : > { %v11333_v40 = vsub.f32 %v4395_v50, %v4405_v58  ;;  %v9513_v50 = vld [vmem:[#allocation18 + $0xc0] sm:$0xff]  }
0x1ad2   : > { %v4404_v56 = vpop.xlane.xlu1 %4403  ;;  %8518 = vmatprep.subr.bf16.mxu1 %v9513_v50  ;;  %v9545_v50 = vld [vmem:[#allocation7 + $0x184] ss:$12 sps:$4 sm:$0xff]  }
0x1ad3   : > { %v4406_v22 = vmul.f32 0.0078125, %v4404_v56  ;;  %v4409_v15 = vmul.f32 %v11333_v40, %v11333_v40  ;;  %8519 = vmatpush3.bf16.msra.mxu1 %v9514_v27  ;;  %v9543_v27 = vld [vmem:[#allocation7 + $0x180] ss:$12 sps:$4 sm:$0xff]  }
0x1ad4   : > { %8980 = vmatprep.subr.bf16.mxu1 %v10354_v3 }
0x1ad5   : > { %v11337_v20 = vsub.f32 %v4396_v25, %v4406_v22  ;;  %4411 = vadd.xlane.f32.xlu1 %v4409_v15 }
0x1ad7   : > { %v4410_v17 = vmul.f32 %v11337_v20, %v11337_v20 }
0x1ad9   : > { %4413 = vadd.xlane.f32.xlu1 %v4410_v17 }
0x1b5e   : > { %v4412_v11 = vpop.xlane.xlu1 %4411 }
0x1b5f   : > { %v4415_v9 = vmul.f32 0.0078125, %v4412_v11 }
0x1b61   : > { %v4417_v14 = vadd.f32 1e-05, %v4415_v9 }
0x1b62   : > { %v4414_v53 = vpop.xlane.xlu1 %4413 }
0x1b63   : > { %9827 = vrsqrt.f32 %v4417_v14  ;;  %v4416_v36 = vmul.f32 0.0078125, %v4414_v53  ;;  %v9521_v53 = vld [vmem:[#allocation7 + $0x214] ss:$12 sps:$4 sm:$0xff]  }
0x1b65   : > { %v4418_v16 = vadd.f32 1e-05, %v4416_v36  ;;  %v9519_v36 = vld [vmem:[#allocation7 + $0x210] ss:$12 sps:$4 sm:$0xff]  }
0x1b67   : > { %9829 = vrsqrt.f32 %v4418_v16  ;;  %v9522_v16 = vld [vmem:[#allocation7 + $0x218] ss:$12 sps:$4 sm:$0xff]  }
0x1b70   : > { %v9828_v57 = vpop.eup %9827 }
0x1b71   : > { %v4421_v49 = vmul.f32 %v9828_v57, %v11333_v40  ;;  %v9525_v57 = vld [vmem:[#allocation7 + $0x1fc] ss:$12 sps:$4 sm:$0xff]  }
0x1b73   : > { %v4429_v18 = vmul.f32 %v8132_v41, %v4421_v49  ;;  %v9523_v49 = vld [vmem:[#allocation7 + $0x1f8] ss:$12 sps:$4 sm:$0xff]  }
0x1b74   : > { %v9830_v34 = vpop.eup %9829 }
0x1b75   : > { %v4422_v19 = vmul.f32 %v9830_v34, %v11337_v20  ;;  %v4437_v29 = vadd.f32 %v8133_v33, %v4429_v18  ;;  %v9529_v34 = vld [vmem:[#allocation7 + $0x1e4] ss:$12 sps:$4 sm:$0xff]   ;;  %v9530_v18 = vld [vmem:[#allocation7 + $0x1e8] ss:$12 sps:$4 sm:$0xff]  }
0x1b77   : > { %v4430_v54 = vmul.f32 %v8132_v41, %v4422_v19  ;;  %v9526_v41 = vld [vmem:[#allocation7 + $0x200] ss:$12 sps:$4 sm:$0xff]  }
0x1b78   : > { %v9527_v19 = vld [vmem:[#allocation7 + $0x1e0] ss:$12 sps:$4 sm:$0xff]  }
0x1b79   : > { %v4438_v63 = vadd.f32 %v8133_v33, %v4430_v54  ;;  %v9533_v33 = vld [vmem:[#allocation7 + $0x1cc] ss:$12 sps:$4 sm:$0xff]   ;;  %v9531_v54 = vld [vmem:[#allocation7 + $0x1c8] ss:$12 sps:$4 sm:$0xff]  }
0x1b7b   : > { %v4439_v39 = vpack.c.bf16 %v4438_v63, %v4437_v29 }
0x1b7d   : > { %4583 = vmatmul.mubr.bf16.vlgmr.msra.gmra.mxu0 %v4439_v39  ;;  %v9535_v39 = vld [vmem:[#allocation7 + $0x1b0] ss:$12 sps:$4 sm:$0xff]  }
0x1b7e   : > { %5033 = vmatprep.mubr.bf16.mxu0 %v10353_v2  ;;  %5002 = vmatpush1.bf16.msra.mxu0 %v9515_v60 }
0x1b7f   : > { %5003 = vmatprep.subr.bf16.mxu0 %v9521_v53 }
0x1b82   : > { %5004 = vmatpush1.bf16.msra.mxu0 %v9519_v36 }
0x1b83   : > { %5005 = vmatprep.subr.bf16.mxu0 %v9525_v57 }
0x1b86   : > { %5006 = vmatpush1.bf16.msra.mxu0 %v9523_v49 }
0x1b87   : > { %5007 = vmatprep.subr.bf16.mxu0 %v9529_v34 }
0x1b8a   : > { %5008 = vmatpush1.bf16.msra.mxu0 %v9527_v19 }
0x1b8b   : > { %5009 = vmatprep.subr.bf16.mxu0 %v9533_v33 }
0x1b8e   : > { %5010 = vmatpush1.bf16.msra.mxu0 %v9531_v54 }
0x1c3d   : > { %v4584_v25 = vpop.f32.mrf.mxu0 }
0x1c3e   : > { %v4585_v22 = vadd.f32 %v4584_v25, %v4463_v32 }
0x1c3f   : > { %v4586_v38 = vpop.f32.mrf.mxu0 }
0x1c40   : > { %v4587_v40 = vadd.f32 %v4586_v38, %v4467_v10  ;;  %v4593_v1 = vmax.f32 %v4585_v22, 0.0 }
0x1c41   : > { %v4588_v58 = vpop.f32.mrf.mxu0 }
0x1c42   : > { %v4589_v56 = vadd.f32 %v4588_v58, %v4463_v32  ;;  %v4594_v45 = vmax.f32 %v4587_v40, 0.0 }
0x1c43   : > { %v4590_v15 = vpop.f32.mrf.mxu0 }
0x1c44   : > { %v4591_v20 = vadd.f32 %v4590_v15, %v4467_v10  ;;  %v4595_v17 = vmax.f32 %v4589_v56, 0.0  ;;  %v8168_v15 = vld [vmem:[%s11872_s16 + $0x1] ss:$0 sm:$0xff] }
0x1c46   : > { %v4596_v61 = vmax.f32 %v4591_v20, 0.0  ;;  %v4597_v51 = vpack.c.bf16 %v4595_v17, %v4593_v1 }
0x1c48   : > { %v4598_v0 = vpack.c.bf16 %v4596_v61, %v4594_v45  ;;  %v8169_v61 = vld [vmem:[#allocation13 + $0x1] ss:$0 sm:$0xff] }
0x1c4a   : > { %4768 = vmatprep.mubr.bf16.mxu1 %v4598_v0 }
0x1c4b   : > { %4769 = vmatmul.mubr.bf16.vlgmr.msra.gmra.mxu1 %v4597_v51 }
0x1c4c   : > { %8996 = vmatprep.mubr.msk.bf16.mxu1 %vm10355_vm0, %v10354_v3  ;;  %8981 = vmatpush3.bf16.msra.mxu1 %v9518_v8 }
0x1c4d   : > { %8982 = vmatprep.subr.bf16.mxu1 %v10354_v3 }
0x1c50   : > { %8983 = vmatpush3.bf16.msra.mxu1 %v9522_v16 }
0x1c51   : > { %8984 = vmatprep.subr.bf16.mxu1 %v10354_v3 }
0x1c54   : > { %8985 = vmatpush3.bf16.msra.mxu1 %v9526_v41 }
0x1c55   : > { %8986 = vmatprep.subr.bf16.mxu1 %v10354_v3 }
0x1c58   : > { %8987 = vmatpush3.bf16.msra.mxu1 %v9530_v18 }
0x1c59   : > { %8988 = vmatprep.subr.bf16.mxu1 %v10354_v3 }
0x1d0b   : > { %v8520_v48 = vpop.f32.mrf.mxu1 }
0x1d0d   : > { %v8521_v23 = vpop.f32.mrf.mxu1 }
0x1d0e   : > { %v8522_v26 = vadd.f32 %v8521_v23, %v8520_v48 }
0x1d0f   : > { %v8523_v30 = vpop.f32.mrf.mxu1 }
0x1d10   : > { %v4771_v31 = vadd.f32 %v8522_v26, %v8150_v52 }
0x1d11   : > { %v8524_v55 = vpop.f32.mrf.mxu1 }
0x1d12   : > { %v8525_v62 = vadd.f32 %v8524_v55, %v8523_v30  ;;  %v4777_v59 = vadd.f32 %v4771_v31, %v4437_v29  ;;  %v9534_v29 = vld [vmem:[#allocation7 + $0x1d0] ss:$12 sps:$4 sm:$0xff]  }
0x1d13   : > { %8989 = vmatpush3.bf16.msra.mxu1 %v9534_v29 }
0x1d14   : > { %v4774_v35 = vadd.f32 %v8525_v62, %v8150_v52  ;;  %4783 = vadd.xlane.f32.xlu1 %v4777_v59  ;;  %8990 = vmatprep.subr.bf16.mxu1 %v10354_v3  ;;  %v4856_v52 = vld [vmem:[#allocation9 + $0x6] sm:$0x7] }
0x1d15   : > { %v4869_v30 = vrot.slane %v4856_v52, %v10747_v13  ;;  %v4865_v62 = vrot.slane %v4856_v52, %v10708_v37 }
0x1d16   : > { %v4778_v28 = vadd.f32 %v4774_v35, %v4438_v63  ;;  %v9537_v63 = vld [vmem:[#allocation7 + $0x1b4] ss:$12 sps:$4 sm:$0xff]  }
0x1d17   : > { %5011 = vmatprep.subr.bf16.mxu0 %v9537_v63  ;;  %8991 = vmatpush3.bf16.msra.mxu1 %v9538_v47 }
0x1d18   : > { %4785 = vadd.xlane.f32.xlu1 %v4778_v28  ;;  %5012 = vmatpush1.bf16.msra.mxu0 %v9535_v39 }
0x1d19   : > { %8992 = vmatprep.subr.bf16.mxu1 %v10354_v3  ;;  %5013 = vmatprep.subr.bf16.mxu0 %v9541_v42 }
0x1d1b   : > { %8993 = vmatpush3.bf16.msra.mxu1 %v9542_v46 }
0x1d1c   : > { %5014 = vmatpush1.bf16.msra.mxu0 %v9539_v24  ;;  %8994 = vmatprep.subr.bf16.mxu1 %v10354_v3 }
0x1d1d   : > { %5015 = vmatprep.subr.bf16.mxu0 %v9545_v50 }
0x1d1f   : > { %8995 = vmatpush3.bf16.msra.mxu1 %v9546_v5 }
0x1d20   : > { %5016 = vmatpush1.bf16.msra.mxu0 %v9543_v27  ;;  %9006 = vmatprep.subr.bf16.mxu1 %v10354_v3 }
0x1d21   : > { %9000 = vmatprep.subr.bf16.mxu0 %v10354_v3 }
0x1d9d   : > { %v4784_v4 = vpop.xlane.xlu1 %4783 }
0x1d9e   : > { %v4787_v7 = vmul.f32 0.0078125, %v4784_v4  ;;  %v4861_v4 = vrot.slane %v4856_v52, %v10711_v44 }
0x1da0   : > { %v11353_v12 = vsub.f32 %v4777_v59, %v4787_v7 }
0x1da1   : > { %v4786_v43 = vpop.xlane.xlu1 %4785 }
0x1da2   : > { %v4788_v6 = vmul.f32 0.0078125, %v4786_v43  ;;  %v4791_v11 = vmul.f32 %v11353_v12, %v11353_v12 }
0x1da4   : > { %v11357_v9 = vsub.f32 %v4778_v28, %v4788_v6  ;;  %4793 = vadd.xlane.f32.xlu0 %v4791_v11 }
0x1da6   : > { %v4792_v14 = vmul.f32 %v11357_v9, %v11357_v9 }
0x1da8   : > { %4795 = vadd.xlane.f32.xlu1 %v4792_v14 }
0x1e2d   : > { %v4794_v25 = vpop.xlane.xlu0 %4793 }
0x1e2e   : > { %v4797_v10 = vmul.f32 0.0078125, %v4794_v25 }
0x1e30   : > { %v4799_v32 = vadd.f32 1e-05, %v4797_v10 }
0x1e31   : > { %v4796_v38 = vpop.xlane.xlu1 %4795 }
0x1e32   : > { %9831 = vrsqrt.f32 %v4799_v32  ;;  %v4798_v58 = vmul.f32 0.0078125, %v4796_v38 }
0x1e34   : > { %v4800_v40 = vadd.f32 1e-05, %v4798_v58 }
0x1e36   : > { %9833 = vrsqrt.f32 %v4800_v40 }
0x1e3f   : > { %v9832_v56 = vpop.eup %9831 }
0x1e40   : > { %v4803_v22 = vmul.f32 %v9832_v56, %v11353_v12 }
0x1e42   : > { %v4811_v17 = vmul.f32 %v8168_v15, %v4803_v22 }
0x1e43   : > { %v9834_v20 = vpop.eup %9833 }
0x1e44   : > { %v4804_v45 = vmul.f32 %v9834_v20, %v11357_v9  ;;  %v11374_v0 = vadd.f32 %v8169_v61, %v4811_v17 }
0x1e46   : > { %v4812_v1 = vmul.f32 %v8168_v15, %v4804_v45 }
0x1e48   : > { %v11376_v51 = vadd.f32 %v8169_v61, %v4812_v1 }
0x1e4a   : > { %v11380_v48 = vpack.c.bf16 %v11376_v51, %v11374_v0 }
0x1e4c   : > { %5034 = vmatmul.mubr.bf16.vlgmr.msra.gmra.mxu0 %v11380_v48  ;;  %8997 = vmatmul.mubr.bf16.vlgmr.msra.gmra.mxu1 %v11380_v48 }
0x1e4d   : > { %9002 = vmatprep.mubr.msk.bf16.mxu0 %vm10355_vm0, %v10354_v3  ;;  %9008 = vmatprep.mubr.msk.bf16.mxu1 %vm10355_vm0, %v10354_v3 }
0x1f0c   : > { %v5035_v23 = vpop.f32.mrf.mxu0  ;;  %v5078_v26 = vpop.f32.mrf.mxu1 }
0x1f0d   : > { %v5079_v28 = vadd.f32 %v5078_v26, %v4869_v30  ;;  %v5036_v9 = vadd.f32 %v5035_v23, %v4861_v4 }
0x1f0e   : > { %v5037_v31 = vpop.f32.mrf.mxu0  ;;  %v8998_v55 = vpop.f32.mrf.mxu1 }
0x1f0f   : > { %v5038_v7 = vadd.f32 %v5037_v31, %v4865_v62 }
0x1f10   : > { %v5039_v59 = vpop.f32.mrf.mxu0  ;;  %v5081_v35 = vpop.f32.mrf.mxu1 }
0x1f11   : > { %v5082_v60 = vadd.f32 %v5081_v35, %v4869_v30  ;;  %v5040_v6 = vadd.f32 %v5039_v59, %v4861_v4  ;;  %v9549_v35 = vld [vmem:[#allocation10 + $0x98] sm:$0xff]  }
0x1f12   : > { %v5041_v21 = vpop.f32.mrf.mxu0  ;;  %v8999_v8 = vpop.f32.mrf.mxu1 }
0x1f13   : > { %v11391_v12 = vpack.c.bf16 %v5082_v60, %v5079_v28  ;;  %v5042_v43 = vadd.f32 %v5041_v21, %v4865_v62  ;;  %v11401_v53 = vpack.c.bf16 %v5040_v6, %v5036_v9  ;;  %v9547_v6 = vld [vmem:[#allocation10 + $0x88] sm:$0xff]  }
0x1f15   : > { %v11393_v11 = vpack.c.bf16 %v5042_v43, %v5038_v7  ;;  %9007 = vmatpush3.bf16.msra.mxu1 %v11391_v12 }
0x1f16   : > { %9018 = vmatprep.subr.bf16.mxu1 %v10354_v3 }
0x1f17   : > { %5224 = vrot.lane.b32.xlu1 %v11393_v11, %s10356_s3  ;;  %v5109_v14 = vsel %vm999_vm1, %v11393_v11, 0 }
0x1f18   : > { %9001 = vmatpush3.bf16.xpose.msra.mxu0 %v5109_v14  ;;  %v9548_v14 = vld [vmem:[#allocation10 + $0x80] sm:$0xff]  }
0x1f19   : > { %9012 = vmatprep.subr.bf16.mxu0 %v10354_v3 }
0x1f1b   : > { %5221 = vrot.lane.b32.xlu1 %v11401_v53, %s10356_s3 }
0x1f1f   : > { %9003 = vmatmul.mubr.msk.bf16.vlgmr.msra.gmra.mxu0 %vm999_vm1, %v11401_v53 }
0x1f20   : > { %9014 = vmatprep.mubr.msk.bf16.mxu0 %vm10355_vm0, %v10354_v3 }
0x1f89   : > { %v5225_v36 = vpop.permute.xlu1 %5224 }
0x1f8a   : > { %v5230_v16 = vsel %vm999_vm1, %v5225_v36, 0  ;;  %v9550_v36 = vld [vmem:[#allocation10 + $0x90] sm:$0xff]  }
0x1f8b   : > { %9013 = vmatpush3.bf16.xpose.msra.mxu0 %v5230_v16 }
0x1f8c   : > { %9024 = vmatprep.subr.bf16.mxu0 %v10354_v3 }
0x1f8d   : > { %v5222_v57 = vpop.permute.xlu1 %5221 }
0x1f92   : > { %9015 = vmatmul.mubr.msk.bf16.vlgmr.msra.gmra.mxu0 %vm999_vm1, %v5222_v57 }
0x1f93   : > { %9028 = vmatprep.mubr.msk.bf16.mxu0 %vm10355_vm0, %v10354_v3  ;;  %9025 = vmatpush3.bf16.msra.mxu0 %v9549_v35 }
0x1f94   : > { %9026 = vmatprep.subr.bf16.mxu0 %v10354_v3 }
0x1f97   : > { %9027 = vmatpush3.bf16.msra.mxu0 %v9550_v36 }
0x1f98   : > { %9040 = vmatprep.subr.bf16.mxu0 %v10354_v3 }
0x1fdf   : > { %v5145_v49 = vpop.f32.mrf.mxu0 }
0x1fe0   : > { %v5152_v41 = vsel %vm1141_vm2, %v5145_v49, -inf }
0x1fe1   : > { %5153 = vmax.xlane.f32.xlu1 %v5152_v41  ;;  %v9004_v34 = vpop.f32.mrf.mxu0 }
0x1fe3   : > { %v5148_v19 = vpop.f32.mrf.mxu0 }
0x1fe4   : > { %v5155_v18 = vsel %vm1141_vm2, %v5148_v19, -inf }
0x1fe5   : > { %5156 = vmax.xlane.f32.xlu0 %v5155_v18  ;;  %v9005_v33 = vpop.f32.mrf.mxu0 }
0x1ff2   : > { %5459 = vrot.lane.b32.xlu1 %v11393_v11, %s10357_s25 }
0x2052   : > { %v5266_v54 = vpop.f32.mrf.mxu0 }
0x2053   : > { %v5273_v29 = vsel %vm1141_vm2, %v5266_v54, -inf }
0x2054   : > { %5274 = vmax.xlane.f32.xlu0 %v5273_v29  ;;  %v9016_v63 = vpop.f32.mrf.mxu0 }
0x2056   : > { %v5269_v39 = vpop.f32.mrf.mxu0 }
0x2057   : > { %v5276_v47 = vsel %vm1141_vm2, %v5269_v39, -inf }
0x2058   : > { %5277 = vmax.xlane.f32.xlu0 %v5276_v47  ;;  %v9017_v42 = vpop.f32.mrf.mxu0 }
0x206a   : > { %v5154_v24 = vpop.xlane.xlu1 %5153 }
0x206b   : > { %v5158_v46 = vsub.f32 %v5145_v49, %v5154_v24 }
0x206d   : > { %v5160_v50 = vmul.f32 1.442695, %v5158_v46 }
0x206e   : > { %v5157_v27 = vpop.xlane.xlu0 %5156  ;;  %v5460_v33 = vpop.permute.xlu1 %5459 }
0x206f   : > { %9835 = vpow2.f32 %v5160_v50  ;;  %v5159_v5 = vsub.f32 %v5148_v19, %v5157_v27 }
0x2071   : > { %v5162_v25 = vmul.f32 1.442695, %v5159_v5 }
0x2073   : > { %9837 = vpow2.f32 %v5162_v25 }
0x207c   : > { %v9836_v10 = vpop.eup %9835 }
0x207d   : > { %v5164_v32 = vsel %vm1141_vm2, %v9836_v10, 0.0 }
0x207e   : > { %5165 = vadd.xlane.f32.xlu0 %v5164_v32 }
0x2080   : > { %v9838_v38 = vpop.eup %9837 }
0x2081   : > { %v5167_v58 = vsel %vm1141_vm2, %v9838_v38, 0.0 }
0x2082   : > { %5168 = vadd.xlane.f32.xlu0 %v5167_v58 }
0x20dd   : > { %v5275_v40 = vpop.xlane.xlu0 %5274 }
0x20de   : > { %v5279_v56 = vsub.f32 %v5266_v54, %v5275_v40 }
0x20e0   : > { %v5281_v22 = vmul.f32 1.442695, %v5279_v56 }
0x20e1   : > { %v5278_v15 = vpop.xlane.xlu0 %5277 }
0x20e2   : > { %9839 = vpow2.f32 %v5281_v22  ;;  %v5280_v20 = vsub.f32 %v5269_v39, %v5278_v15  ;;  %v5465_v39 = vsel %vm999_vm1, %v5460_v33, 0 }
0x20e4   : > { %v5283_v17 = vmul.f32 1.442695, %v5280_v20 }
0x20e6   : > { %9841 = vpow2.f32 %v5283_v17 }
0x20ef   : > { %v9840_v45 = vpop.eup %9839 }
0x20f0   : > { %v5285_v61 = vsel %vm1141_vm2, %v9840_v45, 0.0 }
0x20f1   : > { %5286 = vadd.xlane.f32.xlu0 %v5285_v61 }
0x20f3   : > { %v9842_v1 = vpop.eup %9841 }
0x20f4   : > { %v5288_v52 = vsel %vm1141_vm2, %v9842_v1, 0.0 }
0x20f5   : > { %5289 = vadd.xlane.f32.xlu0 %v5288_v52 }
0x2107   : > { %v5166_v23 = vpop.xlane.xlu0 %5165 }
0x2108   : > { %9843 = vrcp.f32 %v5166_v23 }
0x210b   : > { %5297 = vrot.lane.b32.xlu0 %v11391_v12, %s10356_s3  ;;  %v5169_v26 = vpop.xlane.xlu0 %5168 }
0x210c   : > { %9845 = vrcp.f32 %v5169_v26 }
0x210f   : > { %5457 = vrot.lane.b32.xlu0 %v11401_v53, %s10357_s25 }
0x2115   : > { %v9844_v30 = vpop.eup %9843 }
0x2116   : > { %v5172_v55 = vmul.f32 %v9844_v30, %v9836_v10 }
0x2119   : > { %v9846_v31 = vpop.eup %9845 }
0x211a   : > { %v5173_v62 = vmul.f32 %v9846_v31, %v9838_v38 }
0x211c   : > { %v5174_v59 = vpack.c.bf16 %v5173_v62, %v5172_v55 }
0x211e   : > { %9009 = vmatmul.mubr.msk.bf16.vlgmr.msra.gmra.mxu1 %vm1141_vm2, %v5174_v59 }
0x211f   : > { %9020 = vmatprep.mubr.msk.bf16.mxu1 %vm10355_vm0, %v10354_v3 }
0x217a   : > { %v5287_v28 = vpop.xlane.xlu0 %5286 }
0x217b   : > { %9847 = vrcp.f32 %v5287_v28 }
0x217e   : > { %v5290_v60 = vpop.xlane.xlu0 %5289 }
0x217f   : > { %9849 = vrcp.f32 %v5290_v60 }
0x2182   : > { %v5298_v21 = vpop.permute.xlu0 %5297 }
0x2183   : > { %9019 = vmatpush3.bf16.msra.mxu1 %v5298_v21 }
0x2184   : > { %9032 = vmatprep.subr.bf16.mxu1 %v10354_v3 }
0x2186   : > { %v5458_v47 = vpop.permute.xlu0 %5457 }
0x2188   : > { %v9848_v8 = vpop.eup %9847 }
0x2189   : > { %v5293_v7 = vmul.f32 %v9848_v8, %v9840_v45 }
0x218c   : > { %v9850_v4 = vpop.eup %9849 }
0x218d   : > { %v5294_v43 = vmul.f32 %v9850_v4, %v9842_v1  ;;  %v9551_v4 = vld [vmem:[#allocation10 + $0xa8] sm:$0xff]  }
0x218f   : > { %v5295_v9 = vpack.c.bf16 %v5294_v43, %v5293_v7  ;;  %v9552_v7 = vld [vmem:[#allocation10 + $0xa0] sm:$0xff]  }
0x2191   : > { %9021 = vmatmul.mubr.msk.bf16.vlgmr.msra.gmra.mxu1 %vm1141_vm2, %v5295_v9 }
0x2192   : > { %9033 = vmatpush3.bf16.msra.mxu1 %v9547_v6  ;;  %9036 = vmatprep.mubr.msk.bf16.mxu1 %vm10355_vm0, %v10354_v3 }
0x2193   : > { %9034 = vmatprep.subr.bf16.mxu1 %v10354_v3 }
0x2196   : > { %9035 = vmatpush3.bf16.msra.mxu1 %v9548_v14 }
0x2197   : > { %9046 = vmatprep.subr.bf16.mxu1 %v10354_v3 }
0x21de   : > { %v5212_v16 = vpop.f32.mrf.mxu1 }
0x21e0   : > { %v9010_v57 = vpop.f32.mrf.mxu1 }
0x21e2   : > { %v5215_v49 = vpop.f32.mrf.mxu1 }
0x21e3   : > { %v5219_v41 = vpack.c.bf16 %v5215_v49, %v5212_v16 }
0x21e4   : > { %v9011_v34 = vpop.f32.mrf.mxu1 }
0x21e5   : > { %9037 = vmatmul.mubr.msk.bf16.vlgmr.msra.gmra.mxu1 %vm999_vm1, %v5219_v41 }
0x21e6   : > { %9048 = vmatprep.mubr.msk.bf16.mxu1 %vm10355_vm0, %v10354_v3 }
0x2251   : > { %v5337_v19 = vpop.f32.mrf.mxu1 }
0x2253   : > { %v9022_v18 = vpop.f32.mrf.mxu1 }
0x2255   : > { %v5340_v54 = vpop.f32.mrf.mxu1 }
0x2256   : > { %v5344_v29 = vpack.c.bf16 %v5340_v54, %v5337_v19 }
0x2257   : > { %v9023_v63 = vpop.f32.mrf.mxu1 }
0x2258   : > { %9029 = vmatmul.mubr.msk.bf16.vlgmr.msra.gmra.mxu0 %vm999_vm1, %v5344_v29 }
0x2259   : > { %9041 = vmatpush3.bf16.xpose.msra.mxu0 %v5465_v39  ;;  %9042 = vmatprep.mubr.msk.bf16.mxu0 %vm10355_vm0, %v10354_v3 }
0x225a   : > { %9052 = vmatprep.subr.bf16.mxu0 %v10354_v3 }
0x2260   : > { %9043 = vmatmul.mubr.msk.bf16.vlgmr.msra.gmra.mxu0 %vm999_vm1, %v5458_v47 }
0x2261   : > { %9056 = vmatprep.mubr.msk.bf16.mxu0 %vm10355_vm0, %v10354_v3  ;;  %9053 = vmatpush3.bf16.msra.mxu0 %v9551_v4 }
0x2262   : > { %9054 = vmatprep.subr.bf16.mxu0 %v10354_v3 }
0x2265   : > { %9055 = vmatpush3.bf16.msra.mxu0 %v9552_v7  ;;  %v9555_v7 = vld [vmem:[#allocation15 + $0x170] ss:$8 sps:$4 sm:$0xff]  }
0x2266   : > { %9066 = vmatprep.subr.bf16.mxu0 %v10354_v3 }
0x22a5   : > { %v11451_v42 = vpop.f32.mrf.mxu1 }
0x22a7   : > { %v9038_v24 = vpop.f32.mrf.mxu1 }
0x22a9   : > { %v11453_v46 = vpop.f32.mrf.mxu1 }
0x22ab   : > { %v9039_v50 = vpop.f32.mrf.mxu1 }
0x2318   : > { %v11455_v27 = vpop.f32.mrf.mxu0 }
0x231a   : > { %v9030_v5 = vpop.f32.mrf.mxu0 }
0x231c   : > { %v11457_v25 = vpop.f32.mrf.mxu0 }
0x231e   : > { %v9031_v10 = vpop.f32.mrf.mxu0 }
0x2320   : > { %v5501_v32 = vpop.f32.mrf.mxu0 }
0x2321   : > { %v5508_v38 = vsel %vm1141_vm2, %v5501_v32, -inf }
0x2322   : > { %5509 = vmax.xlane.f32.xlu1 %v5508_v38  ;;  %v9044_v58 = vpop.f32.mrf.mxu0 }
0x2324   : > { %v5504_v40 = vpop.f32.mrf.mxu0 }
0x2325   : > { %v5511_v56 = vsel %vm1141_vm2, %v5504_v40, -inf }
0x2326   : > { %5512 = vmax.xlane.f32.xlu0 %v5511_v56  ;;  %v9045_v22 = vpop.f32.mrf.mxu0 }
0x23ab   : > { %v5510_v15 = vpop.xlane.xlu1 %5509 }
0x23ac   : > { %v5514_v20 = vsub.f32 %v5501_v32, %v5510_v15 }
0x23ae   : > { %v5516_v17 = vmul.f32 1.442695, %v5514_v20 }
0x23af   : > { %v5513_v45 = vpop.xlane.xlu0 %5512 }
0x23b0   : > { %9851 = vpow2.f32 %v5516_v17  ;;  %v5515_v61 = vsub.f32 %v5504_v40, %v5513_v45  ;;  %v5454_v40 = vadd.f32 %v11453_v46, %v11457_v25  ;;  %v9554_v46 = vld [vmem:[#allocation10 + $0xb0] sm:$0xff]  }
0x23b2   : > { %v5518_v1 = vmul.f32 1.442695, %v5515_v61 }
0x23b4   : > { %9853 = vpow2.f32 %v5518_v1 }
0x23bd   : > { %v9852_v52 = vpop.eup %9851 }
0x23be   : > { %v5520_v23 = vsel %vm1141_vm2, %v9852_v52, 0.0 }
0x23bf   : > { %5521 = vadd.xlane.f32.xlu0 %v5520_v23 }
0x23c1   : > { %v9854_v26 = vpop.eup %9853 }
0x23c2   : > { %v5523_v30 = vsel %vm1141_vm2, %v9854_v26, 0.0 }
0x23c3   : > { %5524 = vadd.xlane.f32.xlu1 %v5523_v30 }
0x23d4   : > { %5639 = vrot.lane.b32.xlu1 %v11393_v11, %s10358_s15 }
0x23d5   : > { %5531 = vrot.lane.b32.xlu0 %v11391_v12, %s10357_s25 }
0x23d8   : > { %5637 = vrot.lane.b32.xlu1 %v11401_v53, %s10358_s15 }
0x2448   : > { %v5522_v31 = vpop.xlane.xlu0 %5521 }
0x2449   : > { %9855 = vrcp.f32 %v5522_v31 }
0x244c   : > { %v5525_v55 = vpop.xlane.xlu1 %5524  ;;  %v5532_v62 = vpop.permute.xlu0 %5531 }
0x244d   : > { %9857 = vrcp.f32 %v5525_v55  ;;  %9047 = vmatpush3.bf16.msra.mxu1 %v5532_v62  ;;  %v8215_v62 = vld [vmem:[%s11800_s5 + $0x2] ss:$0 sm:$0xff] }
0x244e   : > { %9060 = vmatprep.subr.bf16.mxu1 %v10354_v3 }
0x2450   : > { %v5640_v21 = vpop.permute.xlu1 %5639 }
0x2451   : > { %v5645_v8 = vsel %vm999_vm1, %v5640_v21, 0 }
0x2454   : > { %v5638_v53 = vpop.permute.xlu1 %5637 }
0x2456   : > { %v9856_v59 = vpop.eup %9855 }
0x2457   : > { %v5528_v28 = vmul.f32 %v9856_v59, %v9852_v52 }
0x245a   : > { %v9858_v35 = vpop.eup %9857 }
0x245b   : > { %v5529_v60 = vmul.f32 %v9858_v35, %v9854_v26 }
0x245d   : > { %v5530_v11 = vpack.c.bf16 %v5529_v60, %v5528_v28 }
0x245f   : > { %9049 = vmatmul.mubr.msk.bf16.vlgmr.msra.gmra.mxu1 %vm1141_vm2, %v5530_v11 }
0x2460   : > { %9061 = vmatpush3.bf16.xpose.msra.mxu1 %v5645_v8  ;;  %9062 = vmatprep.mubr.msk.bf16.mxu1 %vm10355_vm0, %v10354_v3 }
0x2461   : > { %9072 = vmatprep.subr.bf16.mxu1 %v10354_v3 }
0x2467   : > { %9063 = vmatmul.mubr.msk.bf16.vlgmr.msra.gmra.mxu1 %vm999_vm1, %v5638_v53 }
0x2468   : > { %9076 = vmatprep.mubr.msk.bf16.mxu1 %vm10355_vm0, %v10354_v3 }
0x251f   : > { %v5571_v43 = vpop.f32.mrf.mxu1 }
0x2521   : > { %v9050_v6 = vpop.f32.mrf.mxu1 }
0x2523   : > { %v5574_v9 = vpop.f32.mrf.mxu1 }
0x2524   : > { %v5578_v14 = vpack.c.bf16 %v5574_v9, %v5571_v43  ;;  %v9557_v43 = vld [vmem:[#allocation15 + $0x174] ss:$8 sps:$4 sm:$0xff]  }
0x2525   : > { %v9051_v36 = vpop.f32.mrf.mxu1 }
0x2526   : > { %9057 = vmatmul.mubr.msk.bf16.vlgmr.msra.gmra.mxu0 %vm999_vm1, %v5578_v14 }
0x2527   : > { %v5681_v16 = vpop.f32.mrf.mxu1  ;;  %9068 = vmatprep.mubr.msk.bf16.mxu0 %vm10355_vm0, %v10354_v3 }
0x2528   : > { %v5688_v57 = vsel %vm1141_vm2, %v5681_v16, -inf }
0x2529   : > { %5689 = vmax.xlane.f32.xlu0 %v5688_v57  ;;  %v9064_v49 = vpop.f32.mrf.mxu1 }
0x252b   : > { %v5684_v41 = vpop.f32.mrf.mxu1 }
0x252c   : > { %v5691_v34 = vsel %vm1141_vm2, %v5684_v41, -inf }
0x252d   : > { %5692 = vmax.xlane.f32.xlu1 %v5691_v34  ;;  %v9065_v19 = vpop.f32.mrf.mxu1  ;;  %v9560_v34 = vld [vmem:[#allocation15 + $0x164] ss:$8 sps:$4 sm:$0xff]  }
0x252e   : > { %v9558_v19 = vld [vmem:[#allocation15 + $0x160] ss:$8 sps:$4 sm:$0xff]  }
0x253e   : > { %5711 = vrot.lane.b32.xlu1 %v11391_v12, %s10358_s15  ;;  %v5451_v12 = vadd.f32 %v11451_v42, %v11455_v27  ;;  %v9553_v42 = vld [vmem:[#allocation10 + $0xb8] sm:$0xff]  }
0x253f   : > { %9073 = vmatpush3.bf16.msra.mxu1 %v9553_v42 }
0x2540   : > { %9074 = vmatprep.subr.bf16.mxu1 %v10354_v3 }
0x2543   : > { %9075 = vmatpush3.bf16.msra.mxu1 %v9554_v46 }
0x25b2   : > { %v5690_v18 = vpop.xlane.xlu0 %5689 }
0x25b3   : > { %v5694_v33 = vsub.f32 %v5681_v16, %v5690_v18  ;;  %v9563_v18 = vld [vmem:[#allocation15 + $0x154] ss:$8 sps:$4 sm:$0xff]  }
0x25b5   : > { %v5696_v54 = vmul.f32 1.442695, %v5694_v33  ;;  %v9561_v33 = vld [vmem:[#allocation15 + $0x150] ss:$8 sps:$4 sm:$0xff]  }
0x25b6   : > { %v5693_v29 = vpop.xlane.xlu1 %5692 }
0x25b7   : > { %9859 = vpow2.f32 %v5696_v54  ;;  %v5695_v63 = vsub.f32 %v5684_v41, %v5693_v29  ;;  %v9566_v54 = vld [vmem:[#allocation15 + $0x144] ss:$8 sps:$4 sm:$0xff]   ;;  %v9564_v29 = vld [vmem:[#allocation15 + $0x140] ss:$8 sps:$4 sm:$0xff]  }
0x25b9   : > { %v5698_v39 = vmul.f32 1.442695, %v5695_v63  ;;  %v9569_v63 = vld [vmem:[#allocation15 + $0x134] ss:$8 sps:$4 sm:$0xff]  }
0x25ba   : > { %v5712_v47 = vpop.permute.xlu1 %5711 }
0x25bb   : > { %9861 = vpow2.f32 %v5698_v39  ;;  %9067 = vmatpush3.bf16.msra.mxu0 %v5712_v47  ;;  %v9567_v39 = vld [vmem:[#allocation15 + $0x130] ss:$8 sps:$4 sm:$0xff]   ;;  %v9572_v47 = vld [vmem:[#allocation15 + $0x124] ss:$8 sps:$4 sm:$0xff]  }
0x25bc   : > { %5982 = vmatprep.subr.bf16.mxu0 %v9557_v43  ;;  %v9590_v43 = vld [vmem:[#allocation7 + $0x2a4] ss:$12 sps:$4 sm:$0xff]  }
0x25c4   : > { %v9860_v24 = vpop.eup %9859 }
0x25c5   : > { %v5700_v50 = vsel %vm1141_vm2, %v9860_v24, 0.0 }
0x25c6   : > { %5701 = vadd.xlane.f32.xlu0 %v5700_v50  ;;  %v9575_v50 = vld [vmem:[#allocation15 + $0x114] ss:$8 sps:$4 sm:$0xff]  }
0x25c8   : > { %v9862_v5 = vpop.eup %9861 }
0x25c9   : > { %v5703_v10 = vsel %vm1141_vm2, %v9862_v5, 0.0 }
0x25ca   : > { %5704 = vadd.xlane.f32.xlu0 %v5703_v10  ;;  %v9578_v10 = vld [vmem:[#allocation15 + $0x104] ss:$8 sps:$4 sm:$0xff]  }
0x25e6   : > { %v5628_v32 = vpop.f32.mrf.mxu0 }
0x25e7   : > { %v5635_v38 = vadd.f32 %v5628_v32, %v5451_v12  ;;  %v9576_v12 = vld [vmem:[#allocation15 + $0x100] ss:$8 sps:$4 sm:$0xff]   ;;  %v9581_v32 = vld [vmem:[#allocation7 + $0x2ec] ss:$12 sps:$4 sm:$0xff]  }
0x25e8   : > { %v9058_v58 = vpop.f32.mrf.mxu0 }
0x25e9   : > { %v9604_v58 = vld [vmem:[#allocation18 + $0x138] sm:$0xff]  }
0x25ea   : > { %v5631_v56 = vpop.f32.mrf.mxu0 }
0x25eb   : > { %v5636_v22 = vadd.f32 %v5631_v56, %v5454_v40  ;;  %v9605_v40 = vld [vmem:[#allocation18 + $0x170] sm:$0xff]  }
0x25ec   : > { %v9059_v15 = vpop.f32.mrf.mxu0  ;;  %v9606_v56 = vld [vmem:[#allocation18 + $0x130] sm:$0xff]  }
0x25ed   : > { %v9608_v15 = vld [vmem:[#allocation18 + $0x128] sm:$0xff]  }
0x264f   : > { %v5702_v20 = vpop.xlane.xlu0 %5701 }
0x2650   : > { %9863 = vrcp.f32 %v5702_v20  ;;  %v9609_v20 = vld [vmem:[#allocation18 + $0x160] sm:$0xff]  }
0x2653   : > { %v5705_v17 = vpop.xlane.xlu0 %5704 }
0x2654   : > { %9865 = vrcp.f32 %v5705_v17  ;;  %v9610_v17 = vld [vmem:[#allocation18 + $0x120] sm:$0xff]  }
0x265d   : > { %v9864_v45 = vpop.eup %9863 }
0x265e   : > { %v5708_v1 = vmul.f32 %v9864_v45, %v9860_v24  ;;  %v9570_v24 = vld [vmem:[#allocation15 + $0x120] ss:$8 sps:$4 sm:$0xff]  }
0x265f   : > { %v9611_v45 = vld [vmem:[#allocation18 + $0x158] sm:$0xff]  }
0x2661   : > { %v9866_v61 = vpop.eup %9865 }
0x2662   : > { %v5709_v52 = vmul.f32 %v9866_v61, %v9862_v5  ;;  %v9573_v5 = vld [vmem:[#allocation15 + $0x110] ss:$8 sps:$4 sm:$0xff]   ;;  %v9612_v61 = vld [vmem:[#allocation18 + $0x118] sm:$0xff]  }
0x2664   : > { %v5710_v23 = vpack.c.bf16 %v5709_v52, %v5708_v1 }
0x2666   : > { %9069 = vmatmul.mubr.msk.bf16.vlgmr.msra.gmra.mxu0 %vm1141_vm2, %v5710_v23 }
0x2667   : > { %6014 = vmatprep.mubr.bf16.mxu0 %v10353_v2  ;;  %5983 = vmatpush1.bf16.msra.mxu0 %v9555_v7  ;;  %v9585_v7 = vld [vmem:[#allocation7 + $0x2b8] ss:$12 sps:$4 sm:$0xff]  }
0x2668   : > { %5984 = vmatprep.subr.bf16.mxu0 %v9560_v34  ;;  %v9600_v34 = vld [vmem:[#allocation7 + $0x240] ss:$12 sps:$4 sm:$0xff]  }
0x266b   : > { %5985 = vmatpush1.bf16.msra.mxu0 %v9558_v19  ;;  %v9613_v19 = vld [vmem:[#allocation18 + $0x150] sm:$0xff]  }
0x266c   : > { %5986 = vmatprep.subr.bf16.mxu0 %v9563_v18  ;;  %v9614_v18 = vld [vmem:[#allocation18 + $0x110] sm:$0xff]  }
0x266f   : > { %5987 = vmatpush1.bf16.msra.mxu0 %v9561_v33  ;;  %v9615_v33 = vld [vmem:[#allocation18 + $0x148] sm:$0xff]  }
0x2670   : > { %5988 = vmatprep.subr.bf16.mxu0 %v9566_v54  ;;  %v9616_v54 = vld [vmem:[#allocation18 + $0x108] sm:$0xff]  }
0x2673   : > { %5989 = vmatpush1.bf16.msra.mxu0 %v9564_v29  ;;  %v9617_v29 = vld [vmem:[#allocation18 + $0x140] sm:$0xff]  }
0x2674   : > { %5990 = vmatprep.subr.bf16.mxu0 %v9569_v63  ;;  %v9618_v63 = vld [vmem:[#allocation18 + $0x100] sm:$0xff]  }
0x2677   : > { %5991 = vmatpush1.bf16.msra.mxu0 %v9567_v39  ;;  %v5890_v39 = vld [vmem:[#allocation16 + $0x4] sm:$0x3] }
0x2678   : > { %5992 = vmatprep.subr.bf16.mxu0 %v9572_v47 }
0x267b   : > { %5993 = vmatpush1.bf16.msra.mxu0 %v9570_v24  ;;  %v5899_v24 = vrot.slane %v5890_v39, %v10708_v37 }
0x267c   : > { %5994 = vmatprep.subr.bf16.mxu0 %v9575_v50  ;;  %v5895_v50 = vrot.slane %v5890_v39, %v10711_v44 }
0x267f   : > { %5995 = vmatpush1.bf16.msra.mxu0 %v9573_v5 }
0x2680   : > { %5996 = vmatprep.subr.bf16.mxu0 %v9578_v10 }
0x2683   : > { %5997 = vmatpush1.bf16.msra.mxu0 %v9576_v12 }
0x2684   : > { %6446 = vmatprep.subr.bf16.mxu0 %v9581_v32 }
0x2726   : > { %v5751_v27 = vpop.f32.mrf.mxu0 }
0x2728   : > { %v9070_v25 = vpop.f32.mrf.mxu0 }
0x272a   : > { %v5754_v26 = vpop.f32.mrf.mxu0 }
0x272b   : > { %v5758_v30 = vpack.c.bf16 %v5754_v26, %v5751_v27 }
0x272c   : > { %v9071_v31 = vpop.f32.mrf.mxu0 }
0x272d   : > { %9077 = vmatmul.mubr.msk.bf16.vlgmr.msra.gmra.mxu1 %vm999_vm1, %v5758_v30  ;;  %v8217_v30 = vld [vmem:[%s11801_s6 + $0x2] ss:$0 sm:$0xff] }
0x27ed   : > { %v5808_v55 = vpop.f32.mrf.mxu1 }
0x27ee   : > { %v5815_v59 = vadd.f32 %v5808_v55, %v5635_v38  ;;  %v9603_v38 = vld [vmem:[#allocation18 + $0x178] sm:$0xff]  }
0x27ef   : > { %v9078_v35 = vpop.f32.mrf.mxu1  ;;  %8563 = vmatprep.subr.bf16.mxu1 %v9603_v38 }
0x27f0   : > { %v5825_v28 = vadd.f32 %v8215_v62, %v5815_v59  ;;  %8564 = vmatpush3.bf16.msra.mxu1 %v9604_v58  ;;  %v8218_v59 = vld [vmem:[#allocation12 + $0x2] ss:$0 sm:$0xff] }
0x27f1   : > { %v5811_v60 = vpop.f32.mrf.mxu1  ;;  %8565 = vmatprep.subr.bf16.mxu1 %v9605_v40 }
0x27f2   : > { %v5816_v21 = vadd.f32 %v5811_v60, %v5636_v22  ;;  %v5827_v11 = vadd.f32 %v5825_v28, %v11374_v0  ;;  %v9607_v22 = vld [vmem:[#allocation18 + $0x168] sm:$0xff]  }
0x27f3   : > { %v9079_v8 = vpop.f32.mrf.mxu1 }
0x27f4   : > { %v5826_v53 = vadd.f32 %v8215_v62, %v5816_v21  ;;  %5833 = vadd.xlane.f32.xlu0 %v5827_v11  ;;  %8566 = vmatpush3.bf16.msra.mxu1 %v9606_v56  ;;  %v9579_v21 = vld [vmem:[#allocation7 + $0x2e8] ss:$12 sps:$4 sm:$0xff]  }
0x27f5   : > { %8567 = vmatprep.subr.bf16.mxu1 %v9607_v22  ;;  %v9584_v8 = vld [vmem:[#allocation7 + $0x2d4] ss:$12 sps:$4 sm:$0xff]  }
0x27f6   : > { %v5828_v4 = vadd.f32 %v5826_v53, %v11376_v51  ;;  %v9582_v53 = vld [vmem:[#allocation7 + $0x2d0] ss:$12 sps:$4 sm:$0xff]  }
0x27f8   : > { %5835 = vadd.xlane.f32.xlu0 %v5828_v4  ;;  %8568 = vmatpush3.bf16.msra.mxu1 %v9608_v15 }
0x27f9   : > { %8569 = vmatprep.subr.bf16.mxu1 %v9609_v20 }
0x27fc   : > { %8570 = vmatpush3.bf16.msra.mxu1 %v9610_v17 }
0x27fd   : > { %8571 = vmatprep.subr.bf16.mxu1 %v9611_v45  ;;  %v9619_v45 = vld [vmem:[#allocation7 + $0x2f0] ss:$12 sps:$4 sm:$0xff]  }
0x2800   : > { %8572 = vmatpush3.bf16.msra.mxu1 %v9612_v61 }
0x2801   : > { %8573 = vmatprep.subr.bf16.mxu1 %v9613_v19 }
0x2804   : > { %8574 = vmatpush3.bf16.msra.mxu1 %v9614_v18 }
0x2805   : > { %8575 = vmatprep.subr.bf16.mxu1 %v9615_v33 }
0x2808   : > { %8576 = vmatpush3.bf16.msra.mxu1 %v9616_v54 }
0x2809   : > { %8577 = vmatprep.subr.bf16.mxu1 %v9617_v29 }
0x280c   : > { %8578 = vmatpush3.bf16.msra.mxu1 %v9618_v63 }
0x280d   : > { %9080 = vmatprep.subr.bf16.mxu1 %v10354_v3 }
0x287d   : > { %v5834_v6 = vpop.xlane.xlu0 %5833 }
0x287e   : > { %v5837_v9 = vmul.f32 0.0078125, %v5834_v6  ;;  %v9588_v6 = vld [vmem:[#allocation7 + $0x2a0] ss:$12 sps:$4 sm:$0xff]  }
0x2880   : > { %v11502_v14 = vsub.f32 %v5827_v11, %v5837_v9  ;;  %v9593_v9 = vld [vmem:[#allocation7 + $0x28c] ss:$12 sps:$4 sm:$0xff]  }
0x2881   : > { %v5836_v36 = vpop.xlane.xlu0 %5835 }
0x2882   : > { %v5838_v16 = vmul.f32 0.0078125, %v5836_v36  ;;  %v5841_v57 = vmul.f32 %v11502_v14, %v11502_v14  ;;  %v9596_v36 = vld [vmem:[#allocation7 + $0x274] ss:$12 sps:$4 sm:$0xff]  }
0x2884   : > { %v11506_v49 = vsub.f32 %v5828_v4, %v5838_v16  ;;  %5843 = vadd.xlane.f32.xlu0 %v5841_v57  ;;  %v9587_v4 = vld [vmem:[#allocation7 + $0x2bc] ss:$12 sps:$4 sm:$0xff]  }
0x2885   : > { %v9594_v16 = vld [vmem:[#allocation7 + $0x270] ss:$12 sps:$4 sm:$0xff]  }
0x2886   : > { %v5842_v41 = vmul.f32 %v11506_v49, %v11506_v49  ;;  %v9599_v57 = vld [vmem:[#allocation7 + $0x25c] ss:$12 sps:$4 sm:$0xff]  }
0x2888   : > { %5845 = vadd.xlane.f32.xlu0 %v5842_v41  ;;  %v9602_v41 = vld [vmem:[#allocation7 + $0x244] ss:$12 sps:$4 sm:$0xff]  }
0x290d   : > { %v5844_v1 = vpop.xlane.xlu0 %5843 }
0x290e   : > { %v5847_v52 = vmul.f32 0.0078125, %v5844_v1  ;;  %v9620_v1 = vld [vmem:[#allocation7 + $0x2d8] ss:$12 sps:$4 sm:$0xff]  }
0x2910   : > { %v5849_v23 = vadd.f32 1e-05, %v5847_v52  ;;  %v9621_v52 = vld [vmem:[#allocation7 + $0x2c0] ss:$12 sps:$4 sm:$0xff]  }
0x2911   : > { %v5846_v42 = vpop.xlane.xlu0 %5845 }
0x2912   : > { %9867 = vrsqrt.f32 %v5849_v23  ;;  %v5848_v46 = vmul.f32 0.0078125, %v5846_v42  ;;  %v9622_v23 = vld [vmem:[#allocation7 + $0x2a8] ss:$12 sps:$4 sm:$0xff]   ;;  %v9623_v42 = vld [vmem:[#allocation7 + $0x290] ss:$12 sps:$4 sm:$0xff]  }
0x2914   : > { %v5850_v27 = vadd.f32 1e-05, %v5848_v46  ;;  %v6301_v46 = vld [vmem:[#allocation9 + $0x9] sm:$0x7] }
0x2915   : > { %v6314_v19 = vrot.slane %v6301_v46, %v10747_v13 }
0x2916   : > { %9869 = vrsqrt.f32 %v5850_v27  ;;  %v9624_v27 = vld [vmem:[#allocation7 + $0x278] ss:$12 sps:$4 sm:$0xff]  }
0x291f   : > { %v9868_v25 = vpop.eup %9867 }
0x2920   : > { %v5853_v26 = vmul.f32 %v9868_v25, %v11502_v14  ;;  %v9591_v14 = vld [vmem:[#allocation7 + $0x288] ss:$12 sps:$4 sm:$0xff]  }
0x2922   : > { %v5861_v62 = vmul.f32 %v8217_v30, %v5853_v26  ;;  %v6306_v26 = vrot.slane %v6301_v46, %v10711_v44 }
0x2923   : > { %v9870_v31 = vpop.eup %9869 }
0x2924   : > { %v5854_v55 = vmul.f32 %v9870_v31, %v11506_v49  ;;  %v11515_v28 = vadd.f32 %v8218_v59, %v5861_v62  ;;  %v9597_v49 = vld [vmem:[#allocation7 + $0x258] ss:$12 sps:$4 sm:$0xff]   ;;  %v6310_v31 = vrot.slane %v6301_v46, %v10708_v37 }
0x2926   : > { %v5862_v35 = vmul.f32 %v8217_v30, %v5854_v55  ;;  %v9625_v55 = vld [vmem:[#allocation7 + $0x260] ss:$12 sps:$4 sm:$0xff]  }
0x2928   : > { %v11517_v60 = vadd.f32 %v8218_v59, %v5862_v35 }
0x292a   : > { %v5871_v11 = vpack.c.bf16 %v11517_v60, %v11515_v28 }
0x292c   : > { %6015 = vmatmul.mubr.bf16.vlgmr.msra.gmra.mxu0 %v5871_v11 }
0x292d   : > { %6447 = vmatpush1.bf16.msra.mxu0 %v9579_v21  ;;  %6478 = vmatprep.mubr.bf16.mxu0 %v10353_v2 }
0x292e   : > { %6448 = vmatprep.subr.bf16.mxu0 %v9584_v8 }
0x2931   : > { %6449 = vmatpush1.bf16.msra.mxu0 %v9582_v53 }
0x2932   : > { %6450 = vmatprep.subr.bf16.mxu0 %v9587_v4  ;;  %v9626_v4 = vld [vmem:[#allocation7 + $0x248] ss:$12 sps:$4 sm:$0xff]  }
0x2935   : > { %6451 = vmatpush1.bf16.msra.mxu0 %v9585_v7 }
0x2936   : > { %6452 = vmatprep.subr.bf16.mxu0 %v9590_v43 }
0x2939   : > { %6453 = vmatpush1.bf16.msra.mxu0 %v9588_v6 }
0x293a   : > { %6454 = vmatprep.subr.bf16.mxu0 %v9593_v9 }
0x293d   : > { %6455 = vmatpush1.bf16.msra.mxu0 %v9591_v14 }
0x293e   : > { %6456 = vmatprep.subr.bf16.mxu0 %v9596_v36 }
0x2941   : > { %6457 = vmatpush1.bf16.msra.mxu0 %v9594_v16 }
0x2942   : > { %6458 = vmatprep.subr.bf16.mxu0 %v9599_v57 }
0x2945   : > { %6459 = vmatpush1.bf16.msra.mxu0 %v9597_v49 }
0x2946   : > { %6460 = vmatprep.subr.bf16.mxu0 %v9602_v41 }
0x2949   : > { %6461 = vmatpush1.bf16.msra.mxu0 %v9600_v34 }
0x294a   : > { %9100 = vmatprep.subr.bf16.mxu0 %v10354_v3 }
0x294c   : > { %6479 = vmatmul.mubr.bf16.vlgmr.msra.gmra.mxu0 %v11380_v48 }
0x294d   : > { %9102 = vmatprep.mubr.msk.bf16.mxu0 %vm10355_vm0, %v10354_v3 }
0x29ec   : > { %v6016_v47 = vpop.f32.mrf.mxu0 }
0x29ed   : > { %v6017_v38 = vadd.f32 %v6016_v47, %v5895_v50 }
0x29ee   : > { %v6018_v5 = vpop.f32.mrf.mxu0 }
0x29ef   : > { %v6019_v12 = vadd.f32 %v6018_v5, %v5899_v24  ;;  %v6025_v20 = vmax.f32 %v6017_v38, 0.0 }
0x29f0   : > { %v6020_v10 = vpop.f32.mrf.mxu0 }
0x29f1   : > { %v6021_v32 = vadd.f32 %v6020_v10, %v5895_v50  ;;  %v6026_v22 = vmax.f32 %v6019_v12, 0.0 }
0x29f2   : > { %v6022_v58 = vpop.f32.mrf.mxu0 }
0x29f3   : > { %v6023_v40 = vadd.f32 %v6022_v58, %v5899_v24  ;;  %v6027_v56 = vmax.f32 %v6021_v32, 0.0 }
0x29f5   : > { %v6028_v15 = vmax.f32 %v6023_v40, 0.0  ;;  %v6029_v61 = vpack.c.bf16 %v6027_v56, %v6025_v20 }
0x29f7   : > { %v6030_v17 = vpack.c.bf16 %v6028_v15, %v6026_v22 }
0x29f9   : > { %6200 = vmatprep.mubr.bf16.mxu1 %v6030_v17 }
0x29fa   : > { %6201 = vmatmul.mubr.bf16.vlgmr.msra.gmra.mxu1 %v6029_v61 }
0x29fb   : > { %9081 = vmatpush3.bf16.msra.mxu1 %v9619_v45  ;;  %9096 = vmatprep.mubr.msk.bf16.mxu1 %vm10355_vm0, %v10354_v3 }
0x29fc   : > { %9082 = vmatprep.subr.bf16.mxu1 %v10354_v3 }
0x29ff   : > { %9083 = vmatpush3.bf16.msra.mxu1 %v9620_v1 }
0x2a00   : > { %9084 = vmatprep.subr.bf16.mxu1 %v10354_v3 }
0x2a03   : > { %9085 = vmatpush3.bf16.msra.mxu1 %v9621_v52 }
0x2a04   : > { %9086 = vmatprep.subr.bf16.mxu1 %v10354_v3 }
0x2a07   : > { %9087 = vmatpush3.bf16.msra.mxu1 %v9622_v23 }
0x2a08   : > { %9088 = vmatprep.subr.bf16.mxu1 %v10354_v3 }
0x2a0b   : > { %9089 = vmatpush3.bf16.msra.mxu1 %v9623_v42 }
0x2a0c   : > { %v6480_v25 = vpop.f32.mrf.mxu0  ;;  %9090 = vmatprep.subr.bf16.mxu1 %v10354_v3 }
0x2a0d   : > { %v6481_v59 = vadd.f32 %v6480_v25, %v6306_v26 }
0x2a0e   : > { %v6482_v30 = vpop.f32.mrf.mxu0 }
0x2a0f   : > { %9091 = vmatpush3.bf16.msra.mxu1 %v9624_v27  ;;  %v6483_v11 = vadd.f32 %v6482_v30, %v6310_v31 }
0x2a10   : > { %v6484_v62 = vpop.f32.mrf.mxu0  ;;  %9092 = vmatprep.subr.bf16.mxu1 %v10354_v3 }
0x2a11   : > { %v6485_v35 = vadd.f32 %v6484_v62, %v6306_v26 }
0x2a12   : > { %v6486_v21 = vpop.f32.mrf.mxu0 }
0x2a13   : > { %v11539_v8 = vpack.c.bf16 %v6485_v35, %v6481_v59  ;;  %v6487_v53 = vadd.f32 %v6486_v21, %v6310_v31  ;;  %9093 = vmatpush3.bf16.msra.mxu1 %v9625_v55 }
0x2a14   : > { %9094 = vmatprep.subr.bf16.mxu1 %v10354_v3 }
0x2a15   : > { %v11542_v7 = vpack.c.bf16 %v6487_v53, %v6483_v11  ;;  %6666 = vrot.lane.b32.xlu0 %v11539_v8, %s10356_s3 }
0x2a17   : > { %6669 = vrot.lane.b32.xlu1 %v11542_v7, %s10356_s3  ;;  %9095 = vmatpush3.bf16.msra.mxu1 %v9626_v4  ;;  %v6554_v43 = vsel %vm999_vm1, %v11542_v7, 0 }
0x2a18   : > { %9101 = vmatpush3.bf16.xpose.msra.mxu0 %v6554_v43  ;;  %9106 = vmatprep.subr.bf16.mxu1 %v10354_v3 }
0x2a19   : > { %9112 = vmatprep.subr.bf16.mxu0 %v10354_v3 }
0x2a1a   : > { %9097 = vmatmul.mubr.bf16.vlgmr.msra.gmra.mxu1 %v11380_v48 }
0x2a1b   : > { %9108 = vmatprep.mubr.msk.bf16.mxu1 %vm10355_vm0, %v10354_v3 }
0x2a1f   : > { %9103 = vmatmul.mubr.msk.bf16.vlgmr.msra.gmra.mxu0 %vm999_vm1, %v11539_v8 }
0x2a20   : > { %9114 = vmatprep.mubr.msk.bf16.mxu0 %vm10355_vm0, %v10354_v3 }
0x2a87   : > { %v6667_v14 = vpop.permute.xlu0 %6666 }
0x2a89   : > { %v6670_v6 = vpop.permute.xlu1 %6669 }
0x2a8a   : > { %v6675_v9 = vsel %vm999_vm1, %v6670_v6, 0 }
0x2a8b   : > { %9113 = vmatpush3.bf16.xpose.msra.mxu0 %v6675_v9 }
0x2a8c   : > { %9124 = vmatprep.subr.bf16.mxu0 %v10354_v3 }
0x2a92   : > { %9115 = vmatmul.mubr.msk.bf16.vlgmr.msra.gmra.mxu0 %vm999_vm1, %v6667_v14  ;;  %v9629_v14 = vld [vmem:[#allocation10 + $0xd8] sm:$0xff]  }
0x2a93   : > { %9128 = vmatprep.mubr.msk.bf16.mxu0 %vm10355_vm0, %v10354_v3  ;;  %9125 = vmatpush3.bf16.msra.mxu0 %v9629_v14 }
0x2a94   : > { %9126 = vmatprep.subr.bf16.mxu0 %v10354_v3 }
0x2aba   : > { %v8579_v48 = vpop.f32.mrf.mxu1 }
0x2abc   : > { %v8580_v36 = vpop.f32.mrf.mxu1 }
0x2abd   : > { %v11564_v16 = vadd.f32 %v8580_v36, %v8579_v48 }
0x2abe   : > { %v8582_v57 = vpop.f32.mrf.mxu1 }
0x2ac0   : > { %v8583_v49 = vpop.f32.mrf.mxu1 }
0x2ac1   : > { %v11566_v41 = vadd.f32 %v8583_v49, %v8582_v57 }
0x2ada   : > { %v6523_v34 = vpop.f32.mrf.mxu1 }
0x2adb   : > { %v6524_v54 = vadd.f32 %v6523_v34, %v6314_v19 }
0x2adc   : > { %v9098_v18 = vpop.f32.mrf.mxu1 }
0x2ade   : > { %v6526_v33 = vpop.f32.mrf.mxu1 }
0x2adf   : > { %v6527_v29 = vadd.f32 %v6526_v33, %v6314_v19  ;;  %v6590_v63 = vpop.f32.mrf.mxu0  ;;  %v9627_v33 = vld [vmem:[#allocation10 + $0xc8] sm:$0xff]  }
0x2ae0   : > { %v9099_v39 = vpop.f32.mrf.mxu1  ;;  %v6597_v47 = vsel %vm1141_vm2, %v6590_v63, -inf }
0x2ae1   : > { %v11570_v24 = vpack.c.bf16 %v6527_v29, %v6524_v54  ;;  %6598 = vmax.xlane.f32.xlu1 %v6597_v47  ;;  %v9104_v50 = vpop.f32.mrf.mxu0  ;;  %v9628_v29 = vld [vmem:[#allocation10 + $0xc0] sm:$0xff]  }
0x2ae3   : > { %v6593_v5 = vpop.f32.mrf.mxu0  ;;  %9107 = vmatpush3.bf16.msra.mxu1 %v11570_v24 }
0x2ae4   : > { %v6600_v10 = vsel %vm1141_vm2, %v6593_v5, -inf  ;;  %9118 = vmatprep.subr.bf16.mxu1 %v10354_v3 }
0x2ae5   : > { %6601 = vmax.xlane.f32.xlu0 %v6600_v10  ;;  %v9105_v13 = vpop.f32.mrf.mxu0 }
0x2b52   : > { %v6711_v12 = vpop.f32.mrf.mxu0 }
0x2b53   : > { %v6718_v32 = vsel %vm1141_vm2, %v6711_v12, -inf }
0x2b54   : > { %6719 = vmax.xlane.f32.xlu1 %v6718_v32  ;;  %v9116_v38 = vpop.f32.mrf.mxu0 }
0x2b56   : > { %v6714_v58 = vpop.f32.mrf.mxu0 }
0x2b57   : > { %v6721_v40 = vsel %vm1141_vm2, %v6714_v58, -inf }
0x2b58   : > { %6722 = vmax.xlane.f32.xlu1 %v6721_v40  ;;  %v9117_v56 = vpop.f32.mrf.mxu0 }
0x2b6a   : > { %v6599_v22 = vpop.xlane.xlu1 %6598 }
0x2b6b   : > { %v6603_v15 = vsub.f32 %v6590_v63, %v6599_v22  ;;  %v9630_v63 = vld [vmem:[#allocation10 + $0xd0] sm:$0xff]  }
0x2b6c   : > { %9127 = vmatpush3.bf16.msra.mxu0 %v9630_v63 }
0x2b6d   : > { %v6605_v20 = vmul.f32 1.442695, %v6603_v15  ;;  %9140 = vmatprep.subr.bf16.mxu0 %v10354_v3 }
0x2b6e   : > { %v6602_v17 = vpop.xlane.xlu0 %6601 }
0x2b6f   : > { %9871 = vpow2.f32 %v6605_v20  ;;  %v6604_v45 = vsub.f32 %v6593_v5, %v6602_v17 }
0x2b71   : > { %v6607_v61 = vmul.f32 1.442695, %v6604_v45 }
0x2b73   : > { %9873 = vpow2.f32 %v6607_v61 }
0x2b7c   : > { %v9872_v1 = vpop.eup %9871 }
0x2b7d   : > { %v6609_v52 = vsel %vm1141_vm2, %v9872_v1, 0.0 }
0x2b7e   : > { %6610 = vadd.xlane.f32.xlu1 %v6609_v52 }
0x2b80   : > { %v9874_v23 = vpop.eup %9873 }
0x2b81   : > { %v6612_v42 = vsel %vm1141_vm2, %v9874_v23, 0.0 }
0x2b82   : > { %6613 = vadd.xlane.f32.xlu1 %v6612_v42 }
0x2bdd   : > { %v6720_v46 = vpop.xlane.xlu1 %6719 }
0x2bde   : > { %v6724_v27 = vsub.f32 %v6711_v12, %v6720_v46 }
0x2be0   : > { %v6726_v25 = vmul.f32 1.442695, %v6724_v27 }
0x2be1   : > { %v6723_v26 = vpop.xlane.xlu1 %6722 }
0x2be2   : > { %9875 = vpow2.f32 %v6726_v25  ;;  %v6725_v30 = vsub.f32 %v6714_v58, %v6723_v26 }
0x2be4   : > { %v6728_v31 = vmul.f32 1.442695, %v6725_v30 }
0x2be6   : > { %9877 = vpow2.f32 %v6728_v31 }
0x2bef   : > { %v9876_v55 = vpop.eup %9875 }
0x2bf0   : > { %v6730_v62 = vsel %vm1141_vm2, %v9876_v55, 0.0 }
0x2bf1   : > { %6731 = vadd.xlane.f32.xlu0 %v6730_v62 }
0x2bf3   : > { %v9878_v59 = vpop.eup %9877 }
0x2bf4   : > { %v6733_v35 = vsel %vm1141_vm2, %v9878_v59, 0.0 }
0x2bf5   : > { %6734 = vadd.xlane.f32.xlu1 %v6733_v35 }
0x2c06   : > { %6904 = vrot.lane.b32.xlu1 %v11542_v7, %s10357_s25 }
0x2c07   : > { %v6611_v21 = vpop.xlane.xlu1 %6610  ;;  %6742 = vrot.lane.b32.xlu0 %v11570_v24, %s10356_s3  ;;  %s11707_s3 = scalar_lea.hbm %s11873_s26, %s11826_s17 }
0x2c08   : > { %9879 = vrcp.f32 %v6611_v21 }
0x2c0a   : > { %6902 = vrot.lane.b32.xlu1 %v11539_v8, %s10357_s25 }
0x2c0b   : > { %v6614_v11 = vpop.xlane.xlu1 %6613 }
0x2c0c   : > { %9881 = vrcp.f32 %v6614_v11 }
0x2c15   : > { %v9880_v53 = vpop.eup %9879 }
0x2c16   : > { %v6617_v43 = vmul.f32 %v9880_v53, %v9872_v1 }
0x2c19   : > { %v9882_v4 = vpop.eup %9881 }
0x2c1a   : > { %v6618_v6 = vmul.f32 %v9882_v4, %v9874_v23 }
0x2c1c   : > { %v6619_v9 = vpack.c.bf16 %v6618_v6, %v6617_v43 }
0x2c1e   : > { %9109 = vmatmul.mubr.msk.bf16.vlgmr.msra.gmra.mxu1 %vm1141_vm2, %v6619_v9 }
0x2c1f   : > { %9120 = vmatprep.mubr.msk.bf16.mxu1 %vm10355_vm0, %v10354_v3 }
0x2c7a   : > { %v6732_v48 = vpop.xlane.xlu0 %6731 }
0x2c7b   : > { %9883 = vrcp.f32 %v6732_v48 }
0x2c7e   : > { %v6735_v36 = vpop.xlane.xlu1 %6734  ;;  %v6743_v57 = vpop.permute.xlu0 %6742 }
0x2c7f   : > { %9885 = vrcp.f32 %v6735_v36  ;;  %9119 = vmatpush3.bf16.msra.mxu1 %v6743_v57 }
0x2c80   : > { %9132 = vmatprep.subr.bf16.mxu1 %v10354_v3 }
0x2c82   : > { %v6905_v32 = vpop.permute.xlu1 %6904 }
0x2c83   : > { %v6910_v56 = vsel %vm999_vm1, %v6905_v32, 0 }
0x2c86   : > { %v6903_v22 = vpop.permute.xlu1 %6902 }
0x2c88   : > { %v9884_v49 = vpop.eup %9883 }
0x2c89   : > { %v6738_v19 = vmul.f32 %v9884_v49, %v9876_v55 }
0x2c8c   : > { %v9886_v34 = vpop.eup %9885 }
0x2c8d   : > { %v6739_v18 = vmul.f32 %v9886_v34, %v9878_v59 }
0x2c8f   : > { %v6740_v54 = vpack.c.bf16 %v6739_v18, %v6738_v19  ;;  %v9631_v18 = vld [vmem:[#allocation10 + $0xe8] sm:$0xff]  }
0x2c91   : > { %9121 = vmatmul.mubr.msk.bf16.vlgmr.msra.gmra.mxu1 %vm1141_vm2, %v6740_v54 }
0x2c92   : > { %9133 = vmatpush3.bf16.msra.mxu1 %v9627_v33  ;;  %9136 = vmatprep.mubr.msk.bf16.mxu1 %vm10355_vm0, %v10354_v3  ;;  %v9632_v33 = vld [vmem:[#allocation10 + $0xe0] sm:$0xff]  }
0x2c93   : > { %9134 = vmatprep.subr.bf16.mxu1 %v10354_v3 }
0x2c96   : > { %9135 = vmatpush3.bf16.msra.mxu1 %v9628_v29 }
0x2c97   : > { %9146 = vmatprep.subr.bf16.mxu1 %v10354_v3 }
0x2cde   : > { %v6657_v39 = vpop.f32.mrf.mxu1 }
0x2ce0   : > { %v9110_v47 = vpop.f32.mrf.mxu1 }
0x2ce2   : > { %v6660_v50 = vpop.f32.mrf.mxu1 }
0x2ce3   : > { %v6664_v5 = vpack.c.bf16 %v6660_v50, %v6657_v39 }
0x2ce4   : > { %v9111_v10 = vpop.f32.mrf.mxu1 }
0x2ce5   : > { %9137 = vmatmul.mubr.msk.bf16.vlgmr.msra.gmra.mxu1 %vm999_vm1, %v6664_v5 }
0x2ce6   : > { %9148 = vmatprep.mubr.msk.bf16.mxu1 %vm10355_vm0, %v10354_v3 }
0x2d51   : > { %v6782_v13 = vpop.f32.mrf.mxu1 }
0x2d53   : > { %v9122_v12 = vpop.f32.mrf.mxu1 }
0x2d55   : > { %v6785_v38 = vpop.f32.mrf.mxu1 }
0x2d56   : > { %v6789_v58 = vpack.c.bf16 %v6785_v38, %v6782_v13 }
0x2d57   : > { %v9123_v40 = vpop.f32.mrf.mxu1 }
0x2d58   : > { %9129 = vmatmul.mubr.msk.bf16.vlgmr.msra.gmra.mxu0 %vm999_vm1, %v6789_v58 }
0x2d59   : > { %9141 = vmatpush3.bf16.xpose.msra.mxu0 %v6910_v56  ;;  %9142 = vmatprep.mubr.msk.bf16.mxu0 %vm10355_vm0, %v10354_v3 }
0x2d5a   : > { %9152 = vmatprep.subr.bf16.mxu0 %v10354_v3 }
0x2d60   : > { %9143 = vmatmul.mubr.msk.bf16.vlgmr.msra.gmra.mxu0 %vm999_vm1, %v6903_v22 }
0x2d61   : > { %9156 = vmatprep.mubr.msk.bf16.mxu0 %vm10355_vm0, %v10354_v3  ;;  %9153 = vmatpush3.bf16.msra.mxu0 %v9631_v18 }
0x2d62   : > { %9154 = vmatprep.subr.bf16.mxu0 %v10354_v3 }
0x2d65   : > { %9155 = vmatpush3.bf16.msra.mxu0 %v9632_v33  ;;  %v9635_v33 = vld [vmem:[#allocation15 + $0x1f0] ss:$8 sps:$4 sm:$0xff]  }
0x2d66   : > { %9166 = vmatprep.subr.bf16.mxu0 %v10354_v3 }
0x2da5   : > { %v11609_v15 = vpop.f32.mrf.mxu1 }
0x2da7   : > { %v9138_v20 = vpop.f32.mrf.mxu1 }
0x2da9   : > { %v11611_v17 = vpop.f32.mrf.mxu1 }
0x2dab   : > { %v9139_v45 = vpop.f32.mrf.mxu1 }
0x2e18   : > { %v11613_v61 = vpop.f32.mrf.mxu0 }
0x2e1a   : > { %v9130_v1 = vpop.f32.mrf.mxu0 }
0x2e1c   : > { %v11615_v52 = vpop.f32.mrf.mxu0 }
0x2e1e   : > { %v9131_v23 = vpop.f32.mrf.mxu0 }
0x2e20   : > { %v6946_v42 = vpop.f32.mrf.mxu0 }
0x2e21   : > { %v6953_v46 = vsel %vm1141_vm2, %v6946_v42, -inf }
0x2e22   : > { %6954 = vmax.xlane.f32.xlu0 %v6953_v46  ;;  %v9144_v27 = vpop.f32.mrf.mxu0  ;;  %v6896_v46 = vadd.f32 %v11609_v15, %v11613_v61  ;;  %v9633_v61 = vld [vmem:[#allocation10 + $0xf8] sm:$0xff]  }
0x2e24   : > { %v6949_v25 = vpop.f32.mrf.mxu0 }
0x2e25   : > { %v6956_v26 = vsel %vm1141_vm2, %v6949_v25, -inf }
0x2e26   : > { %6957 = vmax.xlane.f32.xlu1 %v6956_v26  ;;  %v9145_v30 = vpop.f32.mrf.mxu0 }
0x2e27   : > { %v6899_v30 = vadd.f32 %v11611_v17, %v11615_v52  ;;  %v9634_v17 = vld [vmem:[#allocation10 + $0xf0] sm:$0xff]  }
0x2e37   : > { %6976 = vrot.lane.b32.xlu1 %v11570_v24, %s10357_s25  ;;  %s7713_s25 = scalar_lea.sflag [#allocation4], %s10645_s30 }
0x2e3b   : > { %7082 = vrot.lane.b32.xlu1 %v11539_v8, %s10358_s15 }
0x2eab   : > { %v6955_v31 = vpop.xlane.xlu0 %6954 }
0x2eac   : > { %v6959_v55 = vsub.f32 %v6946_v42, %v6955_v31 }
0x2eae   : > { %v6961_v62 = vmul.f32 1.442695, %v6959_v55 }
0x2eaf   : > { %v6958_v59 = vpop.xlane.xlu1 %6957 }
0x2eb0   : > { %9887 = vpow2.f32 %v6961_v62  ;;  %v6960_v35 = vsub.f32 %v6949_v25, %v6958_v59 }
0x2eb2   : > { %v6963_v21 = vmul.f32 1.442695, %v6960_v35 }
0x2eb3   : > { %v6977_v11 = vpop.permute.xlu1 %6976 }
0x2eb4   : > { %9889 = vpow2.f32 %v6963_v21  ;;  %9147 = vmatpush3.bf16.msra.mxu1 %v6977_v11 }
0x2eb5   : > { %9160 = vmatprep.subr.bf16.mxu1 %v10354_v3 }
0x2ebd   : > { %v9888_v53 = vpop.eup %9887 }
0x2ebe   : > { %v6965_v4 = vsel %vm1141_vm2, %v9888_v53, 0.0 }
0x2ebf   : > { %6966 = vadd.xlane.f32.xlu0 %v6965_v4 }
0x2ec1   : > { %v9890_v43 = vpop.eup %9889 }
0x2ec2   : > { %v6968_v6 = vsel %vm1141_vm2, %v9890_v43, 0.0 }
0x2ec3   : > { %6969 = vadd.xlane.f32.xlu0 %v6968_v6 }
0x2ed9   : > { %7084 = vrot.lane.b32.xlu0 %v11542_v7, %s10358_s15  ;;  %v7083_v7 = vpop.permute.xlu1 %7082 }
0x2f48   : > { %v6967_v8 = vpop.xlane.xlu0 %6966 }
0x2f49   : > { %9891 = vrcp.f32 %v6967_v8 }
0x2f4c   : > { %v6970_v9 = vpop.xlane.xlu0 %6969 }
0x2f4d   : > { %9893 = vrcp.f32 %v6970_v9 }
0x2f50   : > { %v7085_v49 = vpop.permute.xlu0 %7084 }
0x2f51   : > { %v7090_v19 = vsel %vm999_vm1, %v7085_v49, 0 }
0x2f56   : > { %v9892_v14 = vpop.eup %9891 }
0x2f57   : > { %v6973_v36 = vmul.f32 %v9892_v14, %v9888_v53 }
0x2f5a   : > { %v9894_v48 = vpop.eup %9893 }
0x2f5b   : > { %v6974_v57 = vmul.f32 %v9894_v48, %v9890_v43  ;;  %v8302_v48 = vld [vmem:[%s11800_s5 + $0x3] ss:$0 sm:$0xff] }
0x2f5d   : > { %v6975_v34 = vpack.c.bf16 %v6974_v57, %v6973_v36 }
0x2f5f   : > { %9149 = vmatmul.mubr.msk.bf16.vlgmr.msra.gmra.mxu1 %vm1141_vm2, %v6975_v34 }
0x2f60   : > { %9161 = vmatpush3.bf16.xpose.msra.mxu1 %v7090_v19  ;;  %9162 = vmatprep.mubr.msk.bf16.mxu1 %vm10355_vm0, %v10354_v3 }
0x2f61   : > { %9172 = vmatprep.subr.bf16.mxu1 %v10354_v3 }
0x2f67   : > { %9163 = vmatmul.mubr.msk.bf16.vlgmr.msra.gmra.mxu1 %vm999_vm1, %v7083_v7 }
0x2f68   : > { %9176 = vmatprep.mubr.msk.bf16.mxu1 %vm10355_vm0, %v10354_v3  ;;  %9173 = vmatpush3.bf16.msra.mxu1 %v9633_v61 }
0x2f69   : > { %9174 = vmatprep.subr.bf16.mxu1 %v10354_v3 }
0x2f6c   : > { %9175 = vmatpush3.bf16.msra.mxu1 %v9634_v17 }
0x301f   : > { %v7016_v54 = vpop.f32.mrf.mxu1 }
0x3021   : > { %v9150_v29 = vpop.f32.mrf.mxu1 }
0x3023   : > { %v7019_v63 = vpop.f32.mrf.mxu1 }
0x3024   : > { %v7023_v39 = vpack.c.bf16 %v7019_v63, %v7016_v54  ;;  %v9637_v54 = vld [vmem:[#allocation15 + $0x1f4] ss:$8 sps:$4 sm:$0xff]  }
0x3025   : > { %v9151_v47 = vpop.f32.mrf.mxu1 }
0x3026   : > { %9157 = vmatmul.mubr.msk.bf16.vlgmr.msra.gmra.mxu0 %vm999_vm1, %v7023_v39 }
0x3027   : > { %v7126_v50 = vpop.f32.mrf.mxu1  ;;  %9168 = vmatprep.mubr.msk.bf16.mxu0 %vm10355_vm0, %v10354_v3 }
0x3028   : > { %v7133_v5 = vsel %vm1141_vm2, %v7126_v50, -inf }
0x3029   : > { %7134 = vmax.xlane.f32.xlu1 %v7133_v5  ;;  %v9164_v10 = vpop.f32.mrf.mxu1 }
0x302b   : > { %v7129_v13 = vpop.f32.mrf.mxu1 }
0x302c   : > { %v7136_v12 = vsel %vm1141_vm2, %v7129_v13, -inf }
0x302d   : > { %7137 = vmax.xlane.f32.xlu0 %v7136_v12  ;;  %v9165_v32 = vpop.f32.mrf.mxu1 }
0x30b2   : > { %v7135_v38 = vpop.xlane.xlu1 %7134 }
0x30b3   : > { %v7139_v58 = vsub.f32 %v7126_v50, %v7135_v38 }
0x30b5   : > { %v7141_v40 = vmul.f32 1.442695, %v7139_v58  ;;  %v9640_v58 = vld [vmem:[#allocation15 + $0x1e4] ss:$8 sps:$4 sm:$0xff]  }
0x30b6   : > { %v7138_v56 = vpop.xlane.xlu0 %7137 }
0x30b7   : > { %9895 = vpow2.f32 %v7141_v40  ;;  %v7140_v22 = vsub.f32 %v7129_v13, %v7138_v56  ;;  %v9638_v40 = vld [vmem:[#allocation15 + $0x1e0] ss:$8 sps:$4 sm:$0xff]   ;;  %v9641_v56 = vld [vmem:[#allocation15 + $0x1d0] ss:$8 sps:$4 sm:$0xff]  }
0x30b9   : > { %v7143_v20 = vmul.f32 1.442695, %v7140_v22  ;;  %v9646_v22 = vld [vmem:[#allocation15 + $0x1c4] ss:$8 sps:$4 sm:$0xff]  }
0x30bb   : > { %9897 = vpow2.f32 %v7143_v20  ;;  %v9647_v20 = vld [vmem:[#allocation15 + $0x1b0] ss:$8 sps:$4 sm:$0xff]  }
0x30c4   : > { %v9896_v45 = vpop.eup %9895 }
0x30c5   : > { %v7145_v1 = vsel %vm1141_vm2, %v9896_v45, 0.0 }
0x30c6   : > { %7146 = vadd.xlane.f32.xlu0 %v7145_v1  ;;  %v9655_v1 = vld [vmem:[#allocation15 + $0x194] ss:$8 sps:$4 sm:$0xff]  }
0x30c8   : > { %v9898_v23 = vpop.eup %9897 }
0x30c9   : > { %v7148_v42 = vsel %vm1141_vm2, %v9898_v23, 0.0 }
0x30ca   : > { %7149 = vadd.xlane.f32.xlu1 %v7148_v42  ;;  %v9658_v42 = vld [vmem:[#allocation15 + $0x184] ss:$8 sps:$4 sm:$0xff]  }
0x30dc   : > { %7156 = vrot.lane.b32.xlu0 %v11570_v24, %s10358_s15  ;;  %s10210_s15 = scalar_lea.vmem %s11709_s7, 256 }
0x30dd   : > { %p10211_p12 = scmp.ne.s32.totalorder %s11709_s7, %s10210_s15  ;;  %p10218_p0 = scmp.lt.s32.totalorder %s10216_s14, %s10210_s15 }
0x30df   : > { %p10212_p11 = pnand %p10211_p12, %p11874_p3  ;;  %p10219_p5 = por %p10218_p0, %p10217_p13 }
0x30e1   : > { %p10213_p10 = pneg %p10212_p11 }
0x30e3   : > { %p10220_p8 = pnand %p10219_p5, %p10213_p10 }
0x30e6   : > { %v7073_v27 = vpop.f32.mrf.mxu0 }
0x30e7   : > { %v7080_v25 = vadd.f32 %v7073_v27, %v6896_v46  ;;  %v9656_v46 = vld [vmem:[#allocation15 + $0x180] ss:$8 sps:$4 sm:$0xff]  }
0x30e8   : > { %v9158_v26 = vpop.f32.mrf.mxu0  ;;  %v9659_v27 = vld [vmem:[#allocation18 + $0x1f8] sm:$0xff]  }
0x30e9   : > { %v9661_v26 = vld [vmem:[#allocation18 + $0x1f0] sm:$0xff]   ;;  %8622 = vmatprep.subr.bf16.mxu1 %v9659_v27 }
0x30ea   : > { %v7076_v31 = vpop.f32.mrf.mxu0 }
0x30eb   : > { %v7081_v55 = vadd.f32 %v7076_v31, %v6899_v30  ;;  %v9662_v30 = vld [vmem:[#allocation18 + $0x1b0] sm:$0xff]   ;;  %v9663_v31 = vld [vmem:[#allocation18 + $0x1e8] sm:$0xff]  }
0x30ec   : > { %v9159_v62 = vpop.f32.mrf.mxu0 }
0x30ed   : > { %v9665_v62 = vld [vmem:[#allocation18 + $0x1e0] sm:$0xff]  }
0x314f   : > { %v7147_v59 = vpop.xlane.xlu0 %7146 }
0x3150   : > { %9899 = vrcp.f32 %v7147_v59  ;;  %v9666_v59 = vld [vmem:[#allocation18 + $0x1a0] sm:$0xff]  }
0x3153   : > { %v7150_v35 = vpop.xlane.xlu1 %7149  ;;  %v7157_v21 = vpop.permute.xlu0 %7156 }
0x3154   : > { %9901 = vrcp.f32 %v7150_v35  ;;  %9167 = vmatpush3.bf16.msra.mxu0 %v7157_v21  ;;  %v9667_v35 = vld [vmem:[#allocation18 + $0x1d8] sm:$0xff]  }
0x3155   : > { %7427 = vmatprep.subr.bf16.mxu0 %v9637_v54  ;;  %v9668_v21 = vld [vmem:[#allocation18 + $0x198] sm:$0xff]  }
0x315d   : > { %v9900_v11 = vpop.eup %9899 }
0x315e   : > { %v7153_v53 = vmul.f32 %v9900_v11, %v9896_v45  ;;  %v9650_v45 = vld [vmem:[#allocation15 + $0x1a0] ss:$8 sps:$4 sm:$0xff]  }
0x3161   : > { %v9902_v24 = vpop.eup %9901 }
0x3162   : > { %v7154_v4 = vmul.f32 %v9902_v24, %v9898_v23  ;;  %v9653_v23 = vld [vmem:[#allocation15 + $0x190] ss:$8 sps:$4 sm:$0xff]  }
0x3164   : > { %v7155_v15 = vpack.c.bf16 %v7154_v4, %v7153_v53 }
0x3166   : > { %9169 = vmatmul.mubr.msk.bf16.vlgmr.msra.gmra.mxu0 %vm1141_vm2, %v7155_v15 }
0x3167   : > { %7459 = vmatprep.mubr.bf16.mxu0 %v10353_v2  ;;  %7428 = vmatpush1.bf16.msra.mxu0 %v9635_v33  ;;  %v7335_v33 = vld [vmem:[#allocation16 + $0x6] sm:$0x3] }
0x3168   : > { %7429 = vmatprep.subr.bf16.mxu0 %v9640_v58 }
0x316b   : > { %7430 = vmatpush1.bf16.msra.mxu0 %v9638_v40 }
0x3226   : > { %v7196_v52 = vpop.f32.mrf.mxu0 }
0x3228   : > { %v9170_v43 = vpop.f32.mrf.mxu0 }
0x3229   : > { %v8304_v43 = vld [vmem:[%s11801_s6 + $0x3] ss:$0 sm:$0xff] }
0x322a   : > { %v7199_v6 = vpop.f32.mrf.mxu0 }
0x322b   : > { %v7203_v8 = vpack.c.bf16 %v7199_v6, %v7196_v52 }
0x322c   : > { %v9171_v9 = vpop.f32.mrf.mxu0 }
0x322d   : > { %9177 = vmatmul.mubr.msk.bf16.vlgmr.msra.gmra.mxu1 %vm999_vm1, %v7203_v8 }
0x32ed   : > { %v7253_v14 = vpop.f32.mrf.mxu1 }
0x32ee   : > { %v7260_v36 = vadd.f32 %v7253_v14, %v7080_v25  ;;  %v9660_v25 = vld [vmem:[#allocation18 + $0x1b8] sm:$0xff]   ;;  %v8305_v14 = vld [vmem:[#allocation12 + $0x3] ss:$0 sm:$0xff] }
0x32ef   : > { %v9178_v2 = vpop.f32.mrf.mxu1  ;;  %8623 = vmatpush3.bf16.msra.mxu1 %v9660_v25 }
0x32f0   : > { %v7270_v57 = vadd.f32 %v8302_v48, %v7260_v36  ;;  %8624 = vmatprep.subr.bf16.mxu1 %v9661_v26 }
0x32f1   : > { %v7256_v49 = vpop.f32.mrf.mxu1 }
0x32f2   : > { %v7261_v34 = vadd.f32 %v7256_v49, %v7081_v55  ;;  %v7272_v3 = vadd.f32 %v7270_v57, %v11374_v0  ;;  %v8235_v0 = vld [vmem:[#allocation19 + $0x2] ss:$0 sm:$0xff]  ;;  %v9664_v55 = vld [vmem:[#allocation18 + $0x1a8] sm:$0xff]   ;;  %v9669_v49 = vld [vmem:[#allocation18 + $0x1d0] sm:$0xff]  }
0x32f3   : > { %v9179_v19 = vpop.f32.mrf.mxu1  ;;  %v6206_v12 = vadd.f32 %v11566_v41, %v8235_v0  ;;  %v9644_v41 = vld [vmem:[#allocation15 + $0x1c0] ss:$8 sps:$4 sm:$0xff]   ;;  %8625 = vmatpush3.bf16.msra.mxu1 %v9662_v30 }
0x32f4   : > { %v7271_v7 = vadd.f32 %v8302_v48, %v7261_v34  ;;  %7278 = vadd.xlane.f32.xlu1 %v7272_v3  ;;  %8626 = vmatprep.subr.bf16.mxu1 %v9663_v31  ;;  %v9670_v34 = vld [vmem:[#allocation18 + $0x190] sm:$0xff]   ;;  %v9672_v19 = vld [vmem:[#allocation18 + $0x188] sm:$0xff]  }
0x32f5   : > { %v11675_v38 = vadd.f32 %v6206_v12, %v11517_v60  ;;  %v9652_v60 = vld [vmem:[#allocation15 + $0x1a4] ss:$8 sps:$4 sm:$0xff]  }
0x32f6   : > { %v7273_v18 = vadd.f32 %v7271_v7, %v11376_v51  ;;  %v6203_v51 = vadd.f32 %v11564_v16, %v8235_v0  ;;  %v9643_v16 = vld [vmem:[#allocation15 + $0x1d4] ss:$8 sps:$4 sm:$0xff]   ;;  %v9673_v7 = vld [vmem:[#allocation18 + $0x1c0] sm:$0xff]  }
0x32f7   : > { %7431 = vmatprep.subr.bf16.mxu0 %v9643_v16  ;;  %8627 = vmatpush3.bf16.msra.mxu1 %v9664_v55 }
0x32f8   : > { %7280 = vadd.xlane.f32.xlu1 %v7273_v18  ;;  %v11671_v32 = vadd.f32 %v6203_v51, %v11515_v28  ;;  %7432 = vmatpush1.bf16.msra.mxu0 %v9641_v56  ;;  %v9649_v28 = vld [vmem:[#allocation15 + $0x1b4] ss:$8 sps:$4 sm:$0xff]  }
0x32f9   : > { %7433 = vmatprep.subr.bf16.mxu0 %v9646_v22  ;;  %8628 = vmatprep.subr.bf16.mxu1 %v9665_v62 }
0x32fb   : > { %8629 = vmatpush3.bf16.msra.mxu1 %v9666_v59 }
0x32fc   : > { %7434 = vmatpush1.bf16.msra.mxu0 %v9644_v41  ;;  %8630 = vmatprep.subr.bf16.mxu1 %v9667_v35 }
0x32fd   : > { %7435 = vmatprep.subr.bf16.mxu0 %v9649_v28 }
0x32ff   : > { %8631 = vmatpush3.bf16.msra.mxu1 %v9668_v21 }
0x3300   : > { %7436 = vmatpush1.bf16.msra.mxu0 %v9647_v20  ;;  %8632 = vmatprep.subr.bf16.mxu1 %v9669_v49 }
0x3301   : > { %7437 = vmatprep.subr.bf16.mxu0 %v9652_v60 }
0x3303   : > { %8633 = vmatpush3.bf16.msra.mxu1 %v9670_v34 }
0x3304   : > { %7438 = vmatpush1.bf16.msra.mxu0 %v9650_v45 }
0x3305   : > { %7439 = vmatprep.subr.bf16.mxu0 %v9655_v1 }
0x3308   : > { %7440 = vmatpush1.bf16.msra.mxu0 %v9653_v23 }
0x3309   : > { %7441 = vmatprep.subr.bf16.mxu0 %v9658_v42 }
0x330c   : > { %7442 = vmatpush1.bf16.msra.mxu0 %v9656_v46 }
0x337d   : > { %v7279_v29 = vpop.xlane.xlu1 %7278 }
0x337e   : > { %v7282_v63 = vmul.f32 0.0078125, %v7279_v29  ;;  %v7344_v29 = vrot.slane %v7335_v33, %v10708_v37  ;;  %v8322_v37 = vld [vmem:[#allocation19 + $0x3] ss:$0 sm:$0xff] }
0x3380   : > { %v11660_v39 = vsub.f32 %v7272_v3, %v7282_v63  ;;  %v9671_v3 = vld [vmem:[#allocation18 + $0x1c8] sm:$0xff]   ;;  %v7340_v63 = vrot.slane %v7335_v33, %v10711_v44 }
0x3381   : > { %v7281_v47 = vpop.xlane.xlu1 %7280  ;;  %8634 = vmatprep.subr.bf16.mxu1 %v9671_v3 }
0x3382   : > { %v7283_v50 = vmul.f32 0.0078125, %v7281_v47  ;;  %v7286_v5 = vmul.f32 %v11660_v39, %v11660_v39  ;;  %8635 = vmatpush3.bf16.msra.mxu1 %v9672_v19 }
0x3383   : > { %8636 = vmatprep.subr.bf16.mxu1 %v9673_v7 }
0x3384   : > { %v11664_v10 = vsub.f32 %v7273_v18, %v7283_v50  ;;  %7288 = vadd.xlane.f32.xlu1 %v7286_v5  ;;  %v9674_v18 = vld [vmem:[#allocation18 + $0x180] sm:$0xff]  }
0x3386   : > { %v7287_v13 = vmul.f32 %v11664_v10, %v11664_v10  ;;  %8637 = vmatpush3.bf16.msra.mxu1 %v9674_v18 }
0x3388   : > { %7290 = vadd.xlane.f32.xlu1 %v7287_v13 }
0x338c   : > { %6215 = vadd.xlane.f32.xlu1 %v11671_v32 }
0x3390   : > { %6217 = vadd.xlane.f32.xlu1 %v11675_v38 }
0x340d   : > { %v7289_v11 = vpop.xlane.xlu1 %7288 }
0x340e   : > { %v7292_v24 = vmul.f32 0.0078125, %v7289_v11 }
0x3410   : > { %v7294_v53 = vadd.f32 1e-05, %v7292_v24 }
0x3411   : > { %v7291_v4 = vpop.xlane.xlu1 %7290 }
0x3412   : > { %9903 = vrsqrt.f32 %v7294_v53  ;;  %v7293_v15 = vmul.f32 0.0078125, %v7291_v4 }
0x3414   : > { %v7295_v61 = vadd.f32 1e-05, %v7293_v15 }
0x3415   : > { %v6216_v41 = vpop.xlane.xlu1 %6215 }
0x3416   : > { %9905 = vrsqrt.f32 %v7295_v61  ;;  %v6219_v1 = vmul.f32 0.0078125, %v6216_v41 }
0x3418   : > { %v6221_v25 = vsub.f32 %v11671_v32, %v6219_v1 }
0x3419   : > { %v6218_v46 = vpop.xlane.xlu1 %6217 }
0x341a   : > { %v6220_v26 = vmul.f32 0.0078125, %v6218_v46  ;;  %v6223_v55 = vmul.f32 %v6221_v25, %v6221_v25 }
0x341c   : > { %v6222_v31 = vsub.f32 %v11675_v38, %v6220_v26 }
0x341e   : > { %v6224_v62 = vmul.f32 %v6222_v31, %v6222_v31 }
0x341f   : > { %v9904_v17 = vpop.eup %9903 }
0x3420   : > { %v7298_v52 = vmul.f32 %v9904_v17, %v11660_v39 }
0x3422   : > { %v7306_v9 = vmul.f32 %v8304_v43, %v7298_v52 }
0x3423   : > { %v9906_v6 = vpop.eup %9905 }
0x3424   : > { %v7299_v8 = vmul.f32 %v9906_v6, %v11664_v10  ;;  %v7314_v36 = vadd.f32 %v8305_v14, %v7306_v9 }
0x3426   : > { %v7307_v48 = vmul.f32 %v8304_v43, %v7299_v8  ;;  %v8253_v8 = vld [vmem:[%s11872_s16 + $0x2] ss:$0 sm:$0xff] }
0x3428   : > { %v7315_v2 = vadd.f32 %v8305_v14, %v7307_v48  ;;  %v8254_v14 = vld [vmem:[#allocation13 + $0x2] ss:$0 sm:$0xff] }
0x342a   : > { %v7316_v57 = vpack.c.bf16 %v7315_v2, %v7314_v36 }
0x342c   : > { %7460 = vmatmul.mubr.bf16.vlgmr.msra.gmra.mxu0 %v7316_v57 }
0x34ec   : > { %v7461_v54 = vpop.f32.mrf.mxu0 }
0x34ed   : > { %v7462_v0 = vadd.f32 %v7461_v54, %v7340_v63 }
0x34ee   : > { %v7463_v39 = vpop.f32.mrf.mxu0 }
0x34ef   : > { %v7464_v50 = vadd.f32 %v7463_v39, %v7344_v29  ;;  %v7470_v40 = vmax.f32 %v7462_v0, 0.0 }
0x34f0   : > { %v7465_v47 = vpop.f32.mrf.mxu0 }
0x34f1   : > { %v7466_v5 = vadd.f32 %v7465_v47, %v7340_v63  ;;  %v7471_v12 = vmax.f32 %v7464_v50, 0.0 }
0x34f2   : > { %v7467_v10 = vpop.f32.mrf.mxu0 }
0x34f3   : > { %v7468_v51 = vadd.f32 %v7467_v10, %v7344_v29  ;;  %v7472_v13 = vmax.f32 %v7466_v5, 0.0 }
0x34f5   : > { %v7473_v58 = vmax.f32 %v7468_v51, 0.0  ;;  %v7474_v56 = vpack.c.bf16 %v7472_v13, %v7470_v40 }
0x34f7   : > { %v7475_v16 = vpack.c.bf16 %v7473_v58, %v7471_v12 }
0x34f9   : > { %7645 = vmatprep.mubr.bf16.mxu1 %v7475_v16 }
0x34fa   : > { %7646 = vmatmul.mubr.bf16.vlgmr.msra.gmra.mxu1 %v7474_v56 }
0x35ba   : > { %v8638_v22 = vpop.f32.mrf.mxu1 }
0x35bc   : > { %v8639_v28 = vpop.f32.mrf.mxu1 }
0x35bd   : > { %v8640_v44 = vadd.f32 %v8639_v28, %v8638_v22 }
0x35be   : > { %v8641_v20 = vpop.f32.mrf.mxu1 }
0x35bf   : > { %v7648_v60 = vadd.f32 %v8640_v44, %v8322_v37 }
0x35c0   : > { %v8642_v45 = vpop.f32.mrf.mxu1 }
0x35c1   : > { %v8643_v23 = vadd.f32 %v8642_v45, %v8641_v20  ;;  %v7654_v42 = vadd.f32 %v7648_v60, %v7314_v36 }
0x35c3   : > { %v7651_v27 = vadd.f32 %v8643_v23, %v8322_v37  ;;  %7660 = vadd.xlane.f32.xlu0 %v7654_v42 }
0x35c5   : > { %v7655_v30 = vadd.f32 %v7651_v27, %v7315_v2 }
0x35c7   : > { %7662 = vadd.xlane.f32.xlu1 %v7655_v30 }
0x35cb   : > { %6225 = vadd.xlane.f32.xlu1 %v6223_v55 }
0x35cf   : > { %6227 = vadd.xlane.f32.xlu1 %v6224_v62 }
0x364c   : > { %v7661_v59 = vpop.xlane.xlu0 %7660 }
0x364d   : > { %v7664_v35 = vmul.f32 0.0078125, %v7661_v59 }
0x364f   : > { %v11687_v21 = vsub.f32 %v7654_v42, %v7664_v35 }
0x3650   : > { %v7663_v11 = vpop.xlane.xlu1 %7662 }
0x3651   : > { %v7668_v24 = vmul.f32 %v11687_v21, %v11687_v21  ;;  %v7665_v53 = vmul.f32 0.0078125, %v7663_v11 }
0x3653   : > { %v11691_v4 = vsub.f32 %v7655_v30, %v7665_v53  ;;  %7670 = vadd.xlane.f32.xlu1 %v7668_v24 }
0x3654   : > { %v6226_v32 = vpop.xlane.xlu1 %6225 }
0x3655   : > { %v6229_v15 = vmul.f32 0.0078125, %v6226_v32  ;;  %v7669_v38 = vmul.f32 %v11691_v4, %v11691_v4 }
0x3657   : > { %v6231_v61 = vadd.f32 1e-05, %v6229_v15  ;;  %7672 = vadd.xlane.f32.xlu1 %v7669_v38 }
0x3658   : > { %v6228_v17 = vpop.xlane.xlu1 %6227 }
0x3659   : > { %9907 = vrsqrt.f32 %v6231_v61  ;;  %v6230_v52 = vmul.f32 0.0078125, %v6228_v17 }
0x365b   : > { %v6232_v43 = vadd.f32 1e-05, %v6230_v52 }
0x365d   : > { %9909 = vrsqrt.f32 %v6232_v43 }
0x3666   : > { %v9908_v6 = vpop.eup %9907 }
0x3667   : > { %v6235_v9 = vmul.f32 %v9908_v6, %v6221_v25 }
0x3669   : > { %v6243_v48 = vmul.f32 %v8253_v8, %v6235_v9 }
0x366a   : > { %v9910_v36 = vpop.eup %9909 }
0x366b   : > { %v6251_v2 = vadd.f32 %v8254_v14, %v6243_v48  ;;  %v6236_v57 = vmul.f32 %v9910_v36, %v6222_v31 }
0x366d   : > { %v8255_v49 = vmul.f32 -1.442695, %v6251_v2  ;;  %v6244_v34 = vmul.f32 %v8253_v8, %v6236_v57 }
0x366f   : > { %9911 = vpow2.f32 %v8255_v49  ;;  %v6252_v3 = vadd.f32 %v8254_v14, %v6244_v34 }
0x3671   : > { %v8256_v19 = vmul.f32 -1.442695, %v6252_v3 }
0x3673   : > { %9913 = vpow2.f32 %v8256_v19 }
0x367c   : > { %v9912_v7 = vpop.eup %9911 }
0x367d   : > { %v6259_v18 = vadd.f32 1.0, %v9912_v7 }
0x367f   : > { %9915 = vrcp.f32 %v6259_v18 }
0x3680   : > { %v9914_v33 = vpop.eup %9913 }
0x3681   : > { %v6260_v54 = vadd.f32 1.0, %v9914_v33 }
0x3683   : > { %9917 = vrcp.f32 %v6260_v54 }
0x368c   : > { %v9916_v29 = vpop.eup %9915 }
0x368d   : > { %6265 = vst [vmem:[%s659_s2] sm:$0xff] %v9916_v29 }
0x3690   : > { %v9918_v63 = vpop.eup %9917 }
0x3691   : > { %6266 = vst [vmem:[%s659_s2 + $0x8] sm:$0xff] %v9918_v63 }
0x3692   : > { %10223 = shalt.err (!%p10220_p8)
}
0x3693   : > { %s10224_s2 = scalar_lea.hbm %s11707_s3, 256  ;;  %s10228_s1 = scalar_lea.hbm %s11873_s26, 512 }
0x3694   : > { %p10225_p9 = scmp.ne.s32.totalorder %s11707_s3, %s10224_s2  ;;  %p10229_p4 = scmp.lt.s32.totalorder %s11707_s3, %s11873_s26 }
0x3695   : > { %p10230_p7 = scmp.lt.s32.totalorder %s10228_s1, %s10224_s2 }
0x3696   : > { %p10226_p6 = pnand %p10225_p9, %p11874_p3 }
0x3697   : > { %p10231_p2 = por %p10230_p7, %p10229_p4 }
0x3698   : > { %p10227_p1 = pneg %p10226_p6 }
0x369a   : > { %p10232_p12 = pnand %p10231_p2, %p10227_p1 }
0x369c   : > { %10235 = shalt.err (!%p10232_p12)
}
0x369d   : > { %s11828_s15 = smov 128   ;;  %s10361_s23 = smov 8   ;;  %v8340_v13 = vld [vmem:[%s11872_s16 + $0x3] ss:$0 sm:$0xff]  ;;  %v8341_v58 = vld [vmem:[#allocation13 + $0x3] ss:$0 sm:$0xff] }
0x369e   : > { %9225 = dma.vmem_to_hbm [thread:$0]  (%p11874_p3), %s11709_s7, 256, %s11707_s3, %s7713_s25, %s11828_s15, %s11828_s15, %s10361_s23  }
0x369f   : > { %s11875_s7 = sshll.u32 %s10645_s30, 4  ;;  %s11876_s14 = sshll.u32 %s10464_s24, 8 }
0x36a0   : > { %s666_s3 = scalar_lea.vmem [#allocation22], %s11875_s7  ;;  %s11877_s9 = sld [smem:[#allocation41_spill]] }
0x36a1   : > { %s7747_s25 = sshll.u32 %s666_s3, 4  ;;  %s7718_s28 = scalar_lea.sflag [#allocation23], %s10645_s30  ;;  %s11751_s25 = int_to_ptr.vmem [resolvable:$true] %s7747_s25 }
0x36a2   : > { %s10236_s17 = scalar_lea.vmem %s11751_s25, 256  ;;  %s10362_s7 = smov [#allocation22]  }
0x36a3   : > { %p10237_p11 = scmp.ne.s32.totalorder %s11751_s25, %s10236_s17  ;;  %s10240_s24 = sshll.u32 %s10362_s7, 4  ;;  %s10241_s24 = int_to_ptr.vmem [resolvable:$false] %s10240_s24 }
0x36a4   : > { %s10242_s15 = scalar_lea.vmem %s10241_s24, 512  ;;  %p10243_p0 = scmp.lt.s32.totalorder %s11751_s25, %s10241_s24 }
0x36a5   : > { %p10238_p10 = pnand %p10237_p11, %p11874_p3  ;;  %p10244_p5 = scmp.lt.s32.totalorder %s10242_s15, %s10236_s17 }
0x36a6   : > { %s11749_s1 = scalar_lea.hbm %s11877_s9, %s11876_s14 }
0x36a7   : > { %p10239_p13 = pneg %p10238_p10  ;;  %p10245_p8 = por %p10244_p5, %p10243_p0 }
0x36a9   : > { %p10246_p9 = pnand %p10245_p8, %p10239_p13 }
0x36dc   : > { %v7671_v39 = vpop.xlane.xlu1 %7670 }
0x36dd   : > { %v7674_v47 = vmul.f32 0.0078125, %v7671_v39 }
0x36df   : > { %v7676_v50 = vadd.f32 1e-05, %v7674_v47 }
0x36e0   : > { %v7673_v5 = vpop.xlane.xlu1 %7672 }
0x36e1   : > { %9919 = vrsqrt.f32 %v7676_v50  ;;  %v7675_v0 = vmul.f32 0.0078125, %v7673_v5 }
0x36e3   : > { %v7677_v10 = vadd.f32 1e-05, %v7675_v0 }
0x36e5   : > { %9921 = vrsqrt.f32 %v7677_v10 }
0x36ee   : > { %v9920_v51 = vpop.eup %9919 }
0x36ef   : > { %v7680_v12 = vmul.f32 %v9920_v51, %v11687_v21 }
0x36f1   : > { %v7688_v40 = vmul.f32 %v8340_v13, %v7680_v12 }
0x36f2   : > { %v9922_v16 = vpop.eup %9921 }
0x36f3   : > { %v7696_v56 = vadd.f32 %v8341_v58, %v7688_v40  ;;  %v7681_v22 = vmul.f32 %v9922_v16, %v11691_v4 }
0x36f5   : > { %v8342_v41 = vmul.f32 -1.442695, %v7696_v56  ;;  %v7689_v37 = vmul.f32 %v8340_v13, %v7681_v22 }
0x36f7   : > { %9923 = vpow2.f32 %v8342_v41  ;;  %v7697_v28 = vadd.f32 %v8341_v58, %v7689_v37 }
0x36f9   : > { %v8343_v44 = vmul.f32 -1.442695, %v7697_v28 }
0x36fb   : > { %9925 = vpow2.f32 %v8343_v44 }
0x3704   : > { %v9924_v20 = vpop.eup %9923 }
0x3705   : > { %v7704_v60 = vadd.f32 1.0, %v9924_v20 }
0x3707   : > { %9927 = vrcp.f32 %v7704_v60 }
0x3708   : > { %v9926_v45 = vpop.eup %9925 }
0x3709   : > { %v7705_v1 = vadd.f32 1.0, %v9926_v45 }
0x370b   : > { %9929 = vrcp.f32 %v7705_v1 }
0x3714   : > { %v9928_v23 = vpop.eup %9927 }
0x3715   : > { %7710 = vst [vmem:[%s666_s3] sm:$0xff] %v9928_v23 }
0x3718   : > { %v9930_v42 = vpop.eup %9929 }
0x3719   : > { %7711 = vst [vmem:[%s666_s3 + $0x8] sm:$0xff] %v9930_v42 }
0x371a   : > { %10249 = shalt.err (!%p10246_p9)
}
0x371b   : > { %s10250_s3 = scalar_lea.hbm %s11749_s1, 256  ;;  %s10254_s2 = scalar_lea.hbm %s11877_s9, 512 }
0x371c   : > { %p10251_p6 = scmp.ne.s32.totalorder %s11749_s1, %s10250_s3  ;;  %p10255_p7 = scmp.lt.s32.totalorder %s11749_s1, %s11877_s9 }
0x371d   : > { %p10256_p2 = scmp.lt.s32.totalorder %s10254_s2, %s10250_s3 }
0x371e   : > { %p10252_p1 = pnand %p10251_p6, %p11874_p3 }
0x371f   : > { %p10257_p12 = por %p10256_p2, %p10255_p7 }
0x3720   : > { %p10253_p4 = pneg %p10252_p1 }
0x3722   : > { %p10258_p11 = pnand %p10257_p12, %p10253_p4 }
0x3724   : > { %10261 = shalt.err (!%p10258_p11)
}
0x3725   : > { %s11878_s15 = smov 128  }
0x3726   : > { %9226 = dma.vmem_to_hbm [thread:$0]  (%p11874_p3), %s11751_s25, 256, %s11749_s1, %s7718_s28, %s11878_s15, %s11878_s15, %s10361_s23  }
0x3727 PF: > { %s7762_s17 = sand.u32 1, %s10316_s18   ;;  %p11879_p10 = scmp.ne.s32.totalorder %s11854_s8, 0 }
0x3728   : > { %p11880_p13 = scmp.ge.s32.totalorder %s10328_s21, 2  ;;  %s7763_s24 = scalar_lea.sflag [#allocation4], %s7762_s17 }
0x372a   : > { %p9265_p0 = pnand %p11880_p13, %p11879_p10 }
0x372c   : > { %p9266_p5 = pneg %p9265_p0 }
0x372e   : > { %10307 = dma.done.wait (%p9266_p5), %s7763_s24, 256  }
0x372f   : > { %10309 = vsyncadd (%p9266_p5), %s7763_s24, 4294967040  ;;  %s7772_s3 = scalar_lea.sflag [#allocation23], %s7762_s17 }
0x3730   : > { %10311 = dma.done.wait (%p9266_p5), %s7772_s3, 256  }
0x3731   : > { %10313 = vsyncadd (%p9266_p5), %s7772_s3, 4294967040  ;;  %p38_p3 = scmp.ge.s32.totalorder %s10576_s29, 4   ;;  %s11881_s18 = smov %s10320_s19 }
0x3732   : > { %s11882_s19 = smov %s10324_s20  ;;  %s11883_s20 = smov %s10587_s22 }
0x3733   : > { %s11884_s21 = smov %s10576_s29  ;;  %40 = sbr.rel (!%p38_p3) target bundleno = 23 (0x17), region = 215 }
0x3738   :  { %7777 = vsyncpa [#allocation3], 1 }
0x3739   :  { %7779 = vsyncpa [#allocation3 + $0x1], 1 }
0x373a   :  { %7780 = vsyncpa [#allocation8], 1 }
0x373b   :  { %7781 = vsyncpa [#allocation11], 1 }
0x373c   :  { %7782 = vsyncpa [#allocation14], 1 }
0x373d   :  { %7783 = vsyncpa [#allocation17], 1 }
0x373e   :  { %7784 = vsyncpa [#allocation20], 1 }
0x373f   :  { %7785 = vsyncpa [#allocation4], 1 }
0x3740   :  { %7787 = vsyncpa [#allocation4 + $0x1], 1 }
0x3741   :  { %7788 = vsyncpa [#allocation23], 1 }
0x3742   :  { %7790 = vsyncpa [#allocation23 + $0x1], 1 }
0x3743   :  { %7791 = vsyncpa [#allocation5], 1 }
0x3744   :  { %7793 = vsyncpa [#allocation5 + $0x1], 1 }

</bundles_post_ra>
